<compile_context>
chip_gen: v6e
topology: v6e:2x2x1
jax: 0.10.0
libtpu: 0.0.40
codegen_flags: <defaults>
</compile_context>

<pallas_src>
import functools

import numpy as np
import jax
import jax.numpy as jnp
from jax.experimental import pallas as pl
from jax.experimental.pallas import tpu as pltpu


# ----------------------------------------------------------------------------
# Bilinear (align_corners=True) interpolation matrices
# ----------------------------------------------------------------------------
def _bilinear_matrix(out_size, in_size):
    """(out_size, in_size) interpolation matrix, PyTorch align_corners=True."""
    m = np.zeros((out_size, in_size), np.float32)
    if in_size == 1 or out_size == 1:
        m[:, 0] = 1.0
        return m
    scale = (in_size - 1) / (out_size - 1)
    for o in range(out_size):
        src = o * scale
        i0 = min(int(np.floor(src)), in_size - 2)
        frac = src - i0
        m[o, i0] = 1.0 - frac
        m[o, i0 + 1] = frac
    return m


def _bilinear_kron_matrix(h_in, w_in, h_out, w_out):
    """Full 2-D upsample as one matrix: (h_out*w_out, h_in*w_in)."""
    return np.kron(_bilinear_matrix(h_out, h_in), _bilinear_matrix(w_out, w_in))


# ----------------------------------------------------------------------------
# Fused kernel: upsample + pad + (conv3x3 + BN + ReLU) x 2, one image per step
# ----------------------------------------------------------------------------
def _up_no_cat_kernel(hup, wup, py0, px0,
                      x1_ref, m_ref, w1_ref, s1_ref, b1_ref,
                      w2_ref, s2_ref, b2_ref,
                      o_ref, pad1_ref, pad2_ref):
    """
    x1_ref:   (1, H1, W1, Cin)        bf16  low-res input
    m_ref:    (Hup*Wup, H1*W1)        bf16  bilinear (align_corners) kron matrix
    w1_ref:   (9*Cin, Cmid)           bf16  conv1 weights, (ky,kx,ci) flattened
    s1_ref/b1_ref: (1, Cmid)          f32   folded BN scale / bias (incl. conv bias)
    w2_ref:   (9*Cmid, Cout)          bf16
    s2_ref/b2_ref: (1, Cout)          f32
    o_ref:    (1, H2, W2, Cout)       f32
    pad1_ref: (H2+2, W2+2, Cin)       bf16  VMEM scratch (F.pad zeros + conv halo)
    pad2_ref: (H2+2, W2+2, Cmid)      bf16  VMEM scratch (conv halo)
    """
    H1, W1, Cin = x1_ref.shape[1], x1_ref.shape[2], x1_ref.shape[3]
    H2, W2, Cout = o_ref.shape[1], o_ref.shape[2], o_ref.shape[3]
    Cmid = pad2_ref.shape[2]

    # Zero-init padded scratches: provides both the F.pad zeros and the conv
    # halo (cheap: a few tens of KB of VMEM stores per grid step).
    pad1_ref[...] = jnp.zeros_like(pad1_ref)
    pad2_ref[...] = jnp.zeros_like(pad2_ref)

    # ---- 1) bilinear x2 upsample (align_corners=True) as ONE MXU matmul ----
    x2d = x1_ref[0].reshape(H1 * W1, Cin)                         # bf16 (H1*W1, Cin)
    up = jnp.dot(m_ref[...], x2d, preferred_element_type=jnp.float32)
    up = up.astype(jnp.bfloat16).reshape(hup, wup, Cin)

    # ---- 2) F.pad placement (+1 conv halo) into the zeroed scratch ----
    pad1_ref[1 + py0:1 + py0 + hup, 1 + px0:1 + px0 + wup, :] = up

    # ---- 3) conv3x3 + folded-BN + ReLU as 9 shifted-window MXU matmuls ----
    def conv3x3_bn_relu(pad_ref, w_ref, s_ref, b_ref):
        cin = pad_ref.shape[-1]
        cout = w_ref.shape[-1]
        acc = jnp.zeros((H2 * W2, cout), jnp.float32)
        tap = 0
        for ky in range(3):
            for kx in range(3):
                slab = pad_ref[ky:ky + H2, kx:kx + W2, :].reshape(H2 * W2, cin)
                w_t = w_ref[tap * cin:(tap + 1) * cin, :]          # static, aligned
                acc = acc + jnp.dot(slab, w_t,
                                    preferred_element_type=jnp.float32)
                tap += 1
        return jnp.maximum(acc * s_ref[...] + b_ref[...], 0.0)     # f32 epilogue

    y1 = conv3x3_bn_relu(pad1_ref, w1_ref, s1_ref, b1_ref)         # (H2*W2, Cmid) f32
    pad2_ref[1:1 + H2, 1:1 + W2, :] = y1.reshape(H2, W2, Cmid).astype(jnp.bfloat16)

    y2 = conv3x3_bn_relu(pad2_ref, w2_ref, s2_ref, b2_ref)         # (H2*W2, Cout) f32
    o_ref[0] = y2.reshape(H2, W2, Cout).astype(o_ref.dtype)


# ----------------------------------------------------------------------------
# Forward wrapper (NCHW in / NCHW out, matching the PyTorch module)
# ----------------------------------------------------------------------------
@jax.jit
def up_no_cat_forward(x1_nchw, x2_nchw, params):
    B, cin, H1, W1 = x1_nchw.shape
    H2, W2 = x2_nchw.shape[2], x2_nchw.shape[3]
    hup, wup = 2 * H1, 2 * W1
    if H2 < hup or W2 < wup:
        # TODO(synk): negative F.pad (cropping) path when x2 is smaller than 2*x1.
        raise NotImplementedError("x2 spatial size must be >= 2 * x1 spatial size")
    py0, px0 = (H2 - hup) // 2, (W2 - wup) // 2

    m_bf16 = jnp.asarray(_bilinear_kron_matrix(H1, W1, hup, wup), jnp.bfloat16)

    c1, c2 = params["conv1"], params["conv2"]
    cmid, cout = c1["w2d"].shape[1], c2["w2d"].shape[1]

    x1n = jnp.transpose(x1_nchw, (0, 2, 3, 1)).astype(jnp.bfloat16)   # NHWC bf16

    kernel = functools.partial(_up_no_cat_kernel, hup, wup, py0, px0)
    out_nhwc = pl.pallas_call(
        kernel,
        out_shape=jax.ShapeDtypeStruct((B, H2, W2, cout), jnp.float32),
        grid=(B,),
        in_specs=[
            pl.BlockSpec((1, H1, W1, cin), lambda b: (b, 0, 0, 0)),
            pl.BlockSpec((hup * wup, H1 * W1), lambda b: (0, 0)),
            pl.BlockSpec((9 * cin, cmid), lambda b: (0, 0)),
            pl.BlockSpec((1, cmid), lambda b: (0, 0)),
            pl.BlockSpec((1, cmid), lambda b: (0, 0)),
            pl.BlockSpec((9 * cmid, cout), lambda b: (0, 0)),
            pl.BlockSpec((1, cout), lambda b: (0, 0)),
            pl.BlockSpec((1, cout), lambda b: (0, 0)),
        ],
        out_specs=pl.BlockSpec((1, H2, W2, cout), lambda b: (b, 0, 0, 0)),
        scratch_shapes=[
            pltpu.VMEM((H2 + 2, W2 + 2, cin), jnp.bfloat16),
            pltpu.VMEM((H2 + 2, W2 + 2, cmid), jnp.bfloat16),
        ],
        compiler_params=pltpu.CompilerParams(
            dimension_semantics=("parallel",),          # batch shards across TCs
            vmem_limit_bytes=32 * 1024 * 1024),         # legal on v5e/v6e/v7x
    )(x1n, m_bf16, c1["w2d"], c1["scale"], c1["bias"],
      c2["w2d"], c2["scale"], c2["bias"])

    return jnp.transpose(out_nhwc, (0, 3, 1, 2))        # back to NCHW


# ----------------------------------------------------------------------------
# Parameter construction (deterministic, synthetic) + BN (inference) folding
# ----------------------------------------------------------------------------
def _make_conv_bn_params(key, cin, cout):
    kw, kb, kg, kbe, km, kv = jax.random.split(key, 6)
    # torch layout (Cout, Cin, 3, 3) -> HWIO (3, 3, Cin, Cout)
    w_oihw = jax.random.normal(kw, (cout, cin, 3, 3), jnp.float32) / np.sqrt(9.0 * cin)
    w_hwio = jnp.transpose(w_oihw, (2, 3, 1, 0))
    conv_b = 0.02 * jax.random.normal(kb, (cout,), jnp.float32)
    gamma = 1.0 + 0.1 * jax.random.normal(kg, (cout,), jnp.float32)
    beta = 0.1 * jax.random.normal(kbe, (cout,), jnp.float32)
    run_mean = 0.05 * jax.random.normal(km, (cout,), jnp.float32)
    run_var = 1.0 + 0.1 * jnp.abs(jax.random.normal(kv, (cout,), jnp.float32))
    eps = 1e-5
    scale = gamma / jnp.sqrt(run_var + eps)
    bias = beta + (conv_b - run_mean) * scale
    return {
        "w_hwio": w_hwio,                                           # f32, for reference
        "w2d": w_hwio.astype(jnp.bfloat16).reshape(9 * cin, cout),  # kernel weights
        "scale": scale.reshape(1, cout),
        "bias": bias.reshape(1, cout),
    }


def make_up_no_cat_params(key, in_channels, out_channels, bilinear=True):
    if not bilinear:
        # TODO(synk): ConvTranspose2d (bilinear=False) upsampling path not implemented.
        raise NotImplementedError("only the bilinear=True path is implemented")
    cmid = in_channels // 2
    k1, k2 = jax.random.split(key)
    return {"conv1": _make_conv_bn_params(k1, in_channels, cmid),
            "conv2": _make_conv_bn_params(k2, cmid, out_channels)}


# ----------------------------------------------------------------------------
# Pure-JAX reference (same bf16 rounding points as the kernel)
# ----------------------------------------------------------------------------
@jax.jit
def up_no_cat_reference(x1_nchw, x2_nchw, params):
    B, cin, H1, W1 = x1_nchw.shape
    H2, W2 = x2_nchw.shape[2], x2_nchw.shape[3]
    hup, wup = 2 * H1, 2 * W1
    py0, px0 = (H2 - hup) // 2, (W2 - wup) // 2

    m_bf16 = jnp.asarray(_bilinear_kron_matrix(H1, W1, hup, wup), jnp.bfloat16)
    x = jnp.transpose(x1_nchw, (0, 2, 3, 1)).astype(jnp.bfloat16)
    up = jnp.einsum("pk,bkc->bpc", m_bf16, x.reshape(B, H1 * W1, cin),
                    preferred_element_type=jnp.float32)
    up = up.astype(jnp.bfloat16).reshape(B, hup, wup, cin)
    xpad = jnp.pad(up, ((0, 0), (py0, H2 - hup - py0), (px0, W2 - wup - px0), (0, 0)))

    def conv_bn_relu(t, w_hwio, s, b):
        y = jax.lax.conv_general_dilated(
            t, w_hwio.astype(jnp.bfloat16), (1, 1), "SAME",
            dimension_numbers=("NHWC", "HWIO", "NHWC"),
            preferred_element_type=jnp.float32)
        return jnp.maximum(y * s + b, 0.0)

    c1, c2 = params["conv1"], params["conv2"]
    y1 = conv_bn_relu(xpad, c1["w_hwio"], c1["scale"], c1["bias"]).astype(jnp.bfloat16)
    y2 = conv_bn_relu(y1, c2["w_hwio"], c2["scale"], c2["bias"])
    return jnp.transpose(y2, (0, 3, 1, 2))


# ----------------------------------------------------------------------------
if __name__ == "__main__":
    key = jax.random.PRNGKey(0)
    kx1, kx2, kp = jax.random.split(key, 3)

    # Up_no_cat(in_channels=64, out_channels=32, bilinear=True)
    B, Cin, H1, W1 = 2, 64, 8, 8
    Cout, H2, W2 = 32, 16, 16
    x1 = jax.random.normal(kx1, (B, Cin, H1, W1), jnp.float32)
    x2 = jax.random.normal(kx2, (B, Cout, H2, W2), jnp.float32)  # only its size is used

    params = make_up_no_cat_params(kp, Cin, Cout, bilinear=True)

    out = jax.block_until_ready(up_no_cat_forward(x1, x2, params))
    ref = jax.block_until_ready(up_no_cat_reference(x1, x2, params))

    assert out.shape == (B, Cout, H2, W2), out.shape
    assert bool(jnp.all(jnp.isfinite(out)))
    err = float(jnp.max(jnp.abs(out - ref)))
    assert err < 5e-2, f"max abs error vs reference: {err}"

    print("KERNEL_OK")
</pallas_src>

<mosaic_0001>
module attributes {stable_mosaic.version = 11 : i64} {
  func.func @_up_no_cat_kernel(%arg0: i32, %arg1: memref<1x8x8x64xbf16, #tpu.memory_space<vmem>>, %arg2: memref<256x64xbf16, #tpu.memory_space<vmem>>, %arg3: memref<576x32xbf16, #tpu.memory_space<vmem>>, %arg4: memref<1x32xf32, #tpu.memory_space<vmem>>, %arg5: memref<1x32xf32, #tpu.memory_space<vmem>>, %arg6: memref<288x32xbf16, #tpu.memory_space<vmem>>, %arg7: memref<1x32xf32, #tpu.memory_space<vmem>>, %arg8: memref<1x32xf32, #tpu.memory_space<vmem>>, %arg9: memref<1x16x16x32xf32, #tpu.memory_space<vmem>>, %arg10: memref<18x18x64xbf16, #tpu.memory_space<vmem>>, %arg11: memref<18x18x32xbf16, #tpu.memory_space<vmem>>) attributes {dimension_semantics = [#tpu.dimension_semantics<parallel>], iteration_bounds = array<i64: 2>, scalar_prefetch = 0 : i64, scratch_operands = 2 : i64, tpu.core_type = #tpu.core_type<tc>, window_params = [{transform_indices = @transform_0, window_bounds = array<i64: 1, 8, 8, 64>}, {pipeline_mode = #tpu.pipeline_mode<synchronous>, transform_indices = @transform_1, window_bounds = array<i64: 256, 64>}, {pipeline_mode = #tpu.pipeline_mode<synchronous>, transform_indices = @transform_2, window_bounds = array<i64: 576, 32>}, {pipeline_mode = #tpu.pipeline_mode<synchronous>, transform_indices = @transform_3, window_bounds = array<i64: 1, 32>}, {pipeline_mode = #tpu.pipeline_mode<synchronous>, transform_indices = @transform_4, window_bounds = array<i64: 1, 32>}, {pipeline_mode = #tpu.pipeline_mode<synchronous>, transform_indices = @transform_5, window_bounds = array<i64: 288, 32>}, {pipeline_mode = #tpu.pipeline_mode<synchronous>, transform_indices = @transform_6, window_bounds = array<i64: 1, 32>}, {pipeline_mode = #tpu.pipeline_mode<synchronous>, transform_indices = @transform_7, window_bounds = array<i64: 1, 32>}, {transform_indices = @transform_8, window_bounds = array<i64: 1, 16, 16, 32>}]} {
    %cst = arith.constant 0.000000e+00 : bf16
    %0 = vector.broadcast %cst : bf16 to vector<18x18x64xbf16>
    %c0 = arith.constant 0 : index
    %c0_0 = arith.constant 0 : index
    %c0_1 = arith.constant 0 : index
    %1 = vector.load %arg10[%c0, %c0_0, %c0_1] : memref<18x18x64xbf16, #tpu.memory_space<vmem>>, vector<18x18x64xbf16>
    tpu.vector_store %arg10[%c0, %c0_0, %c0_1], %0 {strides = array<i32>} : memref<18x18x64xbf16, #tpu.memory_space<vmem>>, vector<18x18x64xbf16>,
    %cst_2 = arith.constant 0.000000e+00 : bf16
    %2 = vector.broadcast %cst_2 : bf16 to vector<18x18x32xbf16>
    %c0_3 = arith.constant 0 : index
    %c0_4 = arith.constant 0 : index
    %c0_5 = arith.constant 0 : index
    %3 = vector.load %arg11[%c0_3, %c0_4, %c0_5] : memref<18x18x32xbf16, #tpu.memory_space<vmem>>, vector<18x18x32xbf16>
    tpu.vector_store %arg11[%c0_3, %c0_4, %c0_5], %2 {strides = array<i32>} : memref<18x18x32xbf16, #tpu.memory_space<vmem>>, vector<18x18x32xbf16>,
    %c0_6 = arith.constant 0 : index
    %c0_7 = arith.constant 0 : index
    %c0_8 = arith.constant 0 : index
    %c0_9 = arith.constant 0 : index
    %4 = vector.load %arg1[%c0_6, %c0_7, %c0_8, %c0_9] : memref<1x8x8x64xbf16, #tpu.memory_space<vmem>>, vector<1x8x8x64xbf16>
    %5 = vector.shape_cast %4 : vector<1x8x8x64xbf16> to vector<8x8x64xbf16>
    %6 = vector.shape_cast %5 : vector<8x8x64xbf16> to vector<64x64xbf16>
    %c0_10 = arith.constant 0 : index
    %c0_11 = arith.constant 0 : index
    %7 = vector.load %arg2[%c0_10, %c0_11] : memref<256x64xbf16, #tpu.memory_space<vmem>>, vector<256x64xbf16>
    %cst_12 = arith.constant dense<0.000000e+00> : vector<256x64xf32>
    %8 = tpu.matmul %7, %6, %cst_12 {dimension_numbers = #tpu.dot_dimension_numbers<[1], [0], [0], [1], [0, 0, 1, 1], [], []>} : vector<256x64xbf16>, vector<64x64xbf16>, vector<256x64xf32> -> vector<256x64xf32>
    %9 = arith.truncf %8 : vector<256x64xf32> to vector<256x64xbf16>
    %10 = vector.shape_cast %9 : vector<256x64xbf16> to vector<16x16x64xbf16>
    %c1 = arith.constant 1 : index
    %c1_13 = arith.constant 1 : index
    %c0_14 = arith.constant 0 : index
    %11 = vector.load %arg10[%c1, %c1_13, %c0_14] : memref<18x18x64xbf16, #tpu.memory_space<vmem>>, vector<16x16x64xbf16>
    tpu.vector_store %arg10[%c1, %c1_13, %c0_14], %10 {strides = array<i32>} : memref<18x18x64xbf16, #tpu.memory_space<vmem>>, vector<16x16x64xbf16>,
    %cst_15 = arith.constant 0.000000e+00 : f32
    %12 = vector.broadcast %cst_15 : f32 to vector<256x32xf32>
    %c0_16 = arith.constant 0 : index
    %c0_17 = arith.constant 0 : index
    %c0_18 = arith.constant 0 : index
    %13 = vector.load %arg10[%c0_16, %c0_17, %c0_18] : memref<18x18x64xbf16, #tpu.memory_space<vmem>>, vector<16x16x64xbf16>
    %14 = vector.shape_cast %13 : vector<16x16x64xbf16> to vector<256x64xbf16>
    %c0_19 = arith.constant 0 : index
    %c0_20 = arith.constant 0 : index
    %15 = vector.load %arg3[%c0_19, %c0_20] : memref<576x32xbf16, #tpu.memory_space<vmem>>, vector<64x32xbf16>
    %cst_21 = arith.constant dense<0.000000e+00> : vector<256x32xf32>
    %16 = tpu.matmul %14, %15, %cst_21 {dimension_numbers = #tpu.dot_dimension_numbers<[1], [0], [0], [1], [0, 0, 1, 1], [], []>} : vector<256x64xbf16>, vector<64x32xbf16>, vector<256x32xf32> -> vector<256x32xf32>
    %17 = arith.addf %12, %16 : vector<256x32xf32>
    %c0_22 = arith.constant 0 : index
    %c1_23 = arith.constant 1 : index
    %c0_24 = arith.constant 0 : index
    %18 = vector.load %arg10[%c0_22, %c1_23, %c0_24] : memref<18x18x64xbf16, #tpu.memory_space<vmem>>, vector<16x16x64xbf16>
    %19 = vector.shape_cast %18 : vector<16x16x64xbf16> to vector<256x64xbf16>
    %c64 = arith.constant 64 : index
    %c0_25 = arith.constant 0 : index
    %20 = vector.load %arg3[%c64, %c0_25] : memref<576x32xbf16, #tpu.memory_space<vmem>>, vector<64x32xbf16>
    %cst_26 = arith.constant dense<0.000000e+00> : vector<256x32xf32>
    %21 = tpu.matmul %19, %20, %cst_26 {dimension_numbers = #tpu.dot_dimension_numbers<[1], [0], [0], [1], [0, 0, 1, 1], [], []>} : vector<256x64xbf16>, vector<64x32xbf16>, vector<256x32xf32> -> vector<256x32xf32>
    %22 = arith.addf %17, %21 : vector<256x32xf32>
    %c0_27 = arith.constant 0 : index
    %c2 = arith.constant 2 : index
    %c0_28 = arith.constant 0 : index
    %23 = vector.load %arg10[%c0_27, %c2, %c0_28] : memref<18x18x64xbf16, #tpu.memory_space<vmem>>, vector<16x16x64xbf16>
    %24 = vector.shape_cast %23 : vector<16x16x64xbf16> to vector<256x64xbf16>
    %c128 = arith.constant 128 : index
    %c0_29 = arith.constant 0 : index
    %25 = vector.load %arg3[%c128, %c0_29] : memref<576x32xbf16, #tpu.memory_space<vmem>>, vector<64x32xbf16>
    %cst_30 = arith.constant dense<0.000000e+00> : vector<256x32xf32>
    %26 = tpu.matmul %24, %25, %cst_30 {dimension_numbers = #tpu.dot_dimension_numbers<[1], [0], [0], [1], [0, 0, 1, 1], [], []>} : vector<256x64xbf16>, vector<64x32xbf16>, vector<256x32xf32> -> vector<256x32xf32>
    %27 = arith.addf %22, %26 : vector<256x32xf32>
    %c1_31 = arith.constant 1 : index
    %c0_32 = arith.constant 0 : index
    %c0_33 = arith.constant 0 : index
    %28 = vector.load %arg10[%c1_31, %c0_32, %c0_33] : memref<18x18x64xbf16, #tpu.memory_space<vmem>>, vector<16x16x64xbf16>
    %29 = vector.shape_cast %28 : vector<16x16x64xbf16> to vector<256x64xbf16>
    %c192 = arith.constant 192 : index
    %c0_34 = arith.constant 0 : index
    %30 = vector.load %arg3[%c192, %c0_34] : memref<576x32xbf16, #tpu.memory_space<vmem>>, vector<64x32xbf16>
    %cst_35 = arith.constant dense<0.000000e+00> : vector<256x32xf32>
    %31 = tpu.matmul %29, %30, %cst_35 {dimension_numbers = #tpu.dot_dimension_numbers<[1], [0], [0], [1], [0, 0, 1, 1], [], []>} : vector<256x64xbf16>, vector<64x32xbf16>, vector<256x32xf32> -> vector<256x32xf32>
    %32 = arith.addf %27, %31 : vector<256x32xf32>
    %c1_36 = arith.constant 1 : index
    %c1_37 = arith.constant 1 : index
    %c0_38 = arith.constant 0 : index
    %33 = vector.load %arg10[%c1_36, %c1_37, %c0_38] : memref<18x18x64xbf16, #tpu.memory_space<vmem>>, vector<16x16x64xbf16>
    %34 = vector.shape_cast %33 : vector<16x16x64xbf16> to vector<256x64xbf16>
    %c256 = arith.constant 256 : index
    %c0_39 = arith.constant 0 : index
    %35 = vector.load %arg3[%c256, %c0_39] : memref<576x32xbf16, #tpu.memory_space<vmem>>, vector<64x32xbf16>
    %cst_40 = arith.constant dense<0.000000e+00> : vector<256x32xf32>
    %36 = tpu.matmul %34, %35, %cst_40 {dimension_numbers = #tpu.dot_dimension_numbers<[1], [0], [0], [1], [0, 0, 1, 1], [], []>} : vector<256x64xbf16>, vector<64x32xbf16>, vector<256x32xf32> -> vector<256x32xf32>
    %37 = arith.addf %32, %36 : vector<256x32xf32>
    %c1_41 = arith.constant 1 : index
    %c2_42 = arith.constant 2 : index
    %c0_43 = arith.constant 0 : index
    %38 = vector.load %arg10[%c1_41, %c2_42, %c0_43] : memref<18x18x64xbf16, #tpu.memory_space<vmem>>, vector<16x16x64xbf16>
    %39 = vector.shape_cast %38 : vector<16x16x64xbf16> to vector<256x64xbf16>
    %c320 = arith.constant 320 : index
    %c0_44 = arith.constant 0 : index
    %40 = vector.load %arg3[%c320, %c0_44] : memref<576x32xbf16, #tpu.memory_space<vmem>>, vector<64x32xbf16>
    %cst_45 = arith.constant dense<0.000000e+00> : vector<256x32xf32>
    %41 = tpu.matmul %39, %40, %cst_45 {dimension_numbers = #tpu.dot_dimension_numbers<[1], [0], [0], [1], [0, 0, 1, 1], [], []>} : vector<256x64xbf16>, vector<64x32xbf16>, vector<256x32xf32> -> vector<256x32xf32>
    %42 = arith.addf %37, %41 : vector<256x32xf32>
    %c2_46 = arith.constant 2 : index
    %c0_47 = arith.constant 0 : index
    %c0_48 = arith.constant 0 : index
    %43 = vector.load %arg10[%c2_46, %c0_47, %c0_48] : memref<18x18x64xbf16, #tpu.memory_space<vmem>>, vector<16x16x64xbf16>
    %44 = vector.shape_cast %43 : vector<16x16x64xbf16> to vector<256x64xbf16>
    %c384 = arith.constant 384 : index
    %c0_49 = arith.constant 0 : index
    %45 = vector.load %arg3[%c384, %c0_49] : memref<576x32xbf16, #tpu.memory_space<vmem>>, vector<64x32xbf16>
    %cst_50 = arith.constant dense<0.000000e+00> : vector<256x32xf32>
    %46 = tpu.matmul %44, %45, %cst_50 {dimension_numbers = #tpu.dot_dimension_numbers<[1], [0], [0], [1], [0, 0, 1, 1], [], []>} : vector<256x64xbf16>, vector<64x32xbf16>, vector<256x32xf32> -> vector<256x32xf32>
    %47 = arith.addf %42, %46 : vector<256x32xf32>
    %c2_51 = arith.constant 2 : index
    %c1_52 = arith.constant 1 : index
    %c0_53 = arith.constant 0 : index
    %48 = vector.load %arg10[%c2_51, %c1_52, %c0_53] : memref<18x18x64xbf16, #tpu.memory_space<vmem>>, vector<16x16x64xbf16>
    %49 = vector.shape_cast %48 : vector<16x16x64xbf16> to vector<256x64xbf16>
    %c448 = arith.constant 448 : index
    %c0_54 = arith.constant 0 : index
    %50 = vector.load %arg3[%c448, %c0_54] : memref<576x32xbf16, #tpu.memory_space<vmem>>, vector<64x32xbf16>
    %cst_55 = arith.constant dense<0.000000e+00> : vector<256x32xf32>
    %51 = tpu.matmul %49, %50, %cst_55 {dimension_numbers = #tpu.dot_dimension_numbers<[1], [0], [0], [1], [0, 0, 1, 1], [], []>} : vector<256x64xbf16>, vector<64x32xbf16>, vector<256x32xf32> -> vector<256x32xf32>
    %52 = arith.addf %47, %51 : vector<256x32xf32>
    %c2_56 = arith.constant 2 : index
    %c2_57 = arith.constant 2 : index
    %c0_58 = arith.constant 0 : index
    %53 = vector.load %arg10[%c2_56, %c2_57, %c0_58] : memref<18x18x64xbf16, #tpu.memory_space<vmem>>, vector<16x16x64xbf16>
    %54 = vector.shape_cast %53 : vector<16x16x64xbf16> to vector<256x64xbf16>
    %c512 = arith.constant 512 : index
    %c0_59 = arith.constant 0 : index
    %55 = vector.load %arg3[%c512, %c0_59] : memref<576x32xbf16, #tpu.memory_space<vmem>>, vector<64x32xbf16>
    %cst_60 = arith.constant dense<0.000000e+00> : vector<256x32xf32>
    %56 = tpu.matmul %54, %55, %cst_60 {dimension_numbers = #tpu.dot_dimension_numbers<[1], [0], [0], [1], [0, 0, 1, 1], [], []>} : vector<256x64xbf16>, vector<64x32xbf16>, vector<256x32xf32> -> vector<256x32xf32>
    %57 = arith.addf %52, %56 : vector<256x32xf32>
    %c0_61 = arith.constant 0 : index
    %c0_62 = arith.constant 0 : index
    %58 = vector.load %arg4[%c0_61, %c0_62] : memref<1x32xf32, #tpu.memory_space<vmem>>, vector<1x32xf32>
    %59 = vector.broadcast %58 : vector<1x32xf32> to vector<256x32xf32>
    %60 = arith.mulf %57, %59 : vector<256x32xf32>
    %c0_63 = arith.constant 0 : index
    %c0_64 = arith.constant 0 : index
    %61 = vector.load %arg5[%c0_63, %c0_64] : memref<1x32xf32, #tpu.memory_space<vmem>>, vector<1x32xf32>
    %62 = vector.broadcast %61 : vector<1x32xf32> to vector<256x32xf32>
    %63 = arith.addf %60, %62 : vector<256x32xf32>
    %cst_65 = arith.constant 0.000000e+00 : f32
    %64 = vector.broadcast %cst_65 : f32 to vector<256x32xf32>
    %65 = arith.maximumf %63, %64 : vector<256x32xf32>
    %66 = vector.shape_cast %65 : vector<256x32xf32> to vector<16x16x32xf32>
    %67 = arith.truncf %66 : vector<16x16x32xf32> to vector<16x16x32xbf16>
    %c1_66 = arith.constant 1 : index
    %c1_67 = arith.constant 1 : index
    %c0_68 = arith.constant 0 : index
    %68 = vector.load %arg11[%c1_66, %c1_67, %c0_68] : memref<18x18x32xbf16, #tpu.memory_space<vmem>>, vector<16x16x32xbf16>
    tpu.vector_store %arg11[%c1_66, %c1_67, %c0_68], %67 {strides = array<i32>} : memref<18x18x32xbf16, #tpu.memory_space<vmem>>, vector<16x16x32xbf16>,
    %cst_69 = arith.constant 0.000000e+00 : f32
    %69 = vector.broadcast %cst_69 : f32 to vector<256x32xf32>
    %c0_70 = arith.constant 0 : index
    %c0_71 = arith.constant 0 : index
    %c0_72 = arith.constant 0 : index
    %70 = vector.load %arg11[%c0_70, %c0_71, %c0_72] : memref<18x18x32xbf16, #tpu.memory_space<vmem>>, vector<16x16x32xbf16>
    %71 = vector.shape_cast %70 : vector<16x16x32xbf16> to vector<256x32xbf16>
    %c0_73 = arith.constant 0 : index
    %c0_74 = arith.constant 0 : index
    %72 = vector.load %arg6[%c0_73, %c0_74] : memref<288x32xbf16, #tpu.memory_space<vmem>>, vector<32x32xbf16>
    %cst_75 = arith.constant dense<0.000000e+00> : vector<256x32xf32>
    %73 = tpu.matmul %71, %72, %cst_75 {dimension_numbers = #tpu.dot_dimension_numbers<[1], [0], [0], [1], [0, 0, 1, 1], [], []>} : vector<256x32xbf16>, vector<32x32xbf16>, vector<256x32xf32> -> vector<256x32xf32>
    %74 = arith.addf %69, %73 : vector<256x32xf32>
    %c0_76 = arith.constant 0 : index
    %c1_77 = arith.constant 1 : index
    %c0_78 = arith.constant 0 : index
    %75 = vector.load %arg11[%c0_76, %c1_77, %c0_78] : memref<18x18x32xbf16, #tpu.memory_space<vmem>>, vector<16x16x32xbf16>
    %76 = vector.shape_cast %75 : vector<16x16x32xbf16> to vector<256x32xbf16>
    %c32 = arith.constant 32 : index
    %c0_79 = arith.constant 0 : index
    %77 = vector.load %arg6[%c32, %c0_79] : memref<288x32xbf16, #tpu.memory_space<vmem>>, vector<32x32xbf16>
    %cst_80 = arith.constant dense<0.000000e+00> : vector<256x32xf32>
    %78 = tpu.matmul %76, %77, %cst_80 {dimension_numbers = #tpu.dot_dimension_numbers<[1], [0], [0], [1], [0, 0, 1, 1], [], []>} : vector<256x32xbf16>, vector<32x32xbf16>, vector<256x32xf32> -> vector<256x32xf32>
    %79 = arith.addf %74, %78 : vector<256x32xf32>
    %c0_81 = arith.constant 0 : index
    %c2_82 = arith.constant 2 : index
    %c0_83 = arith.constant 0 : index
    %80 = vector.load %arg11[%c0_81, %c2_82, %c0_83] : memref<18x18x32xbf16, #tpu.memory_space<vmem>>, vector<16x16x32xbf16>
    %81 = vector.shape_cast %80 : vector<16x16x32xbf16> to vector<256x32xbf16>
    %c64_84 = arith.constant 64 : index
    %c0_85 = arith.constant 0 : index
    %82 = vector.load %arg6[%c64_84, %c0_85] : memref<288x32xbf16, #tpu.memory_space<vmem>>, vector<32x32xbf16>
    %cst_86 = arith.constant dense<0.000000e+00> : vector<256x32xf32>
    %83 = tpu.matmul %81, %82, %cst_86 {dimension_numbers = #tpu.dot_dimension_numbers<[1], [0], [0], [1], [0, 0, 1, 1], [], []>} : vector<256x32xbf16>, vector<32x32xbf16>, vector<256x32xf32> -> vector<256x32xf32>
    %84 = arith.addf %79, %83 : vector<256x32xf32>
    %c1_87 = arith.constant 1 : index
    %c0_88 = arith.constant 0 : index
    %c0_89 = arith.constant 0 : index
    %85 = vector.load %arg11[%c1_87, %c0_88, %c0_89] : memref<18x18x32xbf16, #tpu.memory_space<vmem>>, vector<16x16x32xbf16>
    %86 = vector.shape_cast %85 : vector<16x16x32xbf16> to vector<256x32xbf16>
    %c96 = arith.constant 96 : index
    %c0_90 = arith.constant 0 : index
    %87 = vector.load %arg6[%c96, %c0_90] : memref<288x32xbf16, #tpu.memory_space<vmem>>, vector<32x32xbf16>
    %cst_91 = arith.constant dense<0.000000e+00> : vector<256x32xf32>
    %88 = tpu.matmul %86, %87, %cst_91 {dimension_numbers = #tpu.dot_dimension_numbers<[1], [0], [0], [1], [0, 0, 1, 1], [], []>} : vector<256x32xbf16>, vector<32x32xbf16>, vector<256x32xf32> -> vector<256x32xf32>
    %89 = arith.addf %84, %88 : vector<256x32xf32>
    %c1_92 = arith.constant 1 : index
    %c1_93 = arith.constant 1 : index
    %c0_94 = arith.constant 0 : index
    %90 = vector.load %arg11[%c1_92, %c1_93, %c0_94] : memref<18x18x32xbf16, #tpu.memory_space<vmem>>, vector<16x16x32xbf16>
    %91 = vector.shape_cast %90 : vector<16x16x32xbf16> to vector<256x32xbf16>
    %c128_95 = arith.constant 128 : index
    %c0_96 = arith.constant 0 : index
    %92 = vector.load %arg6[%c128_95, %c0_96] : memref<288x32xbf16, #tpu.memory_space<vmem>>, vector<32x32xbf16>
    %cst_97 = arith.constant dense<0.000000e+00> : vector<256x32xf32>
    %93 = tpu.matmul %91, %92, %cst_97 {dimension_numbers = #tpu.dot_dimension_numbers<[1], [0], [0], [1], [0, 0, 1, 1], [], []>} : vector<256x32xbf16>, vector<32x32xbf16>, vector<256x32xf32> -> vector<256x32xf32>
    %94 = arith.addf %89, %93 : vector<256x32xf32>
    %c1_98 = arith.constant 1 : index
    %c2_99 = arith.constant 2 : index
    %c0_100 = arith.constant 0 : index
    %95 = vector.load %arg11[%c1_98, %c2_99, %c0_100] : memref<18x18x32xbf16, #tpu.memory_space<vmem>>, vector<16x16x32xbf16>
    %96 = vector.shape_cast %95 : vector<16x16x32xbf16> to vector<256x32xbf16>
    %c160 = arith.constant 160 : index
    %c0_101 = arith.constant 0 : index
    %97 = vector.load %arg6[%c160, %c0_101] : memref<288x32xbf16, #tpu.memory_space<vmem>>, vector<32x32xbf16>
    %cst_102 = arith.constant dense<0.000000e+00> : vector<256x32xf32>
    %98 = tpu.matmul %96, %97, %cst_102 {dimension_numbers = #tpu.dot_dimension_numbers<[1], [0], [0], [1], [0, 0, 1, 1], [], []>} : vector<256x32xbf16>, vector<32x32xbf16>, vector<256x32xf32> -> vector<256x32xf32>
    %99 = arith.addf %94, %98 : vector<256x32xf32>
    %c2_103 = arith.constant 2 : index
    %c0_104 = arith.constant 0 : index
    %c0_105 = arith.constant 0 : index
    %100 = vector.load %arg11[%c2_103, %c0_104, %c0_105] : memref<18x18x32xbf16, #tpu.memory_space<vmem>>, vector<16x16x32xbf16>
    %101 = vector.shape_cast %100 : vector<16x16x32xbf16> to vector<256x32xbf16>
    %c192_106 = arith.constant 192 : index
    %c0_107 = arith.constant 0 : index
    %102 = vector.load %arg6[%c192_106, %c0_107] : memref<288x32xbf16, #tpu.memory_space<vmem>>, vector<32x32xbf16>
    %cst_108 = arith.constant dense<0.000000e+00> : vector<256x32xf32>
    %103 = tpu.matmul %101, %102, %cst_108 {dimension_numbers = #tpu.dot_dimension_numbers<[1], [0], [0], [1], [0, 0, 1, 1], [], []>} : vector<256x32xbf16>, vector<32x32xbf16>, vector<256x32xf32> -> vector<256x32xf32>
    %104 = arith.addf %99, %103 : vector<256x32xf32>
    %c2_109 = arith.constant 2 : index
    %c1_110 = arith.constant 1 : index
    %c0_111 = arith.constant 0 : index
    %105 = vector.load %arg11[%c2_109, %c1_110, %c0_111] : memref<18x18x32xbf16, #tpu.memory_space<vmem>>, vector<16x16x32xbf16>
    %106 = vector.shape_cast %105 : vector<16x16x32xbf16> to vector<256x32xbf16>
    %c224 = arith.constant 224 : index
    %c0_112 = arith.constant 0 : index
    %107 = vector.load %arg6[%c224, %c0_112] : memref<288x32xbf16, #tpu.memory_space<vmem>>, vector<32x32xbf16>
    %cst_113 = arith.constant dense<0.000000e+00> : vector<256x32xf32>
    %108 = tpu.matmul %106, %107, %cst_113 {dimension_numbers = #tpu.dot_dimension_numbers<[1], [0], [0], [1], [0, 0, 1, 1], [], []>} : vector<256x32xbf16>, vector<32x32xbf16>, vector<256x32xf32> -> vector<256x32xf32>
    %109 = arith.addf %104, %108 : vector<256x32xf32>
    %c2_114 = arith.constant 2 : index
    %c2_115 = arith.constant 2 : index
    %c0_116 = arith.constant 0 : index
    %110 = vector.load %arg11[%c2_114, %c2_115, %c0_116] : memref<18x18x32xbf16, #tpu.memory_space<vmem>>, vector<16x16x32xbf16>
    %111 = vector.shape_cast %110 : vector<16x16x32xbf16> to vector<256x32xbf16>
    %c256_117 = arith.constant 256 : index
    %c0_118 = arith.constant 0 : index
    %112 = vector.load %arg6[%c256_117, %c0_118] : memref<288x32xbf16, #tpu.memory_space<vmem>>, vector<32x32xbf16>
    %cst_119 = arith.constant dense<0.000000e+00> : vector<256x32xf32>
    %113 = tpu.matmul %111, %112, %cst_119 {dimension_numbers = #tpu.dot_dimension_numbers<[1], [0], [0], [1], [0, 0, 1, 1], [], []>} : vector<256x32xbf16>, vector<32x32xbf16>, vector<256x32xf32> -> vector<256x32xf32>
    %114 = arith.addf %109, %113 : vector<256x32xf32>
    %c0_120 = arith.constant 0 : index
    %c0_121 = arith.constant 0 : index
    %115 = vector.load %arg7[%c0_120, %c0_121] : memref<1x32xf32, #tpu.memory_space<vmem>>, vector<1x32xf32>
    %116 = vector.broadcast %115 : vector<1x32xf32> to vector<256x32xf32>
    %117 = arith.mulf %114, %116 : vector<256x32xf32>
    %c0_122 = arith.constant 0 : index
    %c0_123 = arith.constant 0 : index
    %118 = vector.load %arg8[%c0_122, %c0_123] : memref<1x32xf32, #tpu.memory_space<vmem>>, vector<1x32xf32>
    %119 = vector.broadcast %118 : vector<1x32xf32> to vector<256x32xf32>
    %120 = arith.addf %117, %119 : vector<256x32xf32>
    %cst_124 = arith.constant 0.000000e+00 : f32
    %121 = vector.broadcast %cst_124 : f32 to vector<256x32xf32>
    %122 = arith.maximumf %120, %121 : vector<256x32xf32>
    %123 = vector.shape_cast %122 : vector<256x32xf32> to vector<16x16x32xf32>
    %c0_125 = arith.constant 0 : index
    %c0_126 = arith.constant 0 : index
    %c0_127 = arith.constant 0 : index
    %c0_128 = arith.constant 0 : index
    %124 = vector.load %arg9[%c0_125, %c0_126, %c0_127, %c0_128] : memref<1x16x16x32xf32, #tpu.memory_space<vmem>>, vector<1x16x16x32xf32>
    %125 = vector.shape_cast %124 : vector<1x16x16x32xf32> to vector<16x16x32xf32>
    %126 = vector.shape_cast %123 : vector<16x16x32xf32> to vector<1x16x16x32xf32>
    tpu.vector_store %arg9[%c0_125, %c0_126, %c0_127, %c0_128], %126 {strides = array<i32>} : memref<1x16x16x32xf32, #tpu.memory_space<vmem>>, vector<1x16x16x32xf32>,
    return
  }
  func.func @transform_0(%arg0: i32) -> (i32, i32, i32, i32) {
    %c0_i32 = arith.constant 0 : i32
    %c0_i32_0 = arith.constant 0 : i32
    %c0_i32_1 = arith.constant 0 : i32
    %c0_i32_2 = arith.constant 0 : i32
    return %arg0, %c0_i32, %c0_i32_0, %c0_i32_1 : i32, i32, i32, i32
  }
  func.func @transform_1(%arg0: i32) -> (i32, i32) {
    %c0_i32 = arith.constant 0 : i32
    %c0_i32_0 = arith.constant 0 : i32
    %c0_i32_1 = arith.constant 0 : i32
    return %c0_i32, %c0_i32_0 : i32, i32
  }
  func.func @transform_2(%arg0: i32) -> (i32, i32) {
    %c0_i32 = arith.constant 0 : i32
    %c0_i32_0 = arith.constant 0 : i32
    %c0_i32_1 = arith.constant 0 : i32
    return %c0_i32, %c0_i32_0 : i32, i32
  }
  func.func @transform_3(%arg0: i32) -> (i32, i32) {
    %c0_i32 = arith.constant 0 : i32
    %c0_i32_0 = arith.constant 0 : i32
    %c0_i32_1 = arith.constant 0 : i32
    return %c0_i32, %c0_i32_0 : i32, i32
  }
  func.func @transform_4(%arg0: i32) -> (i32, i32) {
    %c0_i32 = arith.constant 0 : i32
    %c0_i32_0 = arith.constant 0 : i32
    %c0_i32_1 = arith.constant 0 : i32
    return %c0_i32, %c0_i32_0 : i32, i32
  }
  func.func @transform_5(%arg0: i32) -> (i32, i32) {
    %c0_i32 = arith.constant 0 : i32
    %c0_i32_0 = arith.constant 0 : i32
    %c0_i32_1 = arith.constant 0 : i32
    return %c0_i32, %c0_i32_0 : i32, i32
  }
  func.func @transform_6(%arg0: i32) -> (i32, i32) {
    %c0_i32 = arith.constant 0 : i32
    %c0_i32_0 = arith.constant 0 : i32
    %c0_i32_1 = arith.constant 0 : i32
    return %c0_i32, %c0_i32_0 : i32, i32
  }
  func.func @transform_7(%arg0: i32) -> (i32, i32) {
    %c0_i32 = arith.constant 0 : i32
    %c0_i32_0 = arith.constant 0 : i32
    %c0_i32_1 = arith.constant 0 : i32
    return %c0_i32, %c0_i32_0 : i32, i32
  }
  func.func @transform_8(%arg0: i32) -> (i32, i32, i32, i32) {
    %c0_i32 = arith.constant 0 : i32
    %c0_i32_0 = arith.constant 0 : i32
    %c0_i32_1 = arith.constant 0 : i32
    %c0_i32_2 = arith.constant 0 : i32
    return %arg0, %c0_i32, %c0_i32_0, %c0_i32_1 : i32, i32, i32, i32
  }
}

</mosaic_0001>

<bundles_post_ra>
// kernel: up_no_cat_forward.1
= control target key start
LH: loop header
LB: loop body
LE: loop exit
PB: predicated region body
PF: predicated region fallthrough
CT: control target
= control target key end

     0   :  { %13 = vsyncpa [#allocation5], 0  ;;  %s19500_s0 = inlined_call_operand.vmem [shape: bf16[2,8,8,64], index: 0, kind: input, shape index: {}]   ;;  %s19501_s1 = inlined_call_operand.vmem [shape: bf16[256,64], index: 1, kind: input, shape index: {}]   ;;  %s19502_s2 = inlined_call_operand.vmem [shape: bf16[576,32], index: 2, kind: input, shape index: {}]   ;;  %s19503_s3 = inlined_call_operand.vmem [shape: f32[1,32], index: 3, kind: input, shape index: {}]   ;;  %s19504_s4 = inlined_call_operand.vmem [shape: f32[1,32], index: 4, kind: input, shape index: {}]   ;;  %s19505_s5 = inlined_call_operand.vmem [shape: bf16[288,32], index: 5, kind: input, shape index: {}]   ;;  %s19506_s6 = inlined_call_operand.vmem [shape: f32[1,32], index: 6, kind: input, shape index: {}]   ;;  %s19507_s7 = inlined_call_operand.vmem [shape: f32[1,32], index: 7, kind: input, shape index: {}]   ;;  %s19508_s8 = inlined_call_operand.hbm [shape: f32[2,16,16,32], index: 8, kind: output, shape index: {}]  }
   0x1   :  { %15 = vsyncpa [#allocation5 + $0x1], 0  ;;  %s13962_s27 = smov 0   ;;  %s13964_s28 = smov 0  }
   0x2   :  { %s13966_s29 = smov 0   ;;  %s13968_s30 = smov 0  }
   0x3 LB: > { %s13983_s9 = sadd.s32 4294967295, %s13911_s30   ;;  %s11620_s10 = sadd.s32 4294967294, %s13911_s30   ;;  %s13911_s30 = sphi %s13968_s30, %s19910_s30   ;;  %s13907_s29 = sphi %s13966_s29, %s19909_s29   ;;  %s13903_s28 = sphi %s13964_s28, %s19908_s28   ;;  %s13899_s27 = sphi %s13962_s27, %s19907_s27  }
   0x4   : > { %s13987_s11 = sadd.s32 1, %s13911_s30   ;;  %s201_s12 = sadd.s32 1, %s13907_s29 }
   0x5   : > { %s198_s13 = ssub.s32 %s13911_s30, %s13987_s11  ;;  %p211_p0 = scmp.ne.s32.totalorder %s13907_s29, %s13903_s28 }
   0x6   : > { %p199_p1 = scmp.eq.s32.totalorder %s198_s13, 0  ;;  %p212_p2 = scmp.eq.s32.totalorder %s13983_s9, 1 }
   0x7   : > { %p217_p3 = scmp.ne.s32.totalorder %s13903_s28, %s13899_s27  ;;  %p218_p4 = scmp.eq.s32.totalorder %s11620_s10, 1 }
   0x8   : > { %s13998_s14 = scalar_select %p199_p1, %s13907_s29, %s201_s12  }
   0x9   : > { %p14000_p5 = por %p212_p2, %p211_p0  ;;  %p14004_p6 = por %p218_p4, %p217_p3 }
   0xa   : > { %p11623_p7 = scmp.ge.s32.totalorder %s13911_s30, 1  ;;  %p265_p8 = scmp.lt.s32.totalorder %s13911_s30, 3 }
   0xc   : > { %p266_p9 = pnand %p11623_p7, %p265_p8 }
   0xe   : > { %269 = sbr.rel (%p266_p9) target bundleno = 1422 (0x58e), region = 52 }
  0x13   : > { %p299_p10 = scmp.lt.s32.totalorder %s13983_s9, 1  ;;  %v13668_v0 = vld [vmem:[%s19501_s1] sm:$0xff]   ;;  %vm561_vm0 = vcmask 523264   ;;  %vm305_vm1 = vcmask 519168   ;;  %v13913_v2 = vmov 0   ;;  %vm361_vm2 = vcmask 257024  }
  0x14   : > { %12898 = vmatprep.mubr.msk.bf16.mxu0 %vm561_vm0, %v13668_v0  ;;  %313 = vst.msk [vmem:[#allocation2 + $0x18] sm:$0xf] %vm305_vm1, %v13913_v2  ;;  %306 = vst.msk [vmem:[#allocation2] sm:$0xf] %vm305_vm1, %v13913_v2  ;;  %v13674_v5 = vld [vmem:[%s19501_s1 + $0x40] sm:$0xff]   ;;  %v13669_v7 = vld [vmem:[%s19501_s1 + $0x8] sm:$0xff]  }
  0x15   : > { %s300_s19 = scalar_select %p299_p10, %s13983_s9, 1  ;;  %307 = vst.msk [vmem:[#allocation2 + $0x4] sm:$0xf] %vm305_vm1, %v13913_v2  ;;  %310 = vst.msk [vmem:[#allocation2 + $0xc] sm:$0xf] %vm305_vm1, %v13913_v2  ;;  %12914 = vmatprep.mubr.msk.bf16.mxu1 %vm561_vm0, %v13674_v5  ;;  %v13675_v8 = vld [vmem:[%s19501_s1 + $0x48] sm:$0xff]  }
  0x16   : > { %311 = vst.msk [vmem:[#allocation2 + $0x10] sm:$0xf] %vm305_vm1, %v13913_v2  ;;  %314 = vst.msk [vmem:[#allocation2 + $0x1c] sm:$0xf] %vm305_vm1, %v13913_v2  ;;  %v13670_v9 = vld [vmem:[%s19501_s1 + $0x10] sm:$0xff]   ;;  %v13671_v11 = vld [vmem:[%s19501_s1 + $0x18] sm:$0xff]  }
  0x17   : > { %s12462_s20 = sshll.u32 %s300_s19, 5  ;;  %316 = vst.msk [vmem:[#allocation2 + $0x24] sm:$0xf] %vm305_vm1, %v13913_v2  ;;  %317 = vst.msk [vmem:[#allocation2 + $0x28] sm:$0xf] %vm305_vm1, %v13913_v2  ;;  %v13678_v10 = vld [vmem:[%s19501_s1 + $0x50] sm:$0xff]  }
  0x18   : > { %s14019_s23 = scalar_lea.vmem %s19500_s0, %s12462_s20  ;;  %319 = vst.msk [vmem:[#allocation2 + $0x30] sm:$0xf] %vm305_vm1, %v13913_v2  ;;  %320 = vst.msk [vmem:[#allocation2 + $0x34] sm:$0xf] %vm305_vm1, %v13913_v2  ;;  %v13679_v12 = vld [vmem:[%s19501_s1 + $0x58] sm:$0xff]   ;;  %v13672_v13 = vld [vmem:[%s19501_s1 + $0x20] sm:$0xff]  }
  0x19   : > { %v14022_v1 = vld [vmem:[%s14019_s23 + $0x18] sm:$0xff]   ;;  %322 = vst.msk [vmem:[#allocation2 + $0x3c] sm:$0xf] %vm305_vm1, %v13913_v2  ;;  %323 = vst.msk [vmem:[#allocation2 + $0x40] sm:$0xf] %vm305_vm1, %v13913_v2  ;;  %v13665_v3 = vld [vmem:[%s14019_s23 + $0x10] sm:$0xff]  }
  0x1a   : > { %325 = vst.msk [vmem:[#allocation2 + $0x48] sm:$0xf] %vm305_vm1, %v13913_v2  ;;  %326 = vst.msk [vmem:[#allocation2 + $0x4c] sm:$0xf] %vm305_vm1, %v13913_v2  ;;  %12890 = vmatprep.subr.bf16.mxu0 %v14022_v1  ;;  %13614 = vmatprep.subr.bf16.mxu1 %v14022_v1  ;;  %v13666_v4 = vld [vmem:[%s14019_s23 + $0x8] sm:$0xff]   ;;  %v13667_v6 = vld [vmem:[%s14019_s23] sm:$0xff]  }
  0x1b   : > { %328 = vst.msk [vmem:[#allocation2 + $0x54] sm:$0xf] %vm305_vm1, %v13913_v2  ;;  %329 = vst.msk [vmem:[#allocation2 + $0x58] sm:$0xf] %vm305_vm1, %v13913_v2  ;;  %12891 = vmatpush3.bf16.msra.mxu0 %v14022_v1  ;;  %13618 = vmatpush3.bf16.msra.mxu1 %v14022_v1  ;;  %v13680_v14 = vld [vmem:[%s19501_s1 + $0x60] sm:$0xff]   ;;  %v13673_v15 = vld [vmem:[%s19501_s1 + $0x28] sm:$0xff]  }
  0x1c   : > { %331 = vst.msk [vmem:[#allocation2 + $0x60] sm:$0xf] %vm305_vm1, %v13913_v2  ;;  %332 = vst.msk [vmem:[#allocation2 + $0x64] sm:$0xf] %vm305_vm1, %v13913_v2  ;;  %12892 = vmatprep.subr.bf16.mxu0 %v13665_v3  ;;  %13615 = vmatprep.subr.bf16.mxu1 %v13665_v3  ;;  %v13681_v16 = vld [vmem:[%s19501_s1 + $0x68] sm:$0xff]   ;;  %v13676_v17 = vld [vmem:[%s19501_s1 + $0x30] sm:$0xff]  }
  0x1d   : > { %334 = vst.msk [vmem:[#allocation2 + $0x6c] sm:$0xf] %vm305_vm1, %v13913_v2  ;;  %335 = vst.msk [vmem:[#allocation2 + $0x70] sm:$0xf] %vm305_vm1, %v13913_v2  ;;  %v13682_v18 = vld [vmem:[%s19501_s1 + $0x70] sm:$0xff]   ;;  %v13677_v19 = vld [vmem:[%s19501_s1 + $0x38] sm:$0xff]  }
  0x1e   : > { %337 = vst.msk [vmem:[#allocation2 + $0x78] sm:$0xf] %vm305_vm1, %v13913_v2  ;;  %338 = vst.msk [vmem:[#allocation2 + $0x7c] sm:$0xf] %vm305_vm1, %v13913_v2  ;;  %v13683_v20 = vld [vmem:[%s19501_s1 + $0x78] sm:$0xff]   ;;  %vm308_vm3 = vcmask 516096  }
  0x1f   : > { %340 = vst.msk [vmem:[#allocation2 + $0x84] sm:$0xf] %vm305_vm1, %v13913_v2  ;;  %341 = vst.msk [vmem:[#allocation2 + $0x88] sm:$0xf] %vm305_vm1, %v13913_v2  ;;  %12893 = vmatpush3.bf16.msra.mxu0 %v13665_v3  ;;  %13619 = vmatpush3.bf16.msra.mxu1 %v13665_v3  ;;  %v13686_v21 = vld [vmem:[%s19502_s2 + $0x18] sm:$0xff]   ;;  %vm364_vm4 = vcmask 253952  }
  0x20   : > { %343 = vst.msk [vmem:[#allocation2 + $0x90] sm:$0xf] %vm305_vm1, %v13913_v2  ;;  %344 = vst.msk [vmem:[#allocation2 + $0x94] sm:$0xf] %vm305_vm1, %v13913_v2  ;;  %12894 = vmatprep.subr.bf16.mxu0 %v13666_v4  ;;  %13616 = vmatprep.subr.bf16.mxu1 %v13666_v4  ;;  %v13684_v22 = vld [vmem:[%s19502_s2 + $0x38] sm:$0xff]   ;;  %v19534_v23 = vmov 0 }
  0x21   : > { %346 = vst.msk [vmem:[#allocation2 + $0x9c] sm:$0xf] %vm305_vm1, %v13913_v2  ;;  %347 = vst.msk [vmem:[#allocation2 + $0xa0] sm:$0xf] %vm305_vm1, %v13913_v2  ;;  %vm867_vm5 = vsmask.f32 256 }
  0x22   : > { %349 = vst.msk [vmem:[#allocation2 + $0xa8] sm:$0xf] %vm305_vm1, %v13913_v2  ;;  %350 = vst.msk [vmem:[#allocation2 + $0xac] sm:$0xf] %vm305_vm1, %v13913_v2  ;;  %v13687_v24 = vld [vmem:[%s19502_s2 + $0x10] sm:$0xff]   ;;  %v13689_v25 = vld [vmem:[%s19502_s2 + $0x8] sm:$0xff]  }
  0x23   : > { %352 = vst.msk [vmem:[#allocation2 + $0xb4] sm:$0xf] %vm305_vm1, %v13913_v2  ;;  %353 = vst.msk [vmem:[#allocation2 + $0xb8] sm:$0xf] %vm305_vm1, %v13913_v2  ;;  %12895 = vmatpush3.bf16.msra.mxu0 %v13666_v4  ;;  %13620 = vmatpush3.bf16.msra.mxu1 %v13666_v4  ;;  %v13685_v26 = vld [vmem:[%s19502_s2 + $0x30] sm:$0xff]   ;;  %v13690_v27 = vld [vmem:[%s19502_s2] sm:$0xff]  }
  0x24   : > { %355 = vst.msk [vmem:[#allocation2 + $0xc0] sm:$0xf] %vm305_vm1, %v13913_v2  ;;  %356 = vst.msk [vmem:[#allocation2 + $0xc4] sm:$0xf] %vm305_vm1, %v13913_v2  ;;  %12896 = vmatprep.subr.bf16.mxu0 %v13667_v6  ;;  %13617 = vmatprep.subr.bf16.mxu1 %v13667_v6  ;;  %v1308_v28 = vld [vmem:[#allocation2] sm:$0xf] }
  0x25   : > { %358 = vst.msk [vmem:[#allocation2 + $0xcc] sm:$0xf] %vm305_vm1, %v13913_v2  ;;  %359 = vst.msk [vmem:[#allocation2 + $0xd0] sm:$0xf] %vm305_vm1, %v13913_v2  ;;  %v1309_v29 = vld [vmem:[#allocation2 + $0x4] sm:$0xf] }
  0x26   : > { %362 = vst.msk [vmem:[#allocation3] sm:$0xf] %vm361_vm2, %v13913_v2  ;;  %363 = vst.msk [vmem:[#allocation3 + $0x4] sm:$0xf] %vm361_vm2, %v13913_v2  ;;  %v11731_v30 = vcombine.low %v1308_v28, %v1309_v29  ;;  %v13688_v31 = vld [vmem:[%s19502_s2 + $0x28] sm:$0xff]   ;;  %v13692_v32 = vld [vmem:[%s19502_s2 + $0x20] sm:$0xff]  }
  0x27   : > { %366 = vst.msk [vmem:[#allocation3 + $0xc] sm:$0xf] %vm361_vm2, %v13913_v2  ;;  %367 = vst.msk [vmem:[#allocation3 + $0x10] sm:$0xf] %vm361_vm2, %v13913_v2  ;;  %12897 = vmatpush3.bf16.msra.mxu0 %v13667_v6  ;;  %13621 = vmatpush3.bf16.msra.mxu1 %v13667_v6  ;;  %v1368_v33 = vshrl.u32 %v1308_v28, 16  ;;  %v1371_v34 = vshll.u32 %v1308_v28, 16 }
  0x28   : > { %369 = vst.msk [vmem:[#allocation3 + $0x18] sm:$0xf] %vm361_vm2, %v13913_v2  ;;  %370 = vst.msk [vmem:[#allocation3 + $0x1c] sm:$0xf] %vm361_vm2, %v13913_v2  ;;  %12970 = vmatprep.subr.bf16.mxu0 %v13686_v21  ;;  %12930 = vmatprep.subr.bf16.mxu1 %v13684_v22  ;;  %v1381_v35 = vshrl.u32 %v1309_v29, 16  ;;  %v1377_v38 = vshll.u32 %v1309_v29, 16 }
  0x29   : > { %372 = vst.msk [vmem:[#allocation3 + $0x24] sm:$0xf] %vm361_vm2, %v13913_v2  ;;  %373 = vst.msk [vmem:[#allocation3 + $0x28] sm:$0xf] %vm361_vm2, %v13913_v2  ;;  %v1370_v36 = vrot.slane %v1368_v33, 4  ;;  %v1373_v37 = vrot.slane %v1371_v34, 5 }
  0x2a   : > { %375 = vst.msk [vmem:[#allocation3 + $0x30] sm:$0xf] %vm361_vm2, %v13913_v2  ;;  %376 = vst.msk [vmem:[#allocation3 + $0x34] sm:$0xf] %vm361_vm2, %v13913_v2  ;;  %12899 = vmatmul.mubr.msk.bf16.vlgmr.msra.gmra.mxu0 %vm561_vm0, %v13669_v7  ;;  %12915 = vmatmul.mubr.msk.bf16.vlgmr.msra.gmra.mxu1 %vm561_vm0, %v13675_v8  ;;  %v1379_v39 = vrot.slane %v1377_v38, 5  ;;  %v1383_v40 = vrot.slane %v1381_v35, 4 }
  0x2b   : > { %378 = vst.msk [vmem:[#allocation3 + $0x3c] sm:$0xf] %vm361_vm2, %v13913_v2  ;;  %379 = vst.msk [vmem:[#allocation3 + $0x40] sm:$0xf] %vm361_vm2, %v13913_v2  ;;  %12902 = vmatprep.mubr.msk.bf16.mxu0 %vm561_vm0, %v13670_v9  ;;  %12918 = vmatprep.mubr.msk.bf16.mxu1 %vm561_vm0, %v13678_v10  ;;  %vm1364_vm7 = vsmask.f32 3328  ;;  %v1374_v42 = vor.u32 %v1373_v37, %v1370_v36 }
  0x2c   : > { %381 = vst.msk [vmem:[#allocation3 + $0x48] sm:$0xf] %vm361_vm2, %v13913_v2  ;;  %382 = vst.msk [vmem:[#allocation3 + $0x4c] sm:$0xf] %vm361_vm2, %v13913_v2  ;;  %12971 = vmatpush3.bf16.msra.mxu0 %v13686_v21  ;;  %12931 = vmatpush3.bf16.msra.mxu1 %v13684_v22  ;;  %vm1365_vm8 = vsmask.f32 7440  ;;  %v1384_v43 = vor.u32 %v1383_v40, %v1379_v39 }
  0x2d   : > { %384 = vst.msk [vmem:[#allocation3 + $0x54] sm:$0xf] %vm361_vm2, %v13913_v2  ;;  %385 = vst.msk [vmem:[#allocation3 + $0x58] sm:$0xf] %vm361_vm2, %v13913_v2  ;;  %12972 = vmatprep.subr.bf16.mxu0 %v13687_v24  ;;  %12932 = vmatprep.subr.bf16.mxu1 %v13685_v26  ;;  %v1375_v45 = vrot.slane %v1374_v42, 4  ;;  %v19537_v47 = vmov 0 }
  0x2e   : > { %387 = vst.msk [vmem:[#allocation3 + $0x60] sm:$0xf] %vm361_vm2, %v13913_v2  ;;  %388 = vst.msk [vmem:[#allocation3 + $0x64] sm:$0xf] %vm361_vm2, %v13913_v2  ;;  %v1385_v46 = vrot.slane %v1384_v43, 4  ;;  %v14350_v52 = vld [vmem:[%s19502_s2 + $0x58] sm:$0xff]  }
  0x2f   : > { %390 = vst.msk [vmem:[#allocation3 + $0x6c] sm:$0xf] %vm361_vm2, %v13913_v2  ;;  %391 = vst.msk [vmem:[#allocation3 + $0x70] sm:$0xf] %vm361_vm2, %v13913_v2  ;;  %v14356_v53 = vld [vmem:[%s19502_s2 + $0x78] sm:$0xff]   ;;  %vm2401_vm15 = vcmask 1042432  }
  0x30   : > { %393 = vst.msk [vmem:[#allocation3 + $0x78] sm:$0xf] %vm361_vm2, %v13913_v2  ;;  %394 = vst.msk [vmem:[#allocation3 + $0x7c] sm:$0xf] %vm361_vm2, %v13913_v2  ;;  %12973 = vmatpush3.bf16.msra.mxu0 %v13687_v24  ;;  %12933 = vmatpush3.bf16.msra.mxu1 %v13685_v26  ;;  %vm1192_vm10 = vsmask.f32 7938 }
  0x31   : > { %396 = vst.msk [vmem:[#allocation3 + $0x84] sm:$0xf] %vm361_vm2, %v13913_v2  ;;  %397 = vst.msk [vmem:[#allocation3 + $0x88] sm:$0xf] %vm361_vm2, %v13913_v2  ;;  %12974 = vmatprep.subr.bf16.mxu0 %v13689_v25  ;;  %12934 = vmatprep.subr.bf16.mxu1 %v13688_v31  ;;  %vm868_vm11 = vsmask.f32 4368 }
  0x32   : > { %399 = vst.msk [vmem:[#allocation3 + $0x90] sm:$0xf] %vm361_vm2, %v13913_v2  ;;  %400 = vst.msk [vmem:[#allocation3 + $0x94] sm:$0xf] %vm361_vm2, %v13913_v2  ;;  %12903 = vmatmul.mubr.msk.bf16.gmra.mxu0 %vm561_vm0, %v13671_v11  ;;  %12919 = vmatmul.mubr.msk.bf16.gmra.mxu1 %vm561_vm0, %v13679_v12  ;;  %v1203_v9 = vld [vmem:[#allocation2 + $0x18] sm:$0xf] }
  0x33   : > { %402 = vst.msk [vmem:[#allocation3 + $0x9c] sm:$0xf] %vm361_vm2, %v13913_v2  ;;  %403 = vst.msk [vmem:[#allocation3 + $0xa0] sm:$0xf] %vm361_vm2, %v13913_v2  ;;  %12906 = vmatprep.mubr.msk.bf16.mxu0 %vm561_vm0, %v13672_v13  ;;  %12922 = vmatprep.mubr.msk.bf16.mxu1 %vm561_vm0, %v13680_v14  ;;  %s296_s18 = sand.u32 1, %s13903_s28   ;;  %s12527_s25 = sshll.u32 %s13983_s9, 12 }
  0x34   : > { %405 = vst.msk [vmem:[#allocation3 + $0xa8] sm:$0xf] %vm361_vm2, %v13913_v2  ;;  %406 = vst.msk [vmem:[#allocation3 + $0xac] sm:$0xf] %vm361_vm2, %v13913_v2  ;;  %12975 = vmatpush3.bf16.msra.mxu0 %v13689_v25  ;;  %12935 = vmatpush3.bf16.msra.mxu1 %v13688_v31  ;;  %s11624_s23 = sshll.u32 %s296_s18, 8  ;;  %s19450_s13 = scalar_lea.hbm %s19508_s8, %s12527_s25 }
  0x35   : > { %408 = vst.msk [vmem:[#allocation3 + $0xb4] sm:$0xf] %vm361_vm2, %v13913_v2  ;;  %409 = vst.msk [vmem:[#allocation3 + $0xb8] sm:$0xf] %vm361_vm2, %v13913_v2  ;;  %12976 = vmatprep.subr.bf16.mxu0 %v13690_v27  ;;  %12936 = vmatprep.subr.bf16.mxu1 %v13692_v32  ;;  %s19220_s24 = scalar_lea.vmem [#allocation4], %s11624_s23  ;;  %s19460_s9 = scalar_lea.sflag [#allocation5], %s296_s18 }
  0x36   : > { %411 = vst.msk [vmem:[#allocation3 + $0xc0] sm:$0xf] %vm361_vm2, %v13913_v2  ;;  %412 = vst.msk [vmem:[#allocation3 + $0xc4] sm:$0xf] %vm361_vm2, %v13913_v2  ;;  %s11558_s26 = sshll.u32 %s19220_s24, 4  ;;  %s13914_s19 = smov [#allocation4]   ;;  %s19452_s26 = int_to_ptr.vmem [resolvable:$true] %s11558_s26 }
  0x37   : > { %414 = vst.msk [vmem:[#allocation3 + $0xcc] sm:$0xf] %vm361_vm2, %v13913_v2  ;;  %415 = vst.msk [vmem:[#allocation3 + $0xd0] sm:$0xf] %vm361_vm2, %v13913_v2  ;;  %s13851_s17 = scalar_lea.vmem %s19452_s26, 4096  ;;  %s13855_s20 = sshll.u32 %s13914_s19, 4  ;;  %s13856_s20 = int_to_ptr.vmem [resolvable:$false] %s13855_s20 }
  0x38   : > { %315 = vst.msk [vmem:[#allocation2 + $0x20] sm:$0x1] %vm308_vm3, %v13913_v2  ;;  %309 = vst.msk [vmem:[#allocation2 + $0x8] sm:$0x1] %vm308_vm3, %v13913_v2  ;;  %12977 = vmatpush3.bf16.msra.mxu0 %v13690_v27  ;;  %12937 = vmatpush3.bf16.msra.mxu1 %v13692_v32  ;;  %p13852_p11 = scmp.ne.s32.totalorder %s19452_s26, %s13851_s17  ;;  %s13857_s21 = scalar_lea.vmem %s13856_s20, 8192 }
  0x39   : > { %312 = vst.msk [vmem:[#allocation2 + $0x14] sm:$0x1] %vm308_vm3, %v13913_v2  ;;  %318 = vst.msk [vmem:[#allocation2 + $0x2c] sm:$0x1] %vm308_vm3, %v13913_v2  ;;  %13010 = vmatprep.subr.bf16.mxu1 %v14350_v52  ;;  %13050 = vmatprep.subr.bf16.mxu0 %v14356_v53  ;;  %p13858_p0 = scmp.lt.s32.totalorder %s19452_s26, %s13856_s20  ;;  %p13859_p1 = scmp.lt.s32.totalorder %s13857_s21, %s13851_s17 }
  0x3a   : > { %12907 = vmatmul.mubr.msk.bf16.gmra.mxu0 %vm561_vm0, %v13673_v15  ;;  %12923 = vmatmul.mubr.msk.bf16.gmra.mxu1 %vm561_vm0, %v13681_v16  ;;  %321 = vst.msk [vmem:[#allocation2 + $0x38] sm:$0x1] %vm308_vm3, %v13913_v2  ;;  %324 = vst.msk [vmem:[#allocation2 + $0x44] sm:$0x1] %vm308_vm3, %v13913_v2  ;;  %p13853_p12 = pnand %p13852_p11, %p14000_p5 }
  0x3b   : > { %12910 = vmatprep.mubr.msk.bf16.mxu0 %vm561_vm0, %v13676_v17  ;;  %12926 = vmatprep.mubr.msk.bf16.mxu1 %vm561_vm0, %v13682_v18  ;;  %327 = vst.msk [vmem:[#allocation2 + $0x50] sm:$0x1] %vm308_vm3, %v13913_v2  ;;  %330 = vst.msk [vmem:[#allocation2 + $0x5c] sm:$0x1] %vm308_vm3, %v13913_v2  ;;  %p13860_p2 = por %p13859_p1, %p13858_p0 }
  0x3c   : > { %333 = vst.msk [vmem:[#allocation2 + $0x68] sm:$0x1] %vm308_vm3, %v13913_v2  ;;  %336 = vst.msk [vmem:[#allocation2 + $0x74] sm:$0x1] %vm308_vm3, %v13913_v2  ;;  %p13854_p13 = pneg %p13853_p12 }
  0x3d   : > { %339 = vst.msk [vmem:[#allocation2 + $0x80] sm:$0x1] %vm308_vm3, %v13913_v2  ;;  %342 = vst.msk [vmem:[#allocation2 + $0x8c] sm:$0x1] %vm308_vm3, %v13913_v2 }
  0x3e   : > { %345 = vst.msk [vmem:[#allocation2 + $0x98] sm:$0x1] %vm308_vm3, %v13913_v2  ;;  %348 = vst.msk [vmem:[#allocation2 + $0xa4] sm:$0x1] %vm308_vm3, %v13913_v2  ;;  %p13861_p3 = pnand %p13860_p2, %p13854_p13 }
  0x3f   : > { %351 = vst.msk [vmem:[#allocation2 + $0xb0] sm:$0x1] %vm308_vm3, %v13913_v2  ;;  %354 = vst.msk [vmem:[#allocation2 + $0xbc] sm:$0x1] %vm308_vm3, %v13913_v2  ;;  %v1348_v41 = vld [vmem:[#allocation2 + $0x8] sm:$0x1] }
  0x40   : > { %357 = vst.msk [vmem:[#allocation2 + $0xc8] sm:$0x1] %vm308_vm3, %v13913_v2  ;;  %360 = vst.msk [vmem:[#allocation2 + $0xd4] sm:$0x1] %vm308_vm3, %v13913_v2  ;;  %v1387_v44 = vshll.u32 %v1348_v41, 16 }
  0x41   : > { %365 = vst.msk [vmem:[#allocation3 + $0x8] sm:$0x1] %vm364_vm4, %v13913_v2  ;;  %368 = vst.msk [vmem:[#allocation3 + $0x14] sm:$0x1] %vm364_vm4, %v13913_v2  ;;  %v1207_v33 = vld [vmem:[#allocation2 + $0x20] sm:$0x1] }
  0x42   : > { %12911 = vmatmul.mubr.msk.bf16.gmra.mxu0 %vm561_vm0, %v13677_v19  ;;  %12927 = vmatmul.mubr.msk.bf16.gmra.mxu1 %vm561_vm0, %v13683_v20  ;;  %371 = vst.msk [vmem:[#allocation3 + $0x20] sm:$0x1] %vm364_vm4, %v13913_v2  ;;  %374 = vst.msk [vmem:[#allocation3 + $0x2c] sm:$0x1] %vm364_vm4, %v13913_v2  ;;  %v1389_v48 = vrot.slane %v1387_v44, 5 }
  0x43   : > { %377 = vst.msk [vmem:[#allocation3 + $0x38] sm:$0x1] %vm364_vm4, %v13913_v2  ;;  %380 = vst.msk [vmem:[#allocation3 + $0x44] sm:$0x1] %vm364_vm4, %v13913_v2  ;;  %12978 = vmatprep.mubr.msk.bf16.mxu0 %vm561_vm0, %v11731_v30  ;;  %v1259_v19 = vld [vmem:[#allocation2 + $0x78] sm:$0xf] }
  0x44   : > { %383 = vst.msk [vmem:[#allocation3 + $0x50] sm:$0x1] %vm364_vm4, %v13913_v2  ;;  %386 = vst.msk [vmem:[#allocation3 + $0x5c] sm:$0x1] %vm364_vm4, %v13913_v2  ;;  %v1194_v20 = vld [vmem:[#allocation2 + $0xc] sm:$0xf] }
  0x45   : > { %389 = vst.msk [vmem:[#allocation3 + $0x68] sm:$0x1] %vm364_vm4, %v13913_v2  ;;  %392 = vst.msk [vmem:[#allocation3 + $0x74] sm:$0x1] %vm364_vm4, %v13913_v2  ;;  %v19542_v30 = vmov 0 }
  0x46   : > { %395 = vst.msk [vmem:[#allocation3 + $0x80] sm:$0x1] %vm364_vm4, %v13913_v2  ;;  %398 = vst.msk [vmem:[#allocation3 + $0x8c] sm:$0x1] %vm364_vm4, %v13913_v2 }
  0x47   : > { %401 = vst.msk [vmem:[#allocation3 + $0x98] sm:$0x1] %vm364_vm4, %v13913_v2  ;;  %404 = vst.msk [vmem:[#allocation3 + $0xa4] sm:$0x1] %vm364_vm4, %v13913_v2 }
  0x48   : > { %407 = vst.msk [vmem:[#allocation3 + $0xb0] sm:$0x1] %vm364_vm4, %v13913_v2  ;;  %410 = vst.msk [vmem:[#allocation3 + $0xbc] sm:$0x1] %vm364_vm4, %v13913_v2 }
  0x49   : > { %413 = vst.msk [vmem:[#allocation3 + $0xc8] sm:$0x1] %vm364_vm4, %v13913_v2  ;;  %416 = vst.msk [vmem:[#allocation3 + $0xd4] sm:$0x1] %vm364_vm4, %v13913_v2 }
  0x4a   : > { %vm14315_vm6 = vmand %vm364_vm4, %vm867_vm5 }
  0x4b   : > { %v19535_v23 = vsel %vm14315_vm6, 4294967295, %v19534_v23  ;;  %vm14338_vm9 = vmor %vm1364_vm7, %vm1365_vm8 }
  0x4c   : > { %19536 = vst [vmem:[#allocation7_spill] sm:$0xff] %v19535_v23  ;;  %v19538_v47 = vsel %vm14338_vm9, 4294967295, %v19537_v47  ;;  %v1380_v49 = vsel %vm14338_vm9, %v1375_v45, %v1379_v39  ;;  %v1390_v50 = vsel %vm14338_vm9, %v1385_v46, %v1389_v48  ;;  %vm14363_vm12 = vmand %vm305_vm1, %vm1192_vm10 }
  0x4d   : > { %19539 = vst [vmem:[#allocation8_spill] sm:$0xff] %v19538_v47  ;;  %v11695_v51 = vcombine.low %v1380_v49, %v1390_v50  ;;  %vm14379_vm13 = vmor %vm867_vm5, %vm868_vm11 }
  0x4e   : > { %v19543_v30 = vsel %vm14379_vm13, 4294967295, %v19542_v30  ;;  %vm14385_vm14 = vmand %vm308_vm3, %vm867_vm5 }
  0x4f   : > { %12938 = vmatprep.mubr.msk.bf16.mxu1 %vm561_vm0, %v11695_v51  ;;  %19544 = vst [vmem:[#allocation9_spill] sm:$0xff] %v19543_v30  ;;  %v1200_v51 = vld [vmem:[#allocation2 + $0x14] sm:$0x1]  ;;  %vm16818_vm4 = vmand %vm361_vm2, %vm1192_vm10 }
  0xea   : > { %v12900_v54 = vpop.f32.mrf.mxu0  ;;  %v12916_v55 = vpop.f32.mrf.mxu1 }
  0xeb   : > { %v12465_v56 = vpack.c.bf16 %v12900_v54, %v12900_v54  ;;  %v12481_v57 = vpack.c.bf16 %v12916_v55, %v12916_v55 }
  0xec   : > { %v644_v58 = vpop.f32.mrf.mxu0  ;;  %v708_v59 = vpop.f32.mrf.mxu1 }
  0xed   : > { %v888_v60 = vshrl.u32 %v12465_v56, 16  ;;  %v12463_v61 = vpack.c.bf16 %v644_v58, %v644_v58  ;;  %v1024_v62 = vshrl.u32 %v12481_v57, 16  ;;  %v891_v63 = vshll.u32 %v12465_v56, 16 }
  0xee   : > { %v12901_v0 = vpop.f32.mrf.mxu0  ;;  %v1027_v1 = vshll.u32 %v12481_v57, 16  ;;  %v14359_v2 = vpack.c.bf16 %v708_v59, %v708_v59  ;;  %v12917_v7 = vpop.f32.mrf.mxu1 }
  0xef   : > { %v890_v3 = vrot.slane %v888_v60, 7  ;;  %v871_v4 = vshrl.u32 %v12463_v61, 16  ;;  %v874_v5 = vshll.u32 %v12463_v61, 16  ;;  %v12466_v6 = vpack.c.bf16 %v12901_v0, %v12901_v0  ;;  %v1217_v61 = vld [vmem:[#allocation2 + $0x30] sm:$0xf] }
  0xf0   : > { %v647_v10 = vpop.f32.mrf.mxu0  ;;  %v14367_v11 = vrot.slane %v1024_v62, 7  ;;  %v1007_v12 = vshrl.u32 %v14359_v2, 16  ;;  %v1010_v13 = vshll.u32 %v14359_v2, 16  ;;  %v14371_v14 = vpack.c.bf16 %v12917_v7, %v12917_v7 }
  0xf1   : > { %v893_v15 = vor.u32 %v891_v63, %v890_v3  ;;  %v894_v16 = vrot.slane %v890_v3, 4  ;;  %v873_v17 = vrot.slane %v871_v4, 7  ;;  %v896_v18 = vshrl.u32 %v12466_v6, 16 }
  0xf2   : > { %v899_v21 = vshll.u32 %v12466_v6, 16  ;;  %v12464_v22 = vpack.c.bf16 %v647_v10, %v647_v10  ;;  %v12904_v24 = vpop.f32.mrf.mxu0  ;;  %v1029_v25 = vor.u32 %v1027_v1, %v14367_v11  ;;  %v1030_v26 = vrot.slane %v14367_v11, 4  ;;  %v1210_v6 = vld [vmem:[#allocation2 + $0x24] sm:$0xf] }
  0xf3   : > { %v1204_v27 = vsel %vm14363_vm12, %v893_v15, %v1203_v9  ;;  %v876_v28 = vor.u32 %v874_v5, %v873_v17  ;;  %v877_v29 = vrot.slane %v873_v17, 4  ;;  %v898_v31 = vrot.slane %v896_v18, 7  ;;  %v1252_v9 = vld [vmem:[#allocation2 + $0x6c] sm:$0xf] }
  0xf4   : > { %1205 = vst [vmem:[#allocation2 + $0x18] sm:$0xf] %v1204_v27  ;;  %v879_v34 = vshrl.u32 %v12464_v22, 16  ;;  %v882_v35 = vshll.u32 %v12464_v22, 16  ;;  %v12469_v36 = vpack.c.bf16 %v12904_v24, %v12904_v24  ;;  %v660_v37 = vpop.f32.mrf.mxu0  ;;  %v1260_v38 = vsel %vm14363_vm12, %v1029_v25, %v1259_v19  ;;  %v1221_v27 = vld [vmem:[#allocation2 + $0x38] sm:$0x1] }
  0xf5   : > { %v1195_v39 = vsel %vm14363_vm12, %v876_v28, %v1194_v20  ;;  %v901_v40 = vor.u32 %v899_v21, %v898_v31  ;;  %v903_v41 = vrot.slane %v898_v31, 4  ;;  %v12467_v42 = vpack.c.bf16 %v660_v37, %v660_v37  ;;  %1261 = vst [vmem:[#allocation2 + $0x78] sm:$0xf] %v1260_v38  ;;  %v1214_v37 = vld [vmem:[#allocation2 + $0x2c] sm:$0x1] }
  0xf6   : > { %1196 = vst [vmem:[#allocation2 + $0xc] sm:$0xf] %v1195_v39  ;;  %v881_v43 = vrot.slane %v879_v34, 7  ;;  %v922_v44 = vshrl.u32 %v12469_v36, 16  ;;  %v925_v45 = vshll.u32 %v12469_v36, 16  ;;  %v12905_v46 = vpop.f32.mrf.mxu0  ;;  %v14393_v48 = vrot.slane %v1007_v12, 7 }
  0xf7   : > { %v902_v49 = vsel %vm14379_vm13, %v894_v16, %v901_v40  ;;  %v1208_v50 = vsel %vm14385_vm14, %v903_v41, %v1207_v33  ;;  %v905_v54 = vshrl.u32 %v12467_v42, 16  ;;  %v908_v55 = vshll.u32 %v12467_v42, 16 }
  0xf8   : > { %1206 = vst.msk [vmem:[#allocation2 + $0x1c] sm:$0xf] %vm305_vm1, %v902_v49  ;;  %1209 = vst [vmem:[#allocation2 + $0x20] sm:$0x1] %v1208_v50  ;;  %v884_v56 = vor.u32 %v882_v35, %v881_v43  ;;  %v886_v57 = vrot.slane %v881_v43, 4  ;;  %v924_v58 = vrot.slane %v922_v44, 7  ;;  %v12470_v59 = vpack.c.bf16 %v12905_v46, %v12905_v46  ;;  %v663_v60 = vpop.f32.mrf.mxu0 }
  0xf9   : > { %v907_v62 = vrot.slane %v905_v54, 7  ;;  %v12468_v63 = vpack.c.bf16 %v663_v60, %v663_v60  ;;  %v1012_v0 = vor.u32 %v1010_v13, %v14393_v48  ;;  %v1013_v1 = vrot.slane %v14393_v48, 4  ;;  %v1231_v49 = vld [vmem:[#allocation2 + $0x48] sm:$0xf]  ;;  %v711_v60 = vpop.f32.mrf.mxu1  ;;  %v13716_v48 = vld [vmem:[%s19502_s2 + $0x60] sm:$0xff]  }
  0xfa   : > { %v885_v2 = vsel %vm14379_vm13, %v877_v29, %v884_v56  ;;  %v1201_v3 = vsel %vm14385_vm14, %v886_v57, %v1200_v51  ;;  %v927_v4 = vor.u32 %v925_v45, %v924_v58  ;;  %v928_v5 = vrot.slane %v924_v58, 4  ;;  %v12908_v7 = vpop.f32.mrf.mxu0  ;;  %v1224_v58 = vld [vmem:[#allocation2 + $0x3c] sm:$0xf] }
  0xfb   : > { %1197 = vst.msk [vmem:[#allocation2 + $0x10] sm:$0xf] %vm305_vm1, %v885_v2  ;;  %1202 = vst [vmem:[#allocation2 + $0x14] sm:$0x1] %v1201_v3  ;;  %v910_v10 = vor.u32 %v908_v55, %v907_v62  ;;  %v911_v12 = vrot.slane %v907_v62, 4  ;;  %v930_v15 = vshrl.u32 %v12470_v59, 16  ;;  %v12473_v19 = vpack.c.bf16 %v12908_v7, %v12908_v7 }
  0xfc   : > { %v933_v13 = vshll.u32 %v12470_v59, 16  ;;  %v1218_v16 = vsel %vm14363_vm12, %v927_v4, %v1217_v61  ;;  %v913_v17 = vshrl.u32 %v12468_v63, 16  ;;  %v916_v18 = vshll.u32 %v12468_v63, 16  ;;  %v676_v20 = vpop.f32.mrf.mxu0 }
  0xfd   : > { %1219 = vst [vmem:[#allocation2 + $0x30] sm:$0xf] %v1218_v16  ;;  %v1211_v21 = vsel %vm14363_vm12, %v910_v10, %v1210_v6  ;;  %v932_v22 = vrot.slane %v930_v15, 7  ;;  %v12471_v24 = vpack.c.bf16 %v676_v20, %v676_v20  ;;  %v1253_v25 = vsel %vm14363_vm12, %v1012_v0, %v1252_v9  ;;  %v1235_v10 = vld [vmem:[#allocation2 + $0x50] sm:$0x1]  ;;  %v14429_v20 = vpop.f32.mrf.mxu1 }
  0xfe   : > { %1212 = vst [vmem:[#allocation2 + $0x24] sm:$0xf] %v1211_v21  ;;  %v915_v28 = vrot.slane %v913_v17, 7  ;;  %v956_v29 = vshrl.u32 %v12473_v19, 16  ;;  %v959_v31 = vshll.u32 %v12473_v19, 16  ;;  %v12909_v33 = vpop.f32.mrf.mxu0  ;;  %v1032_v34 = vshrl.u32 %v14371_v14, 16 }
  0xff   : > { %1254 = vst [vmem:[#allocation2 + $0x6c] sm:$0xf] %v1253_v25  ;;  %v935_v35 = vor.u32 %v933_v13, %v932_v22  ;;  %v937_v36 = vrot.slane %v932_v22, 4  ;;  %v939_v38 = vshrl.u32 %v12471_v24, 16  ;;  %v942_v39 = vshll.u32 %v12471_v24, 16 }
 0x100   : > { %v918_v40 = vor.u32 %v916_v18, %v915_v28  ;;  %v920_v41 = vrot.slane %v915_v28, 4  ;;  %v958_v42 = vrot.slane %v956_v29, 7  ;;  %v12474_v43 = vpack.c.bf16 %v12909_v33, %v12909_v33  ;;  %v679_v44 = vpop.f32.mrf.mxu0  ;;  %v1263_v18 = vld [vmem:[#allocation2 + $0x80] sm:$0x1]  ;;  %v1228_v24 = vld [vmem:[#allocation2 + $0x44] sm:$0x1] }
 0x101   : > { %v936_v45 = vsel %vm14379_vm13, %v928_v5, %v935_v35  ;;  %v1222_v46 = vsel %vm14385_vm14, %v937_v36, %v1221_v27  ;;  %v941_v50 = vrot.slane %v939_v38, 7  ;;  %v12472_v51 = vpack.c.bf16 %v679_v44, %v679_v44  ;;  %v1245_v36 = vld [vmem:[#allocation2 + $0x60] sm:$0xf] }
 0x102   : > { %1220 = vst.msk [vmem:[#allocation2 + $0x34] sm:$0xf] %vm305_vm1, %v936_v45  ;;  %1223 = vst [vmem:[#allocation2 + $0x38] sm:$0x1] %v1222_v46  ;;  %v919_v54 = vsel %vm14379_vm13, %v911_v12, %v918_v40  ;;  %v1215_v55 = vsel %vm14385_vm14, %v920_v41, %v1214_v37  ;;  %v961_v56 = vor.u32 %v959_v31, %v958_v42  ;;  %v962_v57 = vrot.slane %v958_v42, 4  ;;  %v12912_v59 = vpop.f32.mrf.mxu0  ;;  %v724_v45 = vpop.f32.mrf.mxu1 }
 0x103   : > { %1213 = vst.msk [vmem:[#allocation2 + $0x28] sm:$0xf] %vm305_vm1, %v919_v54  ;;  %1216 = vst [vmem:[#allocation2 + $0x2c] sm:$0x1] %v1215_v55  ;;  %v944_v61 = vor.u32 %v942_v39, %v941_v50  ;;  %v945_v62 = vrot.slane %v941_v50, 4  ;;  %v964_v63 = vshrl.u32 %v12474_v43, 16  ;;  %v12477_v5 = vpack.c.bf16 %v12912_v59, %v12912_v59 }
 0x104   : > { %v967_v0 = vshll.u32 %v12474_v43, 16  ;;  %v1232_v2 = vsel %vm14363_vm12, %v961_v56, %v1231_v49  ;;  %v947_v3 = vshrl.u32 %v12472_v51, 16  ;;  %v950_v4 = vshll.u32 %v12472_v51, 16  ;;  %v692_v6 = vpop.f32.mrf.mxu0  ;;  %v14443_v39 = vld [vmem:[#allocation2 + $0x10] sm:$0xf] }
 0x105   : > { %1233 = vst [vmem:[#allocation2 + $0x48] sm:$0xf] %v1232_v2  ;;  %v1225_v7 = vsel %vm14363_vm12, %v944_v61, %v1224_v58  ;;  %v966_v9 = vrot.slane %v964_v63, 7  ;;  %v1034_v12 = vrot.slane %v1032_v34, 7  ;;  %v1035_v15 = vshll.u32 %v14371_v14, 16  ;;  %v13711_v54 = vld [vmem:[%s19502_s2 + $0x70] sm:$0xff]  }
 0x106   : > { %1226 = vst [vmem:[#allocation2 + $0x3c] sm:$0xf] %v1225_v7  ;;  %v949_v13 = vrot.slane %v947_v3, 7  ;;  %v990_v16 = vshrl.u32 %v12477_v5, 16  ;;  %v993_v17 = vshll.u32 %v12477_v5, 16  ;;  %v12475_v19 = vpack.c.bf16 %v692_v6, %v692_v6  ;;  %v12913_v44 = vpop.f32.mrf.mxu0  ;;  %v12921_v6 = vpop.f32.mrf.mxu1 }
 0x107   : > { %v969_v21 = vor.u32 %v967_v0, %v966_v9  ;;  %v971_v22 = vrot.slane %v966_v9, 4  ;;  %v1037_v25 = vor.u32 %v1035_v15, %v1034_v12  ;;  %v1039_v27 = vrot.slane %v1034_v12, 4  ;;  %v1310_v34 = vld [vmem:[#allocation2 + $0xc] sm:$0xf]  ;;  %v1312_v43 = vld [vmem:[#allocation2 + $0x18] sm:$0xf] }
 0x108   : > { %v952_v28 = vor.u32 %v950_v4, %v949_v13  ;;  %v954_v29 = vrot.slane %v949_v13, 4  ;;  %v14431_v31 = vrot.slane %v990_v16, 7  ;;  %v973_v33 = vshrl.u32 %v12475_v19, 16  ;;  %v14463_v59 = vld [vmem:[#allocation2 + $0x1c] sm:$0xf]  ;;  %v695_v5 = vpop.f32.mrf.mxu0 }
 0x109   : > { %v970_v14 = vsel %vm14379_vm13, %v962_v57, %v969_v21  ;;  %v1236_v35 = vsel %vm14385_vm14, %v971_v22, %v1235_v10  ;;  %v1038_v37 = vsel %vm14379_vm13, %v1030_v26, %v1037_v25  ;;  %v1264_v38 = vsel %vm14385_vm14, %v1039_v27, %v1263_v18  ;;  %v1238_v26 = vld [vmem:[#allocation2 + $0x54] sm:$0xf] }
 0x10a   : > { %1234 = vst.msk [vmem:[#allocation2 + $0x4c] sm:$0xf] %vm305_vm1, %v970_v14  ;;  %1237 = vst [vmem:[#allocation2 + $0x50] sm:$0x1] %v1236_v35  ;;  %v953_v40 = vsel %vm14379_vm13, %v945_v62, %v952_v28  ;;  %v1229_v41 = vsel %vm14385_vm14, %v954_v29, %v1228_v24  ;;  %v995_v42 = vor.u32 %v993_v17, %v14431_v31  ;;  %v996_v11 = vrot.slane %v14431_v31, 4 }
 0x10b   : > { %1262 = vst.msk [vmem:[#allocation2 + $0x7c] sm:$0xf] %vm305_vm1, %v1038_v37  ;;  %1265 = vst [vmem:[#allocation2 + $0x80] sm:$0x1] %v1264_v38  ;;  %v14454_v46 = vrot.slane %v973_v33, 7  ;;  %v976_v49 = vshll.u32 %v12475_v19, 16  ;;  %v12480_v50 = vpack.c.bf16 %v711_v60, %v711_v60  ;;  %v11732_v58 = vcombine.low %v1310_v34, %v14443_v39  ;;  %v727_v33 = vpop.f32.mrf.mxu1 }
 0x10c   : > { %1227 = vst.msk [vmem:[#allocation2 + $0x40] sm:$0xf] %vm305_vm1, %v953_v40  ;;  %1230 = vst [vmem:[#allocation2 + $0x44] sm:$0x1] %v1229_v41  ;;  %v1392_v51 = vshrl.u32 %v1310_v34, 16  ;;  %v1246_v55 = vsel %vm14363_vm12, %v995_v42, %v1245_v36  ;;  %v1395_v56 = vshll.u32 %v1310_v34, 16  ;;  %v11733_v12 = vcombine.low %v1312_v43, %v14463_v59 }
 0x10d   : > { %v1405_v57 = vshrl.u32 %v14443_v39, 16  ;;  %1247 = vst [vmem:[#allocation2 + $0x60] sm:$0xf] %v1246_v55  ;;  %v978_v61 = vor.u32 %v976_v49, %v14454_v46  ;;  %v979_v60 = vrot.slane %v14454_v46, 4  ;;  %v1015_v62 = vshrl.u32 %v12480_v50, 16  ;;  %12979 = vmatmul.mubr.msk.bf16.vlgmr.msra.gmra.mxu0 %vm561_vm0, %v11732_v58  ;;  %v13714_v19 = vld [vmem:[%s19502_s2 + $0x68] sm:$0xff]  }
 0x10e   : > { %v1018_v63 = vshll.u32 %v12480_v50, 16  ;;  %v14467_v0 = vrot.slane %v1392_v51, 4  ;;  %v14469_v2 = vrot.slane %v1395_v56, 5  ;;  %v1416_v3 = vshrl.u32 %v1312_v43, 16  ;;  %13051 = vmatpush3.bf16.msra.mxu0 %v14356_v53  ;;  %v1256_v15 = vld [vmem:[#allocation2 + $0x74] sm:$0x1]  ;;  %12982 = vmatprep.mubr.msk.bf16.mxu0 %vm561_vm0, %v11733_v12 }
 0x10f   : > { %v1419_v4 = vshll.u32 %v1312_v43, 16  ;;  %v1239_v7 = vsel %vm14363_vm12, %v978_v61, %v1238_v26  ;;  %v1017_v9 = vrot.slane %v1015_v62, 7  ;;  %v1429_v10 = vshrl.u32 %v14463_v59, 16  ;;  %13052 = vmatprep.subr.bf16.mxu0 %v13711_v54  ;;  %v14487_v34 = vld [vmem:[#allocation2 + $0x24] sm:$0xf] }
 0x110   : > { %1240 = vst [vmem:[#allocation2 + $0x54] sm:$0xf] %v1239_v7  ;;  %v14477_v13 = vrot.slane %v1416_v3, 4  ;;  %v12478_v17 = vpack.c.bf16 %v12913_v44, %v12913_v44  ;;  %v12485_v18 = vpack.c.bf16 %v14429_v20, %v14429_v20  ;;  %v12476_v53 = vpack.c.bf16 %v695_v5, %v695_v5  ;;  %v1249_v35 = vld [vmem:[#allocation2 + $0x68] sm:$0x1] }
 0x111   : > { %v14479_v16 = vrot.slane %v1419_v4, 5  ;;  %v1020_v21 = vor.u32 %v1018_v63, %v1017_v9  ;;  %v1022_v22 = vrot.slane %v1017_v9, 4  ;;  %v12483_v24 = vpack.c.bf16 %v724_v45, %v724_v45  ;;  %v1273_v36 = vld [vmem:[#allocation2 + $0x90] sm:$0xf]  ;;  %v1242_v43 = vld [vmem:[#allocation2 + $0x5c] sm:$0x1]  ;;  %v14506_v4 = vpop.f32.mrf.mxu1 }
 0x112   : > { %v998_v25 = vshrl.u32 %v12478_v17, 16  ;;  %v1001_v27 = vshll.u32 %v12478_v17, 16  ;;  %v1058_v28 = vshrl.u32 %v12485_v18, 16  ;;  %v1061_v29 = vshll.u32 %v12485_v18, 16  ;;  %13053 = vmatpush3.bf16.msra.mxu0 %v13711_v54  ;;  %v1266_v56 = vld [vmem:[#allocation2 + $0x84] sm:$0xf] }
 0x113   : > { %v1021_v20 = vsel %vm14379_vm13, %v1013_v1, %v1020_v21  ;;  %v1257_v14 = vsel %vm14385_vm14, %v1022_v22, %v1256_v15  ;;  %v981_v37 = vshrl.u32 %v12476_v53, 16  ;;  %v984_v38 = vshll.u32 %v12476_v53, 16  ;;  %13054 = vmatprep.subr.bf16.mxu0 %v13714_v19  ;;  %v14504_v3 = vld [vmem:[#allocation2 + $0x28] sm:$0xf]  ;;  %v14526_v22 = vld [vmem:[#allocation2 + $0x14] sm:$0x1] }
 0x114   : > { %1255 = vst.msk [vmem:[#allocation2 + $0x70] sm:$0xf] %vm305_vm1, %v1021_v20  ;;  %1258 = vst [vmem:[#allocation2 + $0x74] sm:$0x1] %v1257_v14  ;;  %v1000_v40 = vrot.slane %v998_v25, 7  ;;  %v14496_v41 = vrot.slane %v1058_v28, 7  ;;  %v12486_v44 = vpack.c.bf16 %v12921_v6, %v12921_v6  ;;  %v12484_v45 = vpack.c.bf16 %v727_v33, %v727_v33  ;;  %v740_v28 = vpop.f32.mrf.mxu1 }
 0x115   : > { %v1041_v42 = vshrl.u32 %v12483_v24, 16  ;;  %v1044_v26 = vshll.u32 %v12483_v24, 16  ;;  %v983_v1 = vrot.slane %v981_v37, 7  ;;  %v1440_v49 = vshrl.u32 %v14487_v34, 16  ;;  %v1277_v53 = vld [vmem:[#allocation2 + $0x98] sm:$0x1] }
 0x116   : > { %v1003_v50 = vor.u32 %v1001_v27, %v1000_v40  ;;  %v1005_v51 = vrot.slane %v1000_v40, 4  ;;  %v1063_v54 = vor.u32 %v1061_v29, %v14496_v41  ;;  %v1064_v55 = vrot.slane %v14496_v41, 4  ;;  %13055 = vmatpush3.bf16.msra.mxu0 %v13714_v19  ;;  %v14543_v40 = vld [vmem:[#allocation2 + $0x34] sm:$0xf]  ;;  %v14697_v32 = vld [vmem:[#allocation2 + $0x50] sm:$0x1] }
 0x117   : > { %v986_v58 = vor.u32 %v984_v38, %v983_v1  ;;  %v988_v61 = vrot.slane %v983_v1, 4  ;;  %v1043_v62 = vrot.slane %v1041_v42, 7  ;;  %v1066_v63 = vshrl.u32 %v12486_v44, 16  ;;  %13056 = vmatprep.subr.bf16.mxu0 %v13716_v48 }
 0x118   : > { %v1004_v5 = vsel %vm14379_vm13, %v996_v11, %v1003_v50  ;;  %v1250_v6 = vsel %vm14385_vm14, %v1005_v51, %v1249_v35  ;;  %v1274_v7 = vsel %vm14363_vm12, %v1063_v54, %v1273_v36  ;;  %v1069_v9 = vshll.u32 %v12486_v44, 16  ;;  %v1316_v35 = vld [vmem:[#allocation2 + $0x30] sm:$0xf]  ;;  %v14560_v51 = vld [vmem:[#allocation2 + $0x20] sm:$0x1] }
 0x119   : > { %1248 = vst.msk [vmem:[#allocation2 + $0x64] sm:$0xf] %vm305_vm1, %v1004_v5  ;;  %1251 = vst [vmem:[#allocation2 + $0x68] sm:$0x1] %v1250_v6  ;;  %v987_v31 = vsel %vm14379_vm13, %v979_v60, %v986_v58  ;;  %v1243_v11 = vsel %vm14385_vm14, %v988_v61, %v1242_v43  ;;  %v1046_v12 = vor.u32 %v1044_v26, %v1043_v62  ;;  %v1047_v15 = vrot.slane %v1043_v62, 4  ;;  %v14553_v43 = vld [vmem:[%s19502_s2 + $0xb8] sm:$0xff]  }
 0x11a   : > { %1275 = vst [vmem:[#allocation2 + $0x90] sm:$0xf] %v1274_v7  ;;  %1241 = vst.msk [vmem:[#allocation2 + $0x58] sm:$0xf] %vm305_vm1, %v987_v31  ;;  %v1068_v17 = vrot.slane %v1066_v63, 7  ;;  %v1049_v18 = vshrl.u32 %v12484_v45, 16  ;;  %v11734_v27 = vcombine.low %v14487_v34, %v14504_v3  ;;  %13057 = vmatpush3.bf16.msra.mxu0 %v13716_v48  ;;  %v1398_v14 = vor.u32 %v14469_v2, %v14467_v0 }
 0x11b   : > { %1244 = vst [vmem:[#allocation2 + $0x5c] sm:$0x1] %v1243_v11  ;;  %v1052_v19 = vshll.u32 %v12484_v45, 16  ;;  %v14524_v21 = vrot.slane %v1440_v49, 4  ;;  %v1267_v46 = vsel %vm14363_vm12, %v1046_v12, %v1266_v56  ;;  %v1270_v60 = vld [vmem:[#allocation2 + $0x8c] sm:$0x1]  ;;  %v11735_v58 = vcombine.low %v1316_v35, %v14543_v40  ;;  %13130 = vmatprep.subr.bf16.mxu0 %v14553_v43 }
 0x11c   : > { %v1443_v24 = vshll.u32 %v14487_v34, 16  ;;  %v1453_v25 = vshrl.u32 %v14504_v3, 16  ;;  %1268 = vst [vmem:[#allocation2 + $0x84] sm:$0xf] %v1267_v46  ;;  %v1071_v29 = vor.u32 %v1069_v9, %v1068_v17  ;;  %v1073_v33 = vrot.slane %v1068_v17, 4  ;;  %12983 = vmatmul.mubr.msk.bf16.gmra.mxu0 %vm561_vm0, %v11734_v27  ;;  %v13701_v27 = vld [vmem:[%s19502_s2 + $0x50] sm:$0xff]  }
 0x11d   : > { %v1051_v20 = vrot.slane %v1049_v18, 7  ;;  %v1401_v37 = vshll.u32 %v14443_v39, 16  ;;  %v1407_v38 = vrot.slane %v1405_v57, 4  ;;  %v1411_v34 = vshll.u32 %v14526_v22, 16  ;;  %v12925_v57 = vpop.f32.mrf.mxu1  ;;  %12986 = vmatprep.mubr.msk.bf16.mxu0 %vm561_vm0, %v11735_v58  ;;  %v1318_v12 = vld [vmem:[#allocation2 + $0x3c] sm:$0xf] }
 0x11e   : > { %v14536_v36 = vrot.slane %v1443_v24, 5  ;;  %v1072_v41 = vsel %vm14379_vm13, %v1064_v55, %v1071_v29  ;;  %v1278_v0 = vsel %vm14385_vm14, %v1073_v33, %v1277_v53  ;;  %v1399_v26 = vrot.slane %v1398_v14, 4  ;;  %v1287_v24 = vld [vmem:[#allocation2 + $0xa8] sm:$0xf]  ;;  %v14604_v58 = vld [vmem:[#allocation2 + $0x2c] sm:$0x1] }
 0x11f   : > { %v1054_v2 = vor.u32 %v1052_v19, %v1051_v20  ;;  %v1056_v42 = vrot.slane %v1051_v20, 4  ;;  %1276 = vst.msk [vmem:[#allocation2 + $0x94] sm:$0xf] %vm305_vm1, %v1072_v41  ;;  %1279 = vst [vmem:[#allocation2 + $0x98] sm:$0x1] %v1278_v0  ;;  %v1403_v48 = vrot.slane %v1401_v37, 5  ;;  %v12489_v62 = vpack.c.bf16 %v14506_v4, %v14506_v4  ;;  %v743_v11 = vpop.f32.mrf.mxu1 }
 0x120   : > { %v1413_v1 = vrot.slane %v1411_v34, 5  ;;  %v1464_v39 = vshrl.u32 %v1316_v35, 16  ;;  %v1467_v49 = vshll.u32 %v1316_v35, 16  ;;  %v1477_v50 = vshrl.u32 %v14543_v40, 16  ;;  %v1280_v34 = vld [vmem:[#allocation2 + $0x9c] sm:$0xf] }
 0x121   : > { %v1055_v44 = vsel %vm14379_vm13, %v1047_v15, %v1054_v2  ;;  %v1271_v45 = vsel %vm14385_vm14, %v1056_v42, %v1270_v60  ;;  %v1404_v54 = vsel %vm14338_vm9, %v1399_v26, %v1403_v48  ;;  %v1408_v55 = vor.u32 %v1407_v38, %v1403_v48  ;;  %v14587_v14 = vpop.f32.mrf.mxu1  ;;  %v14591_v48 = vld [vmem:[#allocation2 + $0x40] sm:$0xf]  ;;  %v4888_v30 = vld [vmem:[#allocation2 + $0x90] sm:$0xf] }
 0x122   : > { %1269 = vst.msk [vmem:[#allocation2 + $0x88] sm:$0xf] %vm305_vm1, %v1055_v44  ;;  %1272 = vst [vmem:[#allocation2 + $0x8c] sm:$0x1] %v1271_v45  ;;  %v14565_v56 = vrot.slane %v1464_v39, 4  ;;  %v14569_v61 = vrot.slane %v1467_v49, 5  ;;  %v1422_v63 = vor.u32 %v14479_v16, %v14477_v13  ;;  %v12487_v31 = vpack.c.bf16 %v740_v28, %v740_v28 }
 0x123   : > { %v1425_v5 = vshll.u32 %v14463_v59, 16  ;;  %v1409_v6 = vrot.slane %v1408_v55, 4  ;;  %v1431_v7 = vrot.slane %v1429_v10, 4  ;;  %v1435_v9 = vshll.u32 %v14560_v51, 16  ;;  %v13706_v45 = vld [vmem:[%s19502_s2 + $0x48] sm:$0xff]  }
 0x124   : > { %v1092_v15 = vshrl.u32 %v12489_v62, 16  ;;  %v1095_v17 = vshll.u32 %v12489_v62, 16  ;;  %v1423_v18 = vrot.slane %v1422_v63, 4  ;;  %v1075_v19 = vshrl.u32 %v12487_v31, 16  ;;  %v756_v62 = vpop.f32.mrf.mxu1  ;;  %v1291_v63 = vld [vmem:[#allocation2 + $0xb0] sm:$0x1] }
 0x125   : > { %v1427_v4 = vrot.slane %v1425_v5, 5  ;;  %v1414_v13 = vsel %vm14338_vm9, %v1409_v6, %v1413_v1  ;;  %v1437_v16 = vrot.slane %v1435_v9, 5  ;;  %v1078_v46 = vshll.u32 %v12487_v31, 16 }
 0x126   : > { %v11696_v53 = vcombine.low %v1404_v54, %v1414_v13  ;;  %v1094_v60 = vrot.slane %v1092_v15, 7  ;;  %v1077_v28 = vrot.slane %v1075_v19, 7  ;;  %v12490_v29 = vpack.c.bf16 %v12925_v57, %v12925_v57  ;;  %v1284_v15 = vld [vmem:[#allocation2 + $0xa4] sm:$0x1] }
 0x127   : > { %v1428_v59 = vsel %vm14338_vm9, %v1423_v18, %v1427_v4  ;;  %v1432_v10 = vor.u32 %v1431_v7, %v1427_v4  ;;  %v12488_v33 = vpack.c.bf16 %v743_v11, %v743_v11  ;;  %v1488_v20 = vshrl.u32 %v1318_v12, 16  ;;  %v1320_v4 = vld [vmem:[#allocation2 + $0x48] sm:$0xf] }
 0x128   : > { %12939 = vmatmul.mubr.msk.bf16.vlgmr.msra.gmra.mxu1 %vm561_vm0, %v11696_v53  ;;  %v1097_v35 = vor.u32 %v1095_v17, %v1094_v60  ;;  %v1098_v37 = vrot.slane %v1094_v60, 4  ;;  %v1491_v41 = vshll.u32 %v1318_v12, 16  ;;  %v1080_v0 = vor.u32 %v1078_v46, %v1077_v28  ;;  %v14618_v46 = vld [vmem:[#allocation2 + $0x4c] sm:$0xf] }
 0x129   : > { %v1433_v38 = vrot.slane %v1432_v10, 4  ;;  %13011 = vmatpush3.bf16.msra.mxu1 %v14350_v52  ;;  %v1081_v2 = vrot.slane %v1077_v28, 4  ;;  %v1100_v42 = vshrl.u32 %v12490_v29, 16  ;;  %v1103_v26 = vshll.u32 %v12490_v29, 16 }
 0x12a   : > { %v1288_v1 = vsel %vm14363_vm12, %v1097_v35, %v1287_v24  ;;  %v1083_v57 = vshrl.u32 %v12488_v33, 16  ;;  %v1086_v44 = vshll.u32 %v12488_v33, 16  ;;  %13012 = vmatprep.subr.bf16.mxu1 %v13701_v27  ;;  %v1281_v49 = vsel %vm14363_vm12, %v1080_v0, %v1280_v34  ;;  %v14636_v35 = vld [vmem:[#allocation2 + $0x38] sm:$0x1] }
 0x12b   : > { %v1438_v39 = vsel %vm14338_vm9, %v1433_v38, %v1437_v16  ;;  %1289 = vst [vmem:[#allocation2 + $0xa8] sm:$0xf] %v1288_v1  ;;  %v1102_v54 = vrot.slane %v1100_v42, 7  ;;  %v14602_v55 = vrot.slane %v1488_v20, 4  ;;  %1282 = vst [vmem:[#allocation2 + $0x9c] sm:$0xf] %v1281_v49  ;;  %v11736_v9 = vcombine.low %v1318_v12, %v14591_v48 }
 0x12c   : > { %v11697_v52 = vcombine.low %v1428_v59, %v1438_v39  ;;  %v1085_v5 = vrot.slane %v1083_v57, 7  ;;  %v14606_v6 = vrot.slane %v1491_v41, 5  ;;  %v1501_v7 = vshrl.u32 %v14591_v48, 16  ;;  %v12929_v59 = vpop.f32.mrf.mxu1  ;;  %v14648_v0 = vld [vmem:[%s19502_s2 + $0x98] sm:$0xff]  }
 0x12d   : > { %v1105_v31 = vor.u32 %v1103_v26, %v1102_v54  ;;  %v1107_v11 = vrot.slane %v1102_v54, 4  ;;  %v1446_v17 = vor.u32 %v14536_v36, %v14524_v21  ;;  %v1449_v18 = vshll.u32 %v14504_v3, 16  ;;  %13013 = vmatpush3.bf16.msra.mxu1 %v13701_v27  ;;  %12987 = vmatmul.mubr.msk.bf16.gmra.mxu0 %vm561_vm0, %v11736_v9  ;;  %v13713_v21 = vld [vmem:[%s19502_s2 + $0x40] sm:$0xff]  }
 0x12e   : > { %12942 = vmatprep.mubr.msk.bf16.mxu1 %vm561_vm0, %v11697_v52  ;;  %v1088_v13 = vor.u32 %v1086_v44, %v1085_v5  ;;  %v1090_v16 = vrot.slane %v1085_v5, 4  ;;  %v1455_v19 = vrot.slane %v1453_v25, 4  ;;  %v1459_v12 = vshll.u32 %v14604_v58, 16  ;;  %13014 = vmatprep.subr.bf16.mxu1 %v13706_v45  ;;  %v759_v39 = vpop.f32.mrf.mxu1 }
 0x12f   : > { %v1106_v36 = vsel %vm14379_vm13, %v1098_v37, %v1105_v31  ;;  %v1292_v53 = vsel %vm14385_vm14, %v1107_v11, %v1291_v63  ;;  %v1447_v60 = vrot.slane %v1446_v17, 4  ;;  %v1451_v24 = vrot.slane %v1449_v18, 5  ;;  %v1322_v18 = vld [vmem:[#allocation2 + $0x54] sm:$0xf] }
 0x130   : > { %1290 = vst.msk [vmem:[#allocation2 + $0xac] sm:$0xf] %vm305_vm1, %v1106_v36  ;;  %1293 = vst [vmem:[#allocation2 + $0xb0] sm:$0x1] %v1292_v53  ;;  %v1089_v3 = vsel %vm14379_vm13, %v1081_v2, %v1088_v13  ;;  %v1285_v25 = vsel %vm14385_vm14, %v1090_v16, %v1284_v15  ;;  %v1461_v10 = vrot.slane %v1459_v12, 5  ;;  %v1512_v27 = vshrl.u32 %v1320_v4, 16 }
 0x131   : > { %1283 = vst.msk [vmem:[#allocation2 + $0xa0] sm:$0xf] %vm305_vm1, %v1089_v3  ;;  %1286 = vst [vmem:[#allocation2 + $0xa4] sm:$0x1] %v1285_v25  ;;  %v1452_v28 = vsel %vm14338_vm9, %v1447_v60, %v1451_v24  ;;  %v1456_v29 = vor.u32 %v1455_v19, %v1451_v24  ;;  %v1515_v33 = vshll.u32 %v1320_v4, 16  ;;  %v1525_v20 = vshrl.u32 %v14618_v46, 16  ;;  %13015 = vmatpush3.bf16.msra.mxu1 %v13706_v45 }
 0x132   : > { %v14638_v37 = vrot.slane %v1512_v27, 4  ;;  %v11737_v38 = vcombine.low %v1320_v4, %v14618_v46  ;;  %v12493_v34 = vpack.c.bf16 %v14587_v14, %v14587_v14  ;;  %v1470_v41 = vor.u32 %v14569_v61, %v14565_v56  ;;  %13016 = vmatprep.subr.bf16.mxu1 %v13713_v21  ;;  %v1294_v13 = vld [vmem:[#allocation2 + $0xb4] sm:$0xf]  ;;  %v1305_v36 = vld [vmem:[#allocation2 + $0xc8] sm:$0x1] }
 0x133   : > { %v1457_v2 = vrot.slane %v1456_v29, 4  ;;  %v14650_v42 = vrot.slane %v1515_v33, 5  ;;  %v1473_v26 = vshll.u32 %v14543_v40, 16  ;;  %v1479_v1 = vrot.slane %v1477_v50, 4  ;;  %v1301_v50 = vld [vmem:[#allocation2 + $0xc0] sm:$0xf] }
 0x134   : > { %12990 = vmatprep.mubr.msk.bf16.mxu0 %vm561_vm0, %v11737_v38  ;;  %v1126_v14 = vshrl.u32 %v12493_v34, 16  ;;  %v1129_v57 = vshll.u32 %v12493_v34, 16  ;;  %v1471_v56 = vrot.slane %v1470_v41, 4  ;;  %v1483_v61 = vshll.u32 %v14636_v35, 16  ;;  %v14667_v33 = vld [vmem:[#allocation2 + $0x58] sm:$0xf] }
 0x135   : > { %v1462_v44 = vsel %vm14338_vm9, %v1457_v2, %v1461_v10  ;;  %v1475_v45 = vrot.slane %v1473_v26, 5  ;;  %v12491_v52 = vpack.c.bf16 %v756_v62, %v756_v62  ;;  %v12494_v49 = vpack.c.bf16 %v12929_v59, %v12929_v59  ;;  %13017 = vmatpush3.bf16.msra.mxu1 %v13713_v21  ;;  %v1298_v2 = vld [vmem:[#allocation2 + $0xbc] sm:$0x1] }
 0x136   : > { %v11698_v54 = vcombine.low %v1452_v28, %v1462_v44  ;;  %v1128_v63 = vrot.slane %v1126_v14, 7  ;;  %v1485_v5 = vrot.slane %v1483_v61, 5  ;;  %v12492_v9 = vpack.c.bf16 %v759_v39, %v759_v39  ;;  %13090 = vmatprep.subr.bf16.mxu1 %v14648_v0  ;;  %v1324_v61 = vld [vmem:[#allocation2 + $0x60] sm:$0xf] }
 0x137   : > { %v1476_v31 = vsel %vm14338_vm9, %v1471_v56, %v1475_v45  ;;  %v1480_v11 = vor.u32 %v1479_v1, %v1475_v45  ;;  %v1109_v15 = vshrl.u32 %v12491_v52, 16  ;;  %v1112_v17 = vshll.u32 %v12491_v52, 16  ;;  %v14673_v56 = vld [vmem:[#allocation2 + $0x44] sm:$0x1] }
 0x138   : > { %12943 = vmatmul.mubr.msk.bf16.gmra.mxu1 %vm561_vm0, %v11698_v54  ;;  %v1131_v4 = vor.u32 %v1129_v57, %v1128_v63  ;;  %v1132_v62 = vrot.slane %v1128_v63, 4  ;;  %v1134_v16 = vshrl.u32 %v12494_v49, 16  ;;  %v1137_v19 = vshll.u32 %v12494_v49, 16  ;;  %v14682_v49 = vld [vmem:[#allocation2 + $0x64] sm:$0xf] }
 0x139   : > { %v1481_v12 = vrot.slane %v1480_v11, 4  ;;  %v1111_v21 = vrot.slane %v1109_v15, 7  ;;  %v1117_v53 = vshrl.u32 %v12492_v9, 16  ;;  %v1120_v60 = vshll.u32 %v12492_v9, 16 }
 0x13a   : > { %v1302_v24 = vsel %vm14363_vm12, %v1131_v4, %v1301_v50  ;;  %v1136_v59 = vrot.slane %v1134_v16, 7  ;;  %v1536_v3 = vshrl.u32 %v1322_v18, 16  ;;  %v1539_v25 = vshll.u32 %v1322_v18, 16  ;;  %v1326_v50 = vld [vmem:[#allocation2 + $0x6c] sm:$0xf] }
 0x13b   : > { %1303 = vst [vmem:[#allocation2 + $0xc0] sm:$0xf] %v1302_v24  ;;  %v1486_v10 = vsel %vm14338_vm9, %v1481_v12, %v1485_v5  ;;  %v1114_v27 = vor.u32 %v1112_v17, %v1111_v21  ;;  %v1115_v28 = vrot.slane %v1111_v21, 4  ;;  %v1119_v29 = vrot.slane %v1117_v53, 7 }
 0x13c   : > { %v11699_v38 = vcombine.low %v1476_v31, %v1486_v10  ;;  %v1139_v34 = vor.u32 %v1137_v19, %v1136_v59  ;;  %v1141_v41 = vrot.slane %v1136_v59, 4  ;;  %v14669_v26 = vrot.slane %v1536_v3, 4 }
 0x13d   : > { %v1295_v1 = vsel %vm14363_vm12, %v1114_v27, %v1294_v13  ;;  %v1122_v39 = vor.u32 %v1120_v60, %v1119_v29  ;;  %v1124_v14 = vrot.slane %v1119_v29, 4  ;;  %v1541_v57 = vrot.slane %v1539_v25, 5  ;;  %v1328_v25 = vld [vmem:[#allocation2 + $0x78] sm:$0xf] }
 0x13e   : > { %12946 = vmatprep.mubr.msk.bf16.mxu1 %vm561_vm0, %v11699_v38  ;;  %1296 = vst [vmem:[#allocation2 + $0xb4] sm:$0xf] %v1295_v1  ;;  %v1140_v44 = vsel %vm14379_vm13, %v1132_v62, %v1139_v34  ;;  %v1306_v45 = vsel %vm14385_vm14, %v1141_v41, %v1305_v36  ;;  %v1549_v52 = vshrl.u32 %v14667_v33, 16  ;;  %v11738_v8 = vcombine.low %v1322_v18, %v14667_v33  ;;  %v14701_v62 = vld [vmem:[#allocation2 + $0x70] sm:$0xf] }
 0x13f   : > { %1304 = vst.msk [vmem:[#allocation2 + $0xc4] sm:$0xf] %vm305_vm1, %v1140_v44  ;;  %1307 = vst [vmem:[#allocation2 + $0xc8] sm:$0x1] %v1306_v45  ;;  %v1123_v54 = vsel %vm14379_vm13, %v1115_v28, %v1122_v39  ;;  %v1299_v63 = vsel %vm14385_vm14, %v1124_v14, %v1298_v2  ;;  %v1494_v5 = vor.u32 %v14606_v6, %v14602_v55  ;;  %v1497_v9 = vshll.u32 %v14591_v48, 16 }
 0x140   : > { %1297 = vst.msk [vmem:[#allocation2 + $0xb8] sm:$0xf] %vm305_vm1, %v1123_v54  ;;  %1300 = vst [vmem:[#allocation2 + $0xbc] sm:$0x1] %v1299_v63  ;;  %12991 = vmatmul.mubr.msk.bf16.gmra.mxu0 %vm561_vm0, %v11738_v8  ;;  %v1503_v31 = vrot.slane %v1501_v7, 4  ;;  %v1507_v11 = vshll.u32 %v14673_v56, 16  ;;  %v11739_v6 = vcombine.low %v1324_v61, %v14682_v49  ;;  %v1518_v7 = vor.u32 %v14650_v42, %v14638_v37 }
 0x141   : > { %v1560_v15 = vshrl.u32 %v1324_v61, 16  ;;  %v1563_v17 = vshll.u32 %v1324_v61, 16  ;;  %v1495_v18 = vrot.slane %v1494_v5, 4  ;;  %v1499_v4 = vrot.slane %v1497_v9, 5  ;;  %v14714_v28 = vld [vmem:[#allocation2 + $0x5c] sm:$0x1] }
 0x142   : > { %v1573_v55 = vshrl.u32 %v14682_v49, 16  ;;  %v1509_v13 = vrot.slane %v1507_v11, 5  ;;  %12994 = vmatprep.mubr.msk.bf16.mxu0 %vm561_vm0, %v11739_v6  ;;  %v1521_v36 = vshll.u32 %v14618_v46, 16  ;;  %v1527_v53 = vrot.slane %v1525_v20, 4  ;;  %v14722_v14 = vld [vmem:[#allocation2 + $0x7c] sm:$0xf] }
 0x143   : > { %v1562_v16 = vrot.slane %v1560_v15, 4  ;;  %v1565_v19 = vrot.slane %v1563_v17, 5  ;;  %v1500_v12 = vsel %vm14338_vm9, %v1495_v18, %v1499_v4  ;;  %v1504_v21 = vor.u32 %v1503_v31, %v1499_v4  ;;  %v14729_v31 = vld [vmem:[#allocation2 + $0x68] sm:$0x1]  ;;  %v1330_v15 = vld [vmem:[#allocation2 + $0x84] sm:$0xf] }
 0x144   : > { %v1519_v60 = vrot.slane %v1518_v7, 4  ;;  %v1531_v24 = vshll.u32 %v14697_v32, 16  ;;  %v1584_v59 = vshrl.u32 %v1326_v50, 16  ;;  %v1587_v3 = vshll.u32 %v1326_v50, 16  ;;  %v14735_v6 = vld [vmem:[#allocation2 + $0x88] sm:$0xf] }
 0x145   : > { %v1505_v10 = vrot.slane %v1504_v21, 4  ;;  %v1523_v27 = vrot.slane %v1521_v36, 5  ;;  %v1597_v37 = vshrl.u32 %v14701_v62, 16  ;;  %v11740_v42 = vcombine.low %v1326_v50, %v14701_v62 }
 0x146   : > { %v1533_v29 = vrot.slane %v1531_v24, 5  ;;  %v1586_v38 = vrot.slane %v1584_v59, 4  ;;  %v1589_v34 = vrot.slane %v1587_v3, 5  ;;  %v1542_v41 = vor.u32 %v1541_v57, %v14669_v26 }
 0x147   : > { %v1510_v20 = vsel %vm14338_vm9, %v1505_v10, %v1509_v13  ;;  %v1524_v2 = vsel %vm14338_vm9, %v1519_v60, %v1523_v27  ;;  %v1528_v1 = vor.u32 %v1527_v53, %v1523_v27  ;;  %v1545_v39 = vshll.u32 %v14667_v33, 16 }
 0x148   : > { %v11700_v61 = vcombine.low %v1500_v12, %v1510_v20  ;;  %12995 = vmatmul.mubr.msk.bf16.gmra.mxu0 %vm561_vm0, %v11740_v42  ;;  %v1543_v44 = vrot.slane %v1542_v41, 4  ;;  %v1551_v45 = vrot.slane %v1549_v52, 4  ;;  %v1555_v8 = vshll.u32 %v14714_v28, 16  ;;  %v14747_v41 = vld [vmem:[#allocation2 + $0x94] sm:$0xf] }
 0x149   : > { %v1529_v54 = vrot.slane %v1528_v1, 4  ;;  %v1547_v26 = vrot.slane %v1545_v39, 5  ;;  %v1608_v57 = vshrl.u32 %v1328_v25, 16  ;;  %v1611_v63 = vshll.u32 %v1328_v25, 16 }
 0x14a   : > { %12947 = vmatmul.mubr.msk.bf16.gmra.mxu1 %vm561_vm0, %v11700_v61  ;;  %v1557_v5 = vrot.slane %v1555_v8, 5  ;;  %v1621_v9 = vshrl.u32 %v14722_v14, 16  ;;  %v11741_v50 = vcombine.low %v1328_v25, %v14722_v14  ;;  %v1566_v11 = vor.u32 %v1565_v19, %v1562_v16  ;;  %v14743_v25 = vld [vmem:[#allocation2 + $0x74] sm:$0x1] }
 0x14b   : > { %v1534_v52 = vsel %vm14338_vm9, %v1529_v54, %v1533_v29  ;;  %v1548_v17 = vsel %vm14338_vm9, %v1543_v44, %v1547_v26  ;;  %v1552_v18 = vor.u32 %v1551_v45, %v1547_v26  ;;  %v1610_v4 = vrot.slane %v1608_v57, 4 }
 0x14c   : > { %v11701_v13 = vcombine.low %v1524_v2, %v1534_v52  ;;  %v1613_v7 = vrot.slane %v1611_v63, 5  ;;  %12998 = vmatprep.mubr.msk.bf16.mxu0 %vm561_vm0, %v11741_v50  ;;  %v1567_v12 = vrot.slane %v1566_v11, 4  ;;  %v1569_v21 = vshll.u32 %v14682_v49, 16  ;;  %v14757_v50 = vld [vmem:[#allocation2 + $0x80] sm:$0x1] }
 0x14d   : > { %v1553_v36 = vrot.slane %v1552_v18, 4  ;;  %v1575_v16 = vrot.slane %v1573_v55, 4  ;;  %v1579_v19 = vshll.u32 %v14729_v31, 16  ;;  %v1632_v53 = vshrl.u32 %v1330_v15, 16  ;;  %v1332_v55 = vld [vmem:[#allocation2 + $0x90] sm:$0xf] }
 0x14e   : > { %12950 = vmatprep.mubr.msk.bf16.mxu1 %vm561_vm0, %v11701_v13  ;;  %v1571_v60 = vrot.slane %v1569_v21, 5  ;;  %v1635_v24 = vshll.u32 %v1330_v15, 16  ;;  %v1645_v59 = vshrl.u32 %v14735_v6, 16  ;;  %v11742_v3 = vcombine.low %v1330_v15, %v14735_v6  ;;  %v1334_v15 = vld [vmem:[#allocation2 + $0x9c] sm:$0xf] }
 0x14f   : > { %v1558_v10 = vsel %vm14338_vm9, %v1553_v36, %v1557_v5  ;;  %v1581_v27 = vrot.slane %v1579_v19, 5  ;;  %v1634_v42 = vrot.slane %v1632_v53, 4  ;;  %v1590_v29 = vor.u32 %v1589_v34, %v1586_v38  ;;  %v14762_v13 = vld [vmem:[#allocation2 + $0xa0] sm:$0xf] }
 0x150   : > { %v11702_v20 = vcombine.low %v1548_v17, %v1558_v10  ;;  %v1572_v2 = vsel %vm14338_vm9, %v1567_v12, %v1571_v60  ;;  %v1576_v1 = vor.u32 %v1575_v16, %v1571_v60  ;;  %v1637_v39 = vrot.slane %v1635_v24, 5  ;;  %12999 = vmatmul.mubr.msk.bf16.gmra.mxu0 %vm561_vm0, %v11742_v3 }
 0x151   : > { %v1591_v61 = vrot.slane %v1590_v29, 4  ;;  %v1593_v44 = vshll.u32 %v14701_v62, 16  ;;  %v1599_v45 = vrot.slane %v1597_v37, 4  ;;  %v1603_v8 = vshll.u32 %v14743_v25, 16 }
 0x152   : > { %12951 = vmatmul.mubr.msk.bf16.gmra.mxu1 %vm561_vm0, %v11702_v20  ;;  %v1577_v38 = vrot.slane %v1576_v1, 4  ;;  %v1656_v34 = vshrl.u32 %v1332_v55, 16  ;;  %v1659_v54 = vshll.u32 %v1332_v55, 16  ;;  %v1669_v26 = vshrl.u32 %v14747_v41, 16 }
 0x153   : > { %v1595_v57 = vrot.slane %v1593_v44, 5  ;;  %v1605_v63 = vrot.slane %v1603_v8, 5  ;;  %v11743_v5 = vcombine.low %v1332_v55, %v14747_v41  ;;  %v1614_v11 = vor.u32 %v1613_v7, %v1610_v4  ;;  %v14781_v8 = vld [vmem:[#allocation2 + $0xac] sm:$0xf] }
 0x154   : > { %v1582_v37 = vsel %vm14338_vm9, %v1577_v38, %v1581_v27  ;;  %v1658_v52 = vrot.slane %v1656_v34, 4  ;;  %v1661_v17 = vrot.slane %v1659_v54, 5  ;;  %v1617_v18 = vshll.u32 %v14722_v14, 16  ;;  %v14771_v27 = vld [vmem:[#allocation2 + $0x8c] sm:$0x1] }
 0x155   : > { %v11703_v12 = vcombine.low %v1572_v2, %v1582_v37  ;;  %v1596_v21 = vsel %vm14338_vm9, %v1591_v61, %v1595_v57  ;;  %v1600_v36 = vor.u32 %v1599_v45, %v1595_v57  ;;  %13002 = vmatprep.mubr.msk.bf16.mxu0 %vm561_vm0, %v11743_v5  ;;  %v1615_v16 = vrot.slane %v1614_v11, 4 }
 0x156   : > { %v1619_v19 = vrot.slane %v1617_v18, 5  ;;  %v1623_v4 = vrot.slane %v1621_v9, 4  ;;  %v1627_v7 = vshll.u32 %v14757_v50, 16  ;;  %v1680_v53 = vshrl.u32 %v1334_v15, 16  ;;  %v1336_v9 = vld [vmem:[#allocation2 + $0xa8] sm:$0xf] }
 0x157   : > { %12954 = vmatprep.mubr.msk.bf16.mxu1 %vm561_vm0, %v11703_v12  ;;  %v1601_v60 = vrot.slane %v1600_v36, 4  ;;  %v1683_v24 = vshll.u32 %v1334_v15, 16  ;;  %v1693_v3 = vshrl.u32 %v14762_v13, 16  ;;  %v11744_v10 = vcombine.low %v1334_v15, %v14762_v13  ;;  %v14789_v12 = vld [vmem:[#allocation2 + $0x98] sm:$0x1] }
 0x158   : > { %v1620_v29 = vsel %vm14338_vm9, %v1615_v16, %v1619_v19  ;;  %v1624_v55 = vor.u32 %v1623_v4, %v1619_v19  ;;  %v1629_v20 = vrot.slane %v1627_v7, 5  ;;  %v14775_v2 = vrot.slane %v1680_v53, 4  ;;  %v14793_v4 = vld [vmem:[#allocation2 + $0xb8] sm:$0xf] }
 0x159   : > { %v1606_v1 = vsel %vm14338_vm9, %v1601_v60, %v1605_v63  ;;  %v1685_v61 = vrot.slane %v1683_v24, 5  ;;  %13003 = vmatmul.mubr.msk.bf16.gmra.mxu0 %vm561_vm0, %v11744_v10  ;;  %v1638_v44 = vor.u32 %v1637_v39, %v1634_v42  ;;  %v1641_v45 = vshll.u32 %v14735_v6, 16 }
 0x15a   : > { %v11704_v38 = vcombine.low %v1596_v21, %v1606_v1  ;;  %v1625_v34 = vrot.slane %v1624_v55, 4  ;;  %v1647_v54 = vrot.slane %v1645_v59, 4  ;;  %v1651_v57 = vshll.u32 %v14771_v27, 16  ;;  %v1338_v21 = vld [vmem:[#allocation2 + $0xb4] sm:$0xf] }
 0x15b   : > { %v1639_v5 = vrot.slane %v1638_v44, 4  ;;  %v1643_v11 = vrot.slane %v1641_v45, 5  ;;  %v1704_v15 = vshrl.u32 %v1336_v9, 16  ;;  %v1707_v37 = vshll.u32 %v1336_v9, 16 }
 0x15c   : > { %12955 = vmatmul.mubr.msk.bf16.gmra.mxu1 %vm561_vm0, %v11704_v38  ;;  %v1630_v63 = vsel %vm14338_vm9, %v1625_v34, %v1629_v20  ;;  %v1653_v18 = vrot.slane %v1651_v57, 5  ;;  %v1717_v42 = vshrl.u32 %v14781_v8, 16  ;;  %v11745_v39 = vcombine.low %v1336_v9, %v14781_v8  ;;  %v14801_v38 = vld [vmem:[#allocation2 + $0xa4] sm:$0x1] }
 0x15d   : > { %v11705_v59 = vcombine.low %v1620_v29, %v1630_v63  ;;  %v1644_v36 = vsel %vm14338_vm9, %v1639_v5, %v1643_v11  ;;  %v1648_v16 = vor.u32 %v1647_v54, %v1643_v11  ;;  %v1706_v19 = vrot.slane %v1704_v15, 4  ;;  %v13715_v54 = vld [vmem:[#allocation2 + $0xc] sm:$0xff]  }
 0x15e   : > { %v1709_v7 = vrot.slane %v1707_v37, 5  ;;  %13006 = vmatprep.mubr.msk.bf16.mxu0 %vm561_vm0, %v11745_v39  ;;  %v1662_v53 = vor.u32 %v1661_v17, %v1658_v52  ;;  %v1665_v60 = vshll.u32 %v14747_v41, 16  ;;  %v1671_v24 = vrot.slane %v1669_v26, 4  ;;  %v14809_v37 = vld [vmem:[#allocation2 + $0xb0] sm:$0x1] }
 0x15f   : > { %12958 = vmatprep.mubr.msk.bf16.mxu1 %vm561_vm0, %v11705_v59  ;;  %v1649_v10 = vrot.slane %v1648_v16, 4  ;;  %v1675_v55 = vshll.u32 %v14789_v12, 16  ;;  %v1728_v29 = vshrl.u32 %v1338_v21, 16  ;;  %v1731_v20 = vshll.u32 %v1338_v21, 16 }
 0x160   : > { %v1663_v9 = vrot.slane %v1662_v53, 4  ;;  %v1667_v1 = vrot.slane %v1665_v60, 5  ;;  %v1741_v44 = vshrl.u32 %v14793_v4, 16  ;;  %v11746_v45 = vcombine.low %v1338_v21, %v14793_v4 }
 0x161   : > { %vm2402_vm1 = vcmask 1046532   ;;  %v1654_v26 = vsel %vm14338_vm9, %v1649_v10, %v1653_v18  ;;  %v1677_v52 = vrot.slane %v1675_v55, 5  ;;  %v1730_v17 = vrot.slane %v1728_v29, 4  ;;  %v14819_v55 = vld [vmem:[#allocation2 + $0xbc] sm:$0x1] }
 0x162   : > { %v1733_v34 = vrot.slane %v1731_v20, 5  ;;  %v11706_v57 = vcombine.low %v1644_v36, %v1654_v26  ;;  %v1668_v5 = vsel %vm14338_vm9, %v1663_v9, %v1667_v1  ;;  %v1672_v11 = vor.u32 %v1671_v24, %v1667_v1  ;;  %13007 = vmatmul.mubr.msk.bf16.gmra.mxu0 %vm561_vm0, %v11746_v45  ;;  %v2354_v45 = vld [vmem:[#allocation2 + $0xc] sm:$0xe]  ;;  %vm14839_vm3 = vmor %vm2401_vm15, %vm2402_vm1 }
 0x163   : > { %v1686_v15 = vor.u32 %v1685_v61, %v14775_v2  ;;  %v1689_v63 = vshll.u32 %v14762_v13, 16  ;;  %v1695_v39 = vrot.slane %v1693_v3, 4  ;;  %v1699_v18 = vshll.u32 %v14801_v38, 16  ;;  %13058 = vmatprep.mubr.msk.bf16.mxu0 %vm561_vm0, %v13715_v54 }
 0x164   : > { %v1710_v21 = vor.u32 %v1709_v7, %v1706_v19  ;;  %12959 = vmatmul.mubr.msk.bf16.gmra.mxu1 %vm561_vm0, %v11706_v57  ;;  %v1673_v59 = vrot.slane %v1672_v11, 4  ;;  %v1713_v16 = vshll.u32 %v14781_v8, 16  ;;  %v1719_v53 = vrot.slane %v1717_v42, 4  ;;  %v2353_v7 = vld [vmem:[#allocation2] sm:$0xe]  ;;  %v13717_v57 = vld [vmem:[#allocation2 + $0x18] sm:$0xff]  }
 0x165   : > { %v1687_v36 = vrot.slane %v1686_v15, 4  ;;  %v1691_v60 = vrot.slane %v1689_v63, 5  ;;  %v1701_v24 = vrot.slane %v1699_v18, 5  ;;  %v1723_v61 = vshll.u32 %v14809_v37, 16  ;;  %v13718_v63 = vld [vmem:[#allocation2 + $0x24] sm:$0xff]  }
 0x166   : > { %v1711_v2 = vrot.slane %v1710_v21, 4  ;;  %v1678_v3 = vsel %vm14338_vm9, %v1673_v59, %v1677_v52  ;;  %v1715_v10 = vrot.slane %v1713_v16, 5  ;;  %v1734_v29 = vor.u32 %v1733_v34, %v1730_v17  ;;  %v13735_v17 = vld [vmem:[%s19502_s2 + $0xb0] sm:$0xff]   ;;  %v13834_v59 = vld [vmem:[#allocation2 + $0x4] sm:$0xf] }
 0x167   : > { %v1737_v19 = vshll.u32 %v14793_v4, 16  ;;  %v11707_v20 = vcombine.low %v1668_v5, %v1678_v3  ;;  %v1692_v9 = vsel %vm14338_vm9, %v1687_v36, %v1691_v60  ;;  %v1696_v42 = vor.u32 %v1695_v39, %v1691_v60  ;;  %v13835_v16 = vld [vmem:[#allocation2 + $0x8] sm:$0x1] }
 0x168   : > { %v1725_v1 = vrot.slane %v1723_v61, 5  ;;  %v1716_v26 = vsel %vm14338_vm9, %v1711_v2, %v1715_v10  ;;  %v1720_v54 = vor.u32 %v1719_v53, %v1715_v10  ;;  %v1735_v52 = vrot.slane %v1734_v29, 4  ;;  %v2355_v10 = vld [vmem:[#allocation2 + $0x18] sm:$0xe]  ;;  %v2356_v29 = vld [vmem:[#allocation2 + $0x24] sm:$0xe] }
 0x169   : > { %v1739_v11 = vrot.slane %v1737_v19, 5  ;;  %12962 = vmatprep.mubr.msk.bf16.mxu1 %vm561_vm0, %v11707_v20  ;;  %v1697_v34 = vrot.slane %v1696_v42, 4  ;;  %v1743_v5 = vrot.slane %v1741_v44, 4  ;;  %v1747_v15 = vshll.u32 %v14819_v55, 16  ;;  %v2357_v42 = vld [vmem:[#allocation2 + $0x30] sm:$0xe] }
 0x16a   : > { %v11767_v39 = vrot.slane %v2353_v7, 9  ;;  %v1721_v18 = vrot.slane %v1720_v54, 4  ;;  %13059 = vmatmul.mubr.msk.bf16.vlgmr.msra.gmra.mxu0 %vm561_vm0, %v13717_v57  ;;  %v2406_v36 = vrot.slane %v13834_v59, 5  ;;  %v2409_v53 = vrot.slane %v13835_v16, 5  ;;  %v13738_v54 = vld [vmem:[%s19502_s2 + $0xa8] sm:$0xff]  }
 0x16b   : > { %v1740_v21 = vsel %vm14338_vm9, %v1735_v52, %v1739_v11  ;;  %v1702_v60 = vsel %vm14338_vm9, %v1697_v34, %v1701_v24  ;;  %v1744_v2 = vor.u32 %v1743_v5, %v1739_v11  ;;  %v1749_v61 = vrot.slane %v1747_v15, 5  ;;  %13062 = vmatprep.mubr.msk.bf16.mxu0 %vm561_vm0, %v13718_v63  ;;  %13131 = vmatpush3.bf16.msra.mxu0 %v14553_v43  ;;  %v13836_v52 = vld [vmem:[#allocation2 + $0x10] sm:$0xf]  ;;  %v13837_v5 = vld [vmem:[#allocation2 + $0x1c] sm:$0xf] }
 0x16c   : > { %v19547_v44 = vmov 0  ;;  %v11768_v3 = vrot.slane %v2354_v45, 9  ;;  %v11708_v19 = vcombine.low %v1692_v9, %v1702_v60  ;;  %v1726_v7 = vsel %vm14338_vm9, %v1721_v18, %v1725_v1  ;;  %13132 = vmatprep.subr.bf16.mxu0 %v13735_v17  ;;  %v13719_v1 = vld [vmem:[#allocation2 + $0x30] sm:$0xff]  }
 0x16d   : > { %v19548_v44 = vsel %vm14839_vm3, 4294967295, %v19547_v44  ;;  %v14848_v24 = vsel %vm14839_vm3, %v11767_v39, %v2406_v36  ;;  %v2408_v20 = vrot.slane %v2406_v36, 4  ;;  %v11709_v45 = vcombine.low %v1716_v26, %v1726_v7  ;;  %v2358_v39 = vld [vmem:[#allocation2 + $0x3c] sm:$0xe]  ;;  %v13739_v36 = vld [vmem:[%s19502_s2 + $0xa0] sm:$0xff]  }
 0x16e   : > { %19549 = vst [vmem:[#allocation10_spill] sm:$0xff] %v19548_v44  ;;  %v1745_v57 = vrot.slane %v1744_v2, 4  ;;  %v2413_v11 = vrot.slane %v13836_v52, 5  ;;  %v2416_v43 = vrot.slane %v14526_v22, 5  ;;  %12963 = vmatmul.mubr.msk.bf16.gmra.mxu1 %vm561_vm0, %v11708_v19  ;;  %v11769_v34 = vrot.slane %v2355_v10, 9 }
 0x16f   : > { %v2410_v9 = vsel %vm14839_vm3, %v2408_v20, %v2409_v53  ;;  %v2420_v15 = vrot.slane %v13837_v5, 5  ;;  %v2423_v63 = vrot.slane %v14560_v51, 5  ;;  %12966 = vmatprep.mubr.msk.bf16.mxu1 %vm561_vm0, %v11709_v45  ;;  %13133 = vmatpush3.bf16.msra.mxu0 %v13735_v17  ;;  %v11770_v60 = vrot.slane %v2356_v29, 9  ;;  %v2359_v2 = vld [vmem:[#allocation2 + $0x48] sm:$0xe] }
 0x170   : > { %v1750_v26 = vsel %vm14338_vm9, %v1745_v57, %v1749_v61  ;;  %v11783_v18 = vcombine.low %v14848_v24, %v2410_v9  ;;  %v14864_v22 = vsel %vm14839_vm3, %v11768_v3, %v2413_v11  ;;  %v2415_v59 = vrot.slane %v2413_v11, 4  ;;  %13134 = vmatprep.subr.bf16.mxu0 %v13738_v54  ;;  %v13721_v3 = vld [vmem:[#allocation2 + $0x3c] sm:$0xff]   ;;  %v13838_v10 = vld [vmem:[#allocation2 + $0x28] sm:$0xf]  ;;  %v2360_v45 = vld [vmem:[#allocation2 + $0x54] sm:$0xe] }
 0x171   : > { %v11710_v16 = vcombine.low %v1740_v21, %v1750_v26  ;;  %v14871_v51 = vsel %vm14839_vm3, %v11769_v34, %v2420_v15  ;;  %v2422_v53 = vrot.slane %v2420_v15, 4  ;;  %v2427_v17 = vrot.slane %v13838_v10, 5  ;;  %v2361_v11 = vld [vmem:[#allocation2 + $0x60] sm:$0xe] }
 0x172   : > { %v14875_v61 = vsel %vm14839_vm3, %v2415_v59, %v2416_v43  ;;  %v2430_v19 = vrot.slane %v14604_v58, 5  ;;  %v11771_v7 = vrot.slane %v2357_v42, 9  ;;  %13063 = vmatmul.mubr.msk.bf16.gmra.mxu0 %vm561_vm0, %v13719_v1  ;;  %v2434_v24 = vrot.slane %v14543_v40, 5  ;;  %v14903_v1 = vld [vmem:[%s19502_s2 + $0xf8] sm:$0xff]   ;;  %v2362_v59 = vld [vmem:[#allocation2 + $0x6c] sm:$0xe] }
 0x173   : > { %v11784_v21 = vcombine.low %v14864_v22, %v14875_v61  ;;  %v14883_v29 = vsel %vm14839_vm3, %v2422_v53, %v2423_v63  ;;  %v2437_v20 = vrot.slane %v14636_v35, 5  ;;  %13066 = vmatprep.mubr.msk.bf16.mxu0 %vm561_vm0, %v13721_v3  ;;  %v14892_v42 = vsel %vm14839_vm3, %v11770_v60, %v2427_v17  ;;  %13135 = vmatpush3.bf16.msra.mxu0 %v13738_v54  ;;  %v13723_v60 = vld [vmem:[#allocation2 + $0x54] sm:$0xff]   ;;  %v13730_v22 = vld [vmem:[%s19502_s2 + $0x88] sm:$0xff]  }
 0x174   : > { %v11785_v58 = vcombine.low %v14871_v51, %v14883_v29  ;;  %v2429_v57 = vrot.slane %v2427_v17, 4  ;;  %v11772_v52 = vrot.slane %v2358_v39, 9  ;;  %v14896_v43 = vsel %vm14839_vm3, %v11771_v7, %v2434_v24  ;;  %13136 = vmatprep.subr.bf16.mxu0 %v13739_v36  ;;  %v2363_v17 = vld [vmem:[#allocation2 + $0x78] sm:$0xe] }
 0x175   : > { %v2436_v40 = vrot.slane %v2434_v24, 4  ;;  %v2441_v35 = vrot.slane %v14591_v48, 5  ;;  %v2444_v9 = vrot.slane %v14673_v56, 5  ;;  %v11773_v54 = vrot.slane %v2359_v2, 9  ;;  %v13722_v48 = vld [vmem:[#allocation2 + $0x48] sm:$0xff]  }
 0x176   : > { %v14907_v34 = vsel %vm14839_vm3, %v2429_v57, %v2430_v19  ;;  %v2448_v5 = vrot.slane %v14618_v46, 5  ;;  %v2451_v15 = vrot.slane %v14697_v32, 5  ;;  %12967 = vmatmul.mubr.msk.bf16.gmra.mxu1 %vm561_vm0, %v11710_v16  ;;  %v11774_v53 = vrot.slane %v2360_v45, 9 }
 0x177   : > { %v11786_v56 = vcombine.low %v14892_v42, %v14907_v34  ;;  %v14916_v63 = vsel %vm14839_vm3, %v2436_v40, %v2437_v20  ;;  %v14920_v39 = vsel %vm14839_vm3, %v11772_v52, %v2441_v35  ;;  %v2443_v26 = vrot.slane %v2441_v35, 4  ;;  %13018 = vmatprep.mubr.msk.bf16.mxu1 %vm561_vm0, %v11783_v18  ;;  %13137 = vmatpush3.bf16.msra.mxu0 %v13739_v36  ;;  %v13725_v40 = vld [vmem:[%s19502_s2 + $0x90] sm:$0xff]  }
 0x178   : > { %v11787_v46 = vcombine.low %v14896_v43, %v14916_v63  ;;  %v14927_v32 = vsel %vm14839_vm3, %v11773_v54, %v2448_v5  ;;  %v2450_v16 = vrot.slane %v2448_v5, 4  ;;  %v2455_v3 = vrot.slane %v14667_v33, 5  ;;  %13210 = vmatprep.subr.bf16.mxu0 %v14903_v1  ;;  %v15085_v43 = vld [vmem:[%s19502_s2 + $0xd8] sm:$0xff]  }
 0x179   : > { %v14931_v2 = vsel %vm14839_vm3, %v2443_v26, %v2444_v9  ;;  %v2458_v10 = vrot.slane %v14714_v28, 5  ;;  %v11775_v18 = vrot.slane %v2361_v11, 9  ;;  %v2462_v36 = vrot.slane %v14682_v49, 5  ;;  %v2364_v11 = vld [vmem:[#allocation2 + $0x84] sm:$0xe] }
 0x17a   : > { %v11788_v19 = vcombine.low %v14920_v39, %v14931_v2  ;;  %v14940_v7 = vsel %vm14839_vm3, %v2450_v16, %v2451_v15  ;;  %v2465_v24 = vrot.slane %v14729_v31, 5  ;;  %13067 = vmatmul.mubr.msk.bf16.gmra.mxu0 %vm561_vm0, %v13722_v48  ;;  %v14949_v28 = vsel %vm14839_vm3, %v11774_v53, %v2455_v3  ;;  %v2365_v15 = vld [vmem:[#allocation2 + $0x90] sm:$0xe]  ;;  %v2366_v53 = vld [vmem:[#allocation2 + $0x9c] sm:$0xe] }
 0x17b   : > { %v11789_v33 = vcombine.low %v14927_v32, %v14940_v7  ;;  %v2457_v20 = vrot.slane %v2455_v3, 4  ;;  %v11776_v45 = vrot.slane %v2362_v59, 9  ;;  %13070 = vmatprep.mubr.msk.bf16.mxu0 %vm561_vm0, %v13723_v60  ;;  %v14954_v57 = vsel %vm14839_vm3, %v11775_v18, %v2462_v36  ;;  %v14987_v60 = vld [vmem:[#allocation2 + $0x10] sm:$0xf]  ;;  %v14989_v3 = vld [vmem:[#allocation2 + $0x14] sm:$0x1] }
 0x17c   : > { %v2464_v49 = vrot.slane %v2462_v36, 4  ;;  %v2469_v31 = vrot.slane %v14701_v62, 5  ;;  %v2472_v52 = vrot.slane %v14743_v25, 5  ;;  %v11777_v9 = vrot.slane %v2363_v17, 9  ;;  %v13724_v17 = vld [vmem:[#allocation2 + $0x60] sm:$0xff]  }
 0x17d   : > { %v14963_v35 = vsel %vm14839_vm3, %v2457_v20, %v2458_v10  ;;  %v2476_v54 = vrot.slane %v14722_v14, 5  ;;  %v2479_v5 = vrot.slane %v14757_v50, 5  ;;  %v11778_v16 = vrot.slane %v2364_v11, 9 }
 0x17e   : > { %v11790_v62 = vcombine.low %v14949_v28, %v14963_v35  ;;  %v14971_v25 = vsel %vm14839_vm3, %v2464_v49, %v2465_v24  ;;  %v14975_v48 = vsel %vm14839_vm3, %v11776_v45, %v2469_v31  ;;  %v2471_v26 = vrot.slane %v2469_v31, 4  ;;  %13019 = vmatmul.mubr.msk.bf16.vlgmr.msra.gmra.mxu1 %vm561_vm0, %v11784_v21  ;;  %v3975_v24 = vld [vmem:[#allocation2 + $0xc] sm:$0xe] }
 0x17f   : > { %v11791_v14 = vcombine.low %v14954_v57, %v14971_v25  ;;  %v14985_v50 = vsel %vm14839_vm3, %v11777_v9, %v2476_v54  ;;  %v2478_v59 = vrot.slane %v2476_v54, 4  ;;  %13091 = vmatpush3.bf16.msra.mxu1 %v14648_v0  ;;  %13022 = vmatprep.mubr.msk.bf16.mxu1 %vm561_vm0, %v11785_v58  ;;  %v2483_v21 = vrot.slane %v14735_v6, 5  ;;  %v13726_v0 = vld [vmem:[#allocation2 + $0x6c] sm:$0xff]  }
 0x180   : > { %v15001_v61 = vsel %vm14839_vm3, %v2471_v26, %v2472_v52  ;;  %v2486_v10 = vrot.slane %v14771_v27, 5  ;;  %v11779_v18 = vrot.slane %v2365_v15, 9  ;;  %13092 = vmatprep.subr.bf16.mxu1 %v13725_v40  ;;  %v2490_v58 = vrot.slane %v14747_v41, 5  ;;  %v2367_v52 = vld [vmem:[#allocation2 + $0xa8] sm:$0xe] }
 0x181   : > { %v11792_v51 = vcombine.low %v14975_v48, %v15001_v61  ;;  %v15009_v29 = vsel %vm14839_vm3, %v2478_v59, %v2479_v5  ;;  %v2493_v36 = vrot.slane %v14789_v12, 5  ;;  %v15017_v27 = vsel %vm14839_vm3, %v11778_v16, %v2483_v21  ;;  %v3976_v15 = vld [vmem:[#allocation2 + $0x18] sm:$0xe]  ;;  %v15046_v16 = vld [vmem:[#allocation2 + $0x1c] sm:$0xf] }
 0x182   : > { %v11793_v6 = vcombine.low %v14985_v50, %v15009_v29  ;;  %v2485_v20 = vrot.slane %v2483_v21, 4  ;;  %v11780_v45 = vrot.slane %v2366_v53, 9  ;;  %13071 = vmatmul.mubr.msk.bf16.gmra.mxu0 %vm561_vm0, %v13724_v17  ;;  %v15022_v49 = vsel %vm14839_vm3, %v11779_v18, %v2490_v58  ;;  %v15048_v53 = vld [vmem:[#allocation2 + $0x20] sm:$0x1]  ;;  %v15188_v28 = vld [vmem:[#allocation2 + $0x4c] sm:$0xf] }
 0x183   : > { %v2492_v31 = vrot.slane %v2490_v58, 4  ;;  %v2497_v41 = vrot.slane %v14762_v13, 5  ;;  %v2500_v12 = vrot.slane %v14801_v38, 5  ;;  %13074 = vmatprep.mubr.msk.bf16.mxu0 %vm561_vm0, %v13726_v0  ;;  %13093 = vmatpush3.bf16.msra.mxu1 %v13725_v40  ;;  %v11891_v9 = vrot.slane %v3975_v24, 9  ;;  %v13737_v40 = vld [vmem:[%s19502_s2 + $0x80] sm:$0xff]  }
 0x184   : > { %v15029_v11 = vsel %vm14839_vm3, %v2485_v20, %v2486_v10  ;;  %v4041_v54 = vrot.slane %v14987_v60, 5  ;;  %v4044_v5 = vrot.slane %v14989_v3, 5  ;;  %13094 = vmatprep.subr.bf16.mxu1 %v13730_v22  ;;  %v11781_v17 = vrot.slane %v2367_v52, 9  ;;  %v2368_v0 = vld [vmem:[#allocation2 + $0xb4] sm:$0xe]  ;;  %v13727_v52 = vld [vmem:[#allocation2 + $0x78] sm:$0xff]  }
 0x185   : > { %v15037_v38 = vsel %vm14839_vm3, %v2492_v31, %v2493_v36  ;;  %v15044_v26 = vsel %vm14839_vm3, %v11780_v45, %v2497_v41  ;;  %v2499_v59 = vrot.slane %v2497_v41, 4  ;;  %v15056_v58 = vld [vmem:[#allocation2 + $0x28] sm:$0xf]  ;;  %v15058_v36 = vld [vmem:[#allocation2 + $0x2c] sm:$0x1]  ;;  %v2504_v20 = vrot.slane %v14781_v8, 5 }
 0x186   : > { %v15054_v10 = vsel %vm14839_vm3, %v11891_v9, %v4041_v54  ;;  %v4043_v18 = vrot.slane %v4041_v54, 4  ;;  %13023 = vmatmul.mubr.msk.bf16.gmra.mxu1 %vm561_vm0, %v11786_v56  ;;  %v2507_v45 = vrot.slane %v14809_v37, 5  ;;  %v11892_v31 = vrot.slane %v3976_v15, 9  ;;  %v3977_v41 = vld [vmem:[#allocation2 + $0x24] sm:$0xe] }
 0x187   : > { %v15066_v24 = vsel %vm14839_vm3, %v2499_v59, %v2500_v12  ;;  %13026 = vmatprep.mubr.msk.bf16.mxu1 %vm561_vm0, %v11787_v46  ;;  %13095 = vmatpush3.bf16.msra.mxu1 %v13730_v22  ;;  %v4048_v8 = vrot.slane %v15046_v16, 5  ;;  %v4051_v37 = vrot.slane %v15048_v53, 5  ;;  %v3222_v56 = vld [vmem:[#allocation2 + $0xc] sm:$0xf]  ;;  %v15091_v46 = vsel %vm14839_vm3, %v11781_v17, %v2504_v20  ;;  %v13728_v9 = vld [vmem:[#allocation2 + $0x84] sm:$0xff]  }
 0x188   : > { %v15078_v34 = vsel %vm14839_vm3, %v4043_v18, %v4044_v5  ;;  %13096 = vmatprep.subr.bf16.mxu1 %v13737_v40  ;;  %v2506_v22 = vrot.slane %v2504_v20, 4  ;;  %v11782_v12 = vrot.slane %v2368_v0, 9  ;;  %v2511_v15 = vrot.slane %v14793_v4, 5  ;;  %v15240_v29 = vld [vmem:[#allocation2 + $0x5c] sm:$0x1] }
 0x189   : > { %v15095_v54 = vsel %vm14839_vm3, %v11892_v31, %v4048_v8  ;;  %v4050_v5 = vrot.slane %v4048_v8, 4  ;;  %v2514_v59 = vrot.slane %v14819_v55, 5  ;;  %v11893_v17 = vrot.slane %v3977_v41, 9  ;;  %v15117_v41 = vld [vmem:[#allocation2 + $0x34] sm:$0xf] }
 0x18a   : > { %13075 = vmatmul.mubr.msk.bf16.gmra.mxu0 %vm561_vm0, %v13727_v52  ;;  %v15102_v18 = vsel %vm14839_vm3, %v2506_v22, %v2507_v45  ;;  %v4055_v20 = vrot.slane %v15056_v58, 5  ;;  %v4058_v0 = vrot.slane %v15058_v36, 5  ;;  %v15115_v55 = vsel %vm14839_vm3, %v11782_v12, %v2511_v15  ;;  %v3978_v31 = vld [vmem:[#allocation2 + $0x30] sm:$0xe] }
 0x18b   : > { %13078 = vmatprep.mubr.msk.bf16.mxu0 %vm561_vm0, %v13728_v9  ;;  %13097 = vmatpush3.bf16.msra.mxu1 %v13737_v40  ;;  %v15111_v4 = vsel %vm14839_vm3, %v4050_v5, %v4051_v37  ;;  %v2513_v45 = vrot.slane %v2511_v15, 4  ;;  %v3271_v22 = vshrl.u32 %v3222_v56, 16  ;;  %v15125_v9 = vld [vmem:[#allocation2 + $0x38] sm:$0x1]  ;;  %v3274_v12 = vshll.u32 %v3222_v56, 16 }
 0x18c   : > { %v15123_v40 = vsel %vm14839_vm3, %v11893_v17, %v4055_v20  ;;  %v4057_v8 = vrot.slane %v4055_v20, 4  ;;  %13170 = vmatprep.subr.bf16.mxu1 %v15085_v43  ;;  %v3280_v5 = vshll.u32 %v14987_v60, 16  ;;  %v3284_v15 = vshrl.u32 %v14987_v60, 16  ;;  %v13729_v17 = vld [vmem:[#allocation2 + $0x90] sm:$0xff]  }
 0x18d   : > { %v15130_v37 = vsel %vm14839_vm3, %v2513_v45, %v2514_v59  ;;  %v3273_v59 = vrot.slane %v3271_v22, 4  ;;  %v3290_v56 = vshll.u32 %v14989_v3, 16  ;;  %v3225_v45 = vld [vmem:[#allocation2 + $0x18] sm:$0xf]  ;;  %v3276_v2 = vrot.slane %v3274_v12, 5  ;;  %v13731_v3 = vld [vmem:[#allocation2 + $0x9c] sm:$0xff]  }
 0x18e   : > { %13027 = vmatmul.mubr.msk.bf16.gmra.mxu1 %vm561_vm0, %v11788_v19  ;;  %v15142_v20 = vsel %vm14839_vm3, %v4057_v8, %v4058_v0  ;;  %v3282_v19 = vrot.slane %v3280_v5, 5  ;;  %v3286_v60 = vrot.slane %v3284_v15, 4  ;;  %v11894_v52 = vrot.slane %v3978_v31, 9  ;;  %v15160_v5 = vld [vmem:[#allocation2 + $0x40] sm:$0xf] }
 0x18f   : > { %13030 = vmatprep.mubr.msk.bf16.mxu1 %vm561_vm0, %v11789_v33  ;;  %v3292_v42 = vrot.slane %v3290_v56, 5  ;;  %v4062_v0 = vrot.slane %v15117_v41, 5  ;;  %v4065_v8 = vrot.slane %v15125_v9, 5  ;;  %v3277_v22 = vor.u32 %v3276_v2, %v3273_v59  ;;  %v15162_v15 = vld [vmem:[#allocation2 + $0x44] sm:$0x1] }
 0x190   : > { %v3287_v21 = vor.u32 %v3286_v60, %v3282_v19  ;;  %v3295_v13 = vshrl.u32 %v3225_v45, 16  ;;  %v3298_v32 = vshll.u32 %v3225_v45, 16  ;;  %v3304_v12 = vshll.u32 %v15046_v16, 16 }
 0x191   : > { %v15156_v7 = vsel %vm14839_vm3, %v11894_v52, %v4062_v0  ;;  %v4064_v33 = vrot.slane %v4062_v0, 4  ;;  %v3308_v31 = vshrl.u32 %v15046_v16, 16  ;;  %v3278_v59 = vrot.slane %v3277_v22, 4  ;;  %v3228_v16 = vld [vmem:[#allocation2 + $0x24] sm:$0xf] }
 0x192   : > { %13079 = vmatmul.mubr.msk.bf16.gmra.mxu0 %vm561_vm0, %v13729_v17  ;;  %v3288_v56 = vrot.slane %v3287_v21, 4  ;;  %v3297_v45 = vrot.slane %v3295_v13, 4  ;;  %v3300_v2 = vrot.slane %v3298_v32, 5  ;;  %v3979_v17 = vld [vmem:[#allocation2 + $0x3c] sm:$0xe]  ;;  %v3306_v60 = vrot.slane %v3304_v12, 5 }
 0x193   : > { %13082 = vmatprep.mubr.msk.bf16.mxu0 %vm561_vm0, %v13731_v3  ;;  %v15167_v52 = vsel %vm14839_vm3, %v4064_v33, %v4065_v8  ;;  %v3310_v0 = vrot.slane %v3308_v31, 4  ;;  %v3314_v39 = vshll.u32 %v15048_v53, 16  ;;  %v3283_v63 = vsel %vm14338_vm9, %v3278_v59, %v3282_v19  ;;  %v13732_v8 = vld [vmem:[#allocation2 + $0xa8] sm:$0xff]  }
 0x194   : > { %v3293_v3 = vsel %vm14338_vm9, %v3288_v56, %v3292_v42  ;;  %v11910_v13 = vcombine.low %v15156_v7, %v15167_v52  ;;  %v3301_v21 = vor.u32 %v3300_v2, %v3297_v45  ;;  %v11895_v33 = vrot.slane %v3979_v17, 9  ;;  %v3980_v59 = vld [vmem:[#allocation2 + $0x48] sm:$0xe]  ;;  %v13734_v56 = vld [vmem:[#allocation2 + $0xb4] sm:$0xff]   ;;  %v15198_v2 = vld [vmem:[#allocation2 + $0x50] sm:$0x1] }
 0x195   : > { %v15180_v22 = vcombine.low %v3283_v63, %v3293_v3  ;;  %v3311_v53 = vor.u32 %v3310_v0, %v3306_v60  ;;  %v3316_v32 = vrot.slane %v3314_v39, 5  ;;  %v4069_v19 = vrot.slane %v15160_v5, 5  ;;  %v3231_v3 = vld [vmem:[#allocation2 + $0x30] sm:$0xf] }
 0x196   : > { %13031 = vmatmul.mubr.msk.bf16.gmra.mxu1 %vm561_vm0, %v11790_v62  ;;  %v3302_v42 = vrot.slane %v3301_v21, 4  ;;  %v4072_v12 = vrot.slane %v15162_v15, 5  ;;  %v3319_v31 = vshrl.u32 %v3228_v16, 16  ;;  %v3322_v62 = vshll.u32 %v3228_v16, 16 }
 0x197   : > { %13034 = vmatprep.mubr.msk.bf16.mxu1 %vm561_vm0, %v11791_v14  ;;  %v3312_v35 = vrot.slane %v3311_v53, 4  ;;  %v3328_v63 = vshll.u32 %v15056_v58, 16  ;;  %v3332_v39 = vshrl.u32 %v15056_v58, 16  ;;  %v15196_v25 = vsel %vm14839_vm3, %v11895_v33, %v4069_v19 }
 0x198   : > { %v3307_v57 = vsel %vm14338_vm9, %v3302_v42, %v3306_v60  ;;  %v4071_v14 = vrot.slane %v4069_v19, 4  ;;  %v3321_v45 = vrot.slane %v3319_v31, 4  ;;  %v3324_v0 = vrot.slane %v3322_v62, 5 }
 0x199   : > { %v3317_v17 = vsel %vm14338_vm9, %v3312_v35, %v3316_v32  ;;  %v3330_v58 = vrot.slane %v3328_v63, 5  ;;  %v3334_v16 = vrot.slane %v3332_v39, 4  ;;  %v3338_v53 = vshll.u32 %v15058_v36, 16 }
 0x19a   : > { %13083 = vmatmul.mubr.msk.bf16.gmra.mxu0 %vm561_vm0, %v13732_v8  ;;  %v15204_v60 = vcombine.low %v3307_v57, %v3317_v17  ;;  %v15208_v21 = vsel %vm14839_vm3, %v4071_v14, %v4072_v12  ;;  %v11896_v33 = vrot.slane %v3980_v59, 9  ;;  %v3325_v42 = vor.u32 %v3324_v0, %v3321_v45  ;;  %v13736_v45 = vld [vmem:[#allocation2 + $0xc0] sm:$0xff]  }
 0x19b   : > { %13086 = vmatprep.mubr.msk.bf16.mxu0 %vm561_vm0, %v13734_v56  ;;  %v11911_v8 = vcombine.low %v15196_v25, %v15208_v21  ;;  %v3335_v32 = vor.u32 %v3334_v16, %v3330_v58  ;;  %v4076_v19 = vrot.slane %v15188_v28, 5  ;;  %v3340_v31 = vrot.slane %v3338_v53, 5  ;;  %v15223_v56 = vld [vmem:[#allocation2 + $0x58] sm:$0xf] }
 0x19c   : > { %v4079_v35 = vrot.slane %v15198_v2, 5  ;;  %v3343_v62 = vshrl.u32 %v3231_v3, 16  ;;  %v3346_v63 = vshll.u32 %v3231_v3, 16  ;;  %v3326_v12 = vrot.slane %v3325_v42, 4 }
 0x19d   : > { %v3336_v36 = vrot.slane %v3335_v32, 4  ;;  %v15221_v39 = vsel %vm14839_vm3, %v11896_v33, %v4076_v19  ;;  %v4078_v59 = vrot.slane %v4076_v19, 4  ;;  %v3352_v48 = vshll.u32 %v15117_v41, 16 }
 0x19e   : > { %13035 = vmatmul.mubr.msk.bf16.gmra.mxu1 %vm561_vm0, %v11792_v51  ;;  %v3345_v57 = vrot.slane %v3343_v62, 4  ;;  %v3348_v14 = vrot.slane %v3346_v63, 5  ;;  %v3356_v61 = vshrl.u32 %v15117_v41, 16  ;;  %v3981_v51 = vld [vmem:[#allocation2 + $0x54] sm:$0xe]  ;;  %v3331_v17 = vsel %vm14338_vm9, %v3326_v12, %v3330_v58 }
 0x19f   : > { %13038 = vmatprep.mubr.msk.bf16.mxu1 %vm561_vm0, %v11793_v6  ;;  %v3341_v0 = vsel %vm14338_vm9, %v3336_v36, %v3340_v31  ;;  %v15237_v16 = vsel %vm14839_vm3, %v4078_v59, %v4079_v35  ;;  %v3362_v50 = vshll.u32 %v15125_v9, 16  ;;  %v3234_v6 = vld [vmem:[#allocation2 + $0x3c] sm:$0xf]  ;;  %v3354_v33 = vrot.slane %v3352_v48, 5  ;;  %v3982_v48 = vld [vmem:[#allocation2 + $0x60] sm:$0xe] }
 0x1a0   : > { %v15242_v3 = vcombine.low %v3331_v17, %v3341_v0  ;;  %v11912_v41 = vcombine.low %v15221_v39, %v15237_v16  ;;  %v3349_v53 = vor.u32 %v3348_v14, %v3345_v57  ;;  %v3358_v58 = vrot.slane %v3356_v61, 4  ;;  %v15258_v14 = vld [vmem:[#allocation2 + $0x64] sm:$0xf]  ;;  %v13741_v39 = vld [vmem:[%s19502_s2 + $0xd0] sm:$0xff]  }
 0x1a1   : > { %v3364_v42 = vrot.slane %v3362_v50, 5  ;;  %v11897_v32 = vrot.slane %v3981_v51, 9  ;;  %v4083_v19 = vrot.slane %v15223_v56, 5  ;;  %v19550_v9 = vcombine.low %v15054_v10, %v15078_v34 }
 0x1a2   : > { %13087 = vmatmul.mubr.msk.bf16.gmra.mxu0 %vm561_vm0, %v13736_v45  ;;  %v3350_v31 = vrot.slane %v3349_v53, 4  ;;  %v4086_v35 = vrot.slane %v15240_v29, 5  ;;  %v3367_v62 = vshrl.u32 %v3234_v6, 16  ;;  %v3370_v63 = vshll.u32 %v3234_v6, 16  ;;  %v15263_v45 = vld [vmem:[#allocation2 + $0x68] sm:$0x1] }
 0x1a3   : > { %13138 = vmatprep.mubr.msk.bf16.mxu0 %vm561_vm0, %v19550_v9  ;;  %v3359_v12 = vor.u32 %v3358_v58, %v3354_v33  ;;  %v15255_v36 = vsel %vm14839_vm3, %v11897_v32, %v4083_v19  ;;  %v4085_v59 = vrot.slane %v4083_v19, 4  ;;  %v3376_v57 = vshll.u32 %v15160_v5, 16 }
 0x1a4   : > { %v3355_v10 = vsel %vm14338_vm9, %v3350_v31, %v3354_v33  ;;  %v3369_v34 = vrot.slane %v3367_v62, 4  ;;  %v3372_v61 = vrot.slane %v3370_v63, 5  ;;  %v3380_v51 = vshrl.u32 %v15160_v5, 16  ;;  %v3237_v33 = vld [vmem:[#allocation2 + $0x48] sm:$0xf] }
 0x1a5   : > { %v19551_v17 = vcombine.low %v15017_v27, %v15029_v11  ;;  %v3360_v0 = vrot.slane %v3359_v12, 4  ;;  %v15271_v50 = vsel %vm14839_vm3, %v4085_v59, %v4086_v35  ;;  %v3378_v6 = vrot.slane %v3376_v57, 5 }
 0x1a6   : > { %v3386_v53 = vshll.u32 %v15162_v15, 16  ;;  %v19552_v58 = vcombine.low %v15022_v49, %v15037_v38  ;;  %v11913_v5 = vcombine.low %v15255_v36, %v15271_v50  ;;  %v3373_v27 = vor.u32 %v3372_v61, %v3369_v34  ;;  %v13744_v49 = vld [vmem:[%s19502_s2 + $0xf0] sm:$0xff]   ;;  %v3983_v34 = vld [vmem:[#allocation2 + $0x6c] sm:$0xe] }
 0x1a7   : > { %13039 = vmatmul.mubr.msk.bf16.gmra.mxu1 %vm561_vm0, %v19551_v17  ;;  %v3382_v11 = vrot.slane %v3380_v51, 4  ;;  %v11898_v32 = vrot.slane %v3982_v48, 9  ;;  %v3365_v19 = vsel %vm14338_vm9, %v3360_v0, %v3364_v42  ;;  %v4090_v31 = vrot.slane %v15258_v14, 5  ;;  %v15305_v17 = vld [vmem:[#allocation2 + $0x74] sm:$0x1] }
 0x1a8   : > { %13042 = vmatprep.mubr.msk.bf16.mxu1 %vm561_vm0, %v19552_v58  ;;  %v3388_v9 = vrot.slane %v3386_v53, 5  ;;  %v4093_v15 = vrot.slane %v15263_v45, 5  ;;  %v15287_v38 = vcombine.low %v3355_v10, %v3365_v19  ;;  %v3374_v35 = vrot.slane %v3373_v27, 4  ;;  %v15320_v27 = vld [vmem:[#allocation2 + $0x70] sm:$0xf] }
 0x1a9   : > { %v3383_v62 = vor.u32 %v3382_v11, %v3378_v6  ;;  %v3391_v63 = vshrl.u32 %v3237_v33, 16  ;;  %v19553_v12 = vcombine.low %v15095_v54, %v15111_v4  ;;  %v15295_v42 = vsel %vm14839_vm3, %v11898_v32, %v4090_v31 }
 0x1aa   : > { %v4092_v59 = vrot.slane %v4090_v31, 4  ;;  %v3394_v57 = vshll.u32 %v3237_v33, 16  ;;  %v3400_v48 = vshll.u32 %v15188_v28, 16  ;;  %v19554_v10 = vcombine.low %v15123_v40, %v15142_v20  ;;  %v3240_v20 = vld [vmem:[#allocation2 + $0x54] sm:$0xf] }
 0x1ab   : > { %13139 = vmatmul.mubr.msk.bf16.vlgmr.msra.gmra.mxu0 %vm561_vm0, %v19553_v12  ;;  %v3379_v61 = vsel %vm14338_vm9, %v3374_v35, %v3378_v6  ;;  %v3384_v54 = vrot.slane %v3383_v62, 4  ;;  %v3393_v4 = vrot.slane %v3391_v63, 4  ;;  %v3404_v51 = vshrl.u32 %v15188_v28, 16  ;;  %v13746_v6 = vld [vmem:[%s19502_s2 + $0xe8] sm:$0xff]  }
 0x1ac   : > { %13142 = vmatprep.mubr.msk.bf16.mxu0 %vm561_vm0, %v19554_v10  ;;  %13211 = vmatpush3.bf16.msra.mxu0 %v14903_v1  ;;  %v15310_v0 = vsel %vm14839_vm3, %v4092_v59, %v4093_v15  ;;  %v3396_v53 = vrot.slane %v3394_v57, 5  ;;  %v3402_v33 = vrot.slane %v3400_v48, 5  ;;  %v3410_v40 = vshll.u32 %v15198_v2, 16 }
 0x1ad   : > { %13212 = vmatprep.subr.bf16.mxu0 %v13744_v49  ;;  %v3389_v28 = vsel %vm14338_vm9, %v3384_v54, %v3388_v9  ;;  %v11914_v1 = vcombine.low %v15295_v42, %v15310_v0  ;;  %v3406_v58 = vrot.slane %v3404_v51, 4  ;;  %v11899_v11 = vrot.slane %v3983_v34, 9 }
 0x1ae   : > { %v19555_v32 = vcombine.low %v15044_v26, %v15066_v24  ;;  %v15326_v2 = vcombine.low %v3379_v61, %v3389_v28  ;;  %v3397_v19 = vor.u32 %v3396_v53, %v3393_v4  ;;  %v3412_v31 = vrot.slane %v3410_v40, 5  ;;  %v3984_v61 = vld [vmem:[#allocation2 + $0x78] sm:$0xe]  ;;  %v15354_v53 = vld [vmem:[#allocation2 + $0x80] sm:$0x1] }
 0x1af   : > { %v4097_v15 = vrot.slane %v15320_v27, 5  ;;  %v19556_v9 = vcombine.low %v15091_v46, %v15102_v18  ;;  %v3407_v35 = vor.u32 %v3406_v58, %v3402_v33  ;;  %v4100_v62 = vrot.slane %v15305_v17, 5  ;;  %v13747_v46 = vld [vmem:[%s19502_s2 + $0xe0] sm:$0xff]  }
 0x1b0   : > { %13043 = vmatmul.mubr.msk.bf16.gmra.mxu1 %vm561_vm0, %v19555_v32  ;;  %v3415_v63 = vshrl.u32 %v3240_v20, 16  ;;  %v3418_v12 = vshll.u32 %v3240_v20, 16  ;;  %13213 = vmatpush3.bf16.msra.mxu0 %v13744_v49  ;;  %v3398_v26 = vrot.slane %v3397_v19, 4  ;;  %v3424_v57 = vshll.u32 %v15223_v56, 16  ;;  %v3243_v40 = vld [vmem:[#allocation2 + $0x60] sm:$0xf] }
 0x1b1   : > { %13046 = vmatprep.mubr.msk.bf16.mxu1 %vm561_vm0, %v19556_v9  ;;  %v15336_v24 = vsel %vm14839_vm3, %v11899_v11, %v4097_v15  ;;  %v4099_v59 = vrot.slane %v4097_v15, 4  ;;  %13214 = vmatprep.subr.bf16.mxu0 %v13746_v6  ;;  %v3408_v18 = vrot.slane %v3407_v35, 4  ;;  %v3428_v10 = vshrl.u32 %v15223_v56, 16  ;;  %v3985_v9 = vld [vmem:[#allocation2 + $0x84] sm:$0xe] }
 0x1b2   : > { %v3417_v48 = vrot.slane %v3415_v63, 4  ;;  %v3420_v34 = vrot.slane %v3418_v12, 5  ;;  %v3403_v49 = vsel %vm14338_vm9, %v3398_v26, %v3402_v33  ;;  %v3426_v4 = vrot.slane %v3424_v57, 5  ;;  %v15364_v33 = vld [vmem:[#allocation2 + $0x7c] sm:$0xf] }
 0x1b3   : > { %13143 = vmatmul.mubr.msk.bf16.gmra.mxu0 %vm561_vm0, %v11910_v13  ;;  %v15351_v54 = vsel %vm14839_vm3, %v4099_v59, %v4100_v62  ;;  %v3434_v51 = vshll.u32 %v15240_v29, 16  ;;  %v3413_v7 = vsel %vm14338_vm9, %v3408_v18, %v3412_v31  ;;  %v3430_v56 = vrot.slane %v3428_v10, 4  ;;  %v3246_v18 = vld [vmem:[#allocation2 + $0x6c] sm:$0xf] }
 0x1b4   : > { %13146 = vmatprep.mubr.msk.bf16.mxu0 %vm561_vm0, %v11911_v8  ;;  %v11915_v52 = vcombine.low %v15336_v24, %v15351_v54  ;;  %v3421_v13 = vor.u32 %v3420_v34, %v3417_v48  ;;  %13215 = vmatpush3.bf16.msra.mxu0 %v13746_v6  ;;  %v15366_v29 = vcombine.low %v3403_v49, %v3413_v7  ;;  %v11900_v28 = vrot.slane %v3984_v61, 9  ;;  %v3252_v54 = vld [vmem:[#allocation2 + $0x84] sm:$0xf] }
 0x1b5   : > { %v3436_v20 = vrot.slane %v3434_v51, 5  ;;  %v4104_v58 = vrot.slane %v15364_v33, 5  ;;  %13216 = vmatprep.subr.bf16.mxu0 %v13747_v46  ;;  %v3431_v21 = vor.u32 %v3430_v56, %v3426_v4  ;;  %v4107_v8 = vrot.slane %v15354_v53, 5 }
 0x1b6   : > { %v3422_v25 = vrot.slane %v3421_v13, 4  ;;  %v3439_v11 = vshrl.u32 %v3243_v40, 16  ;;  %v19557_v32 = vcombine.low %v15115_v55, %v15130_v37  ;;  %v3442_v31 = vshll.u32 %v3243_v40, 16  ;;  %v15384_v37 = vld [vmem:[#allocation2 + $0x8c] sm:$0x1] }
 0x1b7   : > { %v15376_v6 = vsel %vm14839_vm3, %v11900_v28, %v4104_v58  ;;  %v4106_v19 = vrot.slane %v4104_v58, 4  ;;  %v3448_v15 = vshll.u32 %v15258_v14, 16  ;;  %v3432_v62 = vrot.slane %v3431_v21, 4  ;;  %v3986_v28 = vld [vmem:[#allocation2 + $0x90] sm:$0xe] }
 0x1b8   : > { %13047 = vmatmul.mubr.msk.bf16.gmra.mxu1 %vm561_vm0, %v19557_v32  ;;  %v3427_v35 = vsel %vm14338_vm9, %v3422_v25, %v3426_v4  ;;  %v3441_v63 = vrot.slane %v3439_v11, 4  ;;  %v3452_v55 = vshrl.u32 %v15258_v14, 16  ;;  %13217 = vmatpush3.bf16.msra.mxu0 %v13747_v46  ;;  %v3444_v26 = vrot.slane %v3442_v31, 5  ;;  %v15395_v14 = vld [vmem:[#allocation2 + $0x88] sm:$0xf] }
 0x1b9   : > { %13098 = vmatprep.mubr.msk.bf16.mxu1 %vm561_vm0, %v15180_v22  ;;  %v15388_v12 = vsel %vm14839_vm3, %v4106_v19, %v4107_v8  ;;  %v3450_v59 = vrot.slane %v3448_v15, 5  ;;  %v3458_v57 = vshll.u32 %v15263_v45, 16  ;;  %v3437_v22 = vsel %vm14338_vm9, %v3432_v62, %v3436_v20  ;;  %v15427_v11 = vld [vmem:[#allocation2 + $0x98] sm:$0x1]  ;;  %v15436_v15 = vld [vmem:[#allocation2 + $0x94] sm:$0xf] }
 0x1ba   : > { %v11916_v48 = vcombine.low %v15376_v6, %v15388_v12  ;;  %v3454_v34 = vrot.slane %v3452_v55, 4  ;;  %v11901_v10 = vrot.slane %v3985_v9, 9  ;;  %v15401_v46 = vcombine.low %v3427_v35, %v3437_v22  ;;  %v3249_v32 = vld [vmem:[#allocation2 + $0x78] sm:$0xf] }
 0x1bb   : > { %13147 = vmatmul.mubr.msk.bf16.gmra.mxu0 %vm561_vm0, %v11912_v41  ;;  %v3445_v61 = vor.u32 %v3444_v26, %v3441_v63  ;;  %v3460_v45 = vrot.slane %v3458_v57, 5  ;;  %v4111_v49 = vrot.slane %v15395_v14, 5  ;;  %v4114_v51 = vrot.slane %v15384_v37, 5 }
 0x1bc   : > { %13150 = vmatprep.mubr.msk.bf16.mxu0 %vm561_vm0, %v11913_v5  ;;  %v3455_v4 = vor.u32 %v3454_v34, %v3450_v59  ;;  %v3463_v40 = vshrl.u32 %v3246_v18, 16  ;;  %v3466_v7 = vshll.u32 %v3246_v18, 16  ;;  %v3472_v56 = vshll.u32 %v15320_v27, 16  ;;  %v3987_v34 = vld [vmem:[#allocation2 + $0x9c] sm:$0xe] }
 0x1bd   : > { %v3446_v16 = vrot.slane %v3445_v61, 4  ;;  %v15414_v41 = vsel %vm14839_vm3, %v11901_v10, %v4111_v49  ;;  %v4113_v13 = vrot.slane %v4111_v49, 4  ;;  %v3476_v20 = vshrl.u32 %v15320_v27, 16  ;;  %v15461_v61 = vld [vmem:[#allocation2 + $0xa4] sm:$0x1] }
 0x1be   : > { %v3456_v36 = vrot.slane %v3455_v4, 4  ;;  %v3465_v50 = vrot.slane %v3463_v40, 4  ;;  %v3468_v5 = vrot.slane %v3466_v7, 5  ;;  %v3474_v21 = vrot.slane %v3472_v56, 5  ;;  %v15475_v7 = vld [vmem:[#allocation2 + $0xa0] sm:$0xf] }
 0x1bf   : > { %v3451_v58 = vsel %vm14338_vm9, %v3446_v16, %v3450_v59  ;;  %v15424_v25 = vsel %vm14839_vm3, %v4113_v13, %v4114_v51  ;;  %v3482_v8 = vshll.u32 %v15305_v17, 16  ;;  %v3478_v31 = vrot.slane %v3476_v20, 4 }
 0x1c0   : > { %13099 = vmatmul.mubr.msk.bf16.vlgmr.msra.gmra.mxu1 %vm561_vm0, %v15204_v60  ;;  %v3461_v60 = vsel %vm14338_vm9, %v3456_v36, %v3460_v45  ;;  %v11917_v27 = vcombine.low %v15414_v41, %v15424_v25  ;;  %v3469_v19 = vor.u32 %v3468_v5, %v3465_v50  ;;  %v11902_v35 = vrot.slane %v3986_v28, 9 }
 0x1c1   : > { %13171 = vmatpush3.bf16.msra.mxu1 %v15085_v43  ;;  %13102 = vmatprep.mubr.msk.bf16.mxu1 %vm561_vm0, %v15242_v3  ;;  %v15438_v17 = vcombine.low %v3451_v58, %v3461_v60  ;;  %v3484_v9 = vrot.slane %v3482_v8, 5  ;;  %v4118_v43 = vrot.slane %v15436_v15, 5  ;;  %v13742_v3 = vld [vmem:[%s19502_s2 + $0xc8] sm:$0xff]   ;;  %v3479_v63 = vor.u32 %v3478_v31, %v3474_v21  ;;  %v15491_v8 = vld [vmem:[%s19502_s2 + $0x118] sm:$0xff]  }
 0x1c2   : > { %13172 = vmatprep.subr.bf16.mxu1 %v13741_v39  ;;  %v3470_v62 = vrot.slane %v3469_v19, 4  ;;  %v4121_v55 = vrot.slane %v15427_v11, 5  ;;  %v3487_v26 = vshrl.u32 %v3249_v32, 16  ;;  %v3490_v18 = vshll.u32 %v3249_v32, 16  ;;  %v3988_v31 = vld [vmem:[#allocation2 + $0xa8] sm:$0xe] }
 0x1c3   : > { %13151 = vmatmul.mubr.msk.bf16.gmra.mxu0 %vm561_vm0, %v11914_v1  ;;  %v15451_v59 = vsel %vm14839_vm3, %v11902_v35, %v4118_v43  ;;  %v4120_v57 = vrot.slane %v4118_v43, 4  ;;  %v3496_v22 = vshll.u32 %v15364_v33, 16  ;;  %v3480_v0 = vrot.slane %v3479_v63, 4  ;;  %v3255_v63 = vld [vmem:[#allocation2 + $0x90] sm:$0xf] }
 0x1c4   : > { %13154 = vmatprep.mubr.msk.bf16.mxu0 %vm561_vm0, %v11915_v52  ;;  %v3475_v42 = vsel %vm14338_vm9, %v3470_v62, %v3474_v21  ;;  %v3489_v1 = vrot.slane %v3487_v26, 4  ;;  %v3500_v10 = vshrl.u32 %v15364_v33, 16  ;;  %v3492_v49 = vrot.slane %v3490_v18, 5  ;;  %v13745_v52 = vld [vmem:[%s19502_s2 + $0xc0] sm:$0xff]   ;;  %v15503_v62 = vld [vmem:[#allocation2 + $0xb0] sm:$0x1] }
 0x1c5   : > { %13173 = vmatpush3.bf16.msra.mxu1 %v13741_v39  ;;  %v15465_v45 = vsel %vm14839_vm3, %v4120_v57, %v4121_v55  ;;  %v3498_v4 = vrot.slane %v3496_v22, 5  ;;  %v3506_v24 = vshll.u32 %v15354_v53, 16  ;;  %v3485_v51 = vsel %vm14338_vm9, %v3480_v0, %v3484_v9  ;;  %v15511_v55 = vld [vmem:[#allocation2 + $0xac] sm:$0xf] }
 0x1c6   : > { %13174 = vmatprep.subr.bf16.mxu1 %v13742_v3  ;;  %v11918_v33 = vcombine.low %v15451_v59, %v15465_v45  ;;  %v3502_v40 = vrot.slane %v3500_v10, 4  ;;  %v11903_v39 = vrot.slane %v3987_v34, 9  ;;  %v15479_v16 = vcombine.low %v3475_v42, %v3485_v51  ;;  %v3989_v10 = vld [vmem:[#allocation2 + $0xb4] sm:$0xe] }
 0x1c7   : > { %v3493_v53 = vor.u32 %v3492_v49, %v3489_v1  ;;  %v3508_v13 = vrot.slane %v3506_v24, 5  ;;  %v4125_v56 = vrot.slane %v15475_v7, 5  ;;  %v4128_v50 = vrot.slane %v15461_v61, 5 }
 0x1c8   : > { %13103 = vmatmul.mubr.msk.bf16.gmra.mxu1 %vm561_vm0, %v15287_v38  ;;  %v3503_v36 = vor.u32 %v3502_v40, %v3498_v4  ;;  %v3511_v5 = vshrl.u32 %v3252_v54, 16  ;;  %v3514_v20 = vshll.u32 %v3252_v54, 16  ;;  %v3520_v21 = vshll.u32 %v15395_v14, 16 }
 0x1c9   : > { %13106 = vmatprep.mubr.msk.bf16.mxu1 %vm561_vm0, %v15326_v2  ;;  %13175 = vmatpush3.bf16.msra.mxu1 %v13742_v3  ;;  %v3494_v28 = vrot.slane %v3493_v53, 4  ;;  %v4126_v58 = vsel %vm14839_vm3, %v11903_v39, %v4125_v56  ;;  %v4127_v38 = vrot.slane %v4125_v56, 4  ;;  %v3524_v19 = vshrl.u32 %v15395_v14, 16  ;;  %v15533_v53 = vld [vmem:[#allocation2 + $0xbc] sm:$0x1] }
 0x1ca   : > { %13176 = vmatprep.subr.bf16.mxu1 %v13745_v52  ;;  %v3504_v2 = vrot.slane %v3503_v36, 4  ;;  %v3513_v32 = vrot.slane %v3511_v5, 4  ;;  %v3516_v60 = vrot.slane %v3514_v20, 5  ;;  %v3522_v43 = vrot.slane %v3520_v21, 5 }
 0x1cb   : > { %13155 = vmatmul.mubr.msk.bf16.gmra.mxu0 %vm561_vm0, %v11916_v48  ;;  %v3499_v9 = vsel %vm14338_vm9, %v3494_v28, %v3498_v4  ;;  %v4129_v35 = vsel %vm14839_vm3, %v4127_v38, %v4128_v50  ;;  %v3530_v3 = vshll.u32 %v15384_v37, 16  ;;  %v3526_v14 = vrot.slane %v3524_v19, 4  ;;  %v15540_v50 = vld [vmem:[#allocation2 + $0xb8] sm:$0xf] }
 0x1cc   : > { %13158 = vmatprep.mubr.msk.bf16.mxu0 %vm561_vm0, %v11917_v27  ;;  %v3509_v6 = vsel %vm14338_vm9, %v3504_v2, %v3508_v13  ;;  %v11919_v12 = vcombine.low %v4126_v58, %v4129_v35  ;;  %v3517_v48 = vor.u32 %v3516_v60, %v3513_v32  ;;  %v11904_v57 = vrot.slane %v3988_v31, 9 }
 0x1cd   : > { %13177 = vmatpush3.bf16.msra.mxu1 %v13745_v52  ;;  %v15513_v26 = vcombine.low %v3499_v9, %v3509_v6  ;;  %v3532_v37 = vrot.slane %v3530_v3, 5  ;;  %v4132_v18 = vrot.slane %v15511_v55, 5  ;;  %v3527_v25 = vor.u32 %v3526_v14, %v3522_v43  ;;  %v15535_v13 = vpop.f32.mrf.mxu0  ;;  %v3261_v14 = vld [vmem:[#allocation2 + $0xa8] sm:$0xf] }
 0x1ce   : > { %13250 = vmatprep.subr.bf16.mxu1 %v15491_v8  ;;  %v3518_v41 = vrot.slane %v3517_v48, 4  ;;  %v4135_v27 = vrot.slane %v15503_v62, 5  ;;  %v3535_v22 = vshrl.u32 %v3255_v63, 16  ;;  %v3538_v0 = vshll.u32 %v3255_v63, 16  ;;  %v15564_v48 = vld [vmem:[#allocation2 + $0xc8] sm:$0x1] }
 0x1cf   : > { %v15522_v34 = vsel %vm14839_vm3, %v11904_v57, %v4132_v18  ;;  %v4134_v42 = vrot.slane %v4132_v18, 4  ;;  %v3544_v1 = vshll.u32 %v15436_v15, 16  ;;  %v3528_v4 = vrot.slane %v3527_v25, 4  ;;  %v15570_v18 = vld [vmem:[#allocation2 + $0xc4] sm:$0xf] }
 0x1d0   : > { %13107 = vmatmul.mubr.msk.bf16.gmra.mxu1 %vm561_vm0, %v15366_v29  ;;  %v3523_v49 = vsel %vm14338_vm9, %v3518_v41, %v3522_v43  ;;  %v3537_v24 = vrot.slane %v3535_v22, 4  ;;  %v3548_v54 = vshrl.u32 %v15436_v15, 16  ;;  %v3258_v29 = vld [vmem:[#allocation2 + $0x9c] sm:$0xf]  ;;  %v3540_v51 = vrot.slane %v3538_v0, 5 }
 0x1d1   : > { %13110 = vmatprep.mubr.msk.bf16.mxu1 %vm561_vm0, %v15401_v46  ;;  %v4136_v52 = vsel %vm14839_vm3, %v4134_v42, %v4135_v27  ;;  %v3546_v40 = vrot.slane %v3544_v1, 5  ;;  %v3554_v39 = vshll.u32 %v15427_v11, 16  ;;  %v3533_v46 = vsel %vm14338_vm9, %v3528_v4, %v3532_v37  ;;  %v3990_v43 = vld [vmem:[#allocation2 + $0xc0] sm:$0xe] }
 0x1d2   : > { %v11920_v56 = vcombine.low %v15522_v34, %v4136_v52  ;;  %v3550_v36 = vrot.slane %v3548_v54, 4  ;;  %v11905_v15 = vrot.slane %v3989_v10, 9  ;;  %v15546_v5 = vcombine.low %v3523_v49, %v3533_v46 }
 0x1d3   : > { %13159 = vmatmul.mubr.msk.bf16.gmra.mxu0 %vm561_vm0, %v11918_v33  ;;  %v3541_v11 = vor.u32 %v3540_v51, %v3537_v24  ;;  %v3556_v20 = vrot.slane %v3554_v39, 5  ;;  %v4139_v28 = vrot.slane %v15540_v50, 5  ;;  %v4142_v38 = vrot.slane %v15533_v53, 5  ;;  %v15554_v33 = vpop.f32.mrf.mxu0  ;;  %v4858_v24 = vld [vmem:[#allocation2 + $0x18] sm:$0xf] }
 0x1d4   : > { %13162 = vmatprep.mubr.msk.bf16.mxu0 %vm561_vm0, %v11919_v12  ;;  %v3551_v58 = vor.u32 %v3550_v36, %v3546_v40  ;;  %v3559_v21 = vshrl.u32 %v3258_v29, 16  ;;  %v3562_v2 = vshll.u32 %v3258_v29, 16  ;;  %v3568_v45 = vshll.u32 %v15475_v7, 16  ;;  %v15589_v36 = vld [vmem:[#allocation2 + $0x1c] sm:$0xf] }
 0x1d5   : > { %v3542_v32 = vrot.slane %v3541_v11, 4  ;;  %v4140_v60 = vsel %vm14839_vm3, %v11905_v15, %v4139_v28  ;;  %v4141_v59 = vrot.slane %v4139_v28, 4  ;;  %v3572_v35 = vshrl.u32 %v15475_v7, 16  ;;  %v15575_v22 = vpop.f32.mrf.mxu0 }
 0x1d6   : > { %v3552_v19 = vrot.slane %v3551_v58, 4  ;;  %v3561_v31 = vrot.slane %v3559_v21, 4  ;;  %v3564_v9 = vrot.slane %v3562_v2, 5  ;;  %v3570_v6 = vrot.slane %v3568_v45, 5  ;;  %v15595_v58 = vld [vmem:[#allocation2 + $0x20] sm:$0x1] }
 0x1d7   : > { %v3547_v3 = vsel %vm14338_vm9, %v3542_v32, %v3546_v40  ;;  %v4143_v63 = vsel %vm14839_vm3, %v4141_v59, %v4142_v38  ;;  %v3578_v12 = vshll.u32 %v15461_v61, 16  ;;  %v3574_v57 = vrot.slane %v3572_v35, 4  ;;  %v15591_v15 = vpop.f32.mrf.mxu0 }
 0x1d8   : > { %13111 = vmatmul.mubr.msk.bf16.gmra.mxu1 %vm561_vm0, %v15438_v17  ;;  %v3557_v7 = vsel %vm14338_vm9, %v3552_v19, %v3556_v20  ;;  %v11921_v37 = vcombine.low %v4140_v60, %v4143_v63  ;;  %v3565_v17 = vor.u32 %v3564_v9, %v3561_v31  ;;  %v11906_v27 = vrot.slane %v3990_v43, 9 }
 0x1d9   : > { %13114 = vmatprep.mubr.msk.bf16.mxu1 %vm561_vm0, %v15479_v16  ;;  %v15572_v41 = vcombine.low %v3547_v3, %v3557_v7  ;;  %v3580_v25 = vrot.slane %v3578_v12, 5  ;;  %v4146_v61 = vrot.slane %v15570_v18, 5  ;;  %v3575_v42 = vor.u32 %v3574_v57, %v3570_v6 }
 0x1da   : > { %v3566_v34 = vrot.slane %v3565_v17, 4  ;;  %v4149_v16 = vrot.slane %v15564_v48, 5  ;;  %v3583_v0 = vshrl.u32 %v3261_v14, 16  ;;  %v3586_v49 = vshll.u32 %v3261_v14, 16  ;;  %v4861_v17 = vld [vmem:[#allocation2 + $0x24] sm:$0xf] }
 0x1db   : > { %13163 = vmatmul.mubr.msk.bf16.gmra.mxu0 %vm561_vm0, %v11920_v56  ;;  %v4147_v1 = vsel %vm14839_vm3, %v11906_v27, %v4146_v61  ;;  %v4148_v10 = vrot.slane %v4146_v61, 4  ;;  %v3592_v4 = vshll.u32 %v15511_v55, 16  ;;  %v3576_v29 = vrot.slane %v3575_v42, 4 }
 0x1dc   : > { %13166 = vmatprep.mubr.msk.bf16.mxu0 %vm561_vm0, %v11921_v37  ;;  %v3571_v54 = vsel %vm14338_vm9, %v3566_v34, %v3570_v6  ;;  %v3585_v52 = vrot.slane %v3583_v0, 4  ;;  %v3596_v51 = vshrl.u32 %v15511_v55, 16  ;;  %v3588_v39 = vrot.slane %v3586_v49, 5  ;;  %v3264_v55 = vld [vmem:[#allocation2 + $0xb4] sm:$0xf]  ;;  %v15604_v3 = vpop.f32.mrf.mxu0 }
 0x1dd   : > { %v4150_v40 = vsel %vm14839_vm3, %v4148_v10, %v4149_v16  ;;  %v3594_v46 = vrot.slane %v3592_v4, 5  ;;  %v3602_v56 = vshll.u32 %v15503_v62, 16  ;;  %v3581_v11 = vsel %vm14338_vm9, %v3576_v29, %v3580_v25 }
 0x1de   : > { %v11922_v20 = vcombine.low %v4147_v1, %v4150_v40  ;;  %v3598_v28 = vrot.slane %v3596_v51, 4  ;;  %v4907_v38 = vshrl.u32 %v4858_v24, 16  ;;  %v11867_v21 = vcombine.low %v3571_v54, %v3581_v11  ;;  %v15614_v1 = vld [vmem:[#allocation2 + $0x28] sm:$0xf]  ;;  %v15616_v10 = vpop.f32.mrf.mxu0  ;;  %v15618_v54 = vld [vmem:[#allocation2 + $0x2c] sm:$0x1] }
 0x1df   : > { %v3589_v2 = vor.u32 %v3588_v39, %v3585_v52  ;;  %v3604_v32 = vrot.slane %v3602_v56, 5  ;;  %v4910_v62 = vshll.u32 %v4858_v24, 16  ;;  %v4916_v45 = vshll.u32 %v15589_v36, 16 }
 0x1e0   : > { %13115 = vmatmul.mubr.msk.bf16.gmra.mxu1 %vm561_vm0, %v15513_v26  ;;  %v3599_v60 = vor.u32 %v3598_v28, %v3594_v46  ;;  %v4909_v59 = vrot.slane %v4907_v38, 4  ;;  %v4920_v19 = vshrl.u32 %v15589_v36, 16  ;;  %v4926_v35 = vshll.u32 %v15595_v58, 16 }
 0x1e1   : > { %13118 = vmatprep.mubr.msk.bf16.mxu1 %vm561_vm0, %v15546_v5  ;;  %v3590_v31 = vrot.slane %v3589_v2, 4  ;;  %v4912_v9 = vrot.slane %v4910_v62, 5  ;;  %v3607_v43 = vshrl.u32 %v3264_v55, 16  ;;  %v4918_v63 = vrot.slane %v4916_v45, 5  ;;  %v15631_v2 = vpop.f32.mrf.mxu0 }
 0x1e2   : > { %v3600_v26 = vrot.slane %v3599_v60, 4  ;;  %v4922_v6 = vrot.slane %v4920_v19, 4  ;;  %v3610_v12 = vshll.u32 %v3264_v55, 16  ;;  %v4928_v7 = vrot.slane %v4926_v35, 5 }
 0x1e3   : > { %13167 = vmatmul.mubr.msk.bf16.gmra.mxu0 %vm561_vm0, %v11922_v20  ;;  %v3595_v5 = vsel %vm14338_vm9, %v3590_v31, %v3594_v46  ;;  %v4913_v14 = vor.u32 %v4912_v9, %v4909_v59  ;;  %v3609_v37 = vrot.slane %v3607_v43, 4  ;;  %v3616_v61 = vshll.u32 %v15540_v50, 16 }
 0x1e4   : > { %v3605_v57 = vsel %vm14338_vm9, %v3600_v26, %v3604_v32  ;;  %v4923_v25 = vor.u32 %v4922_v6, %v4918_v63  ;;  %v3612_v27 = vrot.slane %v3610_v12, 5  ;;  %v3620_v16 = vshrl.u32 %v15540_v50, 16 }
 0x1e5   : > { %v11868_v34 = vcombine.low %v3595_v5, %v3605_v57  ;;  %v4914_v42 = vrot.slane %v4913_v14, 4  ;;  %v3626_v0 = vshll.u32 %v15533_v53, 16  ;;  %v3618_v24 = vrot.slane %v3616_v61, 5  ;;  %v3267_v53 = vld [vmem:[#allocation2 + $0xc0] sm:$0xf] }
 0x1e6   : > { %v4924_v49 = vrot.slane %v4923_v25, 4  ;;  %v3613_v4 = vor.u32 %v3612_v27, %v3609_v37  ;;  %v4931_v29 = vshrl.u32 %v4861_v17, 16  ;;  %v3622_v51 = vrot.slane %v3620_v16, 4 }
 0x1e7   : > { %v4919_v52 = vsel %vm14338_vm9, %v4914_v42, %v4918_v63  ;;  %v3628_v50 = vrot.slane %v3626_v0, 5  ;;  %v4934_v40 = vshll.u32 %v4861_v17, 16  ;;  %v4940_v11 = vshll.u32 %v15614_v1, 16  ;;  %v4864_v63 = vld [vmem:[#allocation2 + $0x30] sm:$0xf]  ;;  %v15645_v17 = vpop.f32.mrf.mxu0 }
 0x1e8   : > { %13119 = vmatmul.mubr.msk.bf16.gmra.mxu1 %vm561_vm0, %v15572_v41  ;;  %v4929_v39 = vsel %vm14338_vm9, %v4924_v49, %v4928_v7  ;;  %v3614_v46 = vrot.slane %v3613_v4, 4  ;;  %v4933_v56 = vrot.slane %v4931_v29, 4  ;;  %v3623_v28 = vor.u32 %v3622_v51, %v3618_v24  ;;  %v15629_v55 = vpop.f32.mrf.mxu1  ;;  %v15641_v7 = vld [vmem:[#allocation2 + $0x34] sm:$0xf]  ;;  %v15651_v0 = vld [vmem:[#allocation2 + $0x38] sm:$0x1] }
 0x1e9   : > { %13122 = vmatprep.mubr.msk.bf16.mxu1 %vm561_vm0, %v11867_v21  ;;  %v11979_v20 = vcombine.low %v4919_v52, %v4929_v39  ;;  %v4936_v38 = vrot.slane %v4934_v40, 5  ;;  %v4944_v41 = vshrl.u32 %v15614_v1, 16  ;;  %v4942_v21 = vrot.slane %v4940_v11, 5  ;;  %v4867_v51 = vld [vmem:[#allocation2 + $0x3c] sm:$0xf] }
 0x1ea   : > { %v3619_v32 = vsel %vm14338_vm9, %v3614_v46, %v3618_v24  ;;  %v4950_v62 = vshll.u32 %v15618_v54, 16  ;;  %v3631_v60 = vshrl.u32 %v3267_v53, 16  ;;  %v3624_v59 = vrot.slane %v3623_v28, 4  ;;  %v15643_v37 = vpop.f32.mrf.mxu1 }
 0x1eb   : > { %13218 = vmatprep.mubr.msk.bf16.mxu0 %vm561_vm0, %v11979_v20  ;;  %v4937_v45 = vor.u32 %v4936_v38, %v4933_v56  ;;  %v4946_v19 = vrot.slane %v4944_v41, 4  ;;  %v3634_v31 = vshll.u32 %v3267_v53, 16  ;;  %v3640_v43 = vshll.u32 %v15570_v18, 16  ;;  %v15658_v53 = vld [vmem:[#allocation2 + $0x40] sm:$0xf] }
 0x1ec   : > { %v4952_v9 = vrot.slane %v4950_v62, 5  ;;  %v3633_v35 = vrot.slane %v3631_v60, 4  ;;  %v3644_v26 = vshrl.u32 %v15570_v18, 16  ;;  %v3629_v6 = vsel %vm14338_vm9, %v3624_v59, %v3628_v50  ;;  %v12941_v39 = vpop.f32.mrf.mxu1  ;;  %v15668_v59 = vld [vmem:[#allocation2 + $0x44] sm:$0x1] }
 0x1ed   : > { %v4938_v12 = vrot.slane %v4937_v45, 4  ;;  %v4947_v5 = vor.u32 %v4946_v19, %v4942_v21  ;;  %v3636_v14 = vrot.slane %v3634_v31, 5  ;;  %v11869_v57 = vcombine.low %v3619_v32, %v3629_v6  ;;  %v15660_v46 = vpop.f32.mrf.mxu0  ;;  %v4870_v31 = vld [vmem:[#allocation2 + $0x48] sm:$0xf] }
 0x1ee   : > { %v3642_v25 = vrot.slane %v3640_v43, 5  ;;  %v3646_v27 = vrot.slane %v3644_v26, 4  ;;  %v3650_v61 = vshll.u32 %v15564_v48, 16  ;;  %v4955_v49 = vshrl.u32 %v4864_v63, 16  ;;  %v13748_v26 = vld [vmem:[#allocation2 + $0x18] sm:$0xff]   ;;  %v1916_v6 = vpop.f32.mrf.mxu1 }
 0x1ef   : > { %v4943_v18 = vsel %vm14338_vm9, %v4938_v12, %v4942_v21  ;;  %v4948_v42 = vrot.slane %v4947_v5, 4  ;;  %v3637_v16 = vor.u32 %v3636_v14, %v3633_v35  ;;  %v4958_v29 = vshll.u32 %v4864_v63, 16  ;;  %v15671_v12 = vpop.f32.mrf.mxu0 }
 0x1f0   : > { %13123 = vmatmul.mubr.msk.bf16.gmra.mxu1 %vm561_vm0, %v11868_v34  ;;  %v3647_v4 = vor.u32 %v3646_v27, %v3642_v25  ;;  %v3652_v24 = vrot.slane %v3650_v61, 5  ;;  %v4964_v52 = vshll.u32 %v15641_v7, 16  ;;  %v4957_v50 = vrot.slane %v4955_v49, 4  ;;  %v15674_v27 = vld [vmem:[#allocation2 + $0x4c] sm:$0xf] }
 0x1f1   : > { %13126 = vmatprep.mubr.msk.bf16.mxu1 %vm561_vm0, %v11869_v57  ;;  %v4953_v48 = vsel %vm14338_vm9, %v4948_v42, %v4952_v9  ;;  %v3638_v34 = vrot.slane %v3637_v16, 4  ;;  %v4968_v40 = vshrl.u32 %v15641_v7, 16  ;;  %v4960_v20 = vrot.slane %v4958_v29, 5  ;;  %v15685_v29 = vld [vmem:[#allocation2 + $0x50] sm:$0x1] }
 0x1f2   : > { %v11980_v56 = vcombine.low %v4943_v18, %v4953_v48  ;;  %v3648_v11 = vrot.slane %v3647_v4, 4  ;;  %v4966_v28 = vrot.slane %v4964_v52, 5  ;;  %v4974_v32 = vshll.u32 %v15651_v0, 16 }
 0x1f3   : > { %v3643_v38 = vsel %vm14338_vm9, %v3638_v34, %v3642_v25  ;;  %v4970_v41 = vrot.slane %v4968_v40, 4  ;;  %v4979_v21 = vshrl.u32 %v4867_v51, 16  ;;  %v4961_v60 = vor.u32 %v4960_v20, %v4957_v50 }
 0x1f4   : > { %13219 = vmatmul.mubr.msk.bf16.vlgmr.msra.gmra.mxu0 %vm561_vm0, %v11980_v56  ;;  %v3653_v62 = vsel %vm14338_vm9, %v3648_v11, %v3652_v24  ;;  %v4982_v45 = vshll.u32 %v4867_v51, 16  ;;  %v4988_v19 = vshll.u32 %v15658_v53, 16  ;;  %v4976_v43 = vrot.slane %v4974_v32, 5 }
 0x1f5   : > { %v11870_v9 = vcombine.low %v3643_v38, %v3653_v62  ;;  %v4971_v35 = vor.u32 %v4970_v41, %v4966_v28  ;;  %v4981_v63 = vrot.slane %v4979_v21, 4  ;;  %v4962_v5 = vrot.slane %v4961_v60, 4  ;;  %v15698_v62 = vld [vmem:[#allocation2 + $0x58] sm:$0xf] }
 0x1f6   : > { %v4984_v14 = vrot.slane %v4982_v45, 5  ;;  %v4990_v57 = vrot.slane %v4988_v19, 5  ;;  %v4992_v25 = vshrl.u32 %v15658_v53, 16  ;;  %v4998_v18 = vshll.u32 %v15668_v59, 16 }
 0x1f7   : > { %v4972_v61 = vrot.slane %v4971_v35, 4  ;;  %v15680_v42 = vadd.f32 %v15535_v13, %v15629_v55  ;;  %v5003_v16 = vshrl.u32 %v4870_v31, 16  ;;  %v4967_v49 = vsel %vm14338_vm9, %v4962_v5, %v4966_v28  ;;  %v15690_v55 = vpop.f32.mrf.mxu0  ;;  %v4873_v28 = vld [vmem:[#allocation2 + $0x54] sm:$0xf] }
 0x1f8   : > { %13127 = vmatmul.mubr.msk.bf16.gmra.mxu1 %vm561_vm0, %v11870_v9  ;;  %v4985_v4 = vor.u32 %v4984_v14, %v4981_v63  ;;  %v4994_v24 = vrot.slane %v4992_v25, 4  ;;  %v5006_v52 = vshll.u32 %v4870_v31, 16  ;;  %v5000_v48 = vrot.slane %v4998_v18, 5  ;;  %v12944_v13 = vpop.f32.mrf.mxu1  ;;  %v13750_v31 = vld [vmem:[#allocation2 + $0x24] sm:$0xff]   ;;  %v13754_v14 = vld [vmem:[%s19502_s2 + $0x110] sm:$0xff]  }
 0x1f9   : > { %13178 = vmatprep.mubr.msk.bf16.mxu1 %vm561_vm0, %v13748_v26  ;;  %v4977_v51 = vsel %vm14338_vm9, %v4972_v61, %v4976_v43  ;;  %v5005_v34 = vrot.slane %v5003_v16, 4  ;;  %v5012_v50 = vshll.u32 %v15674_v27, 16  ;;  %v5016_v41 = vshrl.u32 %v15674_v27, 16  ;;  %v15711_v5 = vpop.f32.mrf.mxu0  ;;  %v4876_v18 = vld [vmem:[#allocation2 + $0x60] sm:$0xf] }
 0x1fa   : > { %v11981_v40 = vcombine.low %v4967_v49, %v4977_v51  ;;  %v4986_v56 = vrot.slane %v4985_v4, 4  ;;  %v4995_v11 = vor.u32 %v4994_v24, %v4990_v57  ;;  %v5008_v20 = vrot.slane %v5006_v52, 5  ;;  %v1929_v60 = vpop.f32.mrf.mxu1  ;;  %v15721_v4 = vld [vmem:[#allocation2 + $0x64] sm:$0xf] }
 0x1fb   : > { %v5014_v38 = vrot.slane %v5012_v50, 5  ;;  %v5022_v32 = vshll.u32 %v15685_v29, 16  ;;  %v15696_v21 = vadd.f32 %v15554_v33, %v15643_v37  ;;  %v15704_v35 = vadd.f32 %v15575_v22, %v12941_v39  ;;  %v15709_v33 = vld [vmem:[#allocation2 + $0x5c] sm:$0x1]  ;;  %v13751_v22 = vld [vmem:[#allocation2 + $0x30] sm:$0xff]  }
 0x1fc   : > { %13222 = vmatprep.mubr.msk.bf16.mxu0 %vm561_vm0, %v11981_v40  ;;  %v4991_v45 = vsel %vm14338_vm9, %v4986_v56, %v4990_v57  ;;  %v4996_v19 = vrot.slane %v4995_v11, 4  ;;  %v5009_v9 = vor.u32 %v5008_v20, %v5005_v34  ;;  %v5018_v43 = vrot.slane %v5016_v41, 4  ;;  %v12945_v24 = vpop.f32.mrf.mxu1  ;;  %v15737_v41 = vld [vmem:[#allocation2 + $0x68] sm:$0x1] }
 0x1fd   : > { %v5024_v26 = vrot.slane %v5022_v32, 5  ;;  %v15707_v63 = vadd.f32 %v15591_v15, %v1916_v6  ;;  %v5027_v37 = vshrl.u32 %v4873_v28, 16  ;;  %v5030_v39 = vshll.u32 %v4873_v28, 16 }
 0x1fe   : > { %v5001_v57 = vsel %vm14338_vm9, %v4996_v19, %v5000_v48  ;;  %v5010_v25 = vrot.slane %v5009_v9, 4  ;;  %v5036_v61 = vshll.u32 %v15698_v62, 16  ;;  %v5019_v6 = vor.u32 %v5018_v43, %v5014_v38  ;;  %v1932_v9 = vpop.f32.mrf.mxu1 }
 0x1ff   : > { %v11982_v15 = vcombine.low %v4991_v45, %v5001_v57  ;;  %v5029_v16 = vrot.slane %v5027_v37, 4  ;;  %v5040_v49 = vshrl.u32 %v15698_v62, 16  ;;  %v5032_v51 = vrot.slane %v5030_v39, 5 }
 0x200   : > { %13179 = vmatmul.mubr.msk.bf16.vlgmr.msra.gmra.mxu1 %vm561_vm0, %v13750_v31  ;;  %v5015_v52 = vsel %vm14338_vm9, %v5010_v25, %v5014_v38  ;;  %v5038_v48 = vrot.slane %v5036_v61, 5  ;;  %v5046_v34 = vshll.u32 %v15709_v33, 16  ;;  %v5020_v50 = vrot.slane %v5019_v6, 4  ;;  %v15732_v20 = vpop.f32.mrf.mxu0  ;;  %v13752_v25 = vld [vmem:[#allocation2 + $0x3c] sm:$0xff]   ;;  %v4879_v61 = vld [vmem:[#allocation2 + $0x6c] sm:$0xf] }
 0x201   : > { %13251 = vmatpush3.bf16.msra.mxu1 %v15491_v8  ;;  %13182 = vmatprep.mubr.msk.bf16.mxu1 %vm561_vm0, %v13751_v22  ;;  %v5042_v40 = vrot.slane %v5040_v49, 4  ;;  %v15730_v56 = vadd.f32 %v15604_v3, %v12944_v13  ;;  %v5051_v11 = vshrl.u32 %v4876_v18, 16  ;;  %v13759_v8 = vld [vmem:[%s19502_s2 + $0x108] sm:$0xff]   ;;  %v5033_v28 = vor.u32 %v5032_v51, %v5029_v16  ;;  %v15749_v16 = vld [vmem:[#allocation2 + $0x70] sm:$0xf] }
 0x202   : > { %13223 = vmatmul.mubr.msk.bf16.gmra.mxu0 %vm561_vm0, %v11982_v15  ;;  %13252 = vmatprep.subr.bf16.mxu1 %v13754_v14  ;;  %v5048_v38 = vrot.slane %v5046_v34, 5  ;;  %v5054_v32 = vshll.u32 %v4876_v18, 16  ;;  %v5060_v45 = vshll.u32 %v15721_v4, 16  ;;  %v5025_v19 = vsel %vm14338_vm9, %v5020_v50, %v5024_v26  ;;  %v15743_v43 = vpop.f32.mrf.mxu0  ;;  %v13753_v34 = vld [vmem:[#allocation2 + $0x48] sm:$0xff]  }
 0x203   : > { %v5043_v3 = vor.u32 %v5042_v40, %v5038_v48  ;;  %v5053_v13 = vrot.slane %v5051_v11, 4  ;;  %v5064_v31 = vshrl.u32 %v15721_v4, 16  ;;  %v11983_v37 = vcombine.low %v5015_v52, %v5025_v19  ;;  %v13764_v52 = vld [vmem:[%s19502_s2 + $0x100] sm:$0xff]  }
 0x204   : > { %v5034_v57 = vrot.slane %v5033_v28, 4  ;;  %v5056_v22 = vrot.slane %v5054_v32, 5  ;;  %v5062_v39 = vrot.slane %v5060_v45, 5  ;;  %v5070_v6 = vshll.u32 %v15737_v41, 16  ;;  %v15751_v49 = vpop.f32.mrf.mxu0  ;;  %v4882_v45 = vld [vmem:[#allocation2 + $0x78] sm:$0xf] }
 0x205   : > { %13253 = vmatpush3.bf16.msra.mxu1 %v13754_v14  ;;  %v5044_v18 = vrot.slane %v5043_v3, 4  ;;  %v5066_v15 = vrot.slane %v5064_v31, 4  ;;  %v15747_v26 = vadd.f32 %v15616_v10, %v1929_v60  ;;  %13226 = vmatprep.mubr.msk.bf16.mxu0 %vm561_vm0, %v11983_v37  ;;  %v15760_v50 = vadd.f32 %v15631_v2, %v12945_v24  ;;  %v15765_v60 = vld [vmem:[#allocation2 + $0x74] sm:$0x1] }
 0x206   : > { %13254 = vmatprep.subr.bf16.mxu1 %v13759_v8  ;;  %v5039_v14 = vsel %vm14338_vm9, %v5034_v57, %v5038_v48  ;;  %v5057_v51 = vor.u32 %v5056_v22, %v5053_v13  ;;  %v15763_v10 = vadd.f32 %v15645_v17, %v1932_v9  ;;  %v5072_v28 = vrot.slane %v5070_v6, 5  ;;  %v15770_v48 = vpop.f32.mrf.mxu0  ;;  %v15776_v9 = vld [vmem:[#allocation2 + $0x7c] sm:$0xf] }
 0x207   : > { %19558 = vst [vmem:[#allocation11_spill] sm:$0xff] %v15747_v26  ;;  %19559 = vst [vmem:[#allocation12_spill] sm:$0xff] %v15760_v50  ;;  %v5049_v40 = vsel %vm14338_vm9, %v5044_v18, %v5048_v38  ;;  %v5067_v11 = vor.u32 %v5066_v15, %v5062_v39  ;;  %v5075_v32 = vshrl.u32 %v4879_v61, 16  ;;  %v5078_v2 = vshll.u32 %v4879_v61, 16  ;;  %v15783_v61 = vld [vmem:[#allocation2 + $0x80] sm:$0x1] }
 0x208   : > { %19560 = vst [vmem:[#allocation13_spill] sm:$0xff] %v15763_v10  ;;  %13183 = vmatmul.mubr.msk.bf16.gmra.mxu1 %vm561_vm0, %v13752_v25  ;;  %v11984_v19 = vcombine.low %v5039_v14, %v5049_v40  ;;  %v5058_v3 = vrot.slane %v5057_v51, 4  ;;  %v5084_v17 = vshll.u32 %v15749_v16, 16  ;;  %v5088_v38 = vshrl.u32 %v15749_v16, 16  ;;  %v15778_v37 = vpop.f32.mrf.mxu0  ;;  %v13761_v50 = vld [vmem:[#allocation2 + $0x90] sm:$0xff]  }
 0x209   : > { %13186 = vmatprep.mubr.msk.bf16.mxu1 %vm561_vm0, %v13753_v34  ;;  %13255 = vmatpush3.bf16.msra.mxu1 %v13759_v8  ;;  %v5068_v24 = vrot.slane %v5067_v11, 4  ;;  %v5077_v13 = vrot.slane %v5075_v32, 4  ;;  %v5094_v31 = vshll.u32 %v15765_v60, 16  ;;  %v5080_v25 = vrot.slane %v5078_v2, 5  ;;  %v4885_v34 = vld [vmem:[#allocation2 + $0x84] sm:$0xf] }
 0x20a   : > { %13256 = vmatprep.subr.bf16.mxu1 %v13764_v52  ;;  %13227 = vmatmul.mubr.msk.bf16.gmra.mxu0 %vm561_vm0, %v11984_v19  ;;  %v5063_v57 = vsel %vm14338_vm9, %v5058_v3, %v5062_v39  ;;  %v5086_v22 = vrot.slane %v5084_v17, 5  ;;  %v5099_v8 = vshrl.u32 %v4882_v45, 16  ;;  %v5090_v15 = vrot.slane %v5088_v38, 4  ;;  %v12948_v14 = vpop.f32.mrf.mxu1  ;;  %v15787_v40 = vpop.f32.mrf.mxu0  ;;  %v13755_v2 = vld [vmem:[#allocation2 + $0x54] sm:$0xff]  }
 0x20b   : > { %v5073_v18 = vsel %vm14338_vm9, %v5068_v24, %v5072_v28  ;;  %v5096_v6 = vrot.slane %v5094_v31, 5  ;;  %v5102_v51 = vshll.u32 %v4882_v45, 16  ;;  %v5081_v32 = vor.u32 %v5080_v25, %v5077_v13  ;;  %v13756_v31 = vld [vmem:[#allocation2 + $0x60] sm:$0xff]  }
 0x20c   : > { %v11985_v11 = vcombine.low %v5063_v57, %v5073_v18  ;;  %v15790_v19 = vadd.f32 %v15660_v46, %v12948_v14  ;;  %v5101_v39 = vrot.slane %v5099_v8, 4  ;;  %v5091_v3 = vor.u32 %v5090_v15, %v5086_v22  ;;  %v1945_v24 = vpop.f32.mrf.mxu1  ;;  %v15794_v38 = vpop.f32.mrf.mxu0  ;;  %v15802_v14 = vld [vmem:[#allocation2 + $0x88] sm:$0xf] }
 0x20d   : > { %13257 = vmatpush3.bf16.msra.mxu1 %v13764_v52  ;;  %v5104_v17 = vrot.slane %v5102_v51, 5  ;;  %v5108_v23 = vshll.u32 %v15776_v9, 16  ;;  %v5112_v28 = vshrl.u32 %v15776_v9, 16  ;;  %v5082_v45 = vrot.slane %v5081_v32, 4 }
 0x20e   : > { %19561 = vst [vmem:[#allocation14_spill] sm:$0xff] %v15790_v19  ;;  %13230 = vmatprep.mubr.msk.bf16.mxu0 %vm561_vm0, %v11985_v11  ;;  %v5118_v13 = vshll.u32 %v15783_v61, 16  ;;  %v15799_v46 = vadd.f32 %v15671_v12, %v1945_v24  ;;  %v5123_v52 = vshrl.u32 %v4885_v34, 16  ;;  %v5092_v57 = vrot.slane %v5091_v3, 4  ;;  %v12949_v15 = vpop.f32.mrf.mxu1  ;;  %v15804_v51 = vpop.f32.mrf.mxu0  ;;  %v15812_v3 = vld [vmem:[#allocation2 + $0x8c] sm:$0x1] }
 0x20f   : > { %v5105_v25 = vor.u32 %v5104_v17, %v5101_v39  ;;  %v5110_v8 = vrot.slane %v5108_v23, 5  ;;  %v5114_v18 = vrot.slane %v5112_v28, 4  ;;  %19563 = vst [vmem:[#allocation16_spill] sm:$0xff] %v15804_v51  ;;  %v5087_v11 = vsel %vm14338_vm9, %v5082_v45, %v5086_v22 }
 0x210   : > { %19562 = vst [vmem:[#allocation15_spill] sm:$0xff] %v15799_v46  ;;  %13187 = vmatmul.mubr.msk.bf16.gmra.mxu1 %vm561_vm0, %v13755_v2  ;;  %v5120_v32 = vrot.slane %v5118_v13, 5  ;;  %v15810_v12 = vadd.f32 %v15690_v55, %v12949_v15  ;;  %v5125_v2 = vrot.slane %v5123_v52, 4  ;;  %v5097_v23 = vsel %vm14338_vm9, %v5092_v57, %v5096_v6  ;;  %v1948_v28 = vpop.f32.mrf.mxu1  ;;  %v15816_v51 = vpop.f32.mrf.mxu0 }
 0x211   : > { %13190 = vmatprep.mubr.msk.bf16.mxu1 %vm561_vm0, %v13756_v31  ;;  %v5106_v39 = vrot.slane %v5105_v25, 4  ;;  %v5115_v17 = vor.u32 %v5114_v18, %v5110_v8  ;;  %v5126_v24 = vshll.u32 %v4885_v34, 16  ;;  %v11986_v22 = vcombine.low %v5087_v11, %v5097_v23  ;;  %v15826_v34 = vld [vmem:[#allocation2 + $0x94] sm:$0xf]  ;;  %v15834_v23 = vld [vmem:[#allocation2 + $0x98] sm:$0x1] }
 0x212   : > { %19564 = vst [vmem:[#allocation17_spill] sm:$0xff] %v15810_v12  ;;  %v15819_v45 = vadd.f32 %v15711_v5, %v1948_v28  ;;  %v5132_v55 = vshll.u32 %v15802_v14, 16  ;;  %v5136_v13 = vshrl.u32 %v15802_v14, 16  ;;  %v5142_v57 = vshll.u32 %v15812_v3, 16  ;;  %v12952_v25 = vpop.f32.mrf.mxu1  ;;  %v15828_v18 = vpop.f32.mrf.mxu0 }
 0x213   : > { %v5111_v31 = vsel %vm14338_vm9, %v5106_v39, %v5110_v8  ;;  %v5116_v52 = vrot.slane %v5115_v17, 4  ;;  %v5128_v6 = vrot.slane %v5126_v24, 5  ;;  %13231 = vmatmul.mubr.msk.bf16.gmra.mxu0 %vm561_vm0, %v11986_v22  ;;  %v15832_v11 = vadd.f32 %v15732_v20, %v12952_v25  ;;  %v13757_v24 = vld [vmem:[#allocation2 + $0x6c] sm:$0xff]   ;;  %v13758_v20 = vld [vmem:[#allocation2 + $0x78] sm:$0xff]  }
 0x214   : > { %19565 = vst [vmem:[#allocation18_spill] sm:$0xff] %v15819_v45  ;;  %v5134_v5 = vrot.slane %v5132_v55, 5  ;;  %v5138_v15 = vrot.slane %v5136_v13, 4  ;;  %v5147_v28 = vshrl.u32 %v4888_v30, 16  ;;  %v5144_v17 = vrot.slane %v5142_v57, 5  ;;  %v1961_v12 = vpop.f32.mrf.mxu1  ;;  %v15838_v46 = vpop.f32.mrf.mxu0 }
 0x215   : > { %19566 = vst [vmem:[#allocation19_spill] sm:$0xff] %v15832_v11  ;;  %v5121_v8 = vsel %vm14338_vm9, %v5116_v52, %v5120_v32  ;;  %v5129_v39 = vor.u32 %v5128_v6, %v5125_v2  ;;  %v5150_v45 = vshll.u32 %v4888_v30, 16  ;;  %v5156_v13 = vshll.u32 %v15826_v34, 16  ;;  %v4891_v52 = vld [vmem:[#allocation2 + $0x9c] sm:$0xf] }
 0x216   : > { %v11987_v19 = vcombine.low %v5111_v31, %v5121_v8  ;;  %v5139_v22 = vor.u32 %v5138_v15, %v5134_v5  ;;  %v5149_v55 = vrot.slane %v5147_v28, 4  ;;  %v5160_v10 = vshrl.u32 %v15826_v34, 16  ;;  %v12953_v2 = vpop.f32.mrf.mxu1  ;;  %v15844_v30 = vpop.f32.mrf.mxu0 }
 0x217   : > { %v5130_v25 = vrot.slane %v5129_v39, 4  ;;  %v5152_v11 = vrot.slane %v5150_v45, 5  ;;  %v5166_v32 = vshll.u32 %v15834_v23, 16  ;;  %19567 = vst [vmem:[#allocation20_spill] sm:$0xff] %v15844_v30  ;;  %v5158_v6 = vrot.slane %v5156_v13, 5 }
 0x218   : > { %13191 = vmatmul.mubr.msk.bf16.gmra.mxu1 %vm561_vm0, %v13757_v24  ;;  %13234 = vmatprep.mubr.msk.bf16.mxu0 %vm561_vm0, %v11987_v19  ;;  %v5140_v31 = vrot.slane %v5139_v22, 4  ;;  %v15849_v57 = vadd.f32 %v15743_v43, %v1961_v12  ;;  %v15852_v15 = vadd.f32 %v15751_v49, %v12953_v2  ;;  %v15854_v45 = vld [vmem:[#allocation2 + $0xa0] sm:$0xf]  ;;  %v5162_v39 = vrot.slane %v5160_v10, 4  ;;  %v1964_v30 = vpop.f32.mrf.mxu1  ;;  %v15858_v19 = vld [vmem:[#allocation2 + $0xa4] sm:$0x1] }
 0x219   : > { %13194 = vmatprep.mubr.msk.bf16.mxu1 %vm561_vm0, %v13758_v20  ;;  %19570 = vst [vmem:[#allocation23_spill] sm:$0xff] %v15854_v45  ;;  %v5135_v28 = vsel %vm14338_vm9, %v5130_v25, %v5134_v5  ;;  %v5153_v8 = vor.u32 %v5152_v11, %v5149_v55  ;;  %v5168_v24 = vrot.slane %v5166_v32, 5  ;;  %19571 = vst [vmem:[#allocation24_spill] sm:$0xff] %v15858_v19  ;;  %v5171_v12 = vshrl.u32 %v4891_v52, 16  ;;  %v4894_v13 = vld [vmem:[#allocation2 + $0xa8] sm:$0xf]  ;;  %v15865_v20 = vpop.f32.mrf.mxu0 }
 0x21a   : > { %19568 = vst [vmem:[#allocation21_spill] sm:$0xff] %v15849_v57  ;;  %19569 = vst [vmem:[#allocation22_spill] sm:$0xff] %v15852_v15  ;;  %v5145_v22 = vsel %vm14338_vm9, %v5140_v31, %v5144_v17  ;;  %v15863_v43 = vadd.f32 %v15770_v48, %v1964_v30  ;;  %v5174_v49 = vshll.u32 %v4891_v52, 16  ;;  %v5163_v5 = vor.u32 %v5162_v39, %v5158_v6  ;;  %v15870_v17 = vld [vmem:[#allocation2 + $0xac] sm:$0xf] }
 0x21b   : > { %v11988_v2 = vcombine.low %v5135_v28, %v5145_v22  ;;  %v5154_v15 = vrot.slane %v5153_v8, 4  ;;  %v5180_v10 = vshll.u32 %v15854_v45, 16  ;;  %v5173_v11 = vrot.slane %v5171_v12, 4  ;;  %19573 = vst [vmem:[#allocation26_spill] sm:$0xff] %v15870_v17  ;;  %v15872_v48 = vpop.f32.mrf.mxu0  ;;  %v13760_v8 = vld [vmem:[#allocation2 + $0x84] sm:$0xff]  }
 0x21c   : > { %19572 = vst [vmem:[#allocation25_spill] sm:$0xff] %v15863_v43  ;;  %v5176_v55 = vrot.slane %v5174_v49, 5  ;;  %v5184_v25 = vshrl.u32 %v15854_v45, 16  ;;  %v5190_v32 = vshll.u32 %v15858_v19, 16  ;;  %v5164_v30 = vrot.slane %v5163_v5, 4  ;;  %v12956_v28 = vpop.f32.mrf.mxu1 }
 0x21d   : > { %13235 = vmatmul.mubr.msk.bf16.gmra.mxu0 %vm561_vm0, %v11988_v2  ;;  %v5159_v52 = vsel %vm14338_vm9, %v5154_v15, %v5158_v6  ;;  %v5182_v31 = vrot.slane %v5180_v10, 5  ;;  %v5195_v39 = vshrl.u32 %v4894_v13, 16  ;;  %v15878_v43 = vadd.f32 %v15778_v37, %v12956_v28  ;;  %v15880_v57 = vld [vmem:[#allocation2 + $0xb0] sm:$0x1]  ;;  %v15882_v26 = vpop.f32.mrf.mxu0 }
 0x21e   : > { %v5177_v22 = vor.u32 %v5176_v55, %v5173_v11  ;;  %v5186_v12 = vrot.slane %v5184_v25, 4  ;;  %v5192_v49 = vrot.slane %v5190_v32, 5  ;;  %19575 = vst [vmem:[#allocation28_spill] sm:$0xff] %v15880_v57  ;;  %v5169_v2 = vsel %vm14338_vm9, %v5164_v30, %v5168_v24  ;;  %v1977_v10 = vpop.f32.mrf.mxu1  ;;  %v4897_v32 = vld [vmem:[#allocation2 + $0xb4] sm:$0xf] }
 0x21f   : > { %19574 = vst [vmem:[#allocation27_spill] sm:$0xff] %v15878_v43  ;;  %v5197_v6 = vrot.slane %v5195_v39, 4  ;;  %v5198_v15 = vshll.u32 %v4894_v13, 16  ;;  %v5204_v5 = vshll.u32 %v15870_v17, 16  ;;  %v11989_v11 = vcombine.low %v5159_v52, %v5169_v2  ;;  %v15890_v28 = vpop.f32.mrf.mxu0 }
 0x220   : > { %13195 = vmatmul.mubr.msk.bf16.gmra.mxu1 %vm561_vm0, %v13760_v8  ;;  %v5178_v55 = vrot.slane %v5177_v22, 4  ;;  %v5187_v25 = vor.u32 %v5186_v12, %v5182_v31  ;;  %v5208_v37 = vshrl.u32 %v15870_v17, 16  ;;  %19576 = vst [vmem:[#allocation29_spill] sm:$0xff] %v15890_v28  ;;  %v5214_v24 = vshll.u32 %v15880_v57, 16  ;;  %v12957_v13 = vpop.f32.mrf.mxu1  ;;  %v15896_v8 = vld [vmem:[#allocation2 + $0xb8] sm:$0xf] }
 0x221   : > { %13198 = vmatprep.mubr.msk.bf16.mxu1 %vm561_vm0, %v13761_v50  ;;  %v5200_v43 = vrot.slane %v5198_v15, 5  ;;  %v5206_v19 = vrot.slane %v5204_v5, 5  ;;  %v15894_v30 = vadd.f32 %v15787_v40, %v1977_v10  ;;  %19578 = vst [vmem:[#allocation31_spill] sm:$0xff] %v15896_v8  ;;  %13238 = vmatprep.mubr.msk.bf16.mxu0 %vm561_vm0, %v11989_v11  ;;  %v15902_v22 = vadd.f32 %v15794_v38, %v12957_v13  ;;  %v15906_v15 = vld [vmem:[#allocation2 + $0xbc] sm:$0x1] }
 0x222   : > { %v5183_v52 = vsel %vm14338_vm9, %v5178_v55, %v5182_v31  ;;  %v5188_v39 = vrot.slane %v5187_v25, 4  ;;  %v5210_v50 = vrot.slane %v5208_v37, 4  ;;  %v15904_v2 = vpop.f32.mrf.mxu1  ;;  %19581 = vst [vmem:[#allocation34_spill] sm:$0xff] %v15906_v15  ;;  %v5219_v40 = vshrl.u32 %v4897_v32, 16  ;;  %v15908_v10 = vpop.f32.mrf.mxu0  ;;  %v4900_v55 = vld [vmem:[#allocation2 + $0xc0] sm:$0xf] }
 0x223   : > { %19577 = vst [vmem:[#allocation30_spill] sm:$0xff] %v15894_v30  ;;  %19579 = vst [vmem:[#allocation32_spill] sm:$0xff] %v15902_v22  ;;  %v5201_v12 = vor.u32 %v5200_v43, %v5197_v6  ;;  %v5222_v5 = vshll.u32 %v4897_v32, 16  ;;  %v5216_v30 = vrot.slane %v5214_v24, 5  ;;  %v5228_v31 = vshll.u32 %v15896_v8, 16  ;;  %v13762_v13 = vld [vmem:[#allocation2 + $0x9c] sm:$0xff]  }
 0x224   : > { %19580 = vst [vmem:[#allocation33_spill] sm:$0xff] %v15904_v2  ;;  %v5193_v11 = vsel %vm14338_vm9, %v5188_v39, %v5192_v49  ;;  %v5211_v28 = vor.u32 %v5210_v50, %v5206_v19  ;;  %v5221_v37 = vrot.slane %v5219_v40, 4  ;;  %v12960_v6 = vpop.f32.mrf.mxu1  ;;  %v13763_v2 = vld [vmem:[#allocation2 + $0xa8] sm:$0xff]   ;;  %v15913_v22 = vpop.f32.mrf.mxu0  ;;  %v5232_v17 = vshrl.u32 %v15896_v8, 16  ;;  %v15917_v39 = vld [vmem:[#allocation2 + $0xc4] sm:$0xf] }
 0x225   : > { %v11990_v25 = vcombine.low %v5183_v52, %v5193_v11  ;;  %v5202_v38 = vrot.slane %v5201_v12, 4  ;;  %v5224_v43 = vrot.slane %v5222_v5, 5  ;;  %v5230_v57 = vrot.slane %v5228_v31, 5  ;;  %v15926_v12 = vld [vmem:[#allocation2 + $0xc8] sm:$0x1] }
 0x226   : > { %v5212_v32 = vrot.slane %v5211_v28, 4  ;;  %v5238_v49 = vshll.u32 %v15906_v15, 16  ;;  %v15923_v50 = vadd.f32 %v15816_v51, %v12960_v6  ;;  %v5243_v28 = vshrl.u32 %v4900_v55, 16  ;;  %v1993_v40 = vpop.f32.mrf.mxu1  ;;  %v15928_v5 = vpop.f32.mrf.mxu0 }
 0x227   : > { %13239 = vmatmul.mubr.msk.bf16.gmra.mxu0 %vm561_vm0, %v11990_v25  ;;  %v5207_v24 = vsel %vm14338_vm9, %v5202_v38, %v5206_v19  ;;  %v5225_v52 = vor.u32 %v5224_v43, %v5221_v37  ;;  %v5234_v31 = vrot.slane %v5232_v17, 4  ;;  %v5246_v15 = vshll.u32 %v4900_v55, 16 }
 0x228   : > { %19582 = vst [vmem:[#allocation35_spill] sm:$0xff] %v15923_v50  ;;  %13199 = vmatmul.mubr.msk.bf16.gmra.mxu1 %vm561_vm0, %v13762_v13  ;;  %v5217_v11 = vsel %vm14338_vm9, %v5212_v32, %v5216_v30  ;;  %v5240_v25 = vrot.slane %v5238_v49, 5  ;;  %v5245_v51 = vrot.slane %v5243_v28, 4  ;;  %v5252_v37 = vshll.u32 %v15917_v39, 16  ;;  %v12961_v43 = vpop.f32.mrf.mxu1  ;;  %v15934_v6 = vpop.f32.mrf.mxu0  ;;  %v5611_v30 = vld [vmem:[#allocation2 + $0x18] sm:$0xe] }
 0x229   : > { %13202 = vmatprep.mubr.msk.bf16.mxu1 %vm561_vm0, %v13763_v2  ;;  %v11991_v19 = vcombine.low %v5207_v24, %v5217_v11  ;;  %v5226_v38 = vrot.slane %v5225_v52, 4  ;;  %19583 = vst [vmem:[#allocation36_spill] sm:$0xff] %v15934_v6  ;;  %v5235_v13 = vor.u32 %v5234_v31, %v5230_v57  ;;  %v5248_v50 = vrot.slane %v5246_v15, 5  ;;  %v4903_v24 = vld [vmem:[#allocation2 + $0xcc] sm:$0xf] }
 0x22a   : > { %v5256_v8 = vshrl.u32 %v15917_v39, 16  ;;  %v5262_v45 = vshll.u32 %v15926_v12, 16  ;;  %v5254_v17 = vrot.slane %v5252_v37, 5  ;;  %v15940_v2 = vadd.f32 %v15828_v18, %v1993_v40  ;;  %v15945_v32 = vpop.f32.mrf.mxu1  ;;  %v15947_v49 = vpop.f32.mrf.mxu0 }
 0x22b   : > { %13242 = vmatprep.mubr.msk.bf16.mxu0 %vm561_vm0, %v11991_v19  ;;  %v15943_v55 = vadd.f32 %v15838_v46, %v12961_v43  ;;  %19586 = vst [vmem:[#allocation39_spill] sm:$0xff] %v15945_v32  ;;  %v5231_v15 = vsel %vm14338_vm9, %v5226_v38, %v5230_v57  ;;  %v5236_v52 = vrot.slane %v5235_v13, 4  ;;  %v5249_v28 = vor.u32 %v5248_v50, %v5245_v51  ;;  %v13765_v19 = vld [vmem:[#allocation2 + $0xb4] sm:$0xff]   ;;  %v13766_v32 = vld [vmem:[#allocation2 + $0xc0] sm:$0xff]  }
 0x22c   : > { %19584 = vst [vmem:[#allocation37_spill] sm:$0xff] %v15940_v2  ;;  %v5258_v11 = vrot.slane %v5256_v8, 4  ;;  %v5264_v31 = vrot.slane %v5262_v45, 5  ;;  %v15951_v37 = vpop.f32.mrf.mxu0  ;;  %v12015_v18 = vrot.slane %v5611_v30, 9  ;;  %v5677_v40 = vrot.slane %v15589_v36, 5 }
 0x22d   : > { %19585 = vst [vmem:[#allocation38_spill] sm:$0xff] %v15943_v55  ;;  %v5241_v46 = vsel %vm14338_vm9, %v5236_v52, %v5240_v25  ;;  %v5250_v43 = vrot.slane %v5249_v28, 4  ;;  %v15956_v55 = vld [vmem:[#allocation2 + $0xd0] sm:$0xf]  ;;  %v5267_v2 = vshrl.u32 %v4903_v24, 16  ;;  %v5680_v8 = vrot.slane %v15595_v58, 5 }
 0x22e   : > { %v5259_v6 = vor.u32 %v5258_v11, %v5254_v17  ;;  %v11992_v57 = vcombine.low %v5231_v15, %v5241_v46  ;;  %v12964_v38 = vpop.f32.mrf.mxu1  ;;  %v5679_v45 = vrot.slane %v5677_v40, 4  ;;  %v15960_v50 = vld [vmem:[#allocation2 + $0xd4] sm:$0x1]  ;;  %v5270_v51 = vshll.u32 %v4903_v24, 16  ;;  %v15962_v36 = vpop.f32.mrf.mxu0 }
 0x22f   : > { %v5255_v25 = vsel %vm14338_vm9, %v5250_v43, %v5254_v17  ;;  %v15967_v30 = vadd.f32 %v15865_v20, %v12964_v38  ;;  %v5269_v15 = vrot.slane %v5267_v2, 4  ;;  %v5276_v24 = vshll.u32 %v15956_v55, 16 }
 0x230   : > { %13203 = vmatmul.mubr.msk.bf16.gmra.mxu1 %vm561_vm0, %v13765_v19  ;;  %v5260_v13 = vrot.slane %v5259_v6, 4  ;;  %13243 = vmatmul.mubr.msk.bf16.gmra.mxu0 %vm561_vm0, %v11992_v57  ;;  %v2009_v52 = vpop.f32.mrf.mxu1  ;;  %v5681_v58 = vsel %vm14839_vm3, %v5679_v45, %v5680_v8  ;;  %v5272_v28 = vrot.slane %v5270_v51, 5  ;;  %v5280_v11 = vshrl.u32 %v15956_v55, 16  ;;  %v15975_v19 = vpop.f32.mrf.mxu0  ;;  %v13767_v57 = vld [vmem:[#allocation2 + $0xcc] sm:$0xff]  }
 0x231   : > { %13206 = vmatprep.mubr.msk.bf16.mxu1 %vm561_vm0, %v13766_v32  ;;  %19587 = vst [vmem:[#allocation40_spill] sm:$0xff] %v15975_v19  ;;  %v15980_v6 = vadd.f32 %v15872_v48, %v2009_v52  ;;  %v5678_v17 = vsel %vm14839_vm3, %v12015_v18, %v5677_v40  ;;  %v5286_v2 = vshll.u32 %v15960_v50, 16  ;;  %v5612_v32 = vld [vmem:[#allocation2 + $0x24] sm:$0xe]  ;;  %v5278_v45 = vrot.slane %v5276_v24, 5 }
 0x232   : > { %v5265_v20 = vsel %vm14338_vm9, %v5260_v13, %v5264_v31  ;;  %v12965_v43 = vpop.f32.mrf.mxu1  ;;  %v5273_v38 = vor.u32 %v5272_v28, %v5269_v15  ;;  %v5282_v8 = vrot.slane %v5280_v11, 4  ;;  %v15985_v51 = vpop.f32.mrf.mxu0  ;;  %v5613_v19 = vld [vmem:[#allocation2 + $0x30] sm:$0xe]  ;;  %v12031_v48 = vcombine.low %v5678_v17, %v5681_v58  ;;  %v5614_v28 = vld [vmem:[#allocation2 + $0x3c] sm:$0xe] }
 0x233   : > { %19588 = vst [vmem:[#allocation41_spill] sm:$0xff] %v15980_v6  ;;  %v11993_v46 = vcombine.low %v5255_v25, %v5265_v20  ;;  %v15988_v31 = vadd.f32 %v15882_v26, %v12965_v43  ;;  %v5684_v13 = vrot.slane %v15614_v1, 5  ;;  %v5288_v52 = vrot.slane %v5286_v2, 5 }
 0x234   : > { %v15992_v18 = vpop.f32.mrf.mxu1  ;;  %v5274_v40 = vrot.slane %v5273_v38, 4  ;;  %v5283_v25 = vor.u32 %v5282_v8, %v5278_v45  ;;  %v12016_v20 = vrot.slane %v5612_v32, 9  ;;  %v15994_v15 = vpop.f32.mrf.mxu0  ;;  %v5687_v11 = vrot.slane %v15618_v54, 5 }
 0x235   : > { %13246 = vmatprep.mubr.msk.bf16.mxu0 %vm561_vm0, %v11993_v46  ;;  %v5686_v24 = vrot.slane %v5684_v13, 4  ;;  %v12017_v6 = vrot.slane %v5613_v19, 9  ;;  %v5691_v26 = vrot.slane %v15641_v7, 5  ;;  %v5694_v32 = vrot.slane %v15651_v0, 5 }
 0x236   : > { %v12968_v58 = vpop.f32.mrf.mxu1  ;;  %v5279_v1 = vsel %vm14338_vm9, %v5274_v40, %v5278_v45  ;;  %v5284_v17 = vrot.slane %v5283_v25, 4  ;;  %v5685_v2 = vsel %vm14839_vm3, %v12016_v20, %v5684_v13  ;;  %v16004_v46 = vpop.f32.mrf.mxu0  ;;  %v12018_v19 = vrot.slane %v5614_v28, 9  ;;  %v5616_v40 = vld [vmem:[#allocation2 + $0x54] sm:$0xe] }
 0x237   : > { %v16007_v43 = vadd.f32 %v15908_v10, %v12968_v58  ;;  %v5688_v54 = vsel %vm14839_vm3, %v5686_v24, %v5687_v11  ;;  %v5693_v7 = vrot.slane %v5691_v26, 4  ;;  %v5692_v0 = vsel %vm14839_vm3, %v12017_v6, %v5691_v26 }
 0x238   : > { %13207 = vmatmul.mubr.msk.bf16.gmra.mxu1 %vm561_vm0, %v13767_v57  ;;  %v5615_v57 = vld [vmem:[#allocation2 + $0x48] sm:$0xe]  ;;  %v2025_v38 = vpop.f32.mrf.mxu1  ;;  %v5289_v45 = vsel %vm14338_vm9, %v5284_v17, %v5288_v52  ;;  %v12032_v8 = vcombine.low %v5685_v2, %v5688_v54  ;;  %v16016_v13 = vpop.f32.mrf.mxu0  ;;  %v5698_v10 = vrot.slane %v15658_v53, 5  ;;  %v5701_v28 = vrot.slane %v15668_v59, 5  ;;  %v5617_v17 = vld [vmem:[#allocation2 + $0x60] sm:$0xe] }
 0x239   : > { %13258 = vmatprep.mubr.msk.bf16.mxu1 %vm561_vm0, %v12031_v48  ;;  %v16020_v48 = vadd.f32 %v15913_v22, %v2025_v38  ;;  %v11994_v25 = vcombine.low %v5279_v1, %v5289_v45  ;;  %v5695_v20 = vsel %vm14839_vm3, %v5693_v7, %v5694_v32  ;;  %v12019_v6 = vrot.slane %v5615_v57, 9 }
 0x23a   : > { %v12969_v24 = vpop.f32.mrf.mxu1  ;;  %v12033_v52 = vcombine.low %v5692_v0, %v5695_v20  ;;  %v16025_v11 = vpop.f32.mrf.mxu0  ;;  %v5700_v58 = vrot.slane %v5698_v10, 4  ;;  %v5705_v26 = vrot.slane %v15674_v27, 5  ;;  %v16034_v22 = vsel %vm14839_vm3, %v12018_v19, %v5698_v10  ;;  %v5618_v19 = vld [vmem:[#allocation2 + $0x6c] sm:$0xe] }
 0x23b   : > { %13247 = vmatmul.mubr.msk.bf16.gmra.mxu0 %vm561_vm0, %v11994_v25  ;;  %v16030_v53 = vadd.f32 %v15928_v5, %v12969_v24  ;;  %v12020_v1 = vrot.slane %v5616_v40, 9  ;;  %v5712_v59 = vrot.slane %v15698_v62, 5  ;;  %v5708_v7 = vrot.slane %v15685_v29, 5 }
 0x23c   : > { %v16037_v2 = vpop.f32.mrf.mxu1  ;;  %v5702_v32 = vsel %vm14839_vm3, %v5700_v58, %v5701_v28  ;;  %v16041_v54 = vpop.f32.mrf.mxu0  ;;  %v16045_v27 = vsel %vm14839_vm3, %v12019_v6, %v5705_v26  ;;  %v5707_v5 = vrot.slane %v5705_v26, 4  ;;  %v5715_v45 = vrot.slane %v15709_v33, 5  ;;  %v5619_v28 = vld [vmem:[#allocation2 + $0x78] sm:$0xe] }
 0x23d   : > { %v12034_v57 = vcombine.low %v16034_v22, %v5702_v32  ;;  %v16051_v62 = vsel %vm14839_vm3, %v12020_v1, %v5712_v59  ;;  %v5714_v38 = vrot.slane %v5712_v59, 4  ;;  %v12021_v25 = vrot.slane %v5617_v17, 9  ;;  %v5620_v32 = vld [vmem:[#allocation2 + $0x84] sm:$0xe] }
 0x23e   : > { %v13020_v0 = vpop.f32.mrf.mxu1  ;;  %v5709_v10 = vsel %vm14839_vm3, %v5707_v5, %v5708_v7  ;;  %v16057_v40 = vpop.f32.mrf.mxu0  ;;  %v5719_v29 = vrot.slane %v15721_v4, 5  ;;  %v5722_v20 = vrot.slane %v15737_v41, 5  ;;  %v12022_v58 = vrot.slane %v5618_v19, 9 }
 0x23f   : > { %v16062_v24 = vadd.f32 %v13020_v0, %v15680_v42  ;;  %v12035_v33 = vcombine.low %v16045_v27, %v5709_v10  ;;  %v5729_v1 = vrot.slane %v15765_v60, 5  ;;  %v12023_v59 = vrot.slane %v5619_v28, 9  ;;  %v5622_v28 = vld [vmem:[#allocation2 + $0x9c] sm:$0xe] }
 0x240   : > { %13259 = vmatmul.mubr.msk.bf16.vlgmr.msra.gmra.mxu1 %vm561_vm0, %v12032_v8  ;;  %v16068_v8 = vsel %vm14839_vm3, %v5714_v38, %v5715_v45  ;;  %v2678_v6 = vpop.f32.mrf.mxu1  ;;  %v16070_v26 = vpop.f32.mrf.mxu0  ;;  %v16076_v41 = vsel %vm14839_vm3, %v12021_v25, %v5719_v29  ;;  %v5721_v42 = vrot.slane %v5719_v29, 4  ;;  %v5733_v17 = vrot.slane %v15776_v9, 5  ;;  %v5621_v38 = vld [vmem:[#allocation2 + $0x90] sm:$0xe] }
 0x241   : > { %13262 = vmatprep.mubr.msk.bf16.mxu1 %vm561_vm0, %v12033_v52  ;;  %v5726_v52 = vrot.slane %v15749_v16, 5  ;;  %v16080_v22 = vadd.f32 %v2678_v6, %v15696_v21  ;;  %v5736_v21 = vrot.slane %v15783_v61, 5  ;;  %v12024_v61 = vrot.slane %v5620_v32, 9 }
 0x242   : > { %v13021_v27 = vpop.f32.mrf.mxu1  ;;  %v16084_v5 = vpop.f32.mrf.mxu0  ;;  %v16088_v7 = vsel %vm14839_vm3, %v5721_v42, %v5722_v20  ;;  %v16102_v45 = vsel %vm14839_vm3, %v12023_v59, %v5733_v17  ;;  %v5735_v0 = vrot.slane %v5733_v17, 4  ;;  %v5740_v20 = vrot.slane %v15802_v14, 5  ;;  %v19593_v14 = vld [vmem:[#allocation31_spill] sm:$0xff] }
 0x243   : > { %v16092_v19 = vsel %vm14839_vm3, %v12022_v58, %v5726_v52  ;;  %v5728_v16 = vrot.slane %v5726_v52, 4  ;;  %v16096_v60 = vadd.f32 %v13021_v27, %v15704_v35  ;;  %v12037_v9 = vcombine.low %v16076_v41, %v16088_v7 }
 0x244   : > { %v2681_v10 = vpop.f32.mrf.mxu1  ;;  %v16104_v25 = vpop.f32.mrf.mxu0  ;;  %v5743_v35 = vrot.slane %v15812_v3, 5  ;;  %v16119_v41 = vsel %vm14839_vm3, %v5735_v0, %v5736_v21  ;;  %v12025_v42 = vrot.slane %v5621_v38, 9  ;;  %v5742_v3 = vrot.slane %v5740_v20, 4 }
 0x245   : > { %v16108_v29 = vsel %vm14839_vm3, %v5728_v16, %v5729_v1  ;;  %v16113_v58 = vadd.f32 %v2681_v10, %v15707_v63  ;;  %v16128_v63 = vsel %vm14839_vm3, %v12024_v61, %v5740_v20  ;;  %v5747_v59 = vrot.slane %v15826_v34, 5  ;;  %v19591_v61 = vld [vmem:[#allocation11_spill] sm:$0xff] }
 0x246   : > { %v13024_v52 = vpop.f32.mrf.mxu1  ;;  %v16122_v1 = vpop.f32.mrf.mxu0  ;;  %v5750_v32 = vrot.slane %v15834_v23, 5  ;;  %v12026_v27 = vrot.slane %v5622_v28, 9  ;;  %v16139_v38 = vsel %vm14839_vm3, %v5742_v3, %v5743_v35  ;;  %v5768_v6 = vrot.slane %v19593_v14, 5 }
 0x247   : > { %v2811_v17 = vadd.f32 %v13024_v52, %v15730_v56  ;;  %v16143_v0 = vsel %vm14839_vm3, %v12025_v42, %v5747_v59  ;;  %v5749_v34 = vrot.slane %v5747_v59, 4  ;;  %v19590_v56 = vld [vmem:[#allocation24_spill] sm:$0xff] }
 0x248   : > { %13263 = vmatmul.mubr.msk.bf16.gmra.mxu1 %vm561_vm0, %v12034_v57  ;;  %v19589_v57 = vld [vmem:[#allocation23_spill] sm:$0xff]  ;;  %v2694_v16 = vpop.f32.mrf.mxu1  ;;  %v16135_v21 = vpop.f32.mrf.mxu0  ;;  %v5757_v10 = vrot.slane %v19590_v56, 5  ;;  %v19592_v59 = vld [vmem:[#allocation12_spill] sm:$0xff] }
 0x249   : > { %13266 = vmatprep.mubr.msk.bf16.mxu1 %vm561_vm0, %v12035_v33  ;;  %v5754_v7 = vrot.slane %v19589_v57, 5  ;;  %v5624_v33 = vld [vmem:[#allocation2 + $0xb4] sm:$0xe]  ;;  %v2809_v23 = vadd.f32 %v2694_v16, %v19591_v61  ;;  %v16157_v42 = vsel %vm14839_vm3, %v5749_v34, %v5750_v32  ;;  %v19594_v32 = vld [vmem:[#allocation13_spill] sm:$0xff] }
 0x24a   : > { %v13025_v35 = vpop.f32.mrf.mxu1  ;;  %v16153_v3 = vpop.f32.mrf.mxu0  ;;  %v12041_v16 = vcombine.low %v16143_v0, %v16157_v42  ;;  %v12028_v61 = vrot.slane %v5624_v33, 9  ;;  %v19596_v0 = vcombine.low %v16051_v62, %v16068_v8  ;;  %v19597_v42 = vld [vmem:[#allocation14_spill] sm:$0xff]  ;;  %v19599_v62 = vld [vmem:[#allocation15_spill] sm:$0xff] }
 0x24b   : > { %v16151_v28 = vsel %vm14839_vm3, %v12026_v27, %v5754_v7  ;;  %v5756_v52 = vrot.slane %v5754_v7, 4  ;;  %v2812_v57 = vadd.f32 %v13025_v35, %v19592_v59  ;;  %v19595_v35 = vld [vmem:[#allocation34_spill] sm:$0xff] }
 0x24c   : > { %v2697_v27 = vpop.f32.mrf.mxu1  ;;  %v16166_v20 = vpop.f32.mrf.mxu0  ;;  %v5771_v59 = vrot.slane %v19595_v35, 5  ;;  %v16183_v33 = vsel %vm14839_vm3, %v12028_v61, %v5768_v6  ;;  %v16198_v61 = vadd.f32 %v15947_v49, %v16062_v24  ;;  %v16217_v49 = vadd.f32 %v15994_v15, %v2809_v23 }
 0x24d   : > { %v16164_v56 = vsel %vm14839_vm3, %v5756_v52, %v5757_v10  ;;  %v16172_v34 = vadd.f32 %v2697_v27, %v19594_v32  ;;  %v5770_v52 = vrot.slane %v5768_v6, 4  ;;  %v16220_v24 = vadd.f32 %v16004_v46, %v2812_v57 }
 0x24e   : > { %v13028_v4 = vpop.f32.mrf.mxu1  ;;  %v16179_v10 = vpop.f32.mrf.mxu0 }
 0x24f   : > { %v2815_v14 = vadd.f32 %v13028_v4, %v19597_v42  ;;  %v16191_v35 = vsel %vm14839_vm3, %v5770_v52, %v5771_v59  ;;  %v19600_v42 = vld [vmem:[#allocation17_spill] sm:$0xff]  ;;  %v16209_v59 = vadd.f32 %v15962_v36, %v16096_v60  ;;  %v16212_v52 = vadd.f32 %v15985_v51, %v2811_v17  ;;  %v19603_v17 = vld [vmem:[#allocation19_spill] sm:$0xff] }
 0x250   : > { %13267 = vmatmul.mubr.msk.bf16.gmra.mxu1 %vm561_vm0, %v19596_v0  ;;  %v2710_v27 = vpop.f32.mrf.mxu1  ;;  %v16187_v32 = vpop.f32.mrf.mxu0  ;;  %v19602_v60 = vcombine.low %v16092_v19, %v16108_v29 }
 0x251   : > { %13270 = vmatprep.mubr.msk.bf16.mxu1 %vm561_vm0, %v12037_v9  ;;  %19598 = vst [vmem:[#allocation23_spill] sm:$0xff] %v16187_v32  ;;  %v2813_v8 = vadd.f32 %v2710_v27, %v19599_v62  ;;  %v16204_v9 = vadd.f32 %v15951_v37, %v16080_v22  ;;  %v19601_v37 = vld [vmem:[#allocation18_spill] sm:$0xff] }
 0x252   : > { %v13029_v6 = vpop.f32.mrf.mxu1  ;;  %v16200_v4 = vpop.f32.mrf.mxu0 }
 0x253   : > { %v2816_v7 = vadd.f32 %v13029_v6, %v19600_v42  ;;  %v16226_v6 = vadd.f32 %v16025_v11, %v2815_v14  ;;  %v16229_v36 = vadd.f32 %v16041_v54, %v2813_v8  ;;  %v19604_v11 = vcombine.low %v16102_v45, %v16119_v41  ;;  %v19606_v14 = vld [vmem:[#allocation21_spill] sm:$0xff] }
 0x254   : > { %v2713_v27 = vpop.f32.mrf.mxu1  ;;  %v16214_v62 = vpop.f32.mrf.mxu0 }
 0x255   : > { %v16223_v22 = vadd.f32 %v2713_v27, %v19601_v37  ;;  %v16238_v46 = vadd.f32 %v16057_v40, %v2816_v7  ;;  %v19607_v40 = vld [vmem:[#allocation26_spill] sm:$0xff] }
 0x256   : > { %v13032_v51 = vpop.f32.mrf.mxu1  ;;  %v16235_v15 = vpop.f32.mrf.mxu0  ;;  %v5761_v7 = vrot.slane %v19607_v40, 5  ;;  %v19608_v27 = vld [vmem:[#allocation22_spill] sm:$0xff]  ;;  %v19611_v40 = vld [vmem:[#allocation28_spill] sm:$0xff] }
 0x257   : > { %v2819_v23 = vadd.f32 %v13032_v51, %v19603_v17  ;;  %v5623_v51 = vld [vmem:[#allocation2 + $0xa8] sm:$0xe]  ;;  %v19609_v17 = vld [vmem:[#allocation25_spill] sm:$0xff] }
 0x258   : > { %13271 = vmatmul.mubr.msk.bf16.gmra.mxu1 %vm561_vm0, %v19602_v60  ;;  %v2726_v54 = vpop.f32.mrf.mxu1  ;;  %v16245_v57 = vpop.f32.mrf.mxu0 }
 0x259   : > { %13274 = vmatprep.mubr.msk.bf16.mxu1 %vm561_vm0, %v19604_v11  ;;  %19605 = vst [vmem:[#allocation24_spill] sm:$0xff] %v16245_v57  ;;  %v2817_v8 = vadd.f32 %v2726_v54, %v19606_v14  ;;  %v16249_v19 = vadd.f32 %v16084_v5, %v2819_v23  ;;  %v19610_v54 = vcombine.low %v16128_v63, %v16139_v38  ;;  %v12027_v14 = vrot.slane %v5623_v51, 9 }
 0x25a   : > { %v13033_v29 = vpop.f32.mrf.mxu1  ;;  %v16251_v42 = vpop.f32.mrf.mxu0 }
 0x25b   : > { %v2820_v37 = vadd.f32 %v13033_v29, %v19608_v27  ;;  %v16256_v45 = vadd.f32 %v16104_v25, %v2817_v8  ;;  %v5763_v29 = vrot.slane %v5761_v7, 4  ;;  %v5764_v25 = vrot.slane %v19611_v40, 5  ;;  %v19612_v27 = vld [vmem:[#allocation27_spill] sm:$0xff] }
 0x25c   : > { %v2729_v41 = vpop.f32.mrf.mxu1  ;;  %v16258_v60 = vpop.f32.mrf.mxu0  ;;  %v5762_v38 = vsel %vm14839_vm3, %v12027_v14, %v5761_v7 }
 0x25d   : > { %v16261_v11 = vadd.f32 %v2729_v41, %v19609_v17  ;;  %v16264_v5 = vadd.f32 %v16122_v1, %v2820_v37  ;;  %v19614_v1 = vld [vmem:[#allocation30_spill] sm:$0xff]  ;;  %v5765_v51 = vsel %vm14839_vm3, %v5763_v29, %v5764_v25  ;;  %v19616_v29 = vcombine.low %v16151_v28, %v16164_v56 }
 0x25e   : > { %v13036_v23 = vpop.f32.mrf.mxu1  ;;  %v16271_v8 = vpop.f32.mrf.mxu0 }
 0x25f   : > { %v2823_v0 = vadd.f32 %v13036_v23, %v19612_v27  ;;  %v5775_v23 = vrot.slane %v15917_v39, 5  ;;  %v5625_v27 = vld [vmem:[#allocation2 + $0xc0] sm:$0xe] }
 0x260   : > { %13275 = vmatmul.mubr.msk.bf16.gmra.mxu1 %vm561_vm0, %v19610_v54  ;;  %v2742_v41 = vpop.f32.mrf.mxu1  ;;  %v16275_v17 = vpop.f32.mrf.mxu0  ;;  %v12029_v39 = vrot.slane %v5625_v27, 9 }
 0x261   : > { %13278 = vmatprep.mubr.msk.bf16.mxu1 %vm561_vm0, %v12041_v16  ;;  %19613 = vst [vmem:[#allocation11_spill] sm:$0xff] %v16275_v17  ;;  %v2821_v37 = vadd.f32 %v2742_v41, %v19614_v1  ;;  %v16279_v57 = vadd.f32 %v16153_v3, %v2823_v0  ;;  %v19615_v16 = vld [vmem:[#allocation32_spill] sm:$0xff]  ;;  %v12043_v0 = vcombine.low %v5762_v38, %v5765_v51  ;;  %v5777_v25 = vrot.slane %v5775_v23, 4 }
 0x262   : > { %v13037_v63 = vpop.f32.mrf.mxu1  ;;  %v16285_v54 = vpop.f32.mrf.mxu0  ;;  %v5778_v1 = vrot.slane %v15926_v12, 5  ;;  %v5782_v38 = vrot.slane %v15956_v55, 5  ;;  %v5776_v12 = vsel %vm14839_vm3, %v12029_v39, %v5775_v23 }
 0x263   : > { %v2824_v40 = vadd.f32 %v13037_v63, %v19615_v16  ;;  %v16290_v17 = vadd.f32 %v16166_v20, %v2821_v37  ;;  %v19617_v37 = vld [vmem:[#allocation35_spill] sm:$0xff]  ;;  %v5626_v16 = vld [vmem:[#allocation2 + $0xcc] sm:$0xe] }
 0x264   : > { %v16292_v41 = vpop.f32.mrf.mxu1  ;;  %v16294_v3 = vpop.f32.mrf.mxu0  ;;  %v5779_v27 = vsel %vm14839_vm3, %v5777_v25, %v5778_v1  ;;  %v19621_v25 = vcombine.low %v16183_v33, %v16191_v35 }
 0x265   : > { %v16297_v7 = vadd.f32 %v16179_v10, %v2824_v40  ;;  %v19619_v40 = vld [vmem:[#allocation37_spill] sm:$0xff] }
 0x266   : > { %v13089_v20 = vpop.f32.mrf.mxu0 }
 0x267   : > { %v13040_v14 = vpop.f32.mrf.mxu1 }
 0x268   : > { %13279 = vmatmul.mubr.msk.bf16.gmra.mxu1 %vm561_vm0, %v19616_v29  ;;  %v2827_v63 = vadd.f32 %v13040_v14, %v19617_v37  ;;  %v16307_v51 = vpop.f32.mrf.mxu0  ;;  %v19620_v29 = vld [vmem:[#allocation38_spill] sm:$0xff]  ;;  %v5784_v37 = vrot.slane %v5782_v38, 4 }
 0x269   : > { %13282 = vmatprep.mubr.msk.bf16.mxu1 %vm561_vm0, %v12043_v0  ;;  %v2758_v10 = vpop.f32.mrf.mxu1  ;;  %19618 = vst [vmem:[#allocation12_spill] sm:$0xff] %v16307_v51  ;;  %v12030_v0 = vrot.slane %v5626_v16, 9  ;;  %v5785_v51 = vrot.slane %v15960_v50, 5 }
 0x26a   : > { %v2825_v32 = vadd.f32 %v2758_v10, %v19619_v40  ;;  %v16311_v28 = vadd.f32 %v16200_v4, %v2827_v63  ;;  %v12045_v40 = vcombine.low %v5776_v12, %v5779_v27 }
 0x26b   : > { %v13041_v56 = vpop.f32.mrf.mxu1  ;;  %v16317_v14 = vpop.f32.mrf.mxu0 }
 0x26c   : > { %v2828_v55 = vadd.f32 %v13041_v56, %v19620_v29  ;;  %v16322_v10 = vadd.f32 %v16214_v62, %v2825_v32  ;;  %v5783_v32 = vsel %vm14839_vm3, %v12030_v0, %v5782_v38  ;;  %v5786_v62 = vsel %vm14839_vm3, %v5784_v37, %v5785_v51  ;;  %v19624_v56 = vld [vmem:[#allocation41_spill] sm:$0xff] }
 0x26d   : > { %v16324_v4 = vpop.f32.mrf.mxu1  ;;  %v16326_v63 = vpop.f32.mrf.mxu0  ;;  %v12046_v27 = vcombine.low %v5783_v32, %v5786_v62 }
 0x26e   : > { %v16329_v23 = vadd.f32 %v16235_v15, %v2828_v55 }
 0x26f   : > { %v16335_v1 = vpop.f32.mrf.mxu0 }
 0x270   : > { %v13044_v39 = vpop.f32.mrf.mxu1  ;;  %13283 = vmatmul.mubr.msk.bf16.gmra.mxu1 %vm561_vm0, %v19621_v25  ;;  %19622 = vst [vmem:[#allocation31_spill] sm:$0xff] %v16335_v1 }
 0x271   : > { %v2831_v50 = vadd.f32 %v13044_v39, %v15967_v30  ;;  %13286 = vmatprep.mubr.msk.bf16.mxu1 %vm561_vm0, %v12045_v40  ;;  %v16343_v16 = vpop.f32.mrf.mxu0  ;;  %v13768_v30 = vld [vmem:[%s19505_s5 + $0x18] sm:$0xff]  }
 0x272   : > { %v2774_v15 = vpop.f32.mrf.mxu1  ;;  %19623 = vst [vmem:[#allocation13_spill] sm:$0xff] %v16343_v16  ;;  %13290 = vmatprep.subr.bf16.mxu0 %v13768_v30 }
 0x273   : > { %v2829_v12 = vadd.f32 %v2774_v15, %v19624_v56  ;;  %v16347_v33 = vadd.f32 %v16251_v42, %v2831_v50  ;;  %v16349_v29 = vpop.f32.mrf.mxu0  ;;  %13291 = vmatpush3.bf16.msra.mxu0 %v13768_v30 }
 0x274   : > { %v13045_v35 = vpop.f32.mrf.mxu1  ;;  %19625 = vst [vmem:[#allocation34_spill] sm:$0xff] %v16349_v29 }
 0x275   : > { %v2832_v38 = vadd.f32 %v13045_v35, %v15988_v31  ;;  %v16356_v51 = vadd.f32 %v16258_v60, %v2829_v12  ;;  %v16360_v55 = vpop.f32.mrf.mxu0 }
 0x276   : > { %v16358_v0 = vpop.f32.mrf.mxu1  ;;  %19626 = vst [vmem:[#allocation14_spill] sm:$0xff] %v16360_v55 }
 0x277   : > { %v16363_v42 = vadd.f32 %v16271_v8, %v2832_v38  ;;  %v13145_v40 = vpop.f32.mrf.mxu0 }
 0x278   : > { %v13048_v37 = vpop.f32.mrf.mxu1  ;;  %13287 = vmatmul.mubr.msk.bf16.gmra.mxu1 %vm561_vm0, %v12046_v27  ;;  %vm7251_vm0 = vcmask 261120  }
 0x279   : > { %v2835_v39 = vadd.f32 %v13048_v37, %v16007_v43  ;;  %v16367_v31 = vpop.f32.mrf.mxu0 }
 0x27a   : > { %v2790_v25 = vpop.f32.mrf.mxu1  ;;  %19627 = vst [vmem:[#allocation15_spill] sm:$0xff] %v16367_v31 }
 0x27b   : > { %v2833_v60 = vadd.f32 %v2790_v25, %v16020_v48  ;;  %v16371_v50 = vadd.f32 %v16285_v54, %v2835_v39  ;;  %v13148_v62 = vpop.f32.mrf.mxu0 }
 0x27c   : > { %v13049_v32 = vpop.f32.mrf.mxu1 }
 0x27d   : > { %v2836_v8 = vadd.f32 %v13049_v32, %v16030_v53  ;;  %v16375_v15 = vadd.f32 %v16294_v3, %v2833_v60  ;;  %v4345_v12 = vpop.f32.mrf.mxu0 }
 0x27e   : > { %v16377_v56 = vpop.f32.mrf.mxu1 }
 0x27f   : > { %v16379_v35 = vadd.f32 %v13089_v20, %v2836_v8  ;;  %v13149_v27 = vpop.f32.mrf.mxu0 }
 0x280   : > { %v13100_v43 = vpop.f32.mrf.mxu1 }
 0x281   : > { %v16382_v30 = vadd.f32 %v13100_v43, %v16198_v61  ;;  %v16384_v54 = vpop.f32.mrf.mxu0 }
 0x282   : > { %v3816_v48 = vpop.f32.mrf.mxu1  ;;  %19628 = vst [vmem:[#allocation17_spill] sm:$0xff] %v16384_v54 }
 0x283   : > { %v16387_v38 = vadd.f32 %v3816_v48, %v16204_v9  ;;  %v13152_v37 = vpop.f32.mrf.mxu0 }
 0x284   : > { %v13101_v53 = vpop.f32.mrf.mxu1 }
 0x285   : > { %v16390_v3 = vadd.f32 %v13101_v53, %v16209_v59  ;;  %v4361_v20 = vpop.f32.mrf.mxu0 }
 0x286   : > { %v16392_v39 = vpop.f32.mrf.mxu1 }
 0x287   : > { %v13153_v60 = vpop.f32.mrf.mxu0 }
 0x288   : > { %v13104_v25 = vpop.f32.mrf.mxu1 }
 0x289   : > { %v16395_v32 = vadd.f32 %v13104_v25, %v16212_v52  ;;  %v16397_v8 = vpop.f32.mrf.mxu0 }
 0x28a   : > { %v3832_v61 = vpop.f32.mrf.mxu1  ;;  %19630 = vst [vmem:[#allocation19_spill] sm:$0xff] %v16397_v8 }
 0x28b   : > { %19629 = vst [vmem:[#allocation18_spill] sm:$0xff] %v16395_v32  ;;  %v16400_v43 = vadd.f32 %v3832_v61, %v16217_v49  ;;  %v13156_v48 = vpop.f32.mrf.mxu0 }
 0x28c   : > { %v13105_v9 = vpop.f32.mrf.mxu1 }
 0x28d   : > { %19631 = vst [vmem:[#allocation21_spill] sm:$0xff] %v16400_v43  ;;  %v3950_v44 = vadd.f32 %v13105_v9, %v16220_v24  ;;  %v4377_v53 = vpop.f32.mrf.mxu0 }
 0x28e   : > { %v16403_v59 = vpop.f32.mrf.mxu1 }
 0x28f   : > { %v16405_v54 = vadd.f32 %v13145_v40, %v3950_v44  ;;  %v13157_v55 = vpop.f32.mrf.mxu0 }
 0x290   : > { %v13108_v31 = vpop.f32.mrf.mxu1 }
 0x291   : > { %v3953_v52 = vadd.f32 %v13108_v31, %v16226_v6  ;;  %v16408_v29 = vpop.f32.mrf.mxu0 }
 0x292   : > { %v3848_v25 = vpop.f32.mrf.mxu1  ;;  %19632 = vst [vmem:[#allocation26_spill] sm:$0xff] %v16408_v29 }
 0x293   : > { %v3951_v8 = vadd.f32 %v3848_v25, %v16229_v36  ;;  %v16411_v49 = vadd.f32 %v13148_v62, %v3953_v52  ;;  %v13160_v43 = vpop.f32.mrf.mxu0 }
 0x294   : > { %v13109_v61 = vpop.f32.mrf.mxu1 }
 0x295   : > { %v3954_v24 = vadd.f32 %v13109_v61, %v16238_v46  ;;  %v16414_v9 = vadd.f32 %v4345_v12, %v3951_v8  ;;  %v4393_v44 = vpop.f32.mrf.mxu0 }
 0x296   : > { %v16416_v32 = vpop.f32.mrf.mxu1 }
 0x297   : > { %v16418_v40 = vadd.f32 %v13149_v27, %v3954_v24  ;;  %v13161_v6 = vpop.f32.mrf.mxu0 }
 0x298   : > { %v13112_v16 = vpop.f32.mrf.mxu1 }
 0x299   : > { %v3957_v31 = vadd.f32 %v13112_v16, %v16249_v19  ;;  %v16421_v1 = vpop.f32.mrf.mxu0  ;;  %v13769_v19 = vld [vmem:[%s19505_s5 + $0x10] sm:$0xff]  }
 0x29a   : > { %v3864_v29 = vpop.f32.mrf.mxu1  ;;  %19633 = vst [vmem:[#allocation22_spill] sm:$0xff] %v16421_v1  ;;  %13292 = vmatprep.subr.bf16.mxu0 %v13769_v19 }
 0x29b   : > { %v3955_v36 = vadd.f32 %v3864_v29, %v16256_v45  ;;  %v16424_v62 = vadd.f32 %v13152_v37, %v3957_v31  ;;  %v13164_v46 = vpop.f32.mrf.mxu0  ;;  %13293 = vmatpush3.bf16.msra.mxu0 %v13769_v19 }
 0x29c   : > { %v13113_v52 = vpop.f32.mrf.mxu1 }
 0x29d   : > { %v3958_v12 = vadd.f32 %v13113_v52, %v16264_v5  ;;  %v16427_v8 = vadd.f32 %v4361_v20, %v3955_v36  ;;  %v4409_v27 = vpop.f32.mrf.mxu0 }
 0x29e   : > { %v16429_v25 = vpop.f32.mrf.mxu1 }
 0x29f   : > { %19634 = vst [vmem:[#allocation25_spill] sm:$0xff] %v16429_v25  ;;  %v16434_v16 = vadd.f32 %v13153_v60, %v3958_v12  ;;  %v13165_v24 = vpop.f32.mrf.mxu0 }
 0x2a0   : > { %v13116_v61 = vpop.f32.mrf.mxu1 }
 0x2a1   : > { %v3961_v45 = vadd.f32 %v13116_v61, %v16279_v57  ;;  %v16437_v37 = vpop.f32.mrf.mxu0 }
 0x2a2   : > { %v3880_v29 = vpop.f32.mrf.mxu1  ;;  %19635 = vst [vmem:[#allocation28_spill] sm:$0xff] %v16437_v37 }
 0x2a3   : > { %v3959_v5 = vadd.f32 %v3880_v29, %v16290_v17  ;;  %v16440_v20 = vadd.f32 %v13156_v48, %v3961_v45  ;;  %v13168_v52 = vpop.f32.mrf.mxu0 }
 0x2a4   : > { %v13117_v31 = vpop.f32.mrf.mxu1 }
 0x2a5   : > { %v3962_v36 = vadd.f32 %v13117_v31, %v16297_v7  ;;  %v16443_v1 = vadd.f32 %v4377_v53, %v3959_v5  ;;  %v4425_v19 = vpop.f32.mrf.mxu0 }
 0x2a6   : > { %v16445_v60 = vpop.f32.mrf.mxu1 }
 0x2a7   : > { %v16447_v12 = vadd.f32 %v13157_v55, %v3962_v36  ;;  %v13169_v7 = vpop.f32.mrf.mxu0 }
 0x2a8   : > { %v13120_v25 = vpop.f32.mrf.mxu1 }
 0x2a9   : > { %v3965_v57 = vadd.f32 %v13120_v25, %v16311_v28  ;;  %v16461_v28 = vpop.f32.mrf.mxu0 }
 0x2aa   : > { %v3896_v61 = vpop.f32.mrf.mxu1  ;;  %19636 = vst [vmem:[#allocation27_spill] sm:$0xff] %v16461_v28 }
 0x2ab   : > { %v3963_v37 = vadd.f32 %v3896_v61, %v16322_v10  ;;  %v16451_v17 = vadd.f32 %v13160_v43, %v3965_v57 }
 0x2ac   : > { %v13121_v48 = vpop.f32.mrf.mxu1 }
 0x2ad   : > { %v3966_v45 = vadd.f32 %v13121_v48, %v16329_v23  ;;  %v16454_v29 = vadd.f32 %v4393_v44, %v3963_v37 }
 0x2ae   : > { %v16456_v53 = vpop.f32.mrf.mxu1 }
 0x2af   : > { %v16458_v5 = vadd.f32 %v13161_v6, %v3966_v45 }
 0x2b0   : > { %v13124_v55 = vpop.f32.mrf.mxu1 }
 0x2b1   : > { %v3969_v31 = vadd.f32 %v13124_v55, %v16347_v33 }
 0x2b2   : > { %v3912_v25 = vpop.f32.mrf.mxu1 }
 0x2b3   : > { %v3967_v10 = vadd.f32 %v3912_v25, %v16356_v51  ;;  %v16464_v43 = vadd.f32 %v13164_v46, %v3969_v31  ;;  %v13770_v51 = vld [vmem:[%s19505_s5 + $0x8] sm:$0xff]  }
 0x2b4   : > { %v13125_v36 = vpop.f32.mrf.mxu1  ;;  %v16467_v57 = vpop.f32.mrf.mxu0  ;;  %13326 = vmatprep.subr.bf16.mxu1 %v13770_v51 }
 0x2b5   : > { %v3970_v23 = vadd.f32 %v13125_v36, %v16363_v42  ;;  %19637 = vst [vmem:[#allocation30_spill] sm:$0xff] %v16467_v57  ;;  %v16469_v44 = vadd.f32 %v4409_v27, %v3967_v10  ;;  %13327 = vmatpush3.bf16.msra.mxu1 %v13770_v51 }
 0x2b6   : > { %v16471_v37 = vpop.f32.mrf.mxu1  ;;  %v16473_v6 = vpop.f32.mrf.mxu0 }
 0x2b7   : > { %19638 = vst [vmem:[#allocation32_spill] sm:$0xff] %v16473_v6  ;;  %v16475_v61 = vadd.f32 %v13165_v24, %v3970_v23  ;;  %v6751_v23 = vld [vmem:[#allocation3] sm:$0xf] }
 0x2b8   : > { %v13128_v33 = vpop.f32.mrf.mxu1  ;;  %v16481_v45 = vpop.f32.mrf.mxu0 }
 0x2b9   : > { %v3973_v46 = vadd.f32 %v13128_v33, %v16371_v50  ;;  %19639 = vst [vmem:[#allocation35_spill] sm:$0xff] %v16481_v45  ;;  %v13771_v50 = vld [vmem:[%s19505_s5] sm:$0xff]  }
 0x2ba   : > { %v3928_v48 = vpop.f32.mrf.mxu1  ;;  %v16489_v25 = vpop.f32.mrf.mxu0  ;;  %13328 = vmatprep.subr.bf16.mxu1 %v13771_v50 }
 0x2bb   : > { %v3971_v42 = vadd.f32 %v3928_v48, %v16375_v15  ;;  %v16484_v27 = vadd.f32 %v13168_v52, %v3973_v46  ;;  %19641 = vst [vmem:[#allocation38_spill] sm:$0xff] %v16489_v25  ;;  %v6752_v15 = vld [vmem:[#allocation3 + $0x4] sm:$0xf]  ;;  %13329 = vmatpush3.bf16.msra.mxu1 %v13771_v50 }
 0x2bc   : > { %v13129_v55 = vpop.f32.mrf.mxu1  ;;  %v12135_v33 = vcombine.low %v6751_v23, %v6752_v15 }
 0x2bd   : > { %v3974_v24 = vadd.f32 %v13129_v55, %v16379_v35  ;;  %v16487_v31 = vadd.f32 %v4425_v19, %v3971_v42  ;;  %v6804_v42 = vshrl.u32 %v6751_v23, 16  ;;  %v6807_v55 = vshll.u32 %v6751_v23, 16 }
 0x2be   : > { %v16491_v10 = vpop.f32.mrf.mxu1  ;;  %13330 = vmatprep.mubr.msk.bf16.mxu1 %vm7251_vm0, %v12135_v33 }
 0x2bf   : > { %19640 = vst [vmem:[#allocation37_spill] sm:$0xff] %v16487_v31  ;;  %v16496_v36 = vadd.f32 %v13169_v7, %v3974_v24  ;;  %v6806_v45 = vrot.slane %v6804_v42, 4  ;;  %v6809_v33 = vrot.slane %v6807_v55, 5  ;;  %v6813_v31 = vshll.u32 %v6752_v15, 16 }
 0x2c0   : > { %v16498_v52 = vpop.f32.mrf.mxu1 }
 0x2c1   : > { %19642 = vst [vmem:[#allocation41_spill] sm:$0xff] %v16496_v36  ;;  %v6810_v36 = vor.u32 %v6809_v33, %v6806_v45 }
 0x2c2   : > { %v16500_v35 = vpop.f32.mrf.mxu0  ;;  %v16502_v19 = vpop.f32.mrf.mxu1 }
 0x2c3   : > { %19643 = vst [vmem:[#allocation42_spill] sm:$0xff] %v16500_v35 }
 0x2c4   : > { %v16505_v51 = vpop.f32.mrf.mxu0  ;;  %v16507_v46 = vpop.f32.mrf.mxu1 }
 0x2c5   : > { %19644 = vst [vmem:[#allocation43_spill] sm:$0xff] %v16505_v51  ;;  %v6817_v51 = vshrl.u32 %v6752_v15, 16 }
 0x2c6   : > { %v16509_v7 = vpop.f32.mrf.mxu0  ;;  %v16511_v48 = vpop.f32.mrf.mxu1 }
 0x2c7   : > { %19645 = vst [vmem:[#allocation44_spill] sm:$0xff] %v16509_v7  ;;  %v6819_v55 = vrot.slane %v6817_v51, 4 }
 0x2c8   : > { %v16513_v24 = vpop.f32.mrf.mxu0  ;;  %v16515_v25 = vpop.f32.mrf.mxu1 }
 0x2c9   : > { %19646 = vst [vmem:[#allocation45_spill] sm:$0xff] %v16513_v24  ;;  %19647 = vst [vmem:[#allocation46_spill] sm:$0xff] %v16515_v25  ;;  %v6787_v24 = vld [vmem:[#allocation3 + $0x8] sm:$0x1] }
 0x2ca   : > { %v16517_v50 = vpop.f32.mrf.mxu1  ;;  %v16519_v35 = vpop.f32.mrf.mxu0 }
 0x2cb   : > { %19648 = vst [vmem:[#allocation47_spill] sm:$0xff] %v16517_v50  ;;  %19649 = vst [vmem:[#allocation48_spill] sm:$0xff] %v16519_v35  ;;  %v13776_v35 = vld [vmem:[%s19505_s5 + $0x28] sm:$0xff]   ;;  %v6823_v50 = vshll.u32 %v6787_v24, 16 }
 0x2cc   : > { %v13185_v6 = vpop.f32.mrf.mxu1  ;;  %v16521_v57 = vpop.f32.mrf.mxu0  ;;  %13362 = vmatprep.subr.bf16.mxu0 %v13776_v35 }
 0x2cd   : > { %19650 = vst [vmem:[#allocation49_spill] sm:$0xff] %v16521_v57  ;;  %v16524_v7 = vadd.f32 %v13185_v6, %v16405_v54  ;;  %v6811_v54 = vrot.slane %v6810_v36, 4  ;;  %v6815_v6 = vrot.slane %v6813_v31, 5  ;;  %v6825_v15 = vrot.slane %v6823_v50, 5 }
 0x2ce   : > { %v16526_v28 = vpop.f32.mrf.mxu1  ;;  %v16528_v23 = vpop.f32.mrf.mxu0 }
 0x2cf   : > { %19651 = vst [vmem:[#allocation50_spill] sm:$0xff] %v16524_v7  ;;  %19652 = vst [vmem:[#allocation51_spill] sm:$0xff] %v16526_v28  ;;  %v6820_v45 = vor.u32 %v6819_v55, %v6815_v6  ;;  %v6816_v24 = vsel %vm14338_vm9, %v6811_v54, %v6815_v6 }
 0x2d0   : > { %19653 = vst [vmem:[#allocation52_spill] sm:$0xff] %v16528_v23  ;;  %v13188_v42 = vpop.f32.mrf.mxu1  ;;  %v16533_v25 = vpop.f32.mrf.mxu0 }
 0x2d1   : > { %v16536_v57 = vadd.f32 %v13188_v42, %v16411_v49  ;;  %v6821_v49 = vrot.slane %v6820_v45, 4 }
 0x2d2   : > { %v4731_v7 = vpop.f32.mrf.mxu1 }
 0x2d3   : > { %v16539_v23 = vadd.f32 %v4731_v7, %v16414_v9  ;;  %v16541_v28 = vpop.f32.mrf.mxu0  ;;  %v6826_v9 = vsel %vm14338_vm9, %v6821_v49, %v6825_v15 }
 0x2d4   : > { %v13189_v33 = vpop.f32.mrf.mxu1  ;;  %v12101_v35 = vcombine.low %v6816_v24, %v6826_v9 }
 0x2d5   : > { %v16544_v51 = vadd.f32 %v13189_v33, %v16418_v40  ;;  %v16550_v31 = vpop.f32.mrf.mxu0 }
 0x2d6   : > { %v16548_v42 = vpop.f32.mrf.mxu1  ;;  %13294 = vmatprep.mubr.msk.bf16.mxu0 %vm7251_vm0, %v12101_v35 }
 0x2d7   : > { %v16554_v7 = vpop.f32.mrf.mxu0 }
 0x2d8   : > { %v13192_v36 = vpop.f32.mrf.mxu1 }
 0x2d9   : > { %v16557_v50 = vadd.f32 %v13192_v36, %v16424_v62  ;;  %v16560_v55 = vpop.f32.mrf.mxu0 }
 0x2da   : > { %v4747_v40 = vpop.f32.mrf.mxu1 }
 0x2db   : > { %v16563_v54 = vadd.f32 %v4747_v40, %v16427_v8 }
 0x2dc   : > { %v13193_v6 = vpop.f32.mrf.mxu1 }
 0x2dd   : > { %v16566_v45 = vadd.f32 %v13193_v6, %v16434_v16  ;;  %v16568_v15 = vpop.f32.mrf.mxu0 }
 0x2de   : > { %19654 = vst [vmem:[#allocation53_spill] sm:$0xff] %v16568_v15  ;;  %v16570_v33 = vpop.f32.mrf.mxu1  ;;  %v19671_v15 = vld [vmem:[#allocation29_spill] sm:$0xff] }
 0x2df   : > { %v16572_v24 = vpop.f32.mrf.mxu0 }
 0x2e0   : > { %19655 = vst [vmem:[#allocation54_spill] sm:$0xff] %v16572_v24  ;;  %v13196_v62 = vpop.f32.mrf.mxu1 }
 0x2e1   : > { %v16575_v49 = vadd.f32 %v13196_v62, %v16440_v20  ;;  %v16577_v9 = vpop.f32.mrf.mxu0 }
 0x2e2   : > { %19656 = vst [vmem:[#allocation55_spill] sm:$0xff] %v16577_v9  ;;  %v4763_v36 = vpop.f32.mrf.mxu1 }
 0x2e3   : > { %v16580_v8 = vadd.f32 %v4763_v36, %v16443_v1  ;;  %v16582_v35 = vpop.f32.mrf.mxu0 }
 0x2e4   : > { %19658 = vst [vmem:[#allocation57_spill] sm:$0xff] %v16582_v35  ;;  %v13197_v16 = vpop.f32.mrf.mxu1 }
 0x2e5   : > { %19657 = vst [vmem:[#allocation56_spill] sm:$0xff] %v16580_v8  ;;  %v16585_v40 = vadd.f32 %v13197_v16, %v16447_v12  ;;  %v19668_v8 = vld [vmem:[#allocation16_spill] sm:$0xff] }
 0x2e6   : > { %v16587_v6 = vpop.f32.mrf.mxu1 }
 0x2e7   : > { %19659 = vst [vmem:[#allocation58_spill] sm:$0xff] %v16585_v40  ;;  %v16589_v47 = vpop.f32.mrf.mxu0 }
 0x2e8   : > { %19660 = vst [vmem:[#allocation59_spill] sm:$0xff] %v16589_v47  ;;  %v13200_v24 = vpop.f32.mrf.mxu1  ;;  %v19667_v47 = vld [vmem:[#allocation33_spill] sm:$0xff] }
 0x2e9   : > { %v16592_v20 = vadd.f32 %v13200_v24, %v16451_v17  ;;  %v16594_v62 = vpop.f32.mrf.mxu0  ;;  %v2294_v17 = vadd.f32 %v19668_v8, %v19667_v47  ;;  %v19669_v24 = vld [vmem:[#allocation39_spill] sm:$0xff] }
 0x2ea   : > { %19662 = vst [vmem:[#allocation61_spill] sm:$0xff] %v16594_v62  ;;  %v4779_v9 = vpop.f32.mrf.mxu1 }
 0x2eb   : > { %19661 = vst [vmem:[#allocation60_spill] sm:$0xff] %v16592_v20  ;;  %v16597_v1 = vadd.f32 %v4779_v9, %v16454_v29  ;;  %v16599_v36 = vpop.f32.mrf.mxu0  ;;  %v19670_v20 = vld [vmem:[#allocation20_spill] sm:$0xff]  ;;  %v2326_v29 = vadd.f32 %v19671_v15, %v15992_v18  ;;  %v3195_v18 = vadd.f32 %v16016_v13, %v16172_v34  ;;  %v3203_v13 = vadd.f32 %v16135_v21, %v16261_v11  ;;  %v19674_v34 = vld [vmem:[#allocation23_spill] sm:$0xff] }
 0x2ec   : > { %19664 = vst [vmem:[#allocation63_spill] sm:$0xff] %v16599_v36  ;;  %v13201_v35 = vpop.f32.mrf.mxu1  ;;  %v2310_v62 = vadd.f32 %v19670_v20, %v19669_v24  ;;  %v19672_v9 = vld [vmem:[#allocation36_spill] sm:$0xff]  ;;  %v19678_v21 = vld [vmem:[#allocation31_spill] sm:$0xff] }
 0x2ed   : > { %19663 = vst [vmem:[#allocation62_spill] sm:$0xff] %v16597_v1  ;;  %v16602_v12 = vadd.f32 %v13201_v35, %v16458_v5  ;;  %v16604_v16 = vpop.f32.mrf.mxu0  ;;  %v2342_v36 = vadd.f32 %v19672_v9, %v16037_v2  ;;  %v2822_v5 = vadd.f32 %v16292_v41, %v2294_v17  ;;  %v19673_v35 = vld [vmem:[#allocation40_spill] sm:$0xff]  ;;  %v2830_v8 = vadd.f32 %v16358_v0, %v2326_v29  ;;  %v19679_v29 = vld [vmem:[#allocation13_spill] sm:$0xff]  ;;  %v19680_v9 = vld [vmem:[#allocation18_spill] sm:$0xff] }
 0x2ee   : > { %19666 = vst [vmem:[#allocation65_spill] sm:$0xff] %v16604_v16  ;;  %v16606_v40 = vpop.f32.mrf.mxu1  ;;  %v3191_v16 = vadd.f32 %v19673_v35, %v16113_v58  ;;  %v2826_v47 = vadd.f32 %v16324_v4, %v2310_v62  ;;  %v3199_v58 = vadd.f32 %v16070_v26, %v16223_v22  ;;  %v3948_v4 = vadd.f32 %v16403_v59, %v3195_v18  ;;  %v19676_v22 = vld [vmem:[#allocation11_spill] sm:$0xff] }
 0x2ef   : > { %19665 = vst [vmem:[#allocation64_spill] sm:$0xff] %v16602_v12  ;;  %v2834_v20 = vadd.f32 %v16377_v56, %v2342_v36  ;;  %v19675_v36 = vld [vmem:[#allocation24_spill] sm:$0xff]  ;;  %v4442_v59 = vadd.f32 %v16317_v14, %v16382_v30  ;;  %v4443_v11 = vadd.f32 %v19678_v21, %v16390_v3  ;;  %v19683_v14 = vld [vmem:[#allocation21_spill] sm:$0xff]  ;;  %v19684_v30 = vld [vmem:[#allocation14_spill] sm:$0xff] }
 0x2f0   : > { %v13204_v1 = vpop.f32.mrf.mxu1  ;;  %v16627_v15 = vpop.f32.mrf.mxu0  ;;  %v3944_v41 = vadd.f32 %v16392_v39, %v3191_v16  ;;  %v3952_v56 = vadd.f32 %v16416_v32, %v3199_v58  ;;  %v3211_v26 = vadd.f32 %v19675_v36, %v2826_v47  ;;  %v19677_v16 = vld [vmem:[#allocation12_spill] sm:$0xff]  ;;  %v4440_v32 = vadd.f32 %v16326_v63, %v16387_v38  ;;  %v19685_v58 = vld [vmem:[#allocation15_spill] sm:$0xff]  ;;  %v19687_v21 = vld [vmem:[#allocation46_spill] sm:$0xff] }
 0x2f1   : > { %v16620_v12 = vadd.f32 %v13204_v1, %v16464_v43  ;;  %v3207_v1 = vadd.f32 %v19674_v34, %v2822_v5  ;;  %v3219_v17 = vadd.f32 %v19677_v16, %v2834_v20  ;;  %v19681_v5 = vld [vmem:[#allocation34_spill] sm:$0xff] }
 0x2f2   : > { %v4795_v2 = vpop.f32.mrf.mxu1  ;;  %v16636_v62 = vpop.f32.mrf.mxu0  ;;  %v4446_v35 = vadd.f32 %v19681_v5, %v19680_v9  ;;  %v3964_v38 = vadd.f32 %v16456_v53, %v3211_v26  ;;  %v19688_v26 = vld [vmem:[#allocation47_spill] sm:$0xff] }
 0x2f3   : > { %v16633_v43 = vadd.f32 %v4795_v2, %v16469_v44  ;;  %v3215_v44 = vadd.f32 %v19676_v22, %v2830_v8  ;;  %v19682_v8 = vld [vmem:[#allocation25_spill] sm:$0xff]  ;;  %v3960_v18 = vadd.f32 %v16445_v60, %v3207_v1  ;;  %v4444_v2 = vadd.f32 %v19684_v30, %v19683_v14  ;;  %v19696_v14 = vld [vmem:[#allocation27_spill] sm:$0xff] }
 0x2f4   : > { %v13205_v0 = vpop.f32.mrf.mxu1  ;;  %v16659_v47 = vpop.f32.mrf.mxu0  ;;  %v3956_v20 = vadd.f32 %v19682_v8, %v3203_v13  ;;  %v3972_v22 = vadd.f32 %v16491_v10, %v3219_v17  ;;  %v4828_v13 = vadd.f32 %v16498_v52, %v4442_v59  ;;  %v4826_v60 = vadd.f32 %v16502_v19, %v4440_v32  ;;  %v19691_v17 = vld [vmem:[#allocation19_spill] sm:$0xff]  ;;  %v19692_v59 = vld [vmem:[#allocation26_spill] sm:$0xff] }
 0x2f5   : > { %v16643_v39 = vadd.f32 %v13205_v0, %v16475_v61  ;;  %v4441_v61 = vadd.f32 %v19679_v29, %v3944_v41  ;;  %v4445_v0 = vadd.f32 %v19685_v58, %v3948_v4  ;;  %v3968_v3 = vadd.f32 %v16471_v37, %v3215_v44  ;;  %v19686_v41 = vld [vmem:[#allocation17_spill] sm:$0xff]  ;;  %v19690_v29 = vld [vmem:[#allocation51_spill] sm:$0xff]  ;;  %v19697_v58 = vld [vmem:[#allocation30_spill] sm:$0xff] }
 0x2f6   : > { %v16650_v24 = vpop.f32.mrf.mxu1  ;;  %v4449_v34 = vadd.f32 %v19686_v41, %v3952_v56  ;;  %v4829_v1 = vadd.f32 %v16507_v46, %v4443_v11  ;;  %v4832_v53 = vadd.f32 %v19687_v21, %v4446_v35  ;;  %v4830_v37 = vadd.f32 %v19688_v26, %v4444_v2  ;;  %v16679_v44 = vpop.f32.mrf.mxu0  ;;  %v19689_v56 = vld [vmem:[#allocation37_spill] sm:$0xff]  ;;  %v19693_v11 = vld [vmem:[#allocation22_spill] sm:$0xff]  ;;  %v19702_v26 = vld [vmem:[#allocation43_spill] sm:$0xff] }
 0x2f7   : > { %v4827_v4 = vadd.f32 %v16511_v48, %v4441_v61  ;;  %v4831_v10 = vadd.f32 %v19690_v29, %v4445_v0  ;;  %v4453_v52 = vadd.f32 %v19691_v17, %v3956_v20  ;;  %v4457_v19 = vadd.f32 %v19692_v59, %v3960_v18  ;;  %v19694_v61 = vld [vmem:[#allocation28_spill] sm:$0xff]  ;;  %v19695_v35 = vld [vmem:[#allocation41_spill] sm:$0xff]  ;;  %v19699_v20 = vld [vmem:[#allocation35_spill] sm:$0xff] }
 0x2f8   : > { %v13208_v63 = vpop.f32.mrf.mxu1  ;;  %v4835_v46 = vadd.f32 %v16548_v42, %v4449_v34  ;;  %v4461_v48 = vadd.f32 %v19693_v11, %v3964_v38  ;;  %v4465_v9 = vadd.f32 %v19694_v61, %v3968_v3  ;;  %v4469_v30 = vadd.f32 %v19696_v14, %v3972_v22  ;;  %v19698_v0 = vld [vmem:[#allocation32_spill] sm:$0xff]  ;;  %v19700_v21 = vld [vmem:[#allocation38_spill] sm:$0xff] }
 0x2f9   : > { %v16670_v36 = vadd.f32 %v13208_v63, %v16484_v27  ;;  %v5581_v63 = vadd.f32 %v19697_v58, %v4828_v13  ;;  %v5579_v41 = vadd.f32 %v19698_v0, %v4826_v60  ;;  %v4839_v18 = vadd.f32 %v16570_v33, %v4453_v52  ;;  %v19701_v34 = vld [vmem:[#allocation42_spill] sm:$0xff]  ;;  %v16705_v13 = vld [vmem:[%s19503_s3] ss:$0 sm:$0xff] }
 0x2fa   : > { %v4811_v16 = vpop.f32.mrf.mxu1  ;;  %v5580_v42 = vadd.f32 %v19700_v21, %v4827_v4  ;;  %v5585_v38 = vadd.f32 %v19701_v34, %v4832_v53  ;;  %v16699_v3 = vadd.f32 %v19702_v26, %v4830_v37  ;;  %v19703_v60 = vld [vmem:[#allocation50_spill] sm:$0xff]  ;;  %v19705_v33 = vld [vmem:[#allocation45_spill] sm:$0xff]  ;;  %v19706_v53 = vld [vmem:[#allocation48_spill] sm:$0xff]  ;;  %v16727_v11 = vadd.f32 %v16533_v25, %v4835_v46 }
 0x2fb   : > { %v16682_v27 = vadd.f32 %v4811_v16, %v19689_v56  ;;  %v13248_v5 = vpop.f32.mrf.mxu0  ;;  %v5582_v16 = vadd.f32 %v19699_v20, %v4829_v1  ;;  %v4843_v56 = vadd.f32 %v16587_v6, %v4457_v19  ;;  %v19704_v1 = vld [vmem:[#allocation44_spill] sm:$0xff]  ;;  %v16712_v4 = vadd.f32 %v19705_v33, %v4831_v10  ;;  %v19707_v6 = vld [vmem:[#allocation49_spill] sm:$0xff] }
 0x2fc   : > { %v13209_v32 = vpop.f32.mrf.mxu1  ;;  %v16709_v17 = vadd.f32 %v19704_v1, %v19703_v60  ;;  %v16716_v37 = vadd.f32 %v19706_v53, %v16536_v57  ;;  %v16720_v59 = vadd.f32 %v19707_v6, %v16539_v23  ;;  %v19708_v19 = vld [vmem:[#allocation52_spill] sm:$0xff]  ;;  %v4847_v61 = vadd.f32 %v16606_v40, %v4461_v48  ;;  %v16733_v10 = vld [vmem:[%s19504_s4] ss:$0 sm:$0xff]  ;;  %v19720_v53 = vld [vmem:[#allocation63_spill] sm:$0xff] }
 0x2fd   : > { %v4857_v8 = vadd.f32 %v13209_v32, %v19695_v35  ;;  %v5564_v29 = vpop.f32.mrf.mxu0  ;;  %v16724_v32 = vadd.f32 %v19708_v19, %v16544_v51  ;;  %v16737_v35 = vadd.f32 %v16541_v28, %v16557_v50  ;;  %v16741_v23 = vadd.f32 %v16550_v31, %v16563_v54  ;;  %v19709_v48 = vld [vmem:[#allocation53_spill] sm:$0xff]  ;;  %v19710_v31 = vld [vmem:[#allocation56_spill] sm:$0xff]  ;;  %v19711_v54 = vld [vmem:[#allocation54_spill] sm:$0xff] }
 0x2fe   : > { %v4814_v2 = vpop.f32.mrf.mxu1  ;;  %v16745_v25 = vadd.f32 %v16554_v7, %v16566_v45  ;;  %v16749_v46 = vadd.f32 %v16560_v55, %v4839_v18  ;;  %v16753_v14 = vadd.f32 %v19709_v48, %v16575_v49  ;;  %v4851_v28 = vadd.f32 %v16650_v24, %v4465_v9  ;;  %v19712_v7 = vld [vmem:[#allocation58_spill] sm:$0xff]  ;;  %v19713_v45 = vld [vmem:[#allocation55_spill] sm:$0xff]  ;;  %v19715_v21 = vld [vmem:[#allocation60_spill] sm:$0xff] }
 0x2ff   : > { %v13249_v50 = vpop.f32.mrf.mxu0  ;;  %v16762_v0 = vadd.f32 %v19713_v45, %v19712_v7  ;;  %v19716_v24 = vld [vmem:[#allocation59_spill] sm:$0xff]  ;;  %v4855_v34 = vadd.f32 %v4814_v2, %v4469_v30  ;;  %v19718_v60 = vld [vmem:[#allocation61_spill] sm:$0xff]  ;;  %v19719_v33 = vld [vmem:[#allocation64_spill] sm:$0xff]  ;;  %v16788_v2 = vadd.f32 %v16627_v15, %v16620_v12  ;;  %v16792_v48 = vadd.f32 %v16636_v62, %v16633_v43 }
 0x300   : > { %v13260_v22 = vpop.f32.mrf.mxu1  ;;  %v16771_v9 = vadd.f32 %v19716_v24, %v19715_v21  ;;  %v16804_v12 = vadd.f32 %v13248_v5, %v16670_v36  ;;  %v16807_v15 = vadd.f32 %v5564_v29, %v16682_v27  ;;  %v16809_v43 = vadd.f32 %v13249_v50, %v4857_v8  ;;  %v6646_v50 = vld [vmem:[#allocation3 + $0x18] sm:$0xf] }
 0x301   : > { %v6078_v52 = vadd.f32 %v13260_v22, %v5581_v63  ;;  %v16758_v63 = vadd.f32 %v19711_v54, %v19710_v31  ;;  %v19717_v22 = vld [vmem:[#allocation62_spill] sm:$0xff] }
 0x302   : > { %v5949_v57 = vpop.f32.mrf.mxu1  ;;  %v16775_v1 = vadd.f32 %v19718_v60, %v19717_v22 }
 0x303   : > { %v6117_v51 = vmul.f32 %v16705_v13, %v6078_v52  ;;  %v6076_v40 = vadd.f32 %v5949_v57, %v5579_v41  ;;  %v19714_v41 = vld [vmem:[#allocation57_spill] sm:$0xff]  ;;  %v16779_v52 = vadd.f32 %v19720_v53, %v19719_v33 }
 0x304   : > { %v13261_v58 = vpop.f32.mrf.mxu1  ;;  %v16765_v20 = vadd.f32 %v19714_v41, %v4843_v56  ;;  %v19721_v56 = vld [vmem:[#allocation65_spill] sm:$0xff] }
 0x305   : > { %v6156_v55 = vadd.f32 %v16733_v10, %v6117_v51  ;;  %v6115_v49 = vmul.f32 %v16705_v13, %v6076_v40  ;;  %v6079_v18 = vadd.f32 %v13261_v58, %v5582_v16  ;;  %v16782_v6 = vadd.f32 %v19721_v56, %v4847_v61  ;;  %v5567_v40 = vpop.f32.mrf.mxu0  ;;  %v6637_v56 = vld [vmem:[#allocation3 + $0xc] sm:$0xf] }
 0x306   : > { %v5952_v26 = vpop.f32.mrf.mxu1  ;;  %v16796_v61 = vadd.f32 %v16659_v47, %v16643_v39  ;;  %v16799_v58 = vadd.f32 %v16679_v44, %v4851_v28  ;;  %v16811_v47 = vadd.f32 %v5567_v40, %v4855_v34 }
 0x307   : > { %v6188_v19 = vmax.f32 %v6156_v55, 0.0  ;;  %v6154_v16 = vadd.f32 %v16733_v10, %v6115_v49  ;;  %v6118_v57 = vmul.f32 %v16705_v13, %v6079_v18  ;;  %v6077_v51 = vadd.f32 %v5952_v26, %v5580_v42 }
 0x308   : > { %v13264_v30 = vpop.f32.mrf.mxu1 }
 0x309   : > { %v12497_v31 = vpack.c.bf16 %v6188_v19, %v6188_v19  ;;  %v6186_v54 = vmax.f32 %v6154_v16, 0.0  ;;  %v6157_v42 = vadd.f32 %v16733_v10, %v6118_v57  ;;  %v6116_v7 = vmul.f32 %v16705_v13, %v6077_v51 }
 0x30a   : > { %v6082_v62 = vadd.f32 %v13264_v30, %v5585_v38  ;;  %v5965_v39 = vpop.f32.mrf.mxu1 }
 0x30b   : > { %v6332_v44 = vshrl.u32 %v12497_v31, 16  ;;  %v12495_v28 = vpack.c.bf16 %v6186_v54, %v6186_v54  ;;  %v6189_v45 = vmax.f32 %v6157_v42, 0.0  ;;  %v6335_v41 = vshll.u32 %v12497_v31, 16 }
 0x30c   : > { %v6155_v55 = vadd.f32 %v16733_v10, %v6116_v7  ;;  %v6121_v49 = vmul.f32 %v16705_v13, %v6082_v62  ;;  %v6080_v36 = vadd.f32 %v5965_v39, %v16699_v3  ;;  %v13265_v5 = vpop.f32.mrf.mxu1 }
 0x30d   : > { %v6334_v18 = vrot.slane %v6332_v44, 7  ;;  %v6315_v27 = vshrl.u32 %v12495_v28, 16  ;;  %v6318_v29 = vshll.u32 %v12495_v28, 16  ;;  %v12498_v8 = vpack.c.bf16 %v6189_v45, %v6189_v45 }
 0x30e   : > { %v6187_v21 = vmax.f32 %v6155_v55, 0.0  ;;  %v6160_v24 = vadd.f32 %v16733_v10, %v6121_v49  ;;  %v6119_v34 = vmul.f32 %v16705_v13, %v6080_v36  ;;  %v6083_v26 = vadd.f32 %v13265_v5, %v16709_v17  ;;  %v5968_v3 = vpop.f32.mrf.mxu1  ;;  %v6650_v17 = vld [vmem:[#allocation3 + $0x20] sm:$0x1] }
 0x30f   : > { %v6337_v22 = vor.u32 %v6335_v41, %v6334_v18  ;;  %v6338_v60 = vrot.slane %v6334_v18, 4  ;;  %v6317_v33 = vrot.slane %v6315_v27, 7  ;;  %v6340_v53 = vshrl.u32 %v12498_v8, 16 }
 0x310   : > { %v6343_v19 = vshll.u32 %v12498_v8, 16  ;;  %v12496_v16 = vpack.c.bf16 %v6187_v21, %v6187_v21  ;;  %v6192_v57 = vmax.f32 %v6160_v24, 0.0  ;;  %v6158_v51 = vadd.f32 %v16733_v10, %v6119_v34  ;;  %v13268_v40 = vpop.f32.mrf.mxu1  ;;  %v6643_v34 = vld [vmem:[#allocation3 + $0x14] sm:$0x1] }
 0x311   : > { %v6647_v30 = vsel %vm16818_vm4, %v6337_v22, %v6646_v50  ;;  %v6320_v31 = vor.u32 %v6318_v29, %v6317_v33  ;;  %v6321_v54 = vrot.slane %v6317_v33, 4  ;;  %v6342_v42 = vrot.slane %v6340_v53, 7 }
 0x312   : > { %6648 = vst [vmem:[#allocation3 + $0x18] sm:$0xf] %v6647_v30  ;;  %v6323_v7 = vshrl.u32 %v12496_v16, 16  ;;  %v6326_v62 = vshll.u32 %v12496_v16, 16  ;;  %v12501_v39 = vpack.c.bf16 %v6192_v57, %v6192_v57  ;;  %v6190_v44 = vmax.f32 %v6158_v51, 0.0  ;;  %v5981_v28 = vpop.f32.mrf.mxu1 }
 0x313   : > { %v6638_v45 = vsel %vm16818_vm4, %v6320_v31, %v6637_v56  ;;  %v6345_v41 = vor.u32 %v6343_v19, %v6342_v42  ;;  %v6347_v55 = vrot.slane %v6342_v42, 4  ;;  %v6122_v49 = vmul.f32 %v16705_v13, %v6083_v26  ;;  %v6660_v57 = vld [vmem:[#allocation3 + $0x30] sm:$0xf] }
 0x314   : > { %6639 = vst [vmem:[#allocation3 + $0xc] sm:$0xf] %v6638_v45  ;;  %v6325_v36 = vrot.slane %v6323_v7, 7  ;;  %v6366_v5 = vshrl.u32 %v12501_v39, 16  ;;  %v6369_v18 = vshll.u32 %v12501_v39, 16  ;;  %v12499_v27 = vpack.c.bf16 %v6190_v44, %v6190_v44  ;;  %v13269_v29 = vpop.f32.mrf.mxu1 }
 0x315   : > { %v6346_v50 = vsel %vm14379_vm13, %v6338_v60, %v6345_v41  ;;  %v6651_v24 = vsel %vm14315_vm6, %v6347_v55, %v6650_v17  ;;  %v6161_v22 = vadd.f32 %v16733_v10, %v6122_v49  ;;  %v6081_v33 = vadd.f32 %v5968_v3, %v16712_v4 }
 0x316   : > { %6649 = vst.msk [vmem:[#allocation3 + $0x1c] sm:$0xf] %vm361_vm2, %v6346_v50  ;;  %6652 = vst [vmem:[#allocation3 + $0x20] sm:$0x1] %v6651_v24  ;;  %v6328_v26 = vor.u32 %v6326_v62, %v6325_v36  ;;  %v6330_v53 = vrot.slane %v6325_v36, 4  ;;  %v6368_v56 = vrot.slane %v6366_v5, 7  ;;  %v5984_v16 = vpop.f32.mrf.mxu1  ;;  %v6086_v31 = vadd.f32 %v13268_v40, %v16716_v37 }
 0x317   : > { %v6349_v19 = vshrl.u32 %v12499_v27, 16  ;;  %v6352_v51 = vshll.u32 %v12499_v27, 16  ;;  %v6193_v30 = vmax.f32 %v6161_v22, 0.0  ;;  %v6120_v60 = vmul.f32 %v16705_v13, %v6081_v33  ;;  %v6653_v40 = vld [vmem:[#allocation3 + $0x24] sm:$0xf] }
 0x318   : > { %v6329_v42 = vsel %vm14379_vm13, %v6321_v54, %v6328_v26  ;;  %v6644_v4 = vsel %vm14315_vm6, %v6330_v53, %v6643_v34  ;;  %v6371_v3 = vor.u32 %v6369_v18, %v6368_v56  ;;  %v6372_v17 = vrot.slane %v6368_v56, 4  ;;  %v13272_v7 = vpop.f32.mrf.mxu1 }
 0x319   : > { %6640 = vst.msk [vmem:[#allocation3 + $0x10] sm:$0xf] %vm361_vm2, %v6329_v42  ;;  %6645 = vst [vmem:[#allocation3 + $0x14] sm:$0x1] %v6644_v4  ;;  %v16845_v62 = vrot.slane %v6349_v19, 7  ;;  %v12502_v39 = vpack.c.bf16 %v6193_v30, %v6193_v30  ;;  %v6159_v44 = vadd.f32 %v16733_v10, %v6120_v60  ;;  %v6125_v45 = vmul.f32 %v16705_v13, %v6086_v31 }
 0x31a   : > { %v6661_v37 = vsel %vm16818_vm4, %v6371_v3, %v6660_v57  ;;  %v6084_v54 = vadd.f32 %v5981_v28, %v16720_v59  ;;  %v6087_v41 = vadd.f32 %v13269_v29, %v16724_v32  ;;  %v6085_v55 = vadd.f32 %v5984_v16, %v16727_v11  ;;  %v5997_v27 = vpop.f32.mrf.mxu1  ;;  %v6664_v11 = vld [vmem:[#allocation3 + $0x38] sm:$0x1] }
 0x31b   : > { %6662 = vst [vmem:[#allocation3 + $0x30] sm:$0xf] %v6661_v37  ;;  %v6354_v49 = vor.u32 %v6352_v51, %v16845_v62  ;;  %v6355_v36 = vrot.slane %v16845_v62, 4  ;;  %v6374_v5 = vshrl.u32 %v12502_v39, 16  ;;  %v6377_v18 = vshll.u32 %v12502_v39, 16 }
 0x31c   : > { %v6191_v50 = vmax.f32 %v6159_v44, 0.0  ;;  %v6164_v24 = vadd.f32 %v16733_v10, %v6125_v45  ;;  %v6123_v34 = vmul.f32 %v16705_v13, %v6084_v54  ;;  %v6126_v22 = vmul.f32 %v16705_v13, %v6087_v41  ;;  %v13273_v30 = vpop.f32.mrf.mxu1  ;;  %v6657_v44 = vld [vmem:[#allocation3 + $0x2c] sm:$0x1] }
 0x31d   : > { %v6654_v59 = vsel %vm16818_vm4, %v6354_v49, %v6653_v40  ;;  %v6376_v32 = vrot.slane %v6374_v5, 7  ;;  %v6124_v28 = vmul.f32 %v16705_v13, %v6085_v55  ;;  %v6090_v29 = vadd.f32 %v13272_v7, %v16737_v35  ;;  %v16877_v5 = vld [vmem:[%s19505_s5 + $0x38] sm:$0xff]  }
 0x31e   : > { %6655 = vst [vmem:[#allocation3 + $0x24] sm:$0xf] %v6654_v59  ;;  %v12500_v33 = vpack.c.bf16 %v6191_v50, %v6191_v50  ;;  %v6196_v26 = vmax.f32 %v6164_v24, 0.0  ;;  %v6162_v53 = vadd.f32 %v16733_v10, %v6123_v34  ;;  %v6165_v56 = vadd.f32 %v16733_v10, %v6126_v22  ;;  %v6674_v22 = vld [vmem:[#allocation3 + $0x48] sm:$0xf]  ;;  %13398 = vmatprep.subr.bf16.mxu1 %v16877_v5 }
 0x31f   : > { %v6379_v19 = vor.u32 %v6377_v18, %v6376_v32  ;;  %v6381_v16 = vrot.slane %v6376_v32, 4  ;;  %v6163_v57 = vadd.f32 %v16733_v10, %v6124_v28  ;;  %v6129_v51 = vmul.f32 %v16705_v13, %v6090_v29 }
 0x320   : > { %v6357_v60 = vshrl.u32 %v12500_v33, 16  ;;  %v6360_v31 = vshll.u32 %v12500_v33, 16  ;;  %v12505_v42 = vpack.c.bf16 %v6196_v26, %v6196_v26  ;;  %v6194_v4 = vmax.f32 %v6162_v53, 0.0 }
 0x321   : > { %v6380_v35 = vsel %vm14379_vm13, %v6372_v17, %v6379_v19  ;;  %v6665_v3 = vsel %vm14315_vm6, %v6381_v16, %v6664_v11  ;;  %v6197_v7 = vmax.f32 %v6165_v56, 0.0  ;;  %v6195_v62 = vmax.f32 %v6163_v57, 0.0  ;;  %v6000_v17 = vpop.f32.mrf.mxu1 }
 0x322   : > { %6663 = vst.msk [vmem:[#allocation3 + $0x34] sm:$0xf] %vm361_vm2, %v6380_v35  ;;  %6666 = vst [vmem:[#allocation3 + $0x38] sm:$0x1] %v6665_v3  ;;  %v6359_v39 = vrot.slane %v6357_v60, 7  ;;  %v6400_v45 = vshrl.u32 %v12505_v42, 16  ;;  %v12503_v40 = vpack.c.bf16 %v6194_v4, %v6194_v4  ;;  %v6168_v55 = vadd.f32 %v16733_v10, %v6129_v51 }
 0x323   : > { %v6403_v37 = vshll.u32 %v12505_v42, 16  ;;  %v12506_v54 = vpack.c.bf16 %v6197_v7, %v6197_v7  ;;  %v12504_v41 = vpack.c.bf16 %v6195_v62, %v6195_v62  ;;  %v6088_v49 = vadd.f32 %v5997_v27, %v16741_v23  ;;  %v13276_v16 = vpop.f32.mrf.mxu1  ;;  %v6667_v51 = vld [vmem:[#allocation3 + $0x3c] sm:$0xf]  ;;  %v6678_v60 = vld [vmem:[#allocation3 + $0x50] sm:$0x1] }
 0x324   : > { %v6362_v18 = vor.u32 %v6360_v31, %v6359_v39  ;;  %v6364_v50 = vrot.slane %v6359_v39, 4  ;;  %v6402_v24 = vrot.slane %v6400_v45, 7  ;;  %v6383_v34 = vshrl.u32 %v12503_v40, 16  ;;  %v6671_v62 = vld [vmem:[#allocation3 + $0x44] sm:$0x1] }
 0x325   : > { %v6386_v59 = vshll.u32 %v12503_v40, 16  ;;  %v6408_v32 = vshrl.u32 %v12506_v54, 16  ;;  %v6411_v11 = vshll.u32 %v12506_v54, 16  ;;  %v6391_v28 = vshrl.u32 %v12504_v41, 16 }
 0x326   : > { %v6363_v23 = vsel %vm14379_vm13, %v6355_v36, %v6362_v18  ;;  %v6658_v27 = vsel %vm14315_vm6, %v6364_v50, %v6657_v44  ;;  %v6405_v29 = vor.u32 %v6403_v37, %v6402_v24  ;;  %v6406_v33 = vrot.slane %v6402_v24, 4 }
 0x327   : > { %6656 = vst.msk [vmem:[#allocation3 + $0x28] sm:$0xf] %vm361_vm2, %v6363_v23  ;;  %6659 = vst [vmem:[#allocation3 + $0x2c] sm:$0x1] %v6658_v27  ;;  %v6385_v26 = vrot.slane %v6383_v34, 7  ;;  %v6410_v53 = vrot.slane %v6408_v32, 7  ;;  %v6127_v36 = vmul.f32 %v16705_v13, %v6088_v49  ;;  %v6091_v42 = vadd.f32 %v13273_v30, %v16745_v25 }
 0x328   : > { %v6393_v56 = vrot.slane %v6391_v28, 7  ;;  %v6394_v19 = vshll.u32 %v12504_v41, 16  ;;  %v6675_v57 = vsel %vm16818_vm4, %v6405_v29, %v6674_v22  ;;  %v6200_v31 = vmax.f32 %v6168_v55, 0.0  ;;  %v6013_v41 = vpop.f32.mrf.mxu1  ;;  %v6753_v55 = vld [vmem:[#allocation3 + $0xc] sm:$0xf] }
 0x329   : > { %6676 = vst [vmem:[#allocation3 + $0x48] sm:$0xf] %v6675_v57  ;;  %v6388_v4 = vor.u32 %v6386_v59, %v6385_v26  ;;  %v6389_v35 = vrot.slane %v6385_v26, 4  ;;  %v6413_v3 = vor.u32 %v6411_v11, %v6410_v53  ;;  %v6415_v7 = vrot.slane %v6410_v53, 4  ;;  %v6688_v29 = vld [vmem:[#allocation3 + $0x60] sm:$0xf] }
 0x32a   : > { %v6396_v39 = vor.u32 %v6394_v19, %v6393_v56  ;;  %v6398_v44 = vrot.slane %v6393_v56, 4  ;;  %v12509_v45 = vpack.c.bf16 %v6200_v31, %v6200_v31  ;;  %v6166_v37 = vadd.f32 %v16733_v10, %v6127_v36  ;;  %v16909_v19 = vpop.f32.mrf.mxu1  ;;  %v16915_v31 = vld [vmem:[#allocation3 + $0x10] sm:$0xf] }
 0x32b   : > { %v6668_v40 = vsel %vm16818_vm4, %v6388_v4, %v6667_v51  ;;  %v6414_v54 = vsel %vm14379_vm13, %v6406_v33, %v6413_v3  ;;  %v6679_v25 = vsel %vm14315_vm6, %v6415_v7, %v6678_v60  ;;  %v6130_v30 = vmul.f32 %v16705_v13, %v6091_v42 }
 0x32c   : > { %6669 = vst [vmem:[#allocation3 + $0x3c] sm:$0xf] %v6668_v40  ;;  %6677 = vst.msk [vmem:[#allocation3 + $0x4c] sm:$0xf] %vm361_vm2, %v6414_v54  ;;  %v6397_v49 = vsel %vm14379_vm13, %v6389_v35, %v6396_v39  ;;  %v6672_v18 = vsel %vm14315_vm6, %v6398_v44, %v6671_v62  ;;  %v6434_v50 = vshrl.u32 %v12509_v45, 16  ;;  %v6437_v24 = vshll.u32 %v12509_v45, 16  ;;  %v6016_v45 = vpop.f32.mrf.mxu1 }
 0x32d   : > { %6680 = vst [vmem:[#allocation3 + $0x50] sm:$0x1] %v6679_v25  ;;  %6670 = vst.msk [vmem:[#allocation3 + $0x40] sm:$0xf] %vm361_vm2, %v6397_v49  ;;  %v6198_v34 = vmax.f32 %v6166_v37, 0.0  ;;  %v6169_v22 = vadd.f32 %v16733_v10, %v6130_v30  ;;  %v6089_v59 = vadd.f32 %v6000_v17, %v16749_v46  ;;  %v6094_v32 = vadd.f32 %v13276_v16, %v16753_v14 }
 0x32e   : > { %6673 = vst [vmem:[#allocation3 + $0x44] sm:$0x1] %v6672_v18  ;;  %v6436_v11 = vrot.slane %v6434_v50, 7  ;;  %v6092_v28 = vadd.f32 %v6013_v41, %v16758_v63  ;;  %v6828_v23 = vshrl.u32 %v6753_v55, 16  ;;  %v6831_v27 = vshll.u32 %v6753_v55, 16  ;;  %v13792_v41 = vld [vmem:[%s19505_s5 + $0x30] sm:$0xff]  }
 0x32f   : > { %v12507_v33 = vpack.c.bf16 %v6198_v34, %v6198_v34  ;;  %v6201_v26 = vmax.f32 %v6169_v22, 0.0  ;;  %v6128_v53 = vmul.f32 %v16705_v13, %v6089_v59  ;;  %v6133_v56 = vmul.f32 %v16705_v13, %v6094_v32  ;;  %v6755_v44 = vld [vmem:[#allocation3 + $0x18] sm:$0xf]  ;;  %v6681_v37 = vld [vmem:[#allocation3 + $0x54] sm:$0xf] }
 0x330   : > { %v6439_v57 = vor.u32 %v6437_v24, %v6436_v11  ;;  %v6440_v51 = vrot.slane %v6436_v11, 4  ;;  %v6131_v46 = vmul.f32 %v16705_v13, %v6092_v28  ;;  %v16912_v17 = vrot.slane %v6828_v23, 4  ;;  %v6692_v34 = vld [vmem:[#allocation3 + $0x68] sm:$0x1] }
 0x331   : > { %v6417_v14 = vshrl.u32 %v12507_v33, 16  ;;  %v6420_v16 = vshll.u32 %v12507_v33, 16  ;;  %v12510_v63 = vpack.c.bf16 %v6201_v26, %v6201_v26  ;;  %v6167_v60 = vadd.f32 %v16733_v10, %v6128_v53  ;;  %v6685_v26 = vld [vmem:[#allocation3 + $0x5c] sm:$0x1] }
 0x332   : > { %v6689_v36 = vsel %vm16818_vm4, %v6439_v57, %v6688_v29  ;;  %v6172_v42 = vadd.f32 %v16733_v10, %v6133_v56  ;;  %v6170_v4 = vadd.f32 %v16733_v10, %v6131_v46  ;;  %v16921_v35 = vrot.slane %v6831_v27, 5  ;;  %v13280_v29 = vpop.f32.mrf.mxu1  ;;  %v16932_v46 = vld [vmem:[#allocation3 + $0x1c] sm:$0xf] }
 0x333   : > { %6690 = vst [vmem:[#allocation3 + $0x60] sm:$0xf] %v6689_v36  ;;  %v6419_v3 = vrot.slane %v6417_v14, 7  ;;  %v6442_v7 = vshrl.u32 %v12510_v63, 16  ;;  %v6445_v62 = vshll.u32 %v12510_v63, 16  ;;  %v6199_v39 = vmax.f32 %v6167_v60, 0.0 }
 0x334   : > { %v6204_v40 = vmax.f32 %v6172_v42, 0.0  ;;  %v6202_v54 = vmax.f32 %v6170_v4, 0.0  ;;  %v6841_v25 = vshrl.u32 %v16915_v31, 16  ;;  %v12136_v30 = vcombine.low %v6753_v55, %v16915_v31  ;;  %v6702_v60 = vld [vmem:[#allocation3 + $0x78] sm:$0xf] }
 0x335   : > { %v6422_v49 = vor.u32 %v6420_v16, %v6419_v3  ;;  %v6423_v18 = vrot.slane %v6419_v3, 4  ;;  %v6444_v50 = vrot.slane %v6442_v7, 7  ;;  %v12508_v24 = vpack.c.bf16 %v6199_v39, %v6199_v39  ;;  %v6695_v42 = vld [vmem:[#allocation3 + $0x6c] sm:$0xf] }
 0x336   : > { %v12513_v22 = vpack.c.bf16 %v6204_v40, %v6204_v40  ;;  %v12511_v59 = vpack.c.bf16 %v6202_v54, %v6202_v54  ;;  %13331 = vmatmul.mubr.msk.bf16.vlgmr.msra.gmra.mxu1 %vm7251_vm0, %v12136_v30  ;;  %v6852_v32 = vshrl.u32 %v6755_v44, 16  ;;  %v6855_v11 = vshll.u32 %v6755_v44, 16  ;;  %v6029_v54 = vpop.f32.mrf.mxu1  ;;  %v16949_v30 = vld [vmem:[#allocation3 + $0x28] sm:$0xf] }
 0x337   : > { %v6682_v28 = vsel %vm16818_vm4, %v6422_v49, %v6681_v37  ;;  %v6447_v23 = vor.u32 %v6445_v62, %v6444_v50  ;;  %v6449_v55 = vrot.slane %v6444_v50, 4  ;;  %v6425_v27 = vshrl.u32 %v12508_v24, 16  ;;  %13399 = vmatpush3.bf16.msra.mxu1 %v16877_v5  ;;  %v6757_v62 = vld [vmem:[#allocation3 + $0x24] sm:$0xf] }
 0x338   : > { %6683 = vst [vmem:[#allocation3 + $0x54] sm:$0xf] %v6682_v28  ;;  %v6428_v33 = vshll.u32 %v12508_v24, 16  ;;  %v6468_v53 = vshrl.u32 %v12513_v22, 16  ;;  %v6471_v56 = vshll.u32 %v12513_v22, 16  ;;  %v6451_v57 = vshrl.u32 %v12511_v59, 16  ;;  %13400 = vmatprep.subr.bf16.mxu1 %v13792_v41 }
 0x339   : > { %v6448_v14 = vsel %vm14379_vm13, %v6440_v51, %v6447_v23  ;;  %v6693_v16 = vsel %vm14315_vm6, %v6449_v55, %v6692_v34  ;;  %v6427_v63 = vrot.slane %v6425_v27, 7  ;;  %v6454_v36 = vshll.u32 %v12511_v59, 16 }
 0x33a   : > { %6691 = vst.msk [vmem:[#allocation3 + $0x64] sm:$0xf] %vm361_vm2, %v6448_v14  ;;  %6694 = vst [vmem:[#allocation3 + $0x68] sm:$0x1] %v6693_v16  ;;  %v16939_v5 = vrot.slane %v6468_v53, 7  ;;  %v16941_v4 = vrot.slane %v6451_v57, 7  ;;  %v12137_v40 = vcombine.low %v6755_v44, %v16932_v46  ;;  %v6095_v44 = vadd.f32 %v16909_v19, %v16762_v0 }
 0x33b   : > { %v16943_v3 = vrot.slane %v6852_v32, 4  ;;  %v16945_v7 = vrot.slane %v6855_v11, 5  ;;  %v6430_v51 = vor.u32 %v6428_v33, %v6427_v63  ;;  %v6432_v39 = vrot.slane %v6427_v63, 4  ;;  %13401 = vmatpush3.bf16.msra.mxu1 %v13792_v41  ;;  %v16988_v63 = vld [vmem:[#allocation3 + $0x30] sm:$0xf] }
 0x33c   : > { %v6865_v37 = vshrl.u32 %v16932_v46, 16  ;;  %v6473_v49 = vor.u32 %v6471_v56, %v16939_v5  ;;  %v6474_v50 = vrot.slane %v16939_v5, 4  ;;  %v6456_v24 = vor.u32 %v6454_v36, %v16941_v4  ;;  %13334 = vmatprep.mubr.msk.bf16.mxu1 %vm7251_vm0, %v12137_v40 }
 0x33d   : > { %v6457_v34 = vrot.slane %v16941_v4, 4  ;;  %v6431_v22 = vsel %vm14379_vm13, %v6423_v18, %v6430_v51  ;;  %v6686_v59 = vsel %vm14315_vm6, %v6432_v39, %v6685_v26  ;;  %v6093_v41 = vadd.f32 %v6016_v45, %v16765_v20  ;;  %v6788_v26 = vld [vmem:[#allocation3 + $0x14] sm:$0x1] }
 0x33e   : > { %6684 = vst.msk [vmem:[#allocation3 + $0x58] sm:$0xf] %vm361_vm2, %v6431_v22  ;;  %6687 = vst [vmem:[#allocation3 + $0x5c] sm:$0x1] %v6686_v59  ;;  %v6703_v32 = vsel %vm16818_vm4, %v6473_v49, %v6702_v60  ;;  %v6696_v11 = vsel %vm16818_vm4, %v6456_v24, %v6695_v42  ;;  %v6098_v18 = vadd.f32 %v13280_v29, %v16771_v9  ;;  %v6876_v20 = vshrl.u32 %v6757_v62, 16  ;;  %v16990_v60 = vpop.f32.mrf.mxu1 }
 0x33f   : > { %v6096_v28 = vadd.f32 %v6029_v54, %v16775_v1  ;;  %6704 = vst [vmem:[#allocation3 + $0x78] sm:$0xf] %v6703_v32  ;;  %6697 = vst [vmem:[#allocation3 + $0x6c] sm:$0xf] %v6696_v11  ;;  %v6134_v23 = vmul.f32 %v16705_v13, %v6095_v44  ;;  %v6132_v0 = vmul.f32 %v16705_v13, %v6093_v41  ;;  %v6879_v19 = vshll.u32 %v6757_v62, 16 }
 0x340   : > { %v6137_v45 = vmul.f32 %v16705_v13, %v6098_v18  ;;  %v6889_v27 = vshrl.u32 %v16949_v30, 16  ;;  %v12138_v33 = vcombine.low %v6757_v62, %v16949_v30  ;;  %v16978_v29 = vrot.slane %v6876_v20, 4  ;;  %v6032_v18 = vpop.f32.mrf.mxu1  ;;  %v6706_v20 = vld [vmem:[#allocation3 + $0x80] sm:$0x1] }
 0x341   : > { %v6135_v55 = vmul.f32 %v16705_v13, %v6096_v28  ;;  %v6173_v9 = vadd.f32 %v16733_v10, %v6134_v23  ;;  %v6171_v1 = vadd.f32 %v16733_v10, %v6132_v0  ;;  %v16980_v53 = vrot.slane %v6879_v19, 5  ;;  %v16997_v0 = vld [vmem:[#allocation3 + $0x34] sm:$0xf] }
 0x342   : > { %v6176_v56 = vadd.f32 %v16733_v10, %v6137_v45  ;;  %13335 = vmatmul.mubr.msk.bf16.gmra.mxu1 %vm7251_vm0, %v12138_v33  ;;  %v6834_v14 = vor.u32 %v16921_v35, %v16912_v17  ;;  %v6837_v16 = vshll.u32 %v16915_v31, 16  ;;  %v6843_v62 = vrot.slane %v6841_v25, 4  ;;  %v6699_v19 = vld [vmem:[#allocation3 + $0x74] sm:$0x1] }
 0x343   : > { %v6174_v57 = vadd.f32 %v16733_v10, %v6135_v55  ;;  %v6205_v36 = vmax.f32 %v6173_v9, 0.0  ;;  %v6203_v42 = vmax.f32 %v6171_v1, 0.0  ;;  %v6847_v51 = vshll.u32 %v6788_v26, 16 }
 0x344   : > { %v6208_v39 = vmax.f32 %v6176_v56, 0.0  ;;  %v6835_v54 = vrot.slane %v6834_v14, 4  ;;  %v6839_v49 = vrot.slane %v6837_v16, 5  ;;  %v6900_v17 = vshrl.u32 %v16988_v63, 16  ;;  %v6716_v56 = vld [vmem:[#allocation3 + $0x90] sm:$0xf] }
 0x345   : > { %v6206_v40 = vmax.f32 %v6174_v57, 0.0  ;;  %v12514_v24 = vpack.c.bf16 %v6205_v36, %v6205_v36  ;;  %v12512_v22 = vpack.c.bf16 %v6203_v42, %v6203_v42  ;;  %v6849_v59 = vrot.slane %v6847_v51, 5  ;;  %v13284_v51 = vpop.f32.mrf.mxu1 }
 0x346   : > { %v12517_v35 = vpack.c.bf16 %v6208_v39, %v6208_v39  ;;  %v6840_v32 = vsel %vm14338_vm9, %v6835_v54, %v6839_v49  ;;  %v6844_v11 = vor.u32 %v6843_v62, %v6839_v49  ;;  %v16999_v14 = vrot.slane %v6900_v17, 4 }
 0x347   : > { %v12515_v44 = vpack.c.bf16 %v6206_v40, %v6206_v40  ;;  %v6476_v28 = vshrl.u32 %v12514_v24, 16  ;;  %v6479_v31 = vshll.u32 %v12514_v24, 16  ;;  %v6459_v25 = vshrl.u32 %v12512_v22, 16  ;;  %v6709_v24 = vld [vmem:[#allocation3 + $0x84] sm:$0xf] }
 0x348   : > { %v6462_v23 = vshll.u32 %v12512_v22, 16  ;;  %v6502_v45 = vshrl.u32 %v12517_v35, 16  ;;  %v6505_v55 = vshll.u32 %v12517_v35, 16  ;;  %v6845_v57 = vrot.slane %v6844_v11, 4 }
 0x349   : > { %v6485_v33 = vshrl.u32 %v12515_v44, 16  ;;  %v6488_v26 = vshll.u32 %v12515_v44, 16  ;;  %v6478_v9 = vrot.slane %v6476_v28, 7  ;;  %v6461_v1 = vrot.slane %v6459_v25, 7 }
 0x34a   : > { %v17001_v16 = vrot.slane %v6502_v45, 7  ;;  %v6903_v42 = vshll.u32 %v16988_v63, 16  ;;  %v6913_v62 = vshrl.u32 %v16997_v0, 16  ;;  %v6850_v4 = vsel %vm14338_vm9, %v6845_v57, %v6849_v59  ;;  %v13785_v59 = vld [vmem:[%s19505_s5 + $0x20] sm:$0xff]  }
 0x34b   : > { %v17003_v36 = vrot.slane %v6485_v33, 7  ;;  %v6481_v39 = vor.u32 %v6479_v31, %v6478_v9  ;;  %v6483_v40 = vrot.slane %v6478_v9, 4  ;;  %v6464_v54 = vor.u32 %v6462_v23, %v6461_v1  ;;  %v6789_v23 = vld [vmem:[#allocation3 + $0x20] sm:$0x1] }
 0x34c   : > { %v6466_v49 = vrot.slane %v6461_v1, 4  ;;  %v6507_v22 = vor.u32 %v6505_v55, %v17001_v16  ;;  %v6508_v35 = vrot.slane %v17001_v16, 4  ;;  %v12139_v45 = vcombine.low %v16988_v63, %v16997_v0 }
 0x34d   : > { %v6490_v17 = vor.u32 %v6488_v26, %v17003_v36  ;;  %v6491_v44 = vrot.slane %v17003_v36, 4  ;;  %v6482_v11 = vsel %vm14379_vm13, %v6474_v50, %v6481_v39  ;;  %v6707_v28 = vsel %vm14315_vm6, %v6483_v40, %v6706_v20  ;;  %v6045_v20 = vpop.f32.mrf.mxu1  ;;  %v6761_v26 = vld [vmem:[#allocation3 + $0x3c] sm:$0xf]  ;;  %v17058_v40 = vld [vmem:[#allocation3 + $0x40] sm:$0xf] }
 0x34e   : > { %v6465_v31 = vsel %vm14379_vm13, %v6457_v34, %v6464_v54  ;;  %v6700_v25 = vsel %vm14315_vm6, %v6466_v49, %v6699_v19  ;;  %6705 = vst.msk [vmem:[#allocation3 + $0x7c] sm:$0xf] %vm361_vm2, %v6482_v11  ;;  %6708 = vst [vmem:[#allocation3 + $0x80] sm:$0x1] %v6707_v28  ;;  %v6717_v5 = vsel %vm16818_vm4, %v6507_v22, %v6716_v56  ;;  %v17031_v34 = vrot.slane %v6903_v42, 5  ;;  %v17119_v36 = vld [vmem:[%s19505_s5 + $0x58] sm:$0xff]  }
 0x34f   : > { %6698 = vst.msk [vmem:[#allocation3 + $0x70] sm:$0xf] %vm361_vm2, %v6465_v31  ;;  %6701 = vst [vmem:[#allocation3 + $0x74] sm:$0x1] %v6700_v25  ;;  %v6710_v50 = vsel %vm16818_vm4, %v6490_v17, %v6709_v24  ;;  %v12102_v19 = vcombine.low %v6840_v32, %v6850_v4  ;;  %v6099_v55 = vadd.f32 %v16990_v60, %v16779_v52  ;;  %v6861_v9 = vshll.u32 %v16932_v46, 16  ;;  %v13839_v60 = vld [vmem:[%s19505_s5 + $0x28] sm:$0xff]  }
 0x350   : > { %6718 = vst [vmem:[#allocation3 + $0x90] sm:$0xf] %v6717_v5  ;;  %6711 = vst [vmem:[#allocation3 + $0x84] sm:$0xf] %v6710_v50  ;;  %v6858_v33 = vor.u32 %v16945_v7, %v16943_v3  ;;  %v6867_v1 = vrot.slane %v6865_v37, 4  ;;  %v6871_v32 = vshll.u32 %v6789_v23, 16  ;;  %v6097_v56 = vadd.f32 %v6032_v18, %v16782_v6  ;;  %13338 = vmatprep.mubr.msk.bf16.mxu1 %vm7251_vm0, %v12139_v45 }
 0x351   : > { %13295 = vmatmul.mubr.msk.bf16.vlgmr.msra.gmra.mxu0 %vm7251_vm0, %v12102_v19  ;;  %v6138_v52 = vmul.f32 %v16705_v13, %v6099_v55  ;;  %v6102_v7 = vadd.f32 %v13284_v51, %v16788_v2  ;;  %v6100_v63 = vadd.f32 %v6045_v20, %v16792_v48  ;;  %v6863_v46 = vrot.slane %v6861_v9, 5  ;;  %v13796_v48 = vld [vmem:[%s19505_s5 + $0x48] sm:$0xff]   ;;  %v17076_v19 = vpop.f32.mrf.mxu1  ;;  %13470 = vmatprep.subr.bf16.mxu1 %v17119_v36 }
 0x352   : > { %v6859_v3 = vrot.slane %v6858_v33, 4  ;;  %13363 = vmatpush3.bf16.msra.mxu0 %v13839_v60  ;;  %v6873_v37 = vrot.slane %v6871_v32, 5  ;;  %v6136_v6 = vmul.f32 %v16705_v13, %v6097_v56  ;;  %v6924_v18 = vshrl.u32 %v6761_v26, 16  ;;  %v17084_v32 = vld [vmem:[#allocation3 + $0x2c] sm:$0x1] }
 0x353   : > { %v6177_v57 = vadd.f32 %v16733_v10, %v6138_v52  ;;  %v6141_v42 = vmul.f32 %v16705_v13, %v6102_v7  ;;  %v6139_v39 = vmul.f32 %v16705_v13, %v6100_v63  ;;  %v6927_v2 = vshll.u32 %v6761_v26, 16  ;;  %13364 = vmatprep.subr.bf16.mxu0 %v13785_v59  ;;  %v6713_v63 = vld [vmem:[#allocation3 + $0x8c] sm:$0x1] }
 0x354   : > { %v6864_v51 = vsel %vm14338_vm9, %v6859_v3, %v6863_v46  ;;  %v6868_v54 = vor.u32 %v6867_v1, %v6863_v46  ;;  %v6175_v49 = vadd.f32 %v16733_v10, %v6136_v6  ;;  %v17066_v24 = vrot.slane %v6924_v18, 4  ;;  %v6730_v6 = vld [vmem:[#allocation3 + $0xa8] sm:$0xf] }
 0x355   : > { %v6209_v22 = vmax.f32 %v6177_v57, 0.0  ;;  %v6180_v17 = vadd.f32 %v16733_v10, %v6141_v42  ;;  %v6178_v13 = vadd.f32 %v16733_v10, %v6139_v39  ;;  %v17070_v11 = vrot.slane %v6927_v2, 5 }
 0x356   : > { %v6869_v28 = vrot.slane %v6868_v54, 4  ;;  %v6207_v31 = vmax.f32 %v6175_v49, 0.0  ;;  %v6937_v25 = vshrl.u32 %v17058_v40, 16  ;;  %v12140_v23 = vcombine.low %v6761_v26, %v17058_v40  ;;  %13365 = vmatpush3.bf16.msra.mxu0 %v13785_v59  ;;  %v6763_v49 = vld [vmem:[#allocation3 + $0x48] sm:$0xf] }
 0x357   : > { %v12518_v5 = vpack.c.bf16 %v6209_v22, %v6209_v22  ;;  %v6212_v50 = vmax.f32 %v6180_v17, 0.0  ;;  %v6210_v4 = vmax.f32 %v6178_v13, 0.0  ;;  %v6882_v20 = vor.u32 %v16980_v53, %v16978_v29  ;;  %13434 = vmatprep.subr.bf16.mxu0 %v13796_v48  ;;  %v6720_v29 = vld [vmem:[#allocation3 + $0x98] sm:$0x1] }
 0x358   : > { %v6874_v10 = vsel %vm14338_vm9, %v6869_v28, %v6873_v37  ;;  %v12516_v45 = vpack.c.bf16 %v6207_v31, %v6207_v31  ;;  %13339 = vmatmul.mubr.msk.bf16.gmra.mxu1 %vm7251_vm0, %v12140_v23  ;;  %v6885_v55 = vshll.u32 %v16949_v30, 16  ;;  %v6891_v33 = vrot.slane %v6889_v27, 4  ;;  %v6048_v30 = vpop.f32.mrf.mxu1 }
 0x359   : > { %v6510_v26 = vshrl.u32 %v12518_v5, 16  ;;  %v6513_v59 = vshll.u32 %v12518_v5, 16  ;;  %v12103_v9 = vcombine.low %v6864_v51, %v6874_v10  ;;  %v12521_v1 = vpack.c.bf16 %v6212_v50, %v6212_v50  ;;  %v6723_v51 = vld [vmem:[#allocation3 + $0x9c] sm:$0xf] }
 0x35a   : > { %v6493_v53 = vshrl.u32 %v12516_v45, 16  ;;  %v6496_v56 = vshll.u32 %v12516_v45, 16  ;;  %v12519_v52 = vpack.c.bf16 %v6210_v4, %v6210_v4  ;;  %v6883_v3 = vrot.slane %v6882_v20, 4  ;;  %v17102_v4 = vld [vmem:[#allocation3 + $0x4c] sm:$0xf]  ;;  %v13288_v20 = vpop.f32.mrf.mxu1 }
 0x35b   : > { %v6512_v7 = vrot.slane %v6510_v26, 7  ;;  %13298 = vmatprep.mubr.msk.bf16.mxu0 %vm7251_vm0, %v12103_v9  ;;  %v6536_v60 = vshrl.u32 %v12521_v1, 16  ;;  %v6539_v46 = vshll.u32 %v12521_v1, 16  ;;  %v6887_v37 = vrot.slane %v6885_v55, 5 }
 0x35c   : > { %v6495_v27 = vrot.slane %v6493_v53, 7  ;;  %v6519_v18 = vshrl.u32 %v12519_v52, 16  ;;  %v6522_v57 = vshll.u32 %v12519_v52, 16  ;;  %v6895_v42 = vshll.u32 %v17084_v32, 16  ;;  %v17125_v53 = vld [vmem:[#allocation3 + $0x38] sm:$0x1] }
 0x35d   : > { %v6515_v39 = vor.u32 %v6513_v59, %v6512_v7  ;;  %v6517_v2 = vrot.slane %v6512_v7, 4  ;;  %v17088_v48 = vrot.slane %v6536_v60, 7  ;;  %v6888_v54 = vsel %vm14338_vm9, %v6883_v3, %v6887_v37  ;;  %v6765_v60 = vld [vmem:[#allocation3 + $0x54] sm:$0xf] }
 0x35e   : > { %v6498_v22 = vor.u32 %v6496_v56, %v6495_v27  ;;  %v6500_v17 = vrot.slane %v6495_v27, 4  ;;  %v17092_v13 = vrot.slane %v6519_v18, 7  ;;  %v6892_v28 = vor.u32 %v6891_v33, %v6887_v37 }
 0x35f   : > { %v6516_v31 = vsel %vm14379_vm13, %v6508_v35, %v6515_v39  ;;  %v6721_v23 = vsel %vm14315_vm6, %v6517_v2, %v6720_v29  ;;  %v6541_v5 = vor.u32 %v6539_v46, %v17088_v48  ;;  %v6542_v50 = vrot.slane %v17088_v48, 4  ;;  %v17156_v39 = vld [vmem:[%s19504_s4] ss:$0 sm:$0xff] }
 0x360   : > { %6719 = vst.msk [vmem:[#allocation3 + $0x94] sm:$0xf] %vm361_vm2, %v6516_v31  ;;  %6722 = vst [vmem:[#allocation3 + $0x98] sm:$0x1] %v6721_v23  ;;  %v6499_v16 = vsel %vm14379_vm13, %v6491_v44, %v6498_v22  ;;  %v6714_v35 = vsel %vm14315_vm6, %v6500_v17, %v6713_v63  ;;  %v6524_v10 = vor.u32 %v6522_v57, %v17092_v13  ;;  %v6525_v45 = vrot.slane %v17092_v13, 4  ;;  %v6061_v63 = vpop.f32.mrf.mxu1 }
 0x361   : > { %6712 = vst.msk [vmem:[#allocation3 + $0x88] sm:$0xf] %vm361_vm2, %v6499_v16  ;;  %6715 = vst [vmem:[#allocation3 + $0x8c] sm:$0x1] %v6714_v35  ;;  %v6731_v55 = vsel %vm16818_vm4, %v6541_v5, %v6730_v6  ;;  %v6893_v33 = vrot.slane %v6892_v28, 4  ;;  %v6897_v26 = vrot.slane %v6895_v42, 5  ;;  %v12141_v29 = vcombine.low %v6763_v49, %v17102_v4 }
 0x362   : > { %v6948_v59 = vshrl.u32 %v6763_v49, 16  ;;  %6732 = vst [vmem:[#allocation3 + $0xa8] sm:$0xf] %v6731_v55  ;;  %v6724_v44 = vsel %vm16818_vm4, %v6524_v10, %v6723_v51  ;;  %v6951_v9 = vshll.u32 %v6763_v49, 16  ;;  %v6961_v1 = vshrl.u32 %v17102_v4, 16 }
 0x363   : > { %6725 = vst [vmem:[#allocation3 + $0x9c] sm:$0xf] %v6724_v44  ;;  %v6898_v56 = vsel %vm14338_vm9, %v6893_v33, %v6897_v26  ;;  %v6103_v3 = vadd.f32 %v17076_v19, %v16796_v61  ;;  %v6906_v7 = vor.u32 %v17031_v34, %v16999_v14  ;;  %13342 = vmatprep.mubr.msk.bf16.mxu1 %vm7251_vm0, %v12141_v29  ;;  %v6909_v27 = vshll.u32 %v16997_v0, 16  ;;  %v17145_v61 = vld [vmem:[%s19503_s3] ss:$0 sm:$0xff] }
 0x364   : > { %v17129_v52 = vrot.slane %v6948_v59, 4  ;;  %v12104_v46 = vcombine.low %v6888_v54, %v6898_v56  ;;  %v17136_v37 = vrot.slane %v6951_v9, 5  ;;  %v6915_v6 = vrot.slane %v6913_v62, 4  ;;  %v17160_v49 = vld [vmem:[#allocation3 + $0x58] sm:$0xf] }
 0x365   : > { %v6142_v14 = vmul.f32 %v17145_v61, %v6103_v3  ;;  %v6907_v34 = vrot.slane %v6906_v7, 4  ;;  %v6919_v19 = vshll.u32 %v17125_v53, 16  ;;  %v6101_v18 = vadd.f32 %v6048_v30, %v16799_v58 }
 0x366   : > { %13299 = vmatmul.mubr.msk.bf16.gmra.mxu0 %vm7251_vm0, %v12104_v46  ;;  %v6911_v57 = vrot.slane %v6909_v27, 5  ;;  %v6106_v42 = vadd.f32 %v13288_v20, %v16804_v12  ;;  %v6104_v0 = vadd.f32 %v6061_v63, %v16807_v15  ;;  %v6972_v62 = vshrl.u32 %v6765_v60, 16 }
 0x367   : > { %v6181_v2 = vadd.f32 %v17156_v39, %v6142_v14  ;;  %v6921_v51 = vrot.slane %v6919_v19, 5  ;;  %v6140_v54 = vmul.f32 %v17145_v61, %v6101_v18  ;;  %v6975_v58 = vshll.u32 %v6765_v60, 16  ;;  %v6734_v18 = vld [vmem:[#allocation3 + $0xb0] sm:$0x1] }
 0x368   : > { %v6912_v30 = vsel %vm14338_vm9, %v6907_v34, %v6911_v57  ;;  %v6916_v12 = vor.u32 %v6915_v6, %v6911_v57  ;;  %v6145_v15 = vmul.f32 %v17145_v61, %v6106_v42  ;;  %v6143_v22 = vmul.f32 %v17145_v61, %v6104_v0  ;;  %v17182_v34 = vld [vmem:[#allocation3 + $0x44] sm:$0x1] }
 0x369   : > { %v6213_v17 = vmax.f32 %v6181_v2, 0.0  ;;  %v6179_v28 = vadd.f32 %v17156_v39, %v6140_v54  ;;  %v17167_v31 = vrot.slane %v6972_v62, 4  ;;  %v17169_v23 = vrot.slane %v6975_v58, 5  ;;  %v6727_v58 = vld [vmem:[#allocation3 + $0xa4] sm:$0x1] }
 0x36a   : > { %v6917_v5 = vrot.slane %v6916_v12, 4  ;;  %v6184_v20 = vadd.f32 %v17156_v39, %v6145_v15  ;;  %v6182_v16 = vadd.f32 %v17156_v39, %v6143_v22  ;;  %v6985_v35 = vshrl.u32 %v17160_v49, 16  ;;  %v6744_v15 = vld [vmem:[#allocation3 + $0xc0] sm:$0xf] }
 0x36b   : > { %v12522_v10 = vpack.c.bf16 %v6213_v17, %v6213_v17  ;;  %v6211_v55 = vmax.f32 %v6179_v28, 0.0  ;;  %v12142_v33 = vcombine.low %v6765_v60, %v17160_v49  ;;  %v6930_v26 = vor.u32 %v17070_v11, %v17066_v24 }
 0x36c   : > { %v6922_v59 = vsel %vm14338_vm9, %v6917_v5, %v6921_v51  ;;  %v6216_v44 = vmax.f32 %v6184_v20, 0.0  ;;  %v6214_v9 = vmax.f32 %v6182_v16, 0.0  ;;  %v6933_v29 = vshll.u32 %v17058_v40, 16 }
 0x36d   : > { %v6544_v56 = vshrl.u32 %v12522_v10, 16  ;;  %v6547_v3 = vshll.u32 %v12522_v10, 16  ;;  %v12105_v7 = vcombine.low %v6912_v30, %v6922_v59  ;;  %v12520_v63 = vpack.c.bf16 %v6211_v55, %v6211_v55  ;;  %13343 = vmatmul.mubr.msk.bf16.gmra.mxu1 %vm7251_vm0, %v12142_v33  ;;  %v6737_v10 = vld [vmem:[#allocation3 + $0xb4] sm:$0xf]  ;;  %v6767_v55 = vld [vmem:[#allocation3 + $0x60] sm:$0xf]  ;;  %v13289_v33 = vpop.f32.mrf.mxu1 }
 0x36e   : > { %v12525_v46 = vpack.c.bf16 %v6216_v44, %v6216_v44  ;;  %v12523_v27 = vpack.c.bf16 %v6214_v9, %v6214_v9  ;;  %v6931_v6 = vrot.slane %v6930_v26, 4  ;;  %v6935_v60 = vrot.slane %v6933_v29, 5 }
 0x36f   : > { %v6546_v14 = vrot.slane %v6544_v56, 7  ;;  %13302 = vmatprep.mubr.msk.bf16.mxu0 %vm7251_vm0, %v12105_v7  ;;  %v6527_v24 = vshrl.u32 %v12520_v63, 16  ;;  %v6530_v11 = vshll.u32 %v12520_v63, 16  ;;  %v6939_v19 = vrot.slane %v6937_v25, 4  ;;  %v17212_v7 = vld [vmem:[#allocation3 + $0x50] sm:$0x1] }
 0x370   : > { %v6570_v57 = vshrl.u32 %v12525_v46, 16  ;;  %v6573_v42 = vshll.u32 %v12525_v46, 16  ;;  %v6553_v0 = vshrl.u32 %v12523_v27, 16  ;;  %v6556_v62 = vshll.u32 %v12523_v27, 16  ;;  %v6769_v63 = vld [vmem:[#allocation3 + $0x6c] sm:$0xf] }
 0x371   : > { %v6549_v2 = vor.u32 %v6547_v3, %v6546_v14  ;;  %v6551_v51 = vrot.slane %v6546_v14, 4  ;;  %v6529_v54 = vrot.slane %v6527_v24, 7  ;;  %v6936_v30 = vsel %vm14338_vm9, %v6931_v6, %v6935_v60 }
 0x372   : > { %v17188_v12 = vrot.slane %v6570_v57, 7  ;;  %v17190_v22 = vrot.slane %v6553_v0, 7  ;;  %v6940_v17 = vor.u32 %v6939_v19, %v6935_v60  ;;  %v6943_v25 = vshll.u32 %v17182_v34, 16 }
 0x373   : > { %v6550_v28 = vsel %vm14379_vm13, %v6542_v50, %v6549_v2  ;;  %v6735_v5 = vsel %vm14315_vm6, %v6551_v51, %v6734_v18  ;;  %v6532_v20 = vor.u32 %v6530_v11, %v6529_v54  ;;  %v6534_v16 = vrot.slane %v6529_v54, 4  ;;  %v17204_v50 = vld [vmem:[#allocation3 + $0x64] sm:$0xf]  ;;  %v6064_v11 = vpop.f32.mrf.mxu1 }
 0x374   : > { %6733 = vst.msk [vmem:[#allocation3 + $0xac] sm:$0xf] %vm361_vm2, %v6550_v28  ;;  %6736 = vst [vmem:[#allocation3 + $0xb0] sm:$0x1] %v6735_v5  ;;  %v6575_v26 = vor.u32 %v6573_v42, %v17188_v12  ;;  %v6576_v59 = vrot.slane %v17188_v12, 4  ;;  %v6558_v48 = vor.u32 %v6556_v62, %v17190_v22  ;;  %v6559_v44 = vrot.slane %v17190_v22, 4 }
 0x375   : > { %v6533_v9 = vsel %vm14379_vm13, %v6525_v45, %v6532_v20  ;;  %v6728_v29 = vsel %vm14315_vm6, %v6534_v16, %v6727_v58  ;;  %v6941_v56 = vrot.slane %v6940_v17, 4  ;;  %v6945_v3 = vrot.slane %v6943_v25, 5  ;;  %v17230_v42 = vld [vmem:[#allocation3 + $0x70] sm:$0xf]  ;;  %v17242_v25 = vld [vmem:[#allocation3 + $0x5c] sm:$0x1] }
 0x376   : > { %6726 = vst.msk [vmem:[#allocation3 + $0xa0] sm:$0xf] %vm361_vm2, %v6533_v9  ;;  %6729 = vst [vmem:[#allocation3 + $0xa4] sm:$0x1] %v6728_v29  ;;  %v6745_v46 = vsel %vm16818_vm4, %v6575_v26, %v6744_v15  ;;  %v6738_v13 = vsel %vm16818_vm4, %v6558_v48, %v6737_v10  ;;  %v6996_v27 = vshrl.u32 %v6767_v55, 16  ;;  %v6999_v6 = vshll.u32 %v6767_v55, 16 }
 0x377   : > { %6746 = vst [vmem:[#allocation3 + $0xc0] sm:$0xf] %v6745_v46  ;;  %6739 = vst [vmem:[#allocation3 + $0xb4] sm:$0xf] %v6738_v13  ;;  %v6946_v45 = vsel %vm14338_vm9, %v6941_v56, %v6945_v3  ;;  %v7009_v60 = vshrl.u32 %v17204_v50, 16  ;;  %v12143_v14 = vcombine.low %v6767_v55, %v17204_v50  ;;  %v6107_v24 = vadd.f32 %v13289_v33, %v16809_v43 }
 0x378   : > { %v12106_v19 = vcombine.low %v6936_v30, %v6946_v45  ;;  %v17224_v18 = vrot.slane %v6996_v27, 4  ;;  %v17226_v57 = vrot.slane %v6999_v6, 5  ;;  %v6954_v38 = vor.u32 %v17136_v37, %v17129_v52  ;;  %v6771_v16 = vld [vmem:[#allocation3 + $0x78] sm:$0xf]  ;;  %v17260_v29 = vld [vmem:[#allocation3 + $0x7c] sm:$0xf] }
 0x379   : > { %13346 = vmatprep.mubr.msk.bf16.mxu1 %vm7251_vm0, %v12143_v14  ;;  %v6146_v0 = vmul.f32 %v17145_v61, %v6107_v24  ;;  %v6957_v62 = vshll.u32 %v17102_v4, 16  ;;  %v6963_v43 = vrot.slane %v6961_v1, 4  ;;  %v6967_v2 = vshll.u32 %v17212_v7, 16 }
 0x37a   : > { %13303 = vmatmul.mubr.msk.bf16.gmra.mxu0 %vm7251_vm0, %v12106_v19  ;;  %v6955_v51 = vrot.slane %v6954_v38, 4  ;;  %v6105_v54 = vadd.f32 %v6064_v11, %v16811_v47  ;;  %v7020_v58 = vshrl.u32 %v6769_v63, 16  ;;  %v7023_v52 = vshll.u32 %v6769_v63, 16 }
 0x37b   : > { %v6185_v37 = vadd.f32 %v17156_v39, %v6146_v0  ;;  %v6959_v30 = vrot.slane %v6957_v62, 5  ;;  %v6969_v15 = vrot.slane %v6967_v2, 5  ;;  %v7033_v17 = vshrl.u32 %v17230_v42, 16  ;;  %v17272_v2 = vld [vmem:[#allocation3 + $0x68] sm:$0x1] }
 0x37c   : > { %v6144_v28 = vmul.f32 %v17145_v61, %v6105_v54  ;;  %v17245_v1 = vrot.slane %v7020_v58, 4  ;;  %v17247_v5 = vrot.slane %v7023_v52, 5  ;;  %v12144_v20 = vcombine.low %v6769_v63, %v17230_v42 }
 0x37d   : > { %v6217_v47 = vmax.f32 %v6185_v37, 0.0  ;;  %v6960_v10 = vsel %vm14338_vm9, %v6955_v51, %v6959_v30  ;;  %v6964_v55 = vor.u32 %v6963_v43, %v6959_v30  ;;  %v6978_v33 = vor.u32 %v17169_v23, %v17167_v31  ;;  %v6748_v51 = vld [vmem:[#allocation3 + $0xc8] sm:$0x1] }
 0x37e   : > { %v6183_v26 = vadd.f32 %v17156_v39, %v6144_v28  ;;  %13347 = vmatmul.mubr.msk.bf16.gmra.mxu1 %vm7251_vm0, %v12144_v20  ;;  %v6981_v61 = vshll.u32 %v17160_v49, 16  ;;  %v6987_v48 = vrot.slane %v6985_v35, 4  ;;  %v6991_v9 = vshll.u32 %v17242_v25, 16 }
 0x37f   : > { %v12526_v56 = vpack.c.bf16 %v6217_v47, %v6217_v47  ;;  %v6965_v3 = vrot.slane %v6964_v55, 4  ;;  %v6979_v63 = vrot.slane %v6978_v33, 4  ;;  %v7044_v46 = vshrl.u32 %v6771_v16, 16 }
 0x380   : > { %v6215_v13 = vmax.f32 %v6183_v26, 0.0  ;;  %v6983_v27 = vrot.slane %v6981_v61, 5  ;;  %v6993_v31 = vrot.slane %v6991_v9, 5  ;;  %v7047_v23 = vshll.u32 %v6771_v16, 16  ;;  %v17284_v26 = vld [vmem:[#allocation3 + $0x88] sm:$0xf] }
 0x381   : > { %v6578_v39 = vshrl.u32 %v12526_v56, 16  ;;  %v6581_v6 = vshll.u32 %v12526_v56, 16  ;;  %v6970_v45 = vsel %vm14338_vm9, %v6965_v3, %v6969_v15  ;;  %v17264_v14 = vrot.slane %v7044_v46, 4  ;;  %v6741_v61 = vld [vmem:[#allocation3 + $0xbc] sm:$0x1] }
 0x382   : > { %v12107_v35 = vcombine.low %v6960_v10, %v6970_v45  ;;  %v12524_v24 = vpack.c.bf16 %v6215_v13, %v6215_v13  ;;  %v6984_v11 = vsel %vm14338_vm9, %v6979_v63, %v6983_v27  ;;  %v6988_v19 = vor.u32 %v6987_v48, %v6983_v27  ;;  %v17297_v27 = vld [vmem:[#allocation3 + $0x74] sm:$0x1] }
 0x383   : > { %v6580_v38 = vrot.slane %v6578_v39, 7  ;;  %v17268_v0 = vrot.slane %v7047_v23, 5  ;;  %v7057_v62 = vshrl.u32 %v17260_v29, 16  ;;  %v12145_v43 = vcombine.low %v6771_v16, %v17260_v29  ;;  %v6773_v16 = vld [vmem:[#allocation3 + $0x84] sm:$0xf] }
 0x384   : > { %13306 = vmatprep.mubr.msk.bf16.mxu0 %vm7251_vm0, %v12107_v35  ;;  %v6561_v54 = vshrl.u32 %v12524_v24, 16  ;;  %v6564_v58 = vshll.u32 %v12524_v24, 16  ;;  %v6989_v52 = vrot.slane %v6988_v19, 4  ;;  %v7002_v37 = vor.u32 %v17226_v57, %v17224_v18  ;;  %v17306_v35 = vld [vmem:[#allocation3 + $0x94] sm:$0xf] }
 0x385   : > { %v6583_v30 = vor.u32 %v6581_v6, %v6580_v38  ;;  %v6585_v15 = vrot.slane %v6580_v38, 4  ;;  %13350 = vmatprep.mubr.msk.bf16.mxu1 %vm7251_vm0, %v12145_v43  ;;  %v7005_v28 = vshll.u32 %v17204_v50, 16  ;;  %v7011_v20 = vrot.slane %v7009_v60, 4  ;;  %v17316_v43 = vld [vmem:[#allocation3 + $0x80] sm:$0x1] }
 0x386   : > { %v6563_v47 = vrot.slane %v6561_v54, 7  ;;  %v6994_v10 = vsel %vm14338_vm9, %v6989_v52, %v6993_v31  ;;  %v7003_v55 = vrot.slane %v7002_v37, 4  ;;  %v7015_v33 = vshll.u32 %v17272_v2, 16  ;;  %v6775_v31 = vld [vmem:[#allocation3 + $0x90] sm:$0xf] }
 0x387   : > { %v6584_v18 = vsel %vm14379_vm13, %v6576_v59, %v6583_v30  ;;  %v6749_v57 = vsel %vm14315_vm6, %v6585_v15, %v6748_v51  ;;  %v12108_v60 = vcombine.low %v6984_v11, %v6994_v10  ;;  %v7007_v48 = vrot.slane %v7005_v28, 5  ;;  %v17321_v28 = vld [vmem:[#allocation3 + $0xa0] sm:$0xf] }
 0x388   : > { %6747 = vst.msk [vmem:[#allocation3 + $0xc4] sm:$0xf] %vm361_vm2, %v6584_v18  ;;  %6750 = vst [vmem:[#allocation3 + $0xc8] sm:$0x1] %v6749_v57  ;;  %v6566_v9 = vor.u32 %v6564_v58, %v6563_v47  ;;  %v6568_v56 = vrot.slane %v6563_v47, 4  ;;  %v7017_v3 = vrot.slane %v7015_v33, 5  ;;  %v12146_v45 = vcombine.low %v6773_v16, %v17284_v26 }
 0x389   : > { %v7068_v63 = vshrl.u32 %v6773_v16, 16  ;;  %13307 = vmatmul.mubr.msk.bf16.gmra.mxu0 %vm7251_vm0, %v12108_v60  ;;  %v7008_v12 = vsel %vm14338_vm9, %v7003_v55, %v7007_v48  ;;  %v7012_v46 = vor.u32 %v7011_v20, %v7007_v48  ;;  %v7071_v59 = vshll.u32 %v6773_v16, 16 }
 0x38a   : > { %v7081_v13 = vshrl.u32 %v17284_v26, 16  ;;  %v6567_v23 = vsel %vm14379_vm13, %v6559_v44, %v6566_v9  ;;  %v6742_v39 = vsel %vm14315_vm6, %v6568_v56, %v6741_v61  ;;  %v7026_v19 = vor.u32 %v17247_v5, %v17245_v1  ;;  %13351 = vmatmul.mubr.msk.bf16.gmra.mxu1 %vm7251_vm0, %v12146_v45  ;;  %v6777_v5 = vld [vmem:[#allocation3 + $0x9c] sm:$0xf]  ;;  %v17335_v9 = vld [vmem:[#allocation3 + $0x8c] sm:$0x1] }
 0x38b   : > { %v7070_v6 = vrot.slane %v7068_v63, 4  ;;  %6740 = vst.msk [vmem:[#allocation3 + $0xb8] sm:$0xf] %vm361_vm2, %v6567_v23  ;;  %6743 = vst [vmem:[#allocation3 + $0xbc] sm:$0x1] %v6742_v39  ;;  %v7013_v24 = vrot.slane %v7012_v46, 4  ;;  %v12147_v16 = vcombine.low %v6775_v31, %v17306_v35  ;;  %v7050_v47 = vor.u32 %v17268_v0, %v17264_v14 }
 0x38c   : > { %v7073_v11 = vrot.slane %v7071_v59, 5  ;;  %v7029_v22 = vshll.u32 %v17230_v42, 16  ;;  %v7035_v8 = vrot.slane %v7033_v17, 4  ;;  %v7039_v21 = vshll.u32 %v17297_v27, 16  ;;  %v6779_v63 = vld [vmem:[#allocation3 + $0xa8] sm:$0xf] }
 0x38d   : > { %v7092_v44 = vshrl.u32 %v6775_v31, 16  ;;  %v7095_v38 = vshll.u32 %v6775_v31, 16  ;;  %v7018_v51 = vsel %vm14338_vm9, %v7013_v24, %v7017_v3  ;;  %v7027_v54 = vrot.slane %v7026_v19, 4  ;;  %13354 = vmatprep.mubr.msk.bf16.mxu1 %vm7251_vm0, %v12147_v16  ;;  %v17343_v31 = vld [vmem:[#allocation3 + $0xac] sm:$0xf] }
 0x38e   : > { %v7031_v58 = vrot.slane %v7029_v22, 5  ;;  %v7105_v1 = vshrl.u32 %v17306_v35, 16  ;;  %v12109_v52 = vcombine.low %v7008_v12, %v7018_v51  ;;  %v7041_v37 = vrot.slane %v7039_v21, 5  ;;  %v17352_v51 = vld [vmem:[#allocation3 + $0x98] sm:$0x1] }
 0x38f   : > { %v7094_v30 = vrot.slane %v7092_v44, 4  ;;  %v7097_v15 = vrot.slane %v7095_v38, 5  ;;  %v7053_v10 = vshll.u32 %v17260_v29, 16  ;;  %v7059_v55 = vrot.slane %v7057_v62, 4 }
 0x390   : > { %v7032_v17 = vsel %vm14338_vm9, %v7027_v54, %v7031_v58  ;;  %v7036_v20 = vor.u32 %v7035_v8, %v7031_v58  ;;  %13310 = vmatprep.mubr.msk.bf16.mxu0 %vm7251_vm0, %v12109_v52  ;;  %v7063_v33 = vshll.u32 %v17316_v43, 16  ;;  %v7116_v18 = vshrl.u32 %v6777_v5, 16  ;;  %v6781_v52 = vld [vmem:[#allocation3 + $0xb4] sm:$0xf] }
 0x391   : > { %v7051_v61 = vrot.slane %v7050_v47, 4  ;;  %v7119_v60 = vshll.u32 %v6777_v5, 16  ;;  %v7129_v48 = vshrl.u32 %v17321_v28, 16  ;;  %v7055_v14 = vrot.slane %v7053_v10, 5 }
 0x392   : > { %v7037_v57 = vrot.slane %v7036_v20, 4  ;;  %v7065_v0 = vrot.slane %v7063_v33, 5  ;;  %v17337_v56 = vrot.slane %v7116_v18, 4  ;;  %v12148_v3 = vcombine.low %v6777_v5, %v17321_v28  ;;  %v17360_v47 = vld [vmem:[#allocation3 + $0xb8] sm:$0xf] }
 0x393   : > { %v7121_v12 = vrot.slane %v7119_v60, 5  ;;  %v7074_v46 = vor.u32 %v7073_v11, %v7070_v6  ;;  %v7077_v59 = vshll.u32 %v17284_v26, 16  ;;  %v7056_v39 = vsel %vm14338_vm9, %v7051_v61, %v7055_v14 }
 0x394   : > { %v7042_v62 = vsel %vm14338_vm9, %v7037_v57, %v7041_v37  ;;  %v7060_v45 = vor.u32 %v7059_v55, %v7055_v14  ;;  %13355 = vmatmul.mubr.msk.bf16.gmra.mxu1 %vm7251_vm0, %v12148_v3  ;;  %v7083_v24 = vrot.slane %v7081_v13, 4  ;;  %v7087_v8 = vshll.u32 %v17335_v9, 16 }
 0x395   : > { %v12110_v23 = vcombine.low %v7032_v17, %v7042_v62  ;;  %v7075_v19 = vrot.slane %v7074_v46, 4  ;;  %v7079_v22 = vrot.slane %v7077_v59, 5  ;;  %v7140_v21 = vshrl.u32 %v6779_v63, 16 }
 0x396   : > { %v7061_v6 = vrot.slane %v7060_v45, 4  ;;  %v7143_v11 = vshll.u32 %v6779_v63, 16  ;;  %v7153_v44 = vshrl.u32 %v17343_v31, 16  ;;  %v12149_v38 = vcombine.low %v6779_v63, %v17343_v31  ;;  %v17368_v63 = vld [vmem:[#allocation3 + $0xa4] sm:$0x1] }
 0x397   : > { %13311 = vmatmul.mubr.msk.bf16.gmra.mxu0 %vm7251_vm0, %v12110_v23  ;;  %v7080_v54 = vsel %vm14338_vm9, %v7075_v19, %v7079_v22  ;;  %v7084_v58 = vor.u32 %v7083_v24, %v7079_v22  ;;  %v7089_v13 = vrot.slane %v7087_v8, 5  ;;  %v7142_v5 = vrot.slane %v7140_v21, 4  ;;  %v13791_v23 = vld [vmem:[#allocation3 + $0xc] sm:$0xff]  }
 0x398   : > { %v7066_v37 = vsel %vm14338_vm9, %v7061_v6, %v7065_v0  ;;  %v7145_v17 = vrot.slane %v7143_v11, 5  ;;  %13358 = vmatprep.mubr.msk.bf16.mxu1 %vm7251_vm0, %v12149_v38  ;;  %v7098_v20 = vor.u32 %v7097_v15, %v7094_v30  ;;  %v7101_v16 = vshll.u32 %v17306_v35, 16 }
 0x399   : > { %v12111_v10 = vcombine.low %v7056_v39, %v7066_v37  ;;  %v7085_v55 = vrot.slane %v7084_v58, 4  ;;  %v7107_v33 = vrot.slane %v7105_v1, 4  ;;  %v7111_v18 = vshll.u32 %v17352_v51, 16  ;;  %v17372_v39 = vld [vmem:[#allocation3 + $0xb0] sm:$0x1] }
 0x39a   : > { %v7099_v57 = vrot.slane %v7098_v20, 4  ;;  %v7103_v61 = vrot.slane %v7101_v16, 5  ;;  %v7164_v60 = vshrl.u32 %v6781_v52, 16  ;;  %v7167_v14 = vshll.u32 %v6781_v52, 16  ;;  %v17384_v20 = vld [vmem:[#allocation3 + $0xbc] sm:$0x1] }
 0x39b   : > { %13314 = vmatprep.mubr.msk.bf16.mxu0 %vm7251_vm0, %v12111_v10  ;;  %v7090_v0 = vsel %vm14338_vm9, %v7085_v55, %v7089_v13  ;;  %v7113_v3 = vrot.slane %v7111_v18, 5  ;;  %v7177_v30 = vshrl.u32 %v17360_v47, 16  ;;  %v12150_v15 = vcombine.low %v6781_v52, %v17360_v47  ;;  %v7762_v52 = vld [vmem:[#allocation3] sm:$0xe] }
 0x39c   : > { %v12112_v62 = vcombine.low %v7080_v54, %v7090_v0  ;;  %v7104_v1 = vsel %vm14338_vm9, %v7099_v57, %v7103_v61  ;;  %v7108_v46 = vor.u32 %v7107_v33, %v7103_v61  ;;  %v7166_v59 = vrot.slane %v7164_v60, 4  ;;  %v7763_v57 = vld [vmem:[#allocation3 + $0xc] sm:$0xe]  ;;  %v13793_v60 = vld [vmem:[#allocation3 + $0x18] sm:$0xff]  }
 0x39d   : > { %v7169_v45 = vrot.slane %v7167_v14, 5  ;;  %13359 = vmatmul.mubr.msk.bf16.gmra.mxu1 %vm7251_vm0, %v12150_v15  ;;  %v7122_v24 = vor.u32 %v7121_v12, %v17337_v56  ;;  %v7125_v19 = vshll.u32 %v17321_v28, 16  ;;  %v7131_v22 = vrot.slane %v7129_v48, 4 }
 0x39e   : > { %v7109_v8 = vrot.slane %v7108_v46, 4  ;;  %v7135_v21 = vshll.u32 %v17368_v63, 16  ;;  %13402 = vmatprep.mubr.msk.bf16.mxu1 %vm7251_vm0, %v13791_v23  ;;  %v7146_v6 = vor.u32 %v7145_v17, %v7142_v5  ;;  %v7149_v11 = vshll.u32 %v17343_v31, 16  ;;  %v13794_v46 = vld [vmem:[#allocation3 + $0x24] sm:$0xff]  }
 0x39f   : > { %13315 = vmatmul.mubr.msk.bf16.gmra.mxu0 %vm7251_vm0, %v12112_v62  ;;  %v7123_v38 = vrot.slane %v7122_v24, 4  ;;  %v7127_v54 = vrot.slane %v7125_v19, 5  ;;  %v7155_v58 = vrot.slane %v7153_v44, 4  ;;  %v7159_v13 = vshll.u32 %v17372_v39, 16  ;;  %v13842_v23 = vld [vmem:[#allocation3 + $0x4] sm:$0xf] }
 0x3a0   : > { %v7114_v56 = vsel %vm14338_vm9, %v7109_v8, %v7113_v3  ;;  %v7137_v48 = vrot.slane %v7135_v21, 5  ;;  %v7147_v12 = vrot.slane %v7146_v6, 4  ;;  %v7151_v37 = vrot.slane %v7149_v11, 5  ;;  %v7764_v21 = vld [vmem:[#allocation3 + $0x18] sm:$0xe] }
 0x3a1   : > { %v12113_v16 = vcombine.low %v7104_v1, %v7114_v56  ;;  %v7128_v5 = vsel %vm14338_vm9, %v7123_v38, %v7127_v54  ;;  %v7132_v17 = vor.u32 %v7131_v22, %v7127_v54  ;;  %v7161_v10 = vrot.slane %v7159_v13, 5 }
 0x3a2   : > { %v7152_v44 = vsel %vm14338_vm9, %v7147_v12, %v7151_v37  ;;  %v7156_v55 = vor.u32 %v7155_v58, %v7151_v37  ;;  %v7170_v33 = vor.u32 %v7169_v45, %v7166_v59  ;;  %v7173_v18 = vshll.u32 %v17360_v47, 16  ;;  %v13811_v59 = vld [vmem:[%s19505_s5 + $0x50] sm:$0xff]   ;;  %v7765_v37 = vld [vmem:[#allocation3 + $0x24] sm:$0xe] }
 0x3a3   : > { %13318 = vmatprep.mubr.msk.bf16.mxu0 %vm7251_vm0, %v12113_v16  ;;  %v7133_v61 = vrot.slane %v7132_v17, 4  ;;  %v7179_v14 = vrot.slane %v7177_v30, 4  ;;  %v7183_v0 = vshll.u32 %v17384_v20, 16  ;;  %v12169_v3 = vrot.slane %v7762_v52, 9  ;;  %v13843_v30 = vld [vmem:[#allocation3 + $0x8] sm:$0x1] }
 0x3a4   : > { %v7157_v15 = vrot.slane %v7156_v55, 4  ;;  %v7171_v62 = vrot.slane %v7170_v33, 4  ;;  %v7175_v1 = vrot.slane %v7173_v18, 5  ;;  %v7812_v24 = vrot.slane %v13842_v23, 5  ;;  %v13846_v55 = vld [vmem:[#allocation3 + $0x1c] sm:$0xf] }
 0x3a5   : > { %v7138_v45 = vsel %vm14338_vm9, %v7133_v61, %v7137_v48  ;;  %13403 = vmatmul.mubr.msk.bf16.vlgmr.msra.gmra.mxu1 %vm7251_vm0, %v13793_v60  ;;  %v7185_v19 = vrot.slane %v7183_v0, 5  ;;  %v7815_v22 = vrot.slane %v13843_v30, 5  ;;  %v12170_v8 = vrot.slane %v7763_v57, 9  ;;  %v13844_v48 = vld [vmem:[#allocation3 + $0x10] sm:$0xf] }
 0x3a6   : > { %v12114_v6 = vcombine.low %v7128_v5, %v7138_v45  ;;  %v7162_v11 = vsel %vm14338_vm9, %v7157_v15, %v7161_v10  ;;  %v7176_v38 = vsel %vm14338_vm9, %v7171_v62, %v7175_v1  ;;  %v7180_v54 = vor.u32 %v7179_v14, %v7175_v1  ;;  %13406 = vmatprep.mubr.msk.bf16.mxu1 %vm7251_vm0, %v13794_v46  ;;  %v13845_v5 = vld [vmem:[#allocation3 + $0x14] sm:$0x1]  ;;  %v13847_v60 = vld [vmem:[#allocation3 + $0x20] sm:$0x1]  ;;  %v7766_v0 = vld [vmem:[#allocation3 + $0x30] sm:$0xe] }
 0x3a7   : > { %v12115_v58 = vcombine.low %v7152_v44, %v7162_v11  ;;  %v17406_v52 = vsel %vm14839_vm3, %v12169_v3, %v7812_v24  ;;  %v7814_v56 = vrot.slane %v7812_v24, 4  ;;  %v7819_v12 = vrot.slane %v13844_v48, 5  ;;  %13471 = vmatpush3.bf16.msra.mxu1 %v17119_v36  ;;  %v17413_v44 = vld [vmem:[%s19505_s5 + $0x78] sm:$0xff]   ;;  %v13795_v36 = vld [vmem:[#allocation3 + $0x30] sm:$0xff]   ;;  %v7767_v23 = vld [vmem:[#allocation3 + $0x3c] sm:$0xe] }
 0x3a8   : > { %13319 = vmatmul.mubr.msk.bf16.gmra.mxu0 %vm7251_vm0, %v12114_v6  ;;  %v7181_v16 = vrot.slane %v7180_v54, 4  ;;  %v7822_v17 = vrot.slane %v13845_v5, 5  ;;  %v12171_v10 = vrot.slane %v7764_v21, 9  ;;  %v7826_v33 = vrot.slane %v13846_v55, 5  ;;  %13472 = vmatprep.subr.bf16.mxu1 %v13811_v59  ;;  %v13797_v62 = vld [vmem:[#allocation3 + $0x3c] sm:$0xff]  }
 0x3a9   : > { %13322 = vmatprep.mubr.msk.bf16.mxu0 %vm7251_vm0, %v12115_v58  ;;  %v7816_v18 = vsel %vm14839_vm3, %v7814_v56, %v7815_v22  ;;  %v17420_v57 = vsel %vm14839_vm3, %v12170_v8, %v7819_v12  ;;  %v7821_v61 = vrot.slane %v7819_v12, 4  ;;  %v7829_v14 = vrot.slane %v13847_v60, 5  ;;  %v7768_v24 = vld [vmem:[#allocation3 + $0x48] sm:$0xe] }
 0x3aa   : > { %v7186_v3 = vsel %vm14338_vm9, %v7181_v16, %v7185_v19  ;;  %v12185_v15 = vcombine.low %v17406_v52, %v7816_v18  ;;  %v17427_v1 = vsel %vm14839_vm3, %v12171_v10, %v7826_v33  ;;  %v7828_v46 = vrot.slane %v7826_v33, 4  ;;  %v13848_v8 = vld [vmem:[#allocation3 + $0x28] sm:$0xf]  ;;  %v13849_v52 = vld [vmem:[#allocation3 + $0x34] sm:$0xf] }
 0x3ab   : > { %v12116_v45 = vcombine.low %v7176_v38, %v7186_v3  ;;  %v17431_v30 = vsel %vm14839_vm3, %v7821_v61, %v7822_v17  ;;  %v12172_v22 = vrot.slane %v7765_v37, 9  ;;  %v7833_v21 = vrot.slane %v13848_v8, 5  ;;  %13473 = vmatpush3.bf16.msra.mxu1 %v13811_v59  ;;  %v7769_v16 = vld [vmem:[#allocation3 + $0x54] sm:$0xe] }
 0x3ac   : > { %v12186_v19 = vcombine.low %v17420_v57, %v17431_v30  ;;  %v17437_v6 = vsel %vm14839_vm3, %v7828_v46, %v7829_v14  ;;  %v7836_v11 = vrot.slane %v17084_v32, 5  ;;  %v12173_v54 = vrot.slane %v7766_v0, 9  ;;  %13542 = vmatprep.subr.bf16.mxu1 %v17413_v44  ;;  %v7770_v14 = vld [vmem:[#allocation3 + $0x60] sm:$0xe]  ;;  %v13798_v46 = vld [vmem:[#allocation3 + $0x48] sm:$0xff]  }
 0x3ad   : > { %13407 = vmatmul.mubr.msk.bf16.gmra.mxu1 %vm7251_vm0, %v13795_v36  ;;  %v12187_v38 = vcombine.low %v17427_v1, %v17437_v6  ;;  %v17446_v59 = vsel %vm14839_vm3, %v12172_v22, %v7833_v21  ;;  %v7835_v58 = vrot.slane %v7833_v21, 4  ;;  %v7840_v56 = vrot.slane %v13849_v52, 5  ;;  %v7775_v30 = vld [vmem:[#allocation3 + $0x9c] sm:$0xe] }
 0x3ae   : > { %13410 = vmatprep.mubr.msk.bf16.mxu1 %vm7251_vm0, %v13797_v62  ;;  %v7843_v48 = vrot.slane %v17125_v53, 5  ;;  %v12174_v32 = vrot.slane %v7767_v23, 9  ;;  %v7847_v12 = vrot.slane %v17058_v40, 5  ;;  %v7850_v37 = vrot.slane %v17182_v34, 5  ;;  %v7771_v62 = vld [vmem:[#allocation3 + $0x6c] sm:$0xe] }
 0x3af   : > { %v17454_v5 = vsel %vm14839_vm3, %v7835_v58, %v7836_v11  ;;  %v17458_v17 = vsel %vm14839_vm3, %v12173_v54, %v7840_v56  ;;  %v7842_v10 = vrot.slane %v7840_v56, 4  ;;  %v12175_v55 = vrot.slane %v7768_v24, 9  ;;  %v7772_v54 = vld [vmem:[#allocation3 + $0x78] sm:$0xe] }
 0x3b0   : > { %13323 = vmatmul.mubr.msk.bf16.gmra.mxu0 %vm7251_vm0, %v12116_v45  ;;  %v12188_v53 = vcombine.low %v17446_v59, %v17454_v5  ;;  %v17465_v40 = vsel %vm14839_vm3, %v12174_v32, %v7847_v12  ;;  %v7849_v34 = vrot.slane %v7847_v12, 4  ;;  %v7854_v33 = vrot.slane %v17102_v4, 5  ;;  %v13799_v45 = vld [vmem:[#allocation3 + $0x54] sm:$0xff]   ;;  %v13805_v12 = vld [vmem:[%s19505_s5 + $0x40] sm:$0xff]  }
 0x3b1   : > { %13366 = vmatprep.mubr.msk.bf16.mxu0 %vm7251_vm0, %v12185_v15  ;;  %v17471_v18 = vsel %vm14839_vm3, %v7842_v10, %v7843_v48  ;;  %v7857_v36 = vrot.slane %v17212_v7, 5  ;;  %v12176_v61 = vrot.slane %v7769_v16, 9  ;;  %v7861_v60 = vrot.slane %v17160_v49, 5  ;;  %v7773_v48 = vld [vmem:[#allocation3 + $0x84] sm:$0xe] }
 0x3b2   : > { %v12189_v0 = vcombine.low %v17458_v17, %v17471_v18  ;;  %v17479_v3 = vsel %vm14839_vm3, %v7849_v34, %v7850_v37  ;;  %v17483_v4 = vsel %vm14839_vm3, %v12175_v55, %v7854_v33  ;;  %v7856_v15 = vrot.slane %v7854_v33, 4 }
 0x3b3   : > { %v12190_v7 = vcombine.low %v17465_v40, %v17479_v3  ;;  %v17489_v49 = vsel %vm14839_vm3, %v12176_v61, %v7861_v60  ;;  %v7863_v23 = vrot.slane %v7861_v60, 4  ;;  %v7864_v24 = vrot.slane %v17242_v25, 5  ;;  %v7774_v61 = vld [vmem:[#allocation3 + $0x90] sm:$0xe] }
 0x3b4   : > { %v17494_v22 = vsel %vm14839_vm3, %v7856_v15, %v7857_v36  ;;  %v12177_v8 = vrot.slane %v7770_v14, 9  ;;  %v7868_v21 = vrot.slane %v17204_v50, 5  ;;  %v7871_v11 = vrot.slane %v17272_v2, 5  ;;  %v13850_v60 = vld [vmem:[%s19505_s5 + $0x48] sm:$0xff]  }
 0x3b5   : > { %13411 = vmatmul.mubr.msk.bf16.gmra.mxu1 %vm7251_vm0, %v13798_v46  ;;  %v12191_v58 = vcombine.low %v17483_v4, %v17494_v22  ;;  %v17503_v52 = vsel %vm14839_vm3, %v7863_v23, %v7864_v24  ;;  %v12178_v25 = vrot.slane %v7771_v62, 9  ;;  %v7875_v56 = vrot.slane %v17230_v42, 5  ;;  %v17556_v15 = vld [vmem:[#allocation3 + $0x10] sm:$0xf] }
 0x3b6   : > { %13414 = vmatprep.mubr.msk.bf16.mxu1 %vm7251_vm0, %v13799_v45  ;;  %v12192_v50 = vcombine.low %v17489_v49, %v17503_v52  ;;  %v17511_v2 = vsel %vm14839_vm3, %v12177_v8, %v7868_v21  ;;  %v7870_v32 = vrot.slane %v7868_v21, 4  ;;  %v7878_v37 = vrot.slane %v17297_v27, 5  ;;  %v17561_v62 = vld [vmem:[%s19505_s5 + $0x68] sm:$0xff]   ;;  %v9333_v21 = vld [vmem:[#allocation3 + $0xc] sm:$0xe] }
 0x3b7   : > { %v17519_v42 = vsel %vm14839_vm3, %v12178_v25, %v7875_v56  ;;  %v7877_v16 = vrot.slane %v7875_v56, 4  ;;  %v12179_v10 = vrot.slane %v7772_v54, 9  ;;  %v7882_v55 = vrot.slane %v17260_v29, 5  ;;  %v13801_v46 = vld [vmem:[#allocation3 + $0x6c] sm:$0xff]   ;;  %v17576_v56 = vld [vmem:[#allocation3 + $0x14] sm:$0x1] }
 0x3b8   : > { %13367 = vmatmul.mubr.msk.bf16.vlgmr.msra.gmra.mxu0 %vm7251_vm0, %v12186_v19  ;;  %v17528_v34 = vsel %vm14839_vm3, %v7870_v32, %v7871_v11  ;;  %v7885_v33 = vrot.slane %v17316_v43, 5  ;;  %v12180_v27 = vrot.slane %v7773_v48, 9  ;;  %v7889_v36 = vrot.slane %v17284_v26, 5  ;;  %v13800_v19 = vld [vmem:[#allocation3 + $0x60] sm:$0xff]   ;;  %v7776_v48 = vld [vmem:[#allocation3 + $0xa8] sm:$0xe] }
 0x3b9   : > { %13435 = vmatpush3.bf16.msra.mxu0 %v13850_v60  ;;  %13370 = vmatprep.mubr.msk.bf16.mxu0 %vm7251_vm0, %v12187_v38  ;;  %v12193_v29 = vcombine.low %v17511_v2, %v17528_v34  ;;  %v17543_v43 = vsel %vm14839_vm3, %v7877_v16, %v7878_v37  ;;  %v17547_v26 = vsel %vm14839_vm3, %v12179_v10, %v7882_v55  ;;  %v7884_v57 = vrot.slane %v7882_v55, 4  ;;  %v17586_v16 = vld [vmem:[#allocation3 + $0x1c] sm:$0xf]  ;;  %v9334_v60 = vld [vmem:[#allocation3 + $0x18] sm:$0xe] }
 0x3ba   : > { %13436 = vmatprep.subr.bf16.mxu0 %v13805_v12  ;;  %v12194_v1 = vcombine.low %v17519_v42, %v17543_v43  ;;  %v17553_v6 = vsel %vm14839_vm3, %v12180_v27, %v7889_v36  ;;  %v7891_v38 = vrot.slane %v7889_v36, 4  ;;  %v7892_v14 = vrot.slane %v17335_v9, 5  ;;  %v17740_v2 = vld [vmem:[#allocation3 + $0x50] sm:$0x1] }
 0x3bb   : > { %v17565_v23 = vsel %vm14839_vm3, %v7884_v57, %v7885_v33  ;;  %v12181_v24 = vrot.slane %v7774_v61, 9  ;;  %v7896_v45 = vrot.slane %v17306_v35, 5  ;;  %v7899_v8 = vrot.slane %v17352_v51, 5  ;;  %v17594_v33 = vld [vmem:[#allocation3 + $0x20] sm:$0x1] }
 0x3bc   : > { %v12195_v9 = vcombine.low %v17547_v26, %v17565_v23  ;;  %v17573_v11 = vsel %vm14839_vm3, %v7891_v38, %v7892_v14  ;;  %v12182_v54 = vrot.slane %v7775_v30, 9  ;;  %v7903_v25 = vrot.slane %v17321_v28, 5  ;;  %v7777_v14 = vld [vmem:[#allocation3 + $0xb4] sm:$0xe] }
 0x3bd   : > { %13415 = vmatmul.mubr.msk.bf16.gmra.mxu1 %vm7251_vm0, %v13800_v19  ;;  %13437 = vmatpush3.bf16.msra.mxu0 %v13805_v12  ;;  %v12196_v35 = vcombine.low %v17553_v6, %v17573_v11  ;;  %v17583_v51 = vsel %vm14839_vm3, %v12181_v24, %v7896_v45  ;;  %v7898_v32 = vrot.slane %v7896_v45, 4  ;;  %v7906_v37 = vrot.slane %v17368_v63, 5  ;;  %v13802_v24 = vld [vmem:[#allocation3 + $0x78] sm:$0xff]  }
 0x3be   : > { %13418 = vmatprep.mubr.msk.bf16.mxu1 %vm7251_vm0, %v13801_v46  ;;  %v17591_v28 = vsel %vm14839_vm3, %v12182_v54, %v7903_v25  ;;  %v7905_v10 = vrot.slane %v7903_v25, 4  ;;  %v12287_v12 = vrot.slane %v9333_v21, 9  ;;  %v9399_v55 = vrot.slane %v17556_v15, 5  ;;  %13506 = vmatprep.subr.bf16.mxu0 %v17561_v62  ;;  %v17628_v46 = vld [vmem:[#allocation3 + $0x28] sm:$0xf] }
 0x3bf   : > { %v17599_v27 = vsel %vm14839_vm3, %v7898_v32, %v7899_v8  ;;  %v9402_v63 = vrot.slane %v17576_v56, 5  ;;  %v12183_v36 = vrot.slane %v7776_v48, 9  ;;  %v7910_v61 = vrot.slane %v17343_v31, 5  ;;  %v9335_v8 = vld [vmem:[#allocation3 + $0x24] sm:$0xe] }
 0x3c0   : > { %13371 = vmatmul.mubr.msk.bf16.gmra.mxu0 %vm7251_vm0, %v12188_v53  ;;  %v12197_v57 = vcombine.low %v17583_v51, %v17599_v27  ;;  %v17611_v30 = vsel %vm14839_vm3, %v7905_v10, %v7906_v37  ;;  %v17615_v19 = vsel %vm14839_vm3, %v12287_v12, %v9399_v55  ;;  %v9401_v38 = vrot.slane %v9399_v55, 4  ;;  %v17643_v48 = vld [vmem:[#allocation3 + $0x2c] sm:$0x1]  ;;  %v13803_v37 = vld [vmem:[#allocation3 + $0x84] sm:$0xff]   ;;  %v17703_v31 = vld [vmem:[#allocation3 + $0x40] sm:$0xf] }
 0x3c1   : > { %13374 = vmatprep.mubr.msk.bf16.mxu0 %vm7251_vm0, %v12189_v0  ;;  %v17625_v59 = vsel %vm14839_vm3, %v12183_v36, %v7910_v61  ;;  %v7912_v5 = vrot.slane %v7910_v61, 4  ;;  %v7913_v53 = vrot.slane %v17372_v39, 5  ;;  %v12288_v17 = vrot.slane %v9334_v60, 9  ;;  %v8596_v32 = vld [vmem:[#allocation3 + $0xc] sm:$0xf] }
 0x3c2   : > { %v17632_v45 = vsel %vm14839_vm3, %v9401_v38, %v9402_v63  ;;  %v9406_v18 = vrot.slane %v17586_v16, 5  ;;  %v9409_v0 = vrot.slane %v17594_v33, 5  ;;  %v12184_v39 = vrot.slane %v7777_v14, 9 }
 0x3c3   : > { %v12303_v21 = vcombine.low %v17615_v19, %v17632_v45  ;;  %v17640_v54 = vsel %vm14839_vm3, %v7912_v5, %v7913_v53  ;;  %v7917_v25 = vrot.slane %v17360_v47, 5  ;;  %v7920_v63 = vrot.slane %v17384_v20, 5  ;;  %v9336_v53 = vld [vmem:[#allocation3 + $0x30] sm:$0xe] }
 0x3c4   : > { %v17649_v12 = vsel %vm14839_vm3, %v12288_v17, %v9406_v18  ;;  %v9408_v55 = vrot.slane %v9406_v18, 4  ;;  %v12289_v61 = vrot.slane %v9335_v8, 9  ;;  %v9413_v60 = vrot.slane %v17628_v46, 5 }
 0x3c5   : > { %13419 = vmatmul.mubr.msk.bf16.gmra.mxu1 %vm7251_vm0, %v13802_v24  ;;  %v17655_v36 = vsel %vm14839_vm3, %v12184_v39, %v7917_v25  ;;  %v7919_v47 = vrot.slane %v7917_v25, 4  ;;  %v9416_v14 = vrot.slane %v17643_v48, 5  ;;  %v8645_v5 = vshrl.u32 %v8596_v32, 16  ;;  %v17674_v39 = vld [vmem:[#allocation3 + $0x34] sm:$0xf] }
 0x3c6   : > { %13422 = vmatprep.mubr.msk.bf16.mxu1 %vm7251_vm0, %v13803_v37  ;;  %v17661_v38 = vsel %vm14839_vm3, %v9408_v55, %v9409_v0  ;;  %v8648_v20 = vshll.u32 %v8596_v32, 16  ;;  %v17672_v18 = vsel %vm14839_vm3, %v12289_v61, %v9413_v60  ;;  %v9415_v8 = vrot.slane %v9413_v60, 4  ;;  %v17676_v0 = vld [vmem:[#allocation3 + $0x38] sm:$0x1]  ;;  %v13804_v25 = vld [vmem:[#allocation3 + $0x90] sm:$0xff]  }
 0x3c7   : > { %v17668_v17 = vsel %vm14839_vm3, %v7919_v47, %v7920_v63  ;;  %v8647_v32 = vrot.slane %v8645_v5, 4  ;;  %v8654_v55 = vshll.u32 %v17556_v15, 16  ;;  %v8599_v63 = vld [vmem:[#allocation3 + $0x18] sm:$0xf]  ;;  %v8658_v40 = vshrl.u32 %v17556_v15, 16 }
 0x3c8   : > { %13375 = vmatmul.mubr.msk.bf16.gmra.mxu0 %vm7251_vm0, %v12190_v7  ;;  %v8650_v37 = vrot.slane %v8648_v20, 5  ;;  %v17691_v47 = vsel %vm14839_vm3, %v9415_v8, %v9416_v14  ;;  %v8664_v3 = vshll.u32 %v17576_v56, 16  ;;  %v12290_v7 = vrot.slane %v9336_v53, 9  ;;  %v13806_v14 = vld [vmem:[#allocation3 + $0x9c] sm:$0xff]  }
 0x3c9   : > { %13378 = vmatprep.mubr.msk.bf16.mxu0 %vm7251_vm0, %v12191_v58  ;;  %v8656_v5 = vrot.slane %v8654_v55, 5  ;;  %v9420_v20 = vrot.slane %v17674_v39, 5  ;;  %v8660_v4 = vrot.slane %v8658_v40, 4  ;;  %v9423_v58 = vrot.slane %v17676_v0, 5 }
 0x3ca   : > { %v8651_v60 = vor.u32 %v8650_v37, %v8647_v32  ;;  %v8666_v22 = vrot.slane %v8664_v3, 5  ;;  %v8669_v10 = vshrl.u32 %v8599_v63, 16  ;;  %v8672_v53 = vshll.u32 %v8599_v63, 16  ;;  %v9337_v3 = vld [vmem:[#allocation3 + $0x3c] sm:$0xe] }
 0x3cb   : > { %v17701_v15 = vsel %vm14839_vm3, %v12290_v7, %v9420_v20  ;;  %v9422_v56 = vrot.slane %v9420_v20, 4  ;;  %v8661_v32 = vor.u32 %v8660_v4, %v8656_v5  ;;  %v8678_v55 = vshll.u32 %v17586_v16, 16 }
 0x3cc   : > { %v8652_v8 = vrot.slane %v8651_v60, 4  ;;  %v8671_v37 = vrot.slane %v8669_v10, 4  ;;  %v8682_v40 = vshrl.u32 %v17586_v16, 16  ;;  %v8674_v63 = vrot.slane %v8672_v53, 5  ;;  %v8602_v10 = vld [vmem:[#allocation3 + $0x24] sm:$0xf] }
 0x3cd   : > { %13423 = vmatmul.mubr.msk.bf16.gmra.mxu1 %vm7251_vm0, %v13804_v25  ;;  %v17713_v7 = vsel %vm14839_vm3, %v9422_v56, %v9423_v58  ;;  %v8688_v20 = vshll.u32 %v17594_v33, 16  ;;  %v17716_v25 = vld [vmem:[#allocation3 + $0x44] sm:$0x1]  ;;  %v8662_v4 = vrot.slane %v8661_v32, 4  ;;  %v8680_v61 = vrot.slane %v8678_v55, 5  ;;  %v13807_v33 = vld [vmem:[#allocation3 + $0xa8] sm:$0xff]  }
 0x3ce   : > { %13426 = vmatprep.mubr.msk.bf16.mxu1 %vm7251_vm0, %v13806_v14  ;;  %v8657_v60 = vsel %vm14338_vm9, %v8652_v8, %v8656_v5  ;;  %v12306_v16 = vcombine.low %v17701_v15, %v17713_v7  ;;  %v8684_v24 = vrot.slane %v8682_v40, 4  ;;  %v8675_v5 = vor.u32 %v8674_v63, %v8671_v37  ;;  %v17738_v40 = vld [vmem:[#allocation3 + $0x4c] sm:$0xf]  ;;  %v13808_v63 = vld [vmem:[#allocation3 + $0xb4] sm:$0xff]  }
 0x3cf   : > { %v8690_v58 = vrot.slane %v8688_v20, 5  ;;  %v12291_v14 = vrot.slane %v9337_v3, 9  ;;  %v9427_v8 = vrot.slane %v17703_v31, 5  ;;  %v8667_v56 = vsel %vm14338_vm9, %v8662_v4, %v8666_v22  ;;  %v9338_v22 = vld [vmem:[#allocation3 + $0x48] sm:$0xe] }
 0x3d0   : > { %13379 = vmatmul.mubr.msk.bf16.gmra.mxu0 %vm7251_vm0, %v12192_v50  ;;  %v8685_v53 = vor.u32 %v8684_v24, %v8680_v61  ;;  %v9430_v32 = vrot.slane %v17716_v25, 5  ;;  %v8693_v49 = vshrl.u32 %v8602_v10, 16  ;;  %v17732_v52 = vcombine.low %v8657_v60, %v8667_v56 }
 0x3d1   : > { %13382 = vmatprep.mubr.msk.bf16.mxu0 %vm7251_vm0, %v12193_v29  ;;  %v8676_v50 = vrot.slane %v8675_v5, 4  ;;  %v17736_v37 = vsel %vm14839_vm3, %v12291_v14, %v9427_v8  ;;  %v9429_v55 = vrot.slane %v9427_v8, 4  ;;  %v8696_v3 = vshll.u32 %v8602_v10, 16  ;;  %v8605_v14 = vld [vmem:[#allocation3 + $0x30] sm:$0xf] }
 0x3d2   : > { %v8686_v34 = vrot.slane %v8685_v53, 4  ;;  %v8695_v29 = vrot.slane %v8693_v49, 4  ;;  %v8702_v24 = vshll.u32 %v17628_v46, 16  ;;  %v8706_v4 = vshrl.u32 %v17628_v46, 16 }
 0x3d3   : > { %v8681_v60 = vsel %vm14338_vm9, %v8676_v50, %v8680_v61  ;;  %v17747_v20 = vsel %vm14839_vm3, %v9429_v55, %v9430_v32  ;;  %v8712_v5 = vshll.u32 %v17643_v48, 16  ;;  %v8698_v56 = vrot.slane %v8696_v3, 5 }
 0x3d4   : > { %v8691_v10 = vsel %vm14338_vm9, %v8686_v34, %v8690_v58  ;;  %v12307_v8 = vcombine.low %v17736_v37, %v17747_v20  ;;  %v8704_v53 = vrot.slane %v8702_v24, 5  ;;  %v8708_v32 = vrot.slane %v8706_v4, 4 }
 0x3d5   : > { %13427 = vmatmul.mubr.msk.bf16.gmra.mxu1 %vm7251_vm0, %v13807_v33  ;;  %v17757_v61 = vcombine.low %v8681_v60, %v8691_v10  ;;  %v8714_v49 = vrot.slane %v8712_v5, 5  ;;  %v12292_v46 = vrot.slane %v9338_v22, 9  ;;  %v8699_v50 = vor.u32 %v8698_v56, %v8695_v29  ;;  %v13809_v10 = vld [vmem:[#allocation3 + $0xc0] sm:$0xff]  }
 0x3d6   : > { %13430 = vmatprep.mubr.msk.bf16.mxu1 %vm7251_vm0, %v13808_v63  ;;  %v9434_v48 = vrot.slane %v17738_v40, 5  ;;  %v9437_v33 = vrot.slane %v17740_v2, 5  ;;  %v8717_v55 = vshrl.u32 %v8605_v14, 16  ;;  %v8709_v58 = vor.u32 %v8708_v32, %v8704_v53  ;;  %v9339_v63 = vld [vmem:[#allocation3 + $0x54] sm:$0xe] }
 0x3d7   : > { %v8720_v34 = vshll.u32 %v8605_v14, 16  ;;  %v8726_v3 = vshll.u32 %v17674_v39, 16  ;;  %v8730_v24 = vshrl.u32 %v17674_v39, 16  ;;  %v8700_v29 = vrot.slane %v8699_v50, 4  ;;  %v17777_v39 = vld [vmem:[#allocation3 + $0x5c] sm:$0x1] }
 0x3d8   : > { %13383 = vmatmul.mubr.msk.bf16.gmra.mxu0 %vm7251_vm0, %v12194_v1  ;;  %v17773_v22 = vsel %vm14839_vm3, %v12292_v46, %v9434_v48  ;;  %v9436_v42 = vrot.slane %v9434_v48, 4  ;;  %v8719_v43 = vrot.slane %v8717_v55, 4  ;;  %v17775_v1 = vld [vmem:[#allocation3 + $0x58] sm:$0xf]  ;;  %v8710_v60 = vrot.slane %v8709_v58, 4 }
 0x3d9   : > { %13386 = vmatprep.mubr.msk.bf16.mxu0 %vm7251_vm0, %v12195_v9  ;;  %v8722_v4 = vrot.slane %v8720_v34, 5  ;;  %v8728_v5 = vrot.slane %v8726_v3, 5  ;;  %v8732_v14 = vrot.slane %v8730_v24, 4  ;;  %v8705_v26 = vsel %vm14338_vm9, %v8700_v29, %v8704_v53  ;;  %v8608_v32 = vld [vmem:[#allocation3 + $0x3c] sm:$0xf] }
 0x3da   : > { %v17783_v23 = vsel %vm14839_vm3, %v9436_v42, %v9437_v33  ;;  %v8736_v9 = vshll.u32 %v17676_v0, 16  ;;  %v12293_v56 = vrot.slane %v9339_v63, 9  ;;  %v8715_v46 = vsel %vm14338_vm9, %v8710_v60, %v8714_v49  ;;  %v17799_v63 = vld [vmem:[#allocation3 + $0x64] sm:$0xf] }
 0x3db   : > { %v12308_v50 = vcombine.low %v17773_v22, %v17783_v23  ;;  %v8723_v48 = vor.u32 %v8722_v4, %v8719_v43  ;;  %v8733_v55 = vor.u32 %v8732_v14, %v8728_v5  ;;  %v17791_v58 = vcombine.low %v8705_v26, %v8715_v46  ;;  %v9340_v4 = vld [vmem:[#allocation3 + $0x60] sm:$0xe]  ;;  %v8611_v26 = vld [vmem:[#allocation3 + $0x48] sm:$0xf]  ;;  %v9344_v22 = vld [vmem:[#allocation3 + $0x90] sm:$0xe] }
 0x3dc   : > { %v8738_v53 = vrot.slane %v8736_v9, 5  ;;  %v9441_v33 = vrot.slane %v17775_v1, 5  ;;  %v9444_v34 = vrot.slane %v17777_v39, 5  ;;  %v8741_v3 = vshrl.u32 %v8608_v32, 16  ;;  %v13813_v23 = vld [vmem:[%s19505_s5 + $0x60] sm:$0xff]  }
 0x3dd   : > { %13431 = vmatmul.mubr.msk.bf16.gmra.mxu1 %vm7251_vm0, %v13809_v10  ;;  %v8724_v0 = vrot.slane %v8723_v48, 4  ;;  %v8734_v49 = vrot.slane %v8733_v55, 4  ;;  %v8744_v24 = vshll.u32 %v8608_v32, 16  ;;  %v8750_v43 = vshll.u32 %v17703_v31, 16  ;;  %v17815_v10 = vld [vmem:[#allocation3 + $0x68] sm:$0x1] }
 0x3de   : > { %13474 = vmatprep.mubr.msk.bf16.mxu1 %vm7251_vm0, %v12303_v21  ;;  %v17803_v29 = vsel %vm14839_vm3, %v12293_v56, %v9441_v33  ;;  %v9443_v42 = vrot.slane %v9441_v33, 4  ;;  %v8754_v60 = vshrl.u32 %v17703_v31, 16  ;;  %v8743_v21 = vrot.slane %v8741_v3, 4  ;;  %v13815_v48 = vld [vmem:[%s19505_s5 + $0x70] sm:$0xff]  }
 0x3df   : > { %v8729_v19 = vsel %vm14338_vm9, %v8724_v0, %v8728_v5  ;;  %v8739_v45 = vsel %vm14338_vm9, %v8734_v49, %v8738_v53  ;;  %v8746_v14 = vrot.slane %v8744_v24, 5  ;;  %v8752_v11 = vrot.slane %v8750_v43, 5  ;;  %v17836_v0 = vld [vmem:[#allocation3 + $0x70] sm:$0xf]  ;;  %v9341_v49 = vld [vmem:[#allocation3 + $0x6c] sm:$0xe] }
 0x3e0   : > { %13387 = vmatmul.mubr.msk.bf16.gmra.mxu0 %vm7251_vm0, %v12196_v35  ;;  %v17821_v31 = vcombine.low %v8729_v19, %v8739_v45  ;;  %v17825_v6 = vsel %vm14839_vm3, %v9443_v42, %v9444_v34  ;;  %v8756_v35 = vrot.slane %v8754_v60, 4  ;;  %v8760_v56 = vshll.u32 %v17716_v25, 16  ;;  %v17846_v60 = vld [vmem:[#allocation3 + $0x74] sm:$0x1] }
 0x3e1   : > { %13390 = vmatprep.mubr.msk.bf16.mxu0 %vm7251_vm0, %v12197_v57  ;;  %v12309_v5 = vcombine.low %v17803_v29, %v17825_v6  ;;  %v8747_v9 = vor.u32 %v8746_v14, %v8743_v21  ;;  %v12294_v32 = vrot.slane %v9340_v4, 9  ;;  %v9448_v51 = vrot.slane %v17799_v63, 5  ;;  %v8614_v21 = vld [vmem:[#allocation3 + $0x54] sm:$0xf] }
 0x3e2   : > { %v8757_v46 = vor.u32 %v8756_v35, %v8752_v11  ;;  %v9451_v27 = vrot.slane %v17815_v10, 5  ;;  %v8765_v57 = vshrl.u32 %v8611_v26, 16  ;;  %v8762_v53 = vrot.slane %v8760_v56, 5  ;;  %v17958_v6 = vld [vmem:[#allocation3 + $0x94] sm:$0xf] }
 0x3e3   : > { %v8748_v55 = vrot.slane %v8747_v9, 4  ;;  %v8768_v33 = vshll.u32 %v8611_v26, 16  ;;  %v8774_v34 = vshll.u32 %v17738_v40, 16  ;;  %v19728_v25 = vcombine.low %v17649_v12, %v17661_v38 }
 0x3e4   : > { %v8758_v3 = vrot.slane %v8757_v46, 4  ;;  %v17844_v24 = vsel %vm14839_vm3, %v12294_v32, %v9448_v51  ;;  %v9450_v42 = vrot.slane %v9448_v51, 4  ;;  %v8767_v43 = vrot.slane %v8765_v57, 4 }
 0x3e5   : > { %13475 = vmatmul.mubr.msk.bf16.vlgmr.msra.gmra.mxu1 %vm7251_vm0, %v19728_v25  ;;  %v19729_v4 = vcombine.low %v17672_v18, %v17691_v47  ;;  %v8753_v19 = vsel %vm14338_vm9, %v8748_v55, %v8752_v11  ;;  %v8770_v12 = vrot.slane %v8768_v33, 5  ;;  %v8776_v38 = vrot.slane %v8774_v34, 5  ;;  %v9342_v55 = vld [vmem:[#allocation3 + $0x78] sm:$0xe]  ;;  %v17883_v34 = vld [vmem:[#allocation3 + $0x7c] sm:$0xf] }
 0x3e6   : > { %v8778_v45 = vshrl.u32 %v17738_v40, 16  ;;  %13543 = vmatpush3.bf16.msra.mxu1 %v17413_v44  ;;  %v8763_v14 = vsel %vm14338_vm9, %v8758_v3, %v8762_v53  ;;  %v17860_v26 = vsel %vm14839_vm3, %v9450_v42, %v9451_v27  ;;  %v8784_v18 = vshll.u32 %v17740_v2, 16 }
 0x3e7   : > { %13478 = vmatprep.mubr.msk.bf16.mxu1 %vm7251_vm0, %v19729_v4  ;;  %v12295_v47 = vrot.slane %v9341_v49, 9  ;;  %13544 = vmatprep.subr.bf16.mxu1 %v13815_v48  ;;  %v19730_v11 = vcombine.low %v17591_v28, %v17611_v30  ;;  %v17867_v40 = vcombine.low %v8753_v19, %v8763_v14  ;;  %v12310_v44 = vcombine.low %v17844_v24, %v17860_v26 }
 0x3e8   : > { %v8771_v35 = vor.u32 %v8770_v12, %v8767_v43  ;;  %v8780_v9 = vrot.slane %v8778_v45, 4  ;;  %v19731_v56 = vcombine.low %v17625_v59, %v17640_v54  ;;  %v8786_v2 = vrot.slane %v8784_v18, 5  ;;  %v17887_v43 = vld [vmem:[#allocation3 + $0x80] sm:$0x1] }
 0x3e9   : > { %13391 = vmatmul.mubr.msk.bf16.gmra.mxu0 %vm7251_vm0, %v19730_v11  ;;  %v9455_v32 = vrot.slane %v17836_v0, 5  ;;  %v9458_v46 = vrot.slane %v17846_v60, 5  ;;  %v8789_v28 = vshrl.u32 %v8614_v21, 16  ;;  %v8792_v27 = vshll.u32 %v8614_v21, 16  ;;  %v8617_v12 = vld [vmem:[#allocation3 + $0x60] sm:$0xf] }
 0x3ea   : > { %13394 = vmatprep.mubr.msk.bf16.mxu0 %vm7251_vm0, %v19731_v56  ;;  %v8772_v30 = vrot.slane %v8771_v35, 4  ;;  %v8781_v51 = vor.u32 %v8780_v9, %v8776_v38  ;;  %v8798_v57 = vshll.u32 %v17775_v1, 16  ;;  %13545 = vmatpush3.bf16.msra.mxu1 %v13815_v48  ;;  %v8802_v33 = vshrl.u32 %v17775_v1, 16  ;;  %v17918_v11 = vld [vmem:[#allocation3 + $0x88] sm:$0xf] }
 0x3eb   : > { %v17880_v53 = vsel %vm14839_vm3, %v12295_v47, %v9455_v32  ;;  %v9457_v59 = vrot.slane %v9455_v32, 4  ;;  %v8791_v54 = vrot.slane %v8789_v28, 4  ;;  %v8794_v3 = vrot.slane %v8792_v27, 5 }
 0x3ec   : > { %v8777_v49 = vsel %vm14338_vm9, %v8772_v30, %v8776_v38  ;;  %v8782_v25 = vrot.slane %v8781_v51, 4  ;;  %v8800_v42 = vrot.slane %v8798_v57, 5  ;;  %v8804_v1 = vrot.slane %v8802_v33, 4  ;;  %v17931_v30 = vld [vmem:[#allocation3 + $0x8c] sm:$0x1] }
 0x3ed   : > { %13479 = vmatmul.mubr.msk.bf16.gmra.mxu1 %vm7251_vm0, %v12306_v16  ;;  %v17895_v48 = vsel %vm14839_vm3, %v9457_v59, %v9458_v46  ;;  %v8808_v4 = vshll.u32 %v17777_v39, 16  ;;  %v12296_v19 = vrot.slane %v9342_v55, 9  ;;  %v8795_v7 = vor.u32 %v8794_v3, %v8791_v54 }
 0x3ee   : > { %13482 = vmatprep.mubr.msk.bf16.mxu1 %vm7251_vm0, %v12307_v8  ;;  %v8787_v38 = vsel %vm14338_vm9, %v8782_v25, %v8786_v2  ;;  %v12311_v15 = vcombine.low %v17880_v53, %v17895_v48  ;;  %v9462_v16 = vrot.slane %v17883_v34, 5  ;;  %v8805_v21 = vor.u32 %v8804_v1, %v8800_v42 }
 0x3ef   : > { %v17907_v45 = vcombine.low %v8777_v49, %v8787_v38  ;;  %v8810_v39 = vrot.slane %v8808_v4, 5  ;;  %v9465_v14 = vrot.slane %v17887_v43, 5  ;;  %v19732_v37 = vcombine.low %v17655_v36, %v17668_v17  ;;  %v9343_v17 = vld [vmem:[#allocation3 + $0x84] sm:$0xe] }
 0x3f0   : > { %v8796_v20 = vrot.slane %v8795_v7, 4  ;;  %v17916_v8 = vsel %vm14839_vm3, %v12296_v19, %v9462_v16  ;;  %v9464_v18 = vrot.slane %v9462_v16, 4  ;;  %v8813_v47 = vshrl.u32 %v8617_v12, 16 }
 0x3f1   : > { %13395 = vmatmul.mubr.msk.bf16.gmra.mxu0 %vm7251_vm0, %v19732_v37  ;;  %v8806_v35 = vrot.slane %v8805_v21, 4  ;;  %v8816_v9 = vshll.u32 %v8617_v12, 16  ;;  %v8822_v56 = vshll.u32 %v17799_v63, 16  ;;  %v8826_v36 = vshrl.u32 %v17799_v63, 16  ;;  %v17962_v21 = vld [vmem:[#allocation3 + $0x98] sm:$0x1] }
 0x3f2   : > { %13438 = vmatprep.mubr.msk.bf16.mxu0 %vm7251_vm0, %v17732_v52  ;;  %v8801_v2 = vsel %vm14338_vm9, %v8796_v20, %v8800_v42  ;;  %v17928_v32 = vsel %vm14839_vm3, %v9464_v18, %v9465_v14  ;;  %v8815_v46 = vrot.slane %v8813_v47, 4  ;;  %v8832_v28 = vshll.u32 %v17815_v10, 16  ;;  %v8620_v52 = vld [vmem:[#allocation3 + $0x6c] sm:$0xf]  ;;  %v8623_v20 = vld [vmem:[#allocation3 + $0x78] sm:$0xf] }
 0x3f3   : > { %v8811_v51 = vsel %vm14338_vm9, %v8806_v35, %v8810_v39  ;;  %v12312_v63 = vcombine.low %v17916_v8, %v17928_v32  ;;  %v8818_v27 = vrot.slane %v8816_v9, 5  ;;  %v8824_v57 = vrot.slane %v8822_v56, 5 }
 0x3f4   : > { %v17937_v55 = vcombine.low %v8801_v2, %v8811_v51  ;;  %v8828_v59 = vrot.slane %v8826_v36, 4  ;;  %v8834_v54 = vrot.slane %v8832_v28, 5  ;;  %v12297_v33 = vrot.slane %v9343_v17, 9 }
 0x3f5   : > { %13483 = vmatmul.mubr.msk.bf16.gmra.mxu1 %vm7251_vm0, %v12308_v50  ;;  %v8819_v10 = vor.u32 %v8818_v27, %v8815_v46  ;;  %v9469_v49 = vrot.slane %v17918_v11, 5  ;;  %v9472_v25 = vrot.slane %v17931_v30, 5  ;;  %v8837_v3 = vshrl.u32 %v8620_v52, 16 }
 0x3f6   : > { %13486 = vmatprep.mubr.msk.bf16.mxu1 %vm7251_vm0, %v12309_v5  ;;  %v8829_v42 = vor.u32 %v8828_v59, %v8824_v57  ;;  %v8840_v1 = vshll.u32 %v8620_v52, 16  ;;  %v8846_v4 = vshll.u32 %v17836_v0, 16  ;;  %v8850_v19 = vshrl.u32 %v17836_v0, 16  ;;  %v17987_v52 = vld [vmem:[#allocation3 + $0xa0] sm:$0xf] }
 0x3f7   : > { %v8820_v50 = vrot.slane %v8819_v10, 4  ;;  %v17956_v12 = vsel %vm14839_vm3, %v12297_v33, %v9469_v49  ;;  %v9471_v38 = vrot.slane %v9469_v49, 4  ;;  %v8839_v29 = vrot.slane %v8837_v3, 4  ;;  %v18007_v10 = vld [vmem:[#allocation3 + $0xa4] sm:$0x1] }
 0x3f8   : > { %v8830_v5 = vrot.slane %v8829_v42, 4  ;;  %v8842_v7 = vrot.slane %v8840_v1, 5  ;;  %v8848_v0 = vrot.slane %v8846_v4, 5  ;;  %v8852_v16 = vrot.slane %v8850_v19, 4  ;;  %v8626_v49 = vld [vmem:[#allocation3 + $0x84] sm:$0xf] }
 0x3f9   : > { %13439 = vmatmul.mubr.msk.bf16.vlgmr.msra.gmra.mxu0 %vm7251_vm0, %v17757_v61  ;;  %v8825_v39 = vsel %vm14338_vm9, %v8820_v50, %v8824_v57  ;;  %v17971_v14 = vsel %vm14839_vm3, %v9471_v38, %v9472_v25  ;;  %v8856_v61 = vshll.u32 %v17846_v60, 16  ;;  %v12298_v37 = vrot.slane %v9344_v22, 9  ;;  %v18009_v25 = vpop.f32.mrf.mxu1 }
 0x3fa   : > { %13507 = vmatpush3.bf16.msra.mxu0 %v17561_v62  ;;  %13442 = vmatprep.mubr.msk.bf16.mxu0 %vm7251_vm0, %v17791_v58  ;;  %v8835_v18 = vsel %vm14338_vm9, %v8830_v5, %v8834_v54  ;;  %v12313_v62 = vcombine.low %v17956_v12, %v17971_v14  ;;  %v8843_v47 = vor.u32 %v8842_v7, %v8839_v29  ;;  %v17981_v58 = vld [vmem:[%s19505_s5 + $0x88] sm:$0xff]   ;;  %v9476_v60 = vrot.slane %v17958_v6, 5  ;;  %v9345_v54 = vld [vmem:[#allocation3 + $0x9c] sm:$0xe]  ;;  %v18028_v7 = vld [vmem:[#allocation3 + $0xac] sm:$0xf] }
 0x3fb   : > { %v8853_v35 = vor.u32 %v8852_v16, %v8848_v0  ;;  %13508 = vmatprep.subr.bf16.mxu0 %v13813_v23  ;;  %v17983_v9 = vcombine.low %v8825_v39, %v8835_v18  ;;  %v8858_v56 = vrot.slane %v8856_v61, 5  ;;  %v9479_v36 = vrot.slane %v17962_v21, 5  ;;  %v18030_v16 = vpop.f32.mrf.mxu1 }
 0x3fc   : > { %v8844_v17 = vrot.slane %v8843_v47, 4  ;;  %v8861_v46 = vshrl.u32 %v8623_v20, 16  ;;  %v8864_v28 = vshll.u32 %v8623_v20, 16  ;;  %v17995_v51 = vsel %vm14839_vm3, %v12298_v37, %v9476_v60  ;;  %v18034_v37 = vld [vmem:[#allocation3 + $0xb0] sm:$0x1] }
 0x3fd   : > { %v8854_v2 = vrot.slane %v8853_v35, 4  ;;  %13487 = vmatmul.mubr.msk.bf16.gmra.mxu1 %vm7251_vm0, %v12310_v44  ;;  %v9478_v27 = vrot.slane %v9476_v60, 4  ;;  %v8870_v57 = vshll.u32 %v17883_v34, 16  ;;  %v8874_v59 = vshrl.u32 %v17883_v34, 16 }
 0x3fe   : > { %13509 = vmatpush3.bf16.msra.mxu0 %v13813_v23  ;;  %13490 = vmatprep.mubr.msk.bf16.mxu1 %vm7251_vm0, %v12311_v15  ;;  %v8849_v24 = vsel %vm14338_vm9, %v8844_v17, %v8848_v0  ;;  %v8863_v44 = vrot.slane %v8861_v46, 4  ;;  %v8866_v33 = vrot.slane %v8864_v28, 5  ;;  %v8880_v1 = vshll.u32 %v17887_v43, 16  ;;  %v9346_v0 = vld [vmem:[#allocation3 + $0xa8] sm:$0xe] }
 0x3ff   : > { %v8859_v26 = vsel %vm14338_vm9, %v8854_v2, %v8858_v56  ;;  %13578 = vmatprep.subr.bf16.mxu0 %v17981_v58  ;;  %v18016_v53 = vsel %vm14839_vm3, %v9478_v27, %v9479_v36  ;;  %v8872_v48 = vrot.slane %v8870_v57, 5  ;;  %v8876_v15 = vrot.slane %v8874_v59, 4  ;;  %v8629_v56 = vld [vmem:[#allocation3 + $0x90] sm:$0xf] }
 0x400   : > { %v18012_v34 = vcombine.low %v8849_v24, %v8859_v26  ;;  %v12314_v3 = vcombine.low %v17995_v51, %v18016_v53  ;;  %v8867_v42 = vor.u32 %v8866_v33, %v8863_v44  ;;  %v12299_v4 = vrot.slane %v9345_v54, 9  ;;  %v9347_v54 = vld [vmem:[#allocation3 + $0xb4] sm:$0xe] }
 0x401   : > { %13443 = vmatmul.mubr.msk.bf16.gmra.mxu0 %vm7251_vm0, %v17821_v31  ;;  %v8877_v19 = vor.u32 %v8876_v15, %v8872_v48  ;;  %v9483_v22 = vrot.slane %v17987_v52, 5  ;;  %v9486_v23 = vrot.slane %v18007_v10, 5  ;;  %v8885_v50 = vshrl.u32 %v8626_v49, 16 }
 0x402   : > { %13446 = vmatprep.mubr.msk.bf16.mxu0 %vm7251_vm0, %v17867_v40  ;;  %v8868_v38 = vrot.slane %v8867_v42, 4  ;;  %v8882_v29 = vrot.slane %v8880_v1, 5  ;;  %v8888_v5 = vshll.u32 %v8626_v49, 16  ;;  %v8894_v31 = vshll.u32 %v17918_v11, 16  ;;  %v18068_v49 = vld [vmem:[#allocation3 + $0xb8] sm:$0xf] }
 0x403   : > { %v8878_v43 = vrot.slane %v8877_v19, 4  ;;  %v9484_v40 = vsel %vm14839_vm3, %v12299_v4, %v9483_v22  ;;  %v9485_v39 = vrot.slane %v9483_v22, 4  ;;  %v8887_v61 = vrot.slane %v8885_v50, 4  ;;  %v18072_v1 = vld [vmem:[#allocation3 + $0xbc] sm:$0x1] }
 0x404   : > { %v8873_v20 = vsel %vm14338_vm9, %v8868_v38, %v8872_v48  ;;  %v8890_v18 = vrot.slane %v8888_v5, 5  ;;  %v8896_v47 = vrot.slane %v8894_v31, 5  ;;  %v8898_v35 = vshrl.u32 %v17918_v11, 16 }
 0x405   : > { %13491 = vmatmul.mubr.msk.bf16.gmra.mxu1 %vm7251_vm0, %v12312_v63  ;;  %v8883_v60 = vsel %vm14338_vm9, %v8878_v43, %v8882_v29  ;;  %v9487_v36 = vsel %vm14839_vm3, %v9485_v39, %v9486_v23  ;;  %v8904_v17 = vshll.u32 %v17931_v30, 16  ;;  %v12300_v2 = vrot.slane %v9346_v0, 9  ;;  %v18054_v63 = vpop.f32.mrf.mxu1 }
 0x406   : > { %13494 = vmatprep.mubr.msk.bf16.mxu1 %vm7251_vm0, %v12313_v62  ;;  %v18052_v11 = vcombine.low %v8873_v20, %v8883_v60  ;;  %v12315_v46 = vcombine.low %v9484_v40, %v9487_v36  ;;  %v8891_v8 = vor.u32 %v8890_v18, %v8887_v61  ;;  %v8900_v32 = vrot.slane %v8898_v35, 4  ;;  %v18093_v18 = vld [vmem:[#allocation3 + $0xc4] sm:$0xf] }
 0x407   : > { %v8906_v28 = vrot.slane %v8904_v17, 5  ;;  %v9490_v27 = vrot.slane %v18028_v7, 5  ;;  %v9493_v57 = vrot.slane %v18034_v37, 5  ;;  %v8909_v59 = vshrl.u32 %v8629_v56, 16  ;;  %v18074_v4 = vpop.f32.mrf.mxu1 }
 0x408   : > { %v8892_v30 = vrot.slane %v8891_v8, 4  ;;  %v8901_v12 = vor.u32 %v8900_v32, %v8896_v47  ;;  %v8912_v14 = vshll.u32 %v8629_v56, 16  ;;  %v8918_v62 = vshll.u32 %v17958_v6, 16  ;;  %v9348_v56 = vld [vmem:[#allocation3 + $0xc0] sm:$0xe] }
 0x409   : > { %13447 = vmatmul.mubr.msk.bf16.gmra.mxu0 %vm7251_vm0, %v17907_v45  ;;  %v18065_v24 = vsel %vm14839_vm3, %v12300_v2, %v9490_v27  ;;  %v9492_v26 = vrot.slane %v9490_v27, 4  ;;  %v8911_v44 = vrot.slane %v8909_v59, 4  ;;  %v8922_v33 = vshrl.u32 %v17958_v6, 16  ;;  %v8632_v6 = vld [vmem:[#allocation3 + $0x9c] sm:$0xf] }
 0x40a   : > { %13450 = vmatprep.mubr.msk.bf16.mxu0 %vm7251_vm0, %v17937_v55  ;;  %v8897_v45 = vsel %vm14338_vm9, %v8892_v30, %v8896_v47  ;;  %v8902_v48 = vrot.slane %v8901_v12, 4  ;;  %v8914_v15 = vrot.slane %v8912_v14, 5  ;;  %v8920_v42 = vrot.slane %v8918_v62, 5  ;;  %v18095_v47 = vpop.f32.mrf.mxu1  ;;  %v8635_v8 = vld [vmem:[#allocation3 + $0xa8] sm:$0xf] }
 0x40b   : > { %v9494_v55 = vsel %vm14839_vm3, %v9492_v26, %v9493_v57  ;;  %v8924_v19 = vrot.slane %v8922_v33, 4  ;;  %v8928_v22 = vshll.u32 %v17962_v21, 16  ;;  %v12301_v23 = vrot.slane %v9347_v54, 9  ;;  %v10184_v33 = vld [vmem:[#allocation3 + $0x18] sm:$0xf] }
 0x40c   : > { %v8907_v50 = vsel %vm14338_vm9, %v8902_v48, %v8906_v28  ;;  %v12316_v38 = vcombine.low %v18065_v24, %v9494_v55  ;;  %v8915_v29 = vor.u32 %v8914_v15, %v8911_v44  ;;  %v9497_v5 = vrot.slane %v18068_v49, 5  ;;  %v18114_v12 = vpop.f32.mrf.mxu1 }
 0x40d   : > { %13495 = vmatmul.mubr.msk.bf16.gmra.mxu1 %vm7251_vm0, %v12314_v3  ;;  %v18087_v31 = vcombine.low %v8897_v45, %v8907_v50  ;;  %v8925_v0 = vor.u32 %v8924_v19, %v8920_v42  ;;  %v8930_v43 = vrot.slane %v8928_v22, 5  ;;  %v9500_v21 = vrot.slane %v18072_v1, 5 }
 0x40e   : > { %13498 = vmatprep.mubr.msk.bf16.mxu1 %vm7251_vm0, %v12315_v46  ;;  %v8916_v40 = vrot.slane %v8915_v29, 4  ;;  %v9498_v39 = vsel %vm14839_vm3, %v12301_v23, %v9497_v5  ;;  %v9499_v61 = vrot.slane %v9497_v5, 4  ;;  %v8933_v20 = vshrl.u32 %v8632_v6, 16  ;;  %v18106_v46 = vld [vmem:[#allocation3 + $0xc8] sm:$0x1] }
 0x40f   : > { %v8926_v51 = vrot.slane %v8925_v0, 4  ;;  %v8936_v53 = vshll.u32 %v8632_v6, 16  ;;  %v8942_v3 = vshll.u32 %v17987_v52, 16  ;;  %v8946_v35 = vshrl.u32 %v17987_v52, 16  ;;  %v18124_v6 = vpop.f32.mrf.mxu1  ;;  %v18131_v29 = vld [vmem:[#allocation3 + $0x1c] sm:$0xf] }
 0x410   : > { %v8921_v60 = vsel %vm14338_vm9, %v8916_v40, %v8920_v42  ;;  %v9501_v36 = vsel %vm14839_vm3, %v9499_v61, %v9500_v21  ;;  %v8935_v17 = vrot.slane %v8933_v20, 4  ;;  %v8952_v2 = vshll.u32 %v18007_v10, 16  ;;  %v8638_v61 = vld [vmem:[#allocation3 + $0xb4] sm:$0xf] }
 0x411   : > { %13451 = vmatmul.mubr.msk.bf16.gmra.mxu0 %vm7251_vm0, %v17983_v9  ;;  %v8931_v52 = vsel %vm14338_vm9, %v8926_v51, %v8930_v43  ;;  %v12317_v32 = vcombine.low %v9498_v39, %v9501_v36  ;;  %v8938_v9 = vrot.slane %v8936_v53, 5  ;;  %v8944_v28 = vrot.slane %v8942_v3, 5  ;;  %v18137_v39 = vld [vmem:[#allocation3 + $0x20] sm:$0x1]  ;;  %v18145_v36 = vpop.f32.mrf.mxu1 }
 0x412   : > { %13454 = vmatprep.mubr.msk.bf16.mxu0 %vm7251_vm0, %v18012_v34  ;;  %v18112_v27 = vcombine.low %v8921_v60, %v8931_v52  ;;  %v8948_v57 = vrot.slane %v8946_v35, 4  ;;  %v8954_v59 = vrot.slane %v8952_v2, 5  ;;  %v12302_v30 = vrot.slane %v9348_v56, 9  ;;  %v18143_v60 = vpop.f32.mrf.mxu0  ;;  %19733 = vst [vmem:[#allocation33_spill] sm:$0xff] %v18145_v36 }
 0x413   : > { %v8939_v10 = vor.u32 %v8938_v9, %v8935_v17  ;;  %v9504_v14 = vrot.slane %v18093_v18, 5  ;;  %v9507_v62 = vrot.slane %v18106_v46, 5  ;;  %v8957_v54 = vshrl.u32 %v8635_v8, 16 }
 0x414   : > { %v8949_v34 = vor.u32 %v8948_v57, %v8944_v28  ;;  %v8960_v24 = vshll.u32 %v8635_v8, 16  ;;  %v8966_v26 = vshll.u32 %v18028_v7, 16  ;;  %v8970_v44 = vshrl.u32 %v18028_v7, 16  ;;  %v10187_v57 = vld [vmem:[#allocation3 + $0x24] sm:$0xf] }
 0x415   : > { %13499 = vmatmul.mubr.msk.bf16.gmra.mxu1 %vm7251_vm0, %v12316_v38  ;;  %v8940_v45 = vrot.slane %v8939_v10, 4  ;;  %v9505_v48 = vsel %vm14839_vm3, %v12302_v30, %v9504_v14  ;;  %v9506_v15 = vrot.slane %v9504_v14, 4  ;;  %v8959_v42 = vrot.slane %v8957_v54, 4 }
 0x416   : > { %13502 = vmatprep.mubr.msk.bf16.mxu1 %vm7251_vm0, %v12317_v32  ;;  %v8950_v55 = vrot.slane %v8949_v34, 4  ;;  %v8962_v19 = vrot.slane %v8960_v24, 5  ;;  %v8968_v22 = vrot.slane %v8966_v26, 5  ;;  %v8972_v23 = vrot.slane %v8970_v44, 4  ;;  %v18155_v26 = vpop.f32.mrf.mxu0 }
 0x417   : > { %v8945_v7 = vsel %vm14338_vm9, %v8940_v45, %v8944_v28  ;;  %v9508_v50 = vsel %vm14839_vm3, %v9506_v15, %v9507_v62  ;;  %v8976_v38 = vshll.u32 %v18034_v37, 16  ;;  %v10233_v5 = vshrl.u32 %v10184_v33, 16 }
 0x418   : > { %v8955_v0 = vsel %vm14338_vm9, %v8950_v55, %v8954_v59  ;;  %v12318_v43 = vcombine.low %v9505_v48, %v9508_v50  ;;  %v8963_v21 = vor.u32 %v8962_v19, %v8959_v42  ;;  %v8973_v40 = vor.u32 %v8972_v23, %v8968_v22  ;;  %v18157_v44 = vpop.f32.mrf.mxu1  ;;  %v18160_v48 = vld [vmem:[#allocation3 + $0x28] sm:$0xf] }
 0x419   : > { %13455 = vmatmul.mubr.msk.bf16.gmra.mxu0 %vm7251_vm0, %v18052_v11  ;;  %v12265_v20 = vcombine.low %v8945_v7, %v8955_v0  ;;  %v8978_v37 = vrot.slane %v8976_v38, 5  ;;  %v10235_v51 = vrot.slane %v10233_v5, 4  ;;  %v10236_v53 = vshll.u32 %v10184_v33, 16  ;;  %v18164_v7 = vld [vmem:[#allocation3 + $0x2c] sm:$0x1] }
 0x41a   : > { %13458 = vmatprep.mubr.msk.bf16.mxu0 %vm7251_vm0, %v18087_v31  ;;  %v8964_v3 = vrot.slane %v8963_v21, 4  ;;  %v8974_v35 = vrot.slane %v8973_v40, 4  ;;  %v10242_v11 = vshll.u32 %v18131_v29, 16  ;;  %v10246_v56 = vshrl.u32 %v18131_v29, 16  ;;  %v8641_v5 = vld [vmem:[#allocation3 + $0xc0] sm:$0xf]  ;;  %v18172_v40 = vpop.f32.mrf.mxu0 }
 0x41b   : > { %v10238_v17 = vrot.slane %v10236_v53, 5  ;;  %v10252_v2 = vshll.u32 %v18137_v39, 16  ;;  %v8981_v8 = vshrl.u32 %v8638_v61, 16  ;;  %v8984_v52 = vshll.u32 %v8638_v61, 16  ;;  %v18174_v61 = vpop.f32.mrf.mxu1 }
 0x41c   : > { %v8969_v31 = vsel %vm14338_vm9, %v8964_v3, %v8968_v22  ;;  %v8979_v32 = vsel %vm14338_vm9, %v8974_v35, %v8978_v37  ;;  %v10244_v9 = vrot.slane %v10242_v11, 5  ;;  %v10248_v28 = vrot.slane %v10246_v56, 4 }
 0x41d   : > { %13503 = vmatmul.mubr.msk.bf16.gmra.mxu1 %vm7251_vm0, %v12318_v43  ;;  %v12266_v59 = vcombine.low %v8969_v31, %v8979_v32  ;;  %v10239_v30 = vor.u32 %v10238_v17, %v10235_v51  ;;  %v10254_v10 = vrot.slane %v10252_v2, 5  ;;  %v8983_v14 = vrot.slane %v8981_v8, 4  ;;  %v10190_v31 = vld [vmem:[#allocation3 + $0x30] sm:$0xf] }
 0x41e   : > { %v10249_v62 = vor.u32 %v10248_v28, %v10244_v9  ;;  %v8986_v54 = vrot.slane %v8984_v52, 5  ;;  %v8990_v34 = vshll.u32 %v18068_v49, 16  ;;  %v8994_v24 = vshrl.u32 %v18068_v49, 16 }
 0x41f   : > { %v10240_v33 = vrot.slane %v10239_v30, 4  ;;  %v9000_v45 = vshll.u32 %v18072_v1, 16  ;;  %v10257_v15 = vshrl.u32 %v10187_v57, 16  ;;  %v10260_v42 = vshll.u32 %v10187_v57, 16  ;;  %v18185_v30 = vld [vmem:[#allocation3 + $0x34] sm:$0xf] }
 0x420   : > { %v10250_v55 = vrot.slane %v10249_v62, 4  ;;  %v8987_v19 = vor.u32 %v8986_v54, %v8983_v14  ;;  %v8992_v22 = vrot.slane %v8990_v34, 5  ;;  %v8996_v23 = vrot.slane %v8994_v24, 4  ;;  %v18189_v14 = vpop.f32.mrf.mxu1 }
 0x421   : > { %13459 = vmatmul.mubr.msk.bf16.gmra.mxu0 %vm7251_vm0, %v18112_v27  ;;  %v10245_v49 = vsel %vm14338_vm9, %v10240_v33, %v10244_v9  ;;  %v9002_v50 = vrot.slane %v9000_v45, 5  ;;  %v10259_v1 = vrot.slane %v10257_v15, 4  ;;  %v10262_v38 = vrot.slane %v10260_v42, 5 }
 0x422   : > { %13462 = vmatprep.mubr.msk.bf16.mxu0 %vm7251_vm0, %v12265_v20  ;;  %v10255_v0 = vsel %vm14338_vm9, %v10250_v55, %v10254_v10  ;;  %v8988_v43 = vrot.slane %v8987_v19, 4  ;;  %v8997_v27 = vor.u32 %v8996_v23, %v8992_v22  ;;  %v10266_v21 = vshll.u32 %v18160_v48, 16  ;;  %v18187_v10 = vpop.f32.mrf.mxu0  ;;  %v18196_v19 = vld [vmem:[#allocation3 + $0x38] sm:$0x1] }
 0x423   : > { %v12371_v37 = vcombine.low %v10245_v49, %v10255_v0  ;;  %v10263_v20 = vor.u32 %v10262_v38, %v10259_v1  ;;  %v10270_v51 = vshrl.u32 %v18160_v48, 16  ;;  %v10276_v53 = vshll.u32 %v18164_v7, 16  ;;  %v18202_v0 = vpop.f32.mrf.mxu1 }
 0x424   : > { %v8993_v3 = vsel %vm14338_vm9, %v8988_v43, %v8992_v22  ;;  %v8998_v35 = vrot.slane %v8997_v27, 4  ;;  %v10268_v11 = vrot.slane %v10266_v21, 5  ;;  %v9005_v56 = vshrl.u32 %v8641_v5, 16 }
 0x425   : > { %13546 = vmatprep.mubr.msk.bf16.mxu1 %vm7251_vm0, %v12371_v37  ;;  %v10264_v17 = vrot.slane %v10263_v20, 4  ;;  %v10272_v2 = vrot.slane %v10270_v51, 4  ;;  %v10278_v8 = vrot.slane %v10276_v53, 5  ;;  %v9008_v52 = vshll.u32 %v8641_v5, 16  ;;  %v18206_v37 = vld [vmem:[#allocation3 + $0x40] sm:$0xf] }
 0x426   : > { %v9003_v32 = vsel %vm14338_vm9, %v8998_v35, %v9002_v50  ;;  %v9007_v9 = vrot.slane %v9005_v56, 4  ;;  %v9014_v28 = vshll.u32 %v18093_v18, 16  ;;  %v9018_v57 = vshrl.u32 %v18093_v18, 16  ;;  %v18200_v5 = vpop.f32.mrf.mxu0 }
 0x427   : > { %v12267_v62 = vcombine.low %v8993_v3, %v9003_v32  ;;  %v10269_v54 = vsel %vm14338_vm9, %v10264_v17, %v10268_v11  ;;  %v10273_v34 = vor.u32 %v10272_v2, %v10268_v11  ;;  %v9010_v24 = vrot.slane %v9008_v52, 5  ;;  %v18214_v52 = vld [vmem:[#allocation3 + $0x44] sm:$0x1]  ;;  %v10196_v32 = vld [vmem:[#allocation3 + $0x48] sm:$0xf] }
 0x428   : > { %v9016_v33 = vrot.slane %v9014_v28, 5  ;;  %v9020_v45 = vrot.slane %v9018_v57, 4  ;;  %v9024_v15 = vshll.u32 %v18106_v46, 16  ;;  %v10281_v42 = vshrl.u32 %v10190_v31, 16 }
 0x429   : > { %13463 = vmatmul.mubr.msk.bf16.gmra.mxu0 %vm7251_vm0, %v12266_v59  ;;  %v10274_v18 = vrot.slane %v10273_v34, 4  ;;  %v9011_v55 = vor.u32 %v9010_v24, %v9007_v9  ;;  %v10284_v22 = vshll.u32 %v10190_v31, 16  ;;  %v10290_v23 = vshll.u32 %v18185_v30, 16  ;;  %v10193_v59 = vld [vmem:[#allocation3 + $0x3c] sm:$0xf]  ;;  %v18217_v9 = vpop.f32.mrf.mxu0 }
 0x42a   : > { %13466 = vmatprep.mubr.msk.bf16.mxu0 %vm7251_vm0, %v12267_v62  ;;  %v9021_v49 = vor.u32 %v9020_v45, %v9016_v33  ;;  %v9026_v50 = vrot.slane %v9024_v15, 5  ;;  %v10283_v1 = vrot.slane %v10281_v42, 4  ;;  %v10294_v38 = vshrl.u32 %v18185_v30, 16 }
 0x42b   : > { %v10279_v46 = vsel %vm14338_vm9, %v10274_v18, %v10278_v8  ;;  %v9012_v43 = vrot.slane %v9011_v55, 4  ;;  %v10286_v27 = vrot.slane %v10284_v22, 5  ;;  %v10292_v21 = vrot.slane %v10290_v23, 5  ;;  %v18222_v18 = vld [vmem:[#allocation3 + $0x4c] sm:$0xf] }
 0x42c   : > { %v12372_v20 = vcombine.low %v10269_v54, %v10279_v46  ;;  %v9022_v51 = vrot.slane %v9021_v49, 4  ;;  %v10296_v53 = vrot.slane %v10294_v38, 4  ;;  %v10300_v3 = vshll.u32 %v18196_v19, 16  ;;  %v13816_v54 = vld [vmem:[#allocation3 + $0x18] sm:$0xff]   ;;  %v18230_v49 = vld [vmem:[#allocation3 + $0x50] sm:$0x1] }
 0x42d   : > { %v10287_v35 = vor.u32 %v10286_v27, %v10283_v1  ;;  %v10305_v11 = vshrl.u32 %v10193_v59, 16  ;;  %v10308_v56 = vshll.u32 %v10193_v59, 16  ;;  %v9017_v17 = vsel %vm14338_vm9, %v9012_v43, %v9016_v33  ;;  %v18219_v28 = vpop.f32.mrf.mxu1  ;;  %v18237_v43 = vpop.f32.mrf.mxu0 }
 0x42e   : > { %13547 = vmatmul.mubr.msk.bf16.vlgmr.msra.gmra.mxu1 %vm7251_vm0, %v12372_v20  ;;  %v9027_v2 = vsel %vm14338_vm9, %v9022_v51, %v9026_v50  ;;  %v10297_v8 = vor.u32 %v10296_v53, %v10292_v21  ;;  %v10314_v31 = vshll.u32 %v18206_v37, 16  ;;  %v10302_v33 = vrot.slane %v10300_v3, 5  ;;  %v10199_v53 = vld [vmem:[#allocation3 + $0x54] sm:$0xf] }
 0x42f   : > { %v12268_v57 = vcombine.low %v9017_v17, %v9027_v2  ;;  %v10288_v62 = vrot.slane %v10287_v35, 4  ;;  %v10307_v34 = vrot.slane %v10305_v11, 4  ;;  %v10310_v24 = vrot.slane %v10308_v56, 5  ;;  %v18239_v27 = vpop.f32.mrf.mxu1  ;;  %v18244_v56 = vld [vmem:[#allocation3 + $0x58] sm:$0xf] }
 0x430   : > { %v10298_v45 = vrot.slane %v10297_v8, 4  ;;  %v10316_v15 = vrot.slane %v10314_v31, 5  ;;  %v10318_v42 = vshrl.u32 %v18206_v37, 16  ;;  %v10324_v22 = vshll.u32 %v18214_v52, 16 }
 0x431   : > { %13467 = vmatmul.mubr.msk.bf16.gmra.mxu0 %vm7251_vm0, %v12268_v57  ;;  %v10311_v55 = vor.u32 %v10310_v24, %v10307_v34  ;;  %v18228_v23 = vadd.f32 %v18009_v25, %v18143_v60  ;;  %v10329_v50 = vshrl.u32 %v10196_v32, 16  ;;  %v10293_v1 = vsel %vm14338_vm9, %v10288_v62, %v10292_v21  ;;  %v18257_v34 = vld [vmem:[#allocation3 + $0x5c] sm:$0x1]  ;;  %v18259_v24 = vpop.f32.mrf.mxu0 }
 0x432   : > { %v10303_v38 = vsel %vm14338_vm9, %v10298_v45, %v10302_v33  ;;  %13510 = vmatprep.mubr.msk.bf16.mxu0 %vm7251_vm0, %v13816_v54  ;;  %v10320_v59 = vrot.slane %v10318_v42, 4  ;;  %v10332_v46 = vshll.u32 %v10196_v32, 16  ;;  %v10338_v51 = vshll.u32 %v18222_v18, 16  ;;  %19734 = vst [vmem:[#allocation16_spill] sm:$0xff] %v18259_v24  ;;  %v18261_v45 = vpop.f32.mrf.mxu1  ;;  %v13818_v33 = vld [vmem:[#allocation3 + $0x24] sm:$0xff]  }
 0x433   : > { %v12373_v20 = vcombine.low %v10293_v1, %v10303_v38  ;;  %v10312_v25 = vrot.slane %v10311_v55, 4  ;;  %v10331_v60 = vrot.slane %v10329_v50, 4  ;;  %v10342_v21 = vshrl.u32 %v18222_v18, 16  ;;  %v13819_v50 = vld [vmem:[#allocation3 + $0x30] sm:$0xff]   ;;  %v10202_v38 = vld [vmem:[#allocation3 + $0x60] sm:$0xf] }
 0x434   : > { %v10321_v3 = vor.u32 %v10320_v59, %v10316_v15  ;;  %v10334_v35 = vrot.slane %v10332_v46, 5  ;;  %v10348_v11 = vshll.u32 %v18230_v49, 16  ;;  %v10326_v17 = vrot.slane %v10324_v22, 5 }
 0x435   : > { %13550 = vmatprep.mubr.msk.bf16.mxu1 %vm7251_vm0, %v12373_v20  ;;  %v10340_v2 = vrot.slane %v10338_v51, 5  ;;  %v18249_v8 = vadd.f32 %v18030_v16, %v18155_v26  ;;  %v18253_v31 = vadd.f32 %v18054_v63, %v18172_v40  ;;  %v10317_v32 = vsel %vm14338_vm9, %v10312_v25, %v10316_v15  ;;  %v13826_v63 = vld [vmem:[%s19505_s5 + $0x80] sm:$0xff]  }
 0x436   : > { %v10322_v57 = vrot.slane %v10321_v3, 4  ;;  %v10335_v62 = vor.u32 %v10334_v35, %v10331_v60  ;;  %v10344_v54 = vrot.slane %v10342_v21, 4  ;;  %v10350_v42 = vrot.slane %v10348_v11, 5  ;;  %v18271_v60 = vld [vmem:[#allocation3 + $0x64] sm:$0xf]  ;;  %v18278_v11 = vpop.f32.mrf.mxu1 }
 0x437   : > { %v10353_v16 = vshrl.u32 %v10199_v53, 16  ;;  %v10356_v26 = vshll.u32 %v10199_v53, 16  ;;  %v10362_v55 = vshll.u32 %v18244_v56, 16  ;;  %v10366_v1 = vshrl.u32 %v18244_v56, 16 }
 0x438   : > { %v10327_v40 = vsel %vm14338_vm9, %v10322_v57, %v10326_v17  ;;  %v10336_v15 = vrot.slane %v10335_v62, 4  ;;  %v10345_v22 = vor.u32 %v10344_v54, %v10340_v2  ;;  %v10372_v35 = vshll.u32 %v18257_v34, 16  ;;  %v18285_v57 = vld [vmem:[#allocation3 + $0x68] sm:$0x1] }
 0x439   : > { %v12374_v59 = vcombine.low %v10317_v32, %v10327_v40  ;;  %13511 = vmatmul.mubr.msk.bf16.vlgmr.msra.gmra.mxu0 %vm7251_vm0, %v13818_v33  ;;  %v10355_v46 = vrot.slane %v10353_v16, 4  ;;  %v10358_v20 = vrot.slane %v10356_v26, 5  ;;  %v10364_v25 = vrot.slane %v10362_v55, 5 }
 0x43a   : > { %v10341_v51 = vsel %vm14338_vm9, %v10336_v15, %v10340_v2  ;;  %v10346_v53 = vrot.slane %v10345_v22, 4  ;;  %13579 = vmatpush3.bf16.msra.mxu0 %v17981_v58  ;;  %13514 = vmatprep.mubr.msk.bf16.mxu0 %vm7251_vm0, %v13819_v50  ;;  %v10368_v3 = vrot.slane %v10366_v1, 4  ;;  %v13304_v21 = vpop.f32.mrf.mxu0  ;;  %v18283_v32 = vadd.f32 %v18095_v47, %v18200_v5 }
 0x43b   : > { %13551 = vmatmul.mubr.msk.bf16.gmra.mxu1 %vm7251_vm0, %v12374_v59  ;;  %v10359_v17 = vor.u32 %v10358_v20, %v10355_v46  ;;  %v10377_v2 = vshrl.u32 %v10202_v38, 16  ;;  %v10380_v62 = vshll.u32 %v10202_v38, 16  ;;  %13580 = vmatprep.subr.bf16.mxu0 %v13826_v63  ;;  %v10374_v33 = vrot.slane %v10372_v35, 5  ;;  %v10205_v38 = vld [vmem:[#allocation3 + $0x6c] sm:$0xf] }
 0x43c   : > { %19735 = vst [vmem:[#allocation39_spill] sm:$0xff] %v18283_v32  ;;  %v10351_v58 = vsel %vm14338_vm9, %v10346_v53, %v10350_v42  ;;  %v10369_v54 = vor.u32 %v10368_v3, %v10364_v25  ;;  %v10386_v16 = vshll.u32 %v18271_v60, 16  ;;  %v18290_v22 = vpop.f32.mrf.mxu0  ;;  %v10390_v50 = vshrl.u32 %v18271_v60, 16  ;;  %v13820_v42 = vld [vmem:[#allocation3 + $0x3c] sm:$0xff]   ;;  %v18305_v53 = vld [vmem:[#allocation3 + $0x70] sm:$0xf] }
 0x43d   : > { %v12375_v26 = vcombine.low %v10341_v51, %v10351_v58  ;;  %v10360_v55 = vrot.slane %v10359_v17, 4  ;;  %v10379_v40 = vrot.slane %v10377_v2, 4  ;;  %v10382_v15 = vrot.slane %v10380_v62, 5  ;;  %v18307_v3 = vld [vmem:[#allocation3 + $0x74] sm:$0x1]  ;;  %v13821_v62 = vld [vmem:[#allocation3 + $0x48] sm:$0xff]  }
 0x43e   : > { %v10370_v47 = vrot.slane %v10369_v54, 4  ;;  %v10388_v5 = vrot.slane %v10386_v16, 5  ;;  %v10396_v1 = vshll.u32 %v18285_v57, 16  ;;  %v18294_v59 = vpop.f32.mrf.mxu1  ;;  %13581 = vmatpush3.bf16.msra.mxu0 %v13826_v63  ;;  %v18299_v20 = vadd.f32 %v18114_v12, %v18217_v9  ;;  %v10208_v54 = vld [vmem:[#allocation3 + $0x78] sm:$0xf]  ;;  %v13305_v16 = vpop.f32.mrf.mxu0 }
 0x43f   : > { %13554 = vmatprep.mubr.msk.bf16.mxu1 %vm7251_vm0, %v12375_v26  ;;  %v10383_v46 = vor.u32 %v10382_v15, %v10379_v40  ;;  %v18303_v51 = vadd.f32 %v18124_v6, %v18237_v43  ;;  %v10365_v35 = vsel %vm14338_vm9, %v10360_v55, %v10364_v25  ;;  %v10392_v17 = vrot.slane %v10390_v50, 4  ;;  %v18320_v40 = vld [vmem:[#allocation3 + $0x7c] sm:$0xf] }
 0x440   : > { %19736 = vst [vmem:[#allocation20_spill] sm:$0xff] %v18299_v20  ;;  %v10375_v63 = vsel %vm14338_vm9, %v10370_v47, %v10374_v33  ;;  %v10398_v2 = vrot.slane %v10396_v1, 5  ;;  %v18313_v58 = vpop.f32.mrf.mxu1  ;;  %v10401_v9 = vshrl.u32 %v10205_v38, 16  ;;  %v10404_v43 = vshll.u32 %v10205_v38, 16  ;;  %v18328_v38 = vld [vmem:[#allocation3 + $0x80] sm:$0x1]  ;;  %v7369_v24 = vpop.f32.mrf.mxu0 }
 0x441   : > { %19737 = vst [vmem:[#allocation29_spill] sm:$0xff] %v18303_v51  ;;  %v12376_v12 = vcombine.low %v10365_v35, %v10375_v63  ;;  %13515 = vmatmul.mubr.msk.bf16.gmra.mxu0 %vm7251_vm0, %v13820_v42  ;;  %v10384_v6 = vrot.slane %v10383_v46, 4  ;;  %v10393_v26 = vor.u32 %v10392_v17, %v10388_v5  ;;  %v10410_v25 = vshll.u32 %v18305_v53, 16  ;;  %v13823_v20 = vld [vmem:[#allocation3 + $0x60] sm:$0xff]  }
 0x442   : > { %13518 = vmatprep.mubr.msk.bf16.mxu0 %vm7251_vm0, %v13821_v62  ;;  %v10414_v33 = vshrl.u32 %v18305_v53, 16  ;;  %v10420_v55 = vshll.u32 %v18307_v3, 16  ;;  %v10403_v47 = vrot.slane %v10401_v9, 4  ;;  %v10406_v50 = vrot.slane %v10404_v43, 5  ;;  %v18330_v17 = vpop.f32.mrf.mxu1  ;;  %v10211_v9 = vld [vmem:[#allocation3 + $0x84] sm:$0xf] }
 0x443   : > { %13555 = vmatmul.mubr.msk.bf16.gmra.mxu1 %vm7251_vm0, %v12376_v12  ;;  %v10389_v15 = vsel %vm14338_vm9, %v10384_v6, %v10388_v5  ;;  %v18326_v1 = vadd.f32 %v18157_v44, %v13304_v21  ;;  %v10394_v42 = vrot.slane %v10393_v26, 4  ;;  %v10412_v46 = vrot.slane %v10410_v25, 5  ;;  %v13822_v25 = vld [vmem:[#allocation3 + $0x54] sm:$0xff]  }
 0x444   : > { %v10416_v35 = vrot.slane %v10414_v33, 4  ;;  %v10422_v63 = vrot.slane %v10420_v55, 5  ;;  %v10407_v62 = vor.u32 %v10406_v50, %v10403_v47  ;;  %v10425_v51 = vshrl.u32 %v10208_v54, 16  ;;  %v18337_v32 = vpop.f32.mrf.mxu1 }
 0x445   : > { %19738 = vst [vmem:[#allocation36_spill] sm:$0xff] %v18326_v1  ;;  %v10428_v36 = vshll.u32 %v10208_v54, 16  ;;  %v10434_v12 = vshll.u32 %v18320_v40, 16  ;;  %v10399_v5 = vsel %vm14338_vm9, %v10394_v42, %v10398_v2  ;;  %v10438_v44 = vshrl.u32 %v18320_v40, 16 }
 0x446   : > { %v10417_v6 = vor.u32 %v10416_v35, %v10412_v46  ;;  %v10444_v21 = vshll.u32 %v18328_v38, 16  ;;  %v12377_v43 = vcombine.low %v10389_v15, %v10399_v5  ;;  %v10408_v26 = vrot.slane %v10407_v62, 4 }
 0x447   : > { %v10427_v33 = vrot.slane %v10425_v51, 4  ;;  %v10430_v55 = vrot.slane %v10428_v36, 5  ;;  %v10436_v50 = vrot.slane %v10434_v12, 5  ;;  %v10440_v54 = vrot.slane %v10438_v44, 4  ;;  %v18347_v36 = vld [vmem:[#allocation3 + $0x88] sm:$0xf] }
 0x448   : > { %v10418_v47 = vrot.slane %v10417_v6, 4  ;;  %v10446_v1 = vrot.slane %v10444_v21, 5  ;;  %13558 = vmatprep.mubr.msk.bf16.mxu1 %vm7251_vm0, %v12377_v43  ;;  %v10413_v2 = vsel %vm14338_vm9, %v10408_v26, %v10412_v46  ;;  %v18345_v15 = vadd.f32 %v18174_v61, %v18290_v22  ;;  %v18349_v51 = vld [vmem:[#allocation3 + $0x8c] sm:$0x1]  ;;  %v10214_v61 = vld [vmem:[#allocation3 + $0x90] sm:$0xf] }
 0x449   : > { %13519 = vmatmul.mubr.msk.bf16.gmra.mxu0 %vm7251_vm0, %v13822_v25  ;;  %v10431_v42 = vor.u32 %v10430_v55, %v10427_v33  ;;  %19740 = vst [vmem:[#allocation23_spill] sm:$0xff] %v18349_v51  ;;  %v10449_v35 = vshrl.u32 %v10211_v9, 16  ;;  %v13308_v62 = vpop.f32.mrf.mxu0  ;;  %v10441_v5 = vor.u32 %v10440_v54, %v10436_v50  ;;  %v18355_v46 = vadd.f32 %v18189_v14, %v13305_v16  ;;  %v18371_v16 = vld [vmem:[#allocation3 + $0x94] sm:$0xf] }
 0x44a   : > { %19739 = vst [vmem:[#allocation40_spill] sm:$0xff] %v18345_v15  ;;  %v10423_v12 = vsel %vm14338_vm9, %v10418_v47, %v10422_v63  ;;  %13522 = vmatprep.mubr.msk.bf16.mxu0 %vm7251_vm0, %v13823_v20  ;;  %v18358_v6 = vadd.f32 %v18202_v0, %v7369_v24  ;;  %v10452_v43 = vshll.u32 %v10211_v9, 16  ;;  %v10458_v33 = vshll.u32 %v18347_v36, 16  ;;  %v18363_v20 = vpop.f32.mrf.mxu1  ;;  %v18373_v9 = vld [vmem:[#allocation3 + $0x98] sm:$0x1] }
 0x44b   : > { %19741 = vst [vmem:[#allocation24_spill] sm:$0xff] %v18355_v46  ;;  %v12378_v22 = vcombine.low %v10413_v2, %v10423_v12  ;;  %v10432_v44 = vrot.slane %v10431_v42, 4  ;;  %v10451_v21 = vrot.slane %v10449_v35, 4  ;;  %v7382_v26 = vpop.f32.mrf.mxu0  ;;  %v10442_v25 = vrot.slane %v10441_v5, 4  ;;  %19744 = vst [vmem:[#allocation31_spill] sm:$0xff] %v18373_v9  ;;  %v13825_v15 = vld [vmem:[#allocation3 + $0x78] sm:$0xff]  }
 0x44c   : > { %19742 = vst [vmem:[#allocation11_spill] sm:$0xff] %v18358_v6  ;;  %v10462_v63 = vshrl.u32 %v18347_v36, 16  ;;  %v10468_v55 = vshll.u32 %v18349_v51, 16  ;;  %v10454_v0 = vrot.slane %v10452_v43, 5  ;;  %v18369_v24 = vadd.f32 %v18219_v28, %v13308_v62  ;;  %v18377_v5 = vpop.f32.mrf.mxu1 }
 0x44d   : > { %13559 = vmatmul.mubr.msk.bf16.gmra.mxu1 %vm7251_vm0, %v12378_v22  ;;  %v10437_v14 = vsel %vm14338_vm9, %v10432_v44, %v10436_v50  ;;  %v10473_v47 = vshrl.u32 %v10214_v61, 16  ;;  %v13309_v54 = vpop.f32.mrf.mxu0  ;;  %v10447_v2 = vsel %vm14338_vm9, %v10442_v25, %v10446_v1  ;;  %v10460_v42 = vrot.slane %v10458_v33, 5  ;;  %v13824_v44 = vld [vmem:[#allocation3 + $0x6c] sm:$0xff]   ;;  %v10217_v1 = vld [vmem:[#allocation3 + $0x9c] sm:$0xf] }
 0x44e   : > { %19743 = vst [vmem:[#allocation12_spill] sm:$0xff] %v18369_v24  ;;  %v10464_v35 = vrot.slane %v10462_v63, 4  ;;  %v10470_v12 = vrot.slane %v10468_v55, 5  ;;  %v12379_v22 = vcombine.low %v10437_v14, %v10447_v2  ;;  %v10455_v50 = vor.u32 %v10454_v0, %v10451_v21  ;;  %v18382_v25 = vpop.f32.mrf.mxu1  ;;  %v18392_v55 = vld [vmem:[#allocation3 + $0xa0] sm:$0xf] }
 0x44f   : > { %v10475_v43 = vrot.slane %v10473_v47, 4  ;;  %v10476_v28 = vshll.u32 %v10214_v61, 16  ;;  %v10482_v24 = vshll.u32 %v18371_v16, 16  ;;  %v10486_v6 = vshrl.u32 %v18371_v16, 16  ;;  %v7385_v51 = vpop.f32.mrf.mxu0  ;;  %19747 = vst [vmem:[#allocation34_spill] sm:$0xff] %v18392_v55 }
 0x450   : > { %v10465_v62 = vor.u32 %v10464_v35, %v10460_v42  ;;  %v10492_v46 = vshll.u32 %v18373_v9, 16  ;;  %13562 = vmatprep.mubr.msk.bf16.mxu1 %vm7251_vm0, %v12379_v22  ;;  %v10456_v33 = vrot.slane %v10455_v50, 4  ;;  %v18387_v61 = vadd.f32 %v18239_v27, %v7382_v26  ;;  %v18395_v35 = vpop.f32.mrf.mxu1  ;;  %v18402_v26 = vld [vmem:[#allocation3 + $0xa4] sm:$0x1] }
 0x451   : > { %13523 = vmatmul.mubr.msk.bf16.gmra.mxu0 %vm7251_vm0, %v13824_v44  ;;  %v10478_v21 = vrot.slane %v10476_v28, 5  ;;  %v18390_v63 = vadd.f32 %v18261_v45, %v13309_v54  ;;  %v10484_v0 = vrot.slane %v10482_v24, 5  ;;  %v10488_v47 = vrot.slane %v10486_v6, 4  ;;  %19749 = vst [vmem:[#allocation21_spill] sm:$0xff] %v18402_v26 }
 0x452   : > { %19745 = vst [vmem:[#allocation13_spill] sm:$0xff] %v18387_v61  ;;  %v10466_v14 = vrot.slane %v10465_v62, 4  ;;  %v10494_v2 = vrot.slane %v10492_v46, 5  ;;  %13526 = vmatprep.mubr.msk.bf16.mxu0 %vm7251_vm0, %v13825_v15  ;;  %v10461_v22 = vsel %vm14338_vm9, %v10456_v33, %v10460_v42  ;;  %v18400_v27 = vadd.f32 %v18278_v11, %v7385_v51  ;;  %v10220_v15 = vld [vmem:[#allocation3 + $0xa8] sm:$0xf]  ;;  %v13828_v61 = vld [vmem:[#allocation3 + $0x90] sm:$0xff]  }
 0x453   : > { %19746 = vst [vmem:[#allocation18_spill] sm:$0xff] %v18390_v63  ;;  %v10479_v50 = vor.u32 %v10478_v21, %v10475_v43  ;;  %v10497_v45 = vshrl.u32 %v10217_v1, 16  ;;  %v10489_v24 = vor.u32 %v10488_v47, %v10484_v0  ;;  %v10500_v6 = vshll.u32 %v10217_v1, 16  ;;  %v18411_v63 = vld [vmem:[#allocation3 + $0xac] sm:$0xf] }
 0x454   : > { %19748 = vst [vmem:[#allocation25_spill] sm:$0xff] %v18400_v27  ;;  %v10471_v54 = vsel %vm14338_vm9, %v10466_v14, %v10470_v12  ;;  %v10506_v46 = vshll.u32 %v18392_v55, 16  ;;  %v18407_v44 = vpop.f32.mrf.mxu1  ;;  %v10510_v43 = vshrl.u32 %v18392_v55, 16  ;;  %v10516_v21 = vshll.u32 %v18402_v26, 16  ;;  %19750 = vst [vmem:[#allocation14_spill] sm:$0xff] %v18411_v63 }
 0x455   : > { %v12380_v28 = vcombine.low %v10461_v22, %v10471_v54  ;;  %v10480_v62 = vrot.slane %v10479_v50, 4  ;;  %v10499_v42 = vrot.slane %v10497_v45, 4  ;;  %v10490_v11 = vrot.slane %v10489_v24, 4  ;;  %v13827_v22 = vld [vmem:[#allocation3 + $0x84] sm:$0xff]   ;;  %v18421_v50 = vld [vmem:[#allocation3 + $0xb0] sm:$0x1] }
 0x456   : > { %v10502_v51 = vrot.slane %v10500_v6, 5  ;;  %v10508_v33 = vrot.slane %v10506_v46, 5  ;;  %v18413_v12 = vpop.f32.mrf.mxu1  ;;  %v10512_v14 = vrot.slane %v10510_v43, 4  ;;  %19752 = vst [vmem:[#allocation17_spill] sm:$0xff] %v18421_v50  ;;  %v10521_v45 = vshrl.u32 %v10220_v15, 16 }
 0x457   : > { %v13312_v27 = vpop.f32.mrf.mxu0  ;;  %13563 = vmatmul.mubr.msk.bf16.gmra.mxu1 %vm7251_vm0, %v12380_v28  ;;  %v10485_v1 = vsel %vm14338_vm9, %v10480_v62, %v10484_v0  ;;  %v10495_v54 = vsel %vm14338_vm9, %v10490_v11, %v10494_v2  ;;  %v10518_v6 = vrot.slane %v10516_v21, 5  ;;  %v10524_v46 = vshll.u32 %v10220_v15, 16 }
 0x458   : > { %v18419_v47 = vadd.f32 %v18294_v59, %v13312_v27  ;;  %v10503_v24 = vor.u32 %v10502_v51, %v10499_v42  ;;  %v18425_v28 = vpop.f32.mrf.mxu1  ;;  %v12381_v55 = vcombine.low %v10485_v1, %v10495_v54  ;;  %v10513_v0 = vor.u32 %v10512_v14, %v10508_v33  ;;  %v10223_v42 = vld [vmem:[#allocation3 + $0xb4] sm:$0xf] }
 0x459   : > { %v7398_v26 = vpop.f32.mrf.mxu0  ;;  %13527 = vmatmul.mubr.msk.bf16.gmra.mxu0 %vm7251_vm0, %v13827_v22  ;;  %v10523_v59 = vrot.slane %v10521_v45, 4  ;;  %v10530_v27 = vshll.u32 %v18411_v63, 16  ;;  %v10526_v43 = vrot.slane %v10524_v46, 5  ;;  %v10540_v2 = vshll.u32 %v18421_v50, 16  ;;  %v18441_v22 = vld [vmem:[#allocation3 + $0xb8] sm:$0xf] }
 0x45a   : > { %19751 = vst [vmem:[#allocation15_spill] sm:$0xff] %v18419_v47  ;;  %v10504_v62 = vrot.slane %v10503_v24, 4  ;;  %v10534_v47 = vshrl.u32 %v18411_v63, 16  ;;  %13530 = vmatprep.mubr.msk.bf16.mxu0 %vm7251_vm0, %v13828_v61  ;;  %v18432_v11 = vpop.f32.mrf.mxu1  ;;  %13566 = vmatprep.mubr.msk.bf16.mxu1 %vm7251_vm0, %v12381_v55  ;;  %v10514_v51 = vrot.slane %v10513_v0, 4  ;;  %v18436_v1 = vadd.f32 %v18313_v58, %v7398_v26  ;;  %19755 = vst [vmem:[#allocation37_spill] sm:$0xff] %v18441_v22 }
 0x45b   : > { %v13313_v15 = vpop.f32.mrf.mxu0  ;;  %v10532_v21 = vrot.slane %v10530_v27, 5  ;;  %v10527_v61 = vor.u32 %v10526_v43, %v10523_v59  ;;  %v18450_v0 = vld [vmem:[#allocation3 + $0xbc] sm:$0x1]  ;;  %v10545_v58 = vshrl.u32 %v10223_v42, 16  ;;  %v10548_v26 = vshll.u32 %v10223_v42, 16 }
 0x45c   : > { %19753 = vst [vmem:[#allocation46_spill] sm:$0xff] %v18436_v1  ;;  %v18439_v14 = vadd.f32 %v18330_v17, %v13313_v15  ;;  %v10509_v45 = vsel %vm14338_vm9, %v10504_v62, %v10508_v33  ;;  %v10536_v54 = vrot.slane %v10534_v47, 4  ;;  %v10519_v46 = vsel %vm14338_vm9, %v10514_v51, %v10518_v6  ;;  %19757 = vst [vmem:[#allocation19_spill] sm:$0xff] %v18450_v0  ;;  %v13829_v47 = vld [vmem:[#allocation3 + $0x9c] sm:$0xff]   ;;  %v18456_v51 = vld [vmem:[#allocation3 + $0xc4] sm:$0xf] }
 0x45d   : > { %v7401_v24 = vpop.f32.mrf.mxu0  ;;  %v18452_v17 = vpop.f32.mrf.mxu1  ;;  %v12382_v27 = vcombine.low %v10509_v45, %v10519_v46  ;;  %v10528_v15 = vrot.slane %v10527_v61, 4  ;;  %v10554_v33 = vshll.u32 %v18441_v22, 16  ;;  %v10226_v62 = vld [vmem:[#allocation3 + $0xc0] sm:$0xf]  ;;  %v10542_v43 = vrot.slane %v10540_v2, 5  ;;  %19758 = vst [vmem:[#allocation26_spill] sm:$0xff] %v18456_v51 }
 0x45e   : > { %19754 = vst [vmem:[#allocation47_spill] sm:$0xff] %v18439_v14  ;;  %v18448_v55 = vadd.f32 %v18337_v32, %v7401_v24  ;;  %v10537_v14 = vor.u32 %v10536_v54, %v10532_v21  ;;  %v10547_v50 = vrot.slane %v10545_v58, 4  ;;  %v10550_v6 = vrot.slane %v10548_v26, 5  ;;  %v13830_v46 = vld [vmem:[#allocation3 + $0xa8] sm:$0xff]  }
 0x45f   : > { %v13316_v59 = vpop.f32.mrf.mxu0  ;;  %v10558_v32 = vshrl.u32 %v18441_v22, 16  ;;  %v18458_v24 = vpop.f32.mrf.mxu1  ;;  %13567 = vmatmul.mubr.msk.bf16.gmra.mxu1 %vm7251_vm0, %v12382_v27  ;;  %v10556_v45 = vrot.slane %v10554_v33, 5  ;;  %v10564_v61 = vshll.u32 %v18450_v0, 16  ;;  %v10533_v2 = vsel %vm14338_vm9, %v10528_v15, %v10532_v21  ;;  %v18468_v1 = vld [vmem:[#allocation3 + $0xc8] sm:$0x1] }
 0x460   : > { %19756 = vst [vmem:[#allocation51_spill] sm:$0xff] %v18448_v55  ;;  %v10538_v42 = vrot.slane %v10537_v14, 4  ;;  %v18463_v54 = vadd.f32 %v18363_v20, %v13316_v59  ;;  %v10551_v58 = vor.u32 %v10550_v6, %v10547_v50  ;;  %v10569_v63 = vshrl.u32 %v10226_v62, 16 }
 0x461   : > { %v7414_v55 = vpop.f32.mrf.mxu0  ;;  %v10560_v26 = vrot.slane %v10558_v32, 4  ;;  %13531 = vmatmul.mubr.msk.bf16.gmra.mxu0 %vm7251_vm0, %v13829_v47  ;;  %v18470_v27 = vpop.f32.mrf.mxu1  ;;  %v10572_v33 = vshll.u32 %v10226_v62, 16  ;;  %v10578_v20 = vshll.u32 %v18456_v51, 16  ;;  %v10582_v59 = vshrl.u32 %v18456_v51, 16  ;;  %v10921_v62 = vld [vmem:[#allocation3 + $0x18] sm:$0xe] }
 0x462   : > { %19759 = vst [vmem:[#allocation22_spill] sm:$0xff] %v18463_v54  ;;  %v10543_v14 = vsel %vm14338_vm9, %v10538_v42, %v10542_v43  ;;  %13534 = vmatprep.mubr.msk.bf16.mxu0 %vm7251_vm0, %v13830_v46  ;;  %v10552_v15 = vrot.slane %v10551_v58, 4  ;;  %v10571_v47 = vrot.slane %v10569_v63, 4  ;;  %v10588_v9 = vshll.u32 %v18468_v1, 16  ;;  %v10229_v58 = vld [vmem:[#allocation3 + $0xcc] sm:$0xf] }
 0x463   : > { %v13317_v21 = vpop.f32.mrf.mxu0  ;;  %v12383_v50 = vcombine.low %v10533_v2, %v10543_v14  ;;  %v10561_v6 = vor.u32 %v10560_v26, %v10556_v45  ;;  %v18477_v32 = vpop.f32.mrf.mxu1  ;;  %v10574_v54 = vrot.slane %v10572_v33, 5  ;;  %v10580_v0 = vrot.slane %v10578_v20, 5 }
 0x464   : > { %v10584_v22 = vrot.slane %v10582_v59, 4  ;;  %v10566_v51 = vrot.slane %v10564_v61, 5  ;;  %v18482_v46 = vadd.f32 %v18377_v5, %v7414_v55  ;;  %v18485_v2 = vadd.f32 %v18382_v25, %v13317_v21  ;;  %v13831_v5 = vld [vmem:[#allocation3 + $0xb4] sm:$0xff]  }
 0x465   : > { %v7417_v43 = vpop.f32.mrf.mxu0  ;;  %13570 = vmatprep.mubr.msk.bf16.mxu1 %vm7251_vm0, %v12383_v50  ;;  %v10562_v42 = vrot.slane %v10561_v6, 4  ;;  %v18487_v63 = vpop.f32.mrf.mxu1  ;;  %v10557_v26 = vsel %vm14338_vm9, %v10552_v15, %v10556_v45  ;;  %v10575_v14 = vor.u32 %v10574_v54, %v10571_v47  ;;  %v10590_v59 = vrot.slane %v10588_v9, 5  ;;  %v18499_v50 = vld [vmem:[#allocation3 + $0xd0] sm:$0xf]  ;;  %v18506_v47 = vld [vmem:[#allocation3 + $0xd4] sm:$0x1] }
 0x466   : > { %19760 = vst [vmem:[#allocation28_spill] sm:$0xff] %v18485_v2  ;;  %v10585_v33 = vor.u32 %v10584_v22, %v10580_v0  ;;  %v18492_v20 = vadd.f32 %v18395_v35, %v7417_v43  ;;  %v12405_v25 = vrot.slane %v10921_v62, 9  ;;  %v10987_v21 = vrot.slane %v18131_v29, 5  ;;  %v13832_v22 = vld [vmem:[#allocation3 + $0xc0] sm:$0xff]  }
 0x467   : > { %v10567_v61 = vsel %vm14338_vm9, %v10562_v42, %v10566_v51  ;;  %v18496_v55 = vpop.f32.mrf.mxu1  ;;  %v10576_v2 = vrot.slane %v10575_v14, 4  ;;  %v10593_v15 = vshrl.u32 %v10229_v58, 16  ;;  %v10990_v51 = vrot.slane %v18137_v39, 5 }
 0x468   : > { %v12384_v6 = vcombine.low %v10557_v26, %v10567_v61  ;;  %v10586_v45 = vrot.slane %v10585_v33, 4  ;;  %v13320_v54 = vpop.f32.mrf.mxu0  ;;  %v10989_v9 = vrot.slane %v10987_v21, 4  ;;  %v10596_v43 = vshll.u32 %v10229_v58, 16 }
 0x469   : > { %v18502_v35 = vadd.f32 %v18407_v44, %v13320_v54  ;;  %13535 = vmatmul.mubr.msk.bf16.gmra.mxu0 %vm7251_vm0, %v13831_v5  ;;  %v18508_v29 = vpop.f32.mrf.mxu1  ;;  %v10581_v62 = vsel %vm14338_vm9, %v10576_v2, %v10580_v0  ;;  %v10595_v26 = vrot.slane %v10593_v15, 4  ;;  %v10602_v14 = vshll.u32 %v18499_v50, 16  ;;  %v10922_v0 = vld [vmem:[#allocation3 + $0x24] sm:$0xe] }
 0x46a   : > { %13571 = vmatmul.mubr.msk.bf16.gmra.mxu1 %vm7251_vm0, %v12384_v6  ;;  %v10591_v42 = vsel %vm14338_vm9, %v10586_v45, %v10590_v59  ;;  %13538 = vmatprep.mubr.msk.bf16.mxu0 %vm7251_vm0, %v13832_v22  ;;  %v7430_v44 = vpop.f32.mrf.mxu0  ;;  %v10991_v58 = vsel %vm14839_vm3, %v10989_v9, %v10990_v51  ;;  %v10598_v61 = vrot.slane %v10596_v43, 5  ;;  %v18526_v2 = vadd.f32 %v18074_v4, %v18187_v10  ;;  %v13833_v22 = vld [vmem:[#allocation3 + $0xcc] sm:$0xff]  }
 0x46b   : > { %v12385_v39 = vcombine.low %v10581_v62, %v10591_v42  ;;  %v18518_v33 = vadd.f32 %v18413_v12, %v7430_v44  ;;  %v18522_v5 = vpop.f32.mrf.mxu1  ;;  %v10604_v6 = vrot.slane %v10602_v14, 5  ;;  %v10606_v45 = vshrl.u32 %v18499_v50, 16  ;;  %v10923_v10 = vld [vmem:[#allocation3 + $0x30] sm:$0xe] }
 0x46c   : > { %v13321_v59 = vpop.f32.mrf.mxu0  ;;  %v10612_v54 = vshll.u32 %v18506_v47, 16  ;;  %v10988_v15 = vsel %vm14839_vm3, %v12405_v25, %v10987_v21  ;;  %v10599_v9 = vor.u32 %v10598_v61, %v10595_v26  ;;  %v10994_v4 = vrot.slane %v18160_v48, 5  ;;  %v10924_v25 = vld [vmem:[#allocation3 + $0x3c] sm:$0xe] }
 0x46d   : > { %19761 = vst [vmem:[#allocation41_spill] sm:$0xff] %v18518_v33  ;;  %13574 = vmatprep.mubr.msk.bf16.mxu1 %vm7251_vm0, %v12385_v39  ;;  %v18532_v12 = vadd.f32 %v18425_v28, %v13321_v59  ;;  %v18536_v51 = vpop.f32.mrf.mxu1  ;;  %v12421_v62 = vcombine.low %v10988_v15, %v10991_v58  ;;  %v10608_v42 = vrot.slane %v10606_v45, 4  ;;  %v12406_v14 = vrot.slane %v10922_v0, 9 }
 0x46e   : > { %v7433_v43 = vpop.f32.mrf.mxu0  ;;  %v10614_v44 = vrot.slane %v10612_v54, 5  ;;  %v10600_v28 = vrot.slane %v10599_v9, 4  ;;  %v10996_v59 = vrot.slane %v10994_v4, 4  ;;  %v12407_v61 = vrot.slane %v10923_v10, 9  ;;  %v10925_v10 = vld [vmem:[#allocation3 + $0x48] sm:$0xe] }
 0x46f   : > { %19762 = vst [vmem:[#allocation27_spill] sm:$0xff] %v18532_v12  ;;  %v18540_v39 = vadd.f32 %v18432_v11, %v7433_v43  ;;  %v10997_v12 = vrot.slane %v18164_v7, 5  ;;  %v18543_v33 = vpop.f32.mrf.mxu1  ;;  %v10609_v26 = vor.u32 %v10608_v42, %v10604_v6  ;;  %v10995_v48 = vsel %vm14839_vm3, %v12406_v14, %v10994_v4 }
 0x470   : > { %v13324_v21 = vpop.f32.mrf.mxu0  ;;  %v11001_v58 = vrot.slane %v18185_v30, 5  ;;  %v11004_v7 = vrot.slane %v18196_v19, 5  ;;  %v11008_v54 = vrot.slane %v18206_v37, 5  ;;  %v10605_v30 = vsel %vm14338_vm9, %v10600_v28, %v10604_v6 }
 0x471   : > { %v18549_v0 = vadd.f32 %v18452_v17, %v13324_v21  ;;  %13539 = vmatmul.mubr.msk.bf16.gmra.mxu0 %vm7251_vm0, %v13833_v22  ;;  %v10998_v11 = vsel %vm14839_vm3, %v10996_v59, %v10997_v12  ;;  %v18555_v45 = vpop.f32.mrf.mxu1  ;;  %v10610_v9 = vrot.slane %v10609_v26, 4  ;;  %v12408_v4 = vrot.slane %v10924_v25, 9 }
 0x472   : > { %13582 = vmatprep.mubr.msk.bf16.mxu0 %vm7251_vm0, %v12421_v62  ;;  %v7446_v15 = vpop.f32.mrf.mxu0  ;;  %v11003_v17 = vrot.slane %v11001_v58, 4  ;;  %v12422_v12 = vcombine.low %v10995_v48, %v10998_v11  ;;  %v11010_v19 = vrot.slane %v11008_v54, 4  ;;  %v11011_v42 = vrot.slane %v18214_v52, 5 }
 0x473   : > { %v18562_v22 = vadd.f32 %v18458_v24, %v7446_v15  ;;  %v18564_v43 = vpop.f32.mrf.mxu1  ;;  %v10615_v37 = vsel %vm14338_vm9, %v10610_v9, %v10614_v44  ;;  %v11002_v6 = vsel %vm14839_vm3, %v12407_v61, %v11001_v58  ;;  %v11015_v28 = vrot.slane %v18222_v18, 5  ;;  %v10926_v44 = vld [vmem:[#allocation3 + $0x54] sm:$0xe]  ;;  %v10927_v58 = vld [vmem:[#allocation3 + $0x60] sm:$0xe] }
 0x474   : > { %v13325_v62 = vpop.f32.mrf.mxu0  ;;  %v11005_v14 = vsel %vm14839_vm3, %v11003_v17, %v11004_v7  ;;  %v12386_v24 = vcombine.low %v10605_v30, %v10615_v37  ;;  %v18581_v52 = vsel %vm14839_vm3, %v11010_v19, %v11011_v42  ;;  %v12409_v41 = vrot.slane %v10925_v10, 9 }
 0x475   : > { %v18575_v59 = vadd.f32 %v18470_v27, %v13325_v62  ;;  %v18577_v25 = vpop.f32.mrf.mxu1  ;;  %v12423_v26 = vcombine.low %v11002_v6, %v11005_v14  ;;  %v18585_v48 = vsel %vm14839_vm3, %v12408_v4, %v11008_v54  ;;  %v11017_v61 = vrot.slane %v11015_v28, 4  ;;  %v10928_v4 = vld [vmem:[#allocation3 + $0x6c] sm:$0xe]  ;;  %v10929_v14 = vld [vmem:[#allocation3 + $0x78] sm:$0xe] }
 0x476   : > { %v7449_v21 = vpop.f32.mrf.mxu0  ;;  %v11018_v18 = vrot.slane %v18230_v49, 5  ;;  %13575 = vmatmul.mubr.msk.bf16.gmra.mxu1 %vm7251_vm0, %v12386_v24  ;;  %v12424_v11 = vcombine.low %v18585_v48, %v18581_v52  ;;  %v11016_v15 = vsel %vm14839_vm3, %v12409_v41, %v11015_v28  ;;  %v11022_v54 = vrot.slane %v18244_v56, 5 }
 0x477   : > { %v18590_v27 = vadd.f32 %v18477_v32, %v7449_v21  ;;  %v18594_v7 = vpop.f32.mrf.mxu1  ;;  %v12410_v9 = vrot.slane %v10926_v44, 9  ;;  %v11025_v17 = vrot.slane %v18257_v34, 5  ;;  %v11029_v32 = vrot.slane %v18271_v60, 5 }
 0x478   : > { %v13368_v30 = vpop.f32.mrf.mxu0  ;;  %v11019_v49 = vsel %vm14839_vm3, %v11017_v61, %v11018_v18  ;;  %v11024_v42 = vrot.slane %v11022_v54, 4  ;;  %v12411_v37 = vrot.slane %v10927_v58, 9  ;;  %v11032_v56 = vrot.slane %v18285_v57, 5 }
 0x479   : > { %19763 = vst [vmem:[#allocation30_spill] sm:$0xff] %v18590_v27  ;;  %v18604_v10 = vadd.f32 %v13368_v30, %v18228_v23  ;;  %13583 = vmatmul.mubr.msk.bf16.vlgmr.msra.gmra.mxu0 %vm7251_vm0, %v12422_v12  ;;  %v18607_v19 = vpop.f32.mrf.mxu1  ;;  %v12425_v6 = vcombine.low %v11016_v15, %v11019_v49  ;;  %v18613_v34 = vsel %vm14839_vm3, %v12410_v9, %v11022_v54  ;;  %v11031_v60 = vrot.slane %v11029_v32, 4  ;;  %v10931_v9 = vld [vmem:[#allocation3 + $0x90] sm:$0xe] }
 0x47a   : > { %13586 = vmatprep.mubr.msk.bf16.mxu0 %vm7251_vm0, %v12423_v26  ;;  %v8068_v62 = vpop.f32.mrf.mxu0  ;;  %v11036_v23 = vrot.slane %v18305_v53, 5  ;;  %v18623_v57 = vsel %vm14839_vm3, %v11024_v42, %v11025_v17  ;;  %v18627_v24 = vsel %vm14839_vm3, %v12411_v37, %v11029_v32  ;;  %v12412_v52 = vrot.slane %v10928_v4, 9  ;;  %v10930_v26 = vld [vmem:[#allocation3 + $0x84] sm:$0xe] }
 0x47b   : > { %v18617_v12 = vadd.f32 %v8068_v62, %v18249_v8  ;;  %v18619_v28 = vpop.f32.mrf.mxu1  ;;  %v18633_v53 = vsel %vm14839_vm3, %v11031_v60, %v11032_v56  ;;  %v11039_v21 = vrot.slane %v18307_v3, 5  ;;  %v12413_v58 = vrot.slane %v10929_v14, 9 }
 0x47c   : > { %v13369_v41 = vpop.f32.mrf.mxu0  ;;  %v11038_v8 = vrot.slane %v11036_v23, 4  ;;  %v12427_v18 = vcombine.low %v18627_v24, %v18633_v53  ;;  %v11043_v15 = vrot.slane %v18320_v40, 5  ;;  %v18646_v30 = vsel %vm14839_vm3, %v12412_v52, %v11036_v23  ;;  %v19765_v23 = vld [vmem:[#allocation39_spill] sm:$0xff]  ;;  %v19773_v40 = vld [vmem:[#allocation37_spill] sm:$0xff] }
 0x47d   : > { %v18637_v48 = vadd.f32 %v13369_v41, %v18253_v31  ;;  %v18639_v61 = vpop.f32.mrf.mxu1  ;;  %v11046_v31 = vrot.slane %v18328_v38, 5  ;;  %v11050_v49 = vrot.slane %v18347_v36, 5  ;;  %v12414_v42 = vrot.slane %v10930_v26, 9  ;;  %v19764_v38 = vld [vmem:[#allocation23_spill] sm:$0xff] }
 0x47e   : > { %v8071_v54 = vpop.f32.mrf.mxu0  ;;  %v18650_v3 = vsel %vm14839_vm3, %v11038_v8, %v11039_v21  ;;  %v11045_v4 = vrot.slane %v11043_v15, 4  ;;  %v18663_v56 = vsel %vm14839_vm3, %v12413_v58, %v11043_v15  ;;  %v11053_v60 = vrot.slane %v19764_v38, 5  ;;  %v10932_v53 = vld [vmem:[#allocation3 + $0x9c] sm:$0xe]  ;;  %v19767_v15 = vld [vmem:[#allocation20_spill] sm:$0xff] }
 0x47f   : > { %v18655_v17 = vadd.f32 %v8071_v54, %v18526_v2  ;;  %v18657_v32 = vpop.f32.mrf.mxu1  ;;  %v11052_v62 = vrot.slane %v11050_v49, 4  ;;  %v11057_v36 = vrot.slane %v18371_v16, 5  ;;  %v18677_v52 = vsel %vm14839_vm3, %v12414_v42, %v11050_v49  ;;  %v19766_v26 = vld [vmem:[#allocation31_spill] sm:$0xff]  ;;  %v19770_v42 = vld [vmem:[#allocation33_spill] sm:$0xff] }
 0x480   : > { %v13372_v37 = vpop.f32.mrf.mxu0  ;;  %v18673_v24 = vsel %vm14839_vm3, %v11045_v4, %v11046_v31  ;;  %v12415_v41 = vrot.slane %v10931_v9, 9  ;;  %v11060_v58 = vrot.slane %v19766_v26, 5  ;;  %v19768_v9 = vld [vmem:[#allocation34_spill] sm:$0xff]  ;;  %v19769_v4 = vld [vmem:[#allocation16_spill] sm:$0xff]  ;;  %v19774_v26 = vld [vmem:[#allocation19_spill] sm:$0xff] }
 0x481   : > { %v8201_v2 = vadd.f32 %v13372_v37, %v19765_v23  ;;  %13587 = vmatmul.mubr.msk.bf16.gmra.mxu0 %vm7251_vm0, %v12424_v11  ;;  %v18669_v14 = vpop.f32.mrf.mxu1  ;;  %v12429_v16 = vcombine.low %v18663_v56, %v18673_v24  ;;  %v18684_v11 = vsel %vm14839_vm3, %v11052_v62, %v11053_v60  ;;  %v11059_v21 = vrot.slane %v11057_v36, 4  ;;  %v19771_v23 = vld [vmem:[#allocation29_spill] sm:$0xff] }
 0x482   : > { %13590 = vmatprep.mubr.msk.bf16.mxu0 %vm7251_vm0, %v12425_v6  ;;  %v8084_v8 = vpop.f32.mrf.mxu0  ;;  %v11064_v6 = vrot.slane %v19768_v9, 5  ;;  %v7655_v37 = vadd.f32 %v19770_v42, %v19769_v4  ;;  %v18697_v62 = vsel %vm14839_vm3, %v12415_v41, %v11057_v36  ;;  %v12416_v60 = vrot.slane %v10932_v53, 9  ;;  %v19772_v9 = vld [vmem:[#allocation21_spill] sm:$0xff]  ;;  %v10934_v42 = vld [vmem:[#allocation3 + $0xb4] sm:$0xe] }
 0x483   : > { %v8199_v54 = vadd.f32 %v8084_v8, %v19767_v15  ;;  %v18688_v31 = vpop.f32.mrf.mxu1  ;;  %v18701_v38 = vsel %vm14839_vm3, %v11059_v21, %v11060_v58  ;;  %v11067_v4 = vrot.slane %v19772_v9, 5  ;;  %v11078_v36 = vrot.slane %v19773_v40, 5  ;;  %v19775_v40 = vld [vmem:[#allocation36_spill] sm:$0xff] }
 0x484   : > { %v13373_v56 = vpop.f32.mrf.mxu0  ;;  %v11066_v15 = vrot.slane %v11064_v6, 4  ;;  %v18714_v53 = vsel %vm14839_vm3, %v12416_v60, %v11064_v6  ;;  %v11081_v27 = vrot.slane %v19774_v26, 5  ;;  %v19777_v26 = vld [vmem:[#allocation40_spill] sm:$0xff] }
 0x485   : > { %v8202_v24 = vadd.f32 %v13373_v56, %v19771_v23  ;;  %v18704_v8 = vpop.f32.mrf.mxu1  ;;  %v12418_v23 = vrot.slane %v10934_v42, 9  ;;  %v11080_v9 = vrot.slane %v11078_v36, 4 }
 0x486   : > { %v8087_v49 = vpop.f32.mrf.mxu0  ;;  %v18718_v21 = vsel %vm14839_vm3, %v11066_v15, %v11067_v4 }
 0x487   : > { %v8200_v41 = vadd.f32 %v8087_v49, %v7655_v37  ;;  %v18710_v44 = vpop.f32.mrf.mxu1  ;;  %v12432_v56 = vcombine.low %v18714_v53, %v18718_v21  ;;  %v19776_v37 = vcombine.low %v18613_v34, %v18623_v57  ;;  %v18733_v15 = vsel %vm14839_vm3, %v12418_v23, %v11078_v36  ;;  %v19778_v23 = vld [vmem:[#allocation24_spill] sm:$0xff]  ;;  %v10936_v53 = vld [vmem:[#allocation3 + $0xcc] sm:$0xe] }
 0x488   : > { %v13376_v58 = vpop.f32.mrf.mxu0  ;;  %v18737_v4 = vsel %vm14839_vm3, %v11080_v9, %v11081_v27  ;;  %v18750_v36 = vadd.f32 %v18496_v55, %v18617_v12  ;;  %v18757_v9 = vadd.f32 %v18508_v29, %v18637_v48  ;;  %v19779_v55 = vld [vmem:[#allocation11_spill] sm:$0xff] }
 0x489   : > { %v8205_v49 = vadd.f32 %v13376_v58, %v19775_v40  ;;  %13591 = vmatmul.mubr.msk.bf16.gmra.mxu0 %vm7251_vm0, %v19776_v37  ;;  %v18728_v6 = vpop.f32.mrf.mxu1  ;;  %v12434_v34 = vcombine.low %v18733_v15, %v18737_v4  ;;  %v18761_v37 = vadd.f32 %v18522_v5, %v18655_v17  ;;  %v18776_v29 = vadd.f32 %v18564_v43, %v8200_v41  ;;  %v19780_v17 = vld [vmem:[#allocation12_spill] sm:$0xff] }
 0x48a   : > { %13594 = vmatprep.mubr.msk.bf16.mxu0 %vm7251_vm0, %v12427_v18  ;;  %v8100_v60 = vpop.f32.mrf.mxu0  ;;  %v18746_v18 = vadd.f32 %v18487_v63, %v18604_v10  ;;  %v18764_v63 = vadd.f32 %v18536_v51, %v8201_v2  ;;  %v18767_v10 = vadd.f32 %v18543_v33, %v8199_v54  ;;  %v19781_v54 = vcombine.low %v18646_v30, %v18650_v3 }
 0x48b   : > { %v8203_v42 = vadd.f32 %v8100_v60, %v19777_v26  ;;  %v18740_v58 = vpop.f32.mrf.mxu1  ;;  %v18779_v5 = vadd.f32 %v18577_v25, %v8205_v49 }
 0x48c   : > { %v13377_v57 = vpop.f32.mrf.mxu0 }
 0x48d   : > { %v8206_v40 = vadd.f32 %v13377_v57, %v19778_v23  ;;  %v18753_v27 = vpop.f32.mrf.mxu1  ;;  %v18773_v57 = vadd.f32 %v18555_v45, %v8202_v24  ;;  %v18782_v51 = vadd.f32 %v18594_v7, %v8203_v42  ;;  %v19782_v7 = vld [vmem:[#allocation13_spill] sm:$0xff]  ;;  %v19783_v42 = vld [vmem:[#allocation18_spill] sm:$0xff] }
 0x48e   : > { %v8103_v60 = vpop.f32.mrf.mxu0  ;;  %v19784_v23 = vld [vmem:[#allocation14_spill] sm:$0xff] }
 0x48f   : > { %v8204_v12 = vadd.f32 %v8103_v60, %v19779_v55  ;;  %v18770_v26 = vpop.f32.mrf.mxu1  ;;  %v18785_v33 = vadd.f32 %v18607_v19, %v8206_v40  ;;  %v11071_v40 = vrot.slane %v19784_v23, 5  ;;  %v19790_v23 = vld [vmem:[#allocation17_spill] sm:$0xff] }
 0x490   : > { %v13380_v48 = vpop.f32.mrf.mxu0 }
 0x491   : > { %v8209_v2 = vadd.f32 %v13380_v48, %v19780_v17  ;;  %13595 = vmatmul.mubr.msk.bf16.gmra.mxu0 %vm7251_vm0, %v19781_v54  ;;  %v18792_v45 = vpop.f32.mrf.mxu1  ;;  %v18795_v43 = vadd.f32 %v18619_v28, %v8204_v12  ;;  %v19786_v17 = vld [vmem:[#allocation15_spill] sm:$0xff]  ;;  %v19787_v54 = vcombine.low %v18677_v52, %v18684_v11 }
 0x492   : > { %13598 = vmatprep.mubr.msk.bf16.mxu0 %vm7251_vm0, %v12429_v16  ;;  %v8116_v25 = vpop.f32.mrf.mxu0  ;;  %v19785_v16 = vld [vmem:[#allocation25_spill] sm:$0xff] }
 0x493   : > { %v8207_v24 = vadd.f32 %v8116_v25, %v19782_v7  ;;  %v18799_v41 = vpop.f32.mrf.mxu1  ;;  %v18802_v19 = vadd.f32 %v18639_v61, %v8209_v2  ;;  %v10933_v25 = vld [vmem:[#allocation3 + $0xa8] sm:$0xe]  ;;  %v11073_v7 = vrot.slane %v11071_v40, 4 }
 0x494   : > { %v13381_v49 = vpop.f32.mrf.mxu0 }
 0x495   : > { %v8210_v30 = vadd.f32 %v13381_v49, %v19783_v42  ;;  %v18805_v3 = vpop.f32.mrf.mxu1  ;;  %v18809_v28 = vadd.f32 %v18657_v32, %v8207_v24  ;;  %v19788_v49 = vcombine.low %v18697_v62, %v18701_v38  ;;  %v19789_v42 = vld [vmem:[#allocation46_spill] sm:$0xff] }
 0x496   : > { %v8119_v60 = vpop.f32.mrf.mxu0  ;;  %v19792_v38 = vld [vmem:[#allocation26_spill] sm:$0xff] }
 0x497   : > { %v8208_v55 = vadd.f32 %v8119_v60, %v19785_v16  ;;  %v18812_v12 = vpop.f32.mrf.mxu1  ;;  %v18815_v48 = vadd.f32 %v18669_v14, %v8210_v30  ;;  %v11074_v60 = vrot.slane %v19790_v23, 5 }
 0x498   : > { %v13384_v61 = vpop.f32.mrf.mxu0 }
 0x499   : > { %v8213_v2 = vadd.f32 %v13384_v61, %v19786_v17  ;;  %13599 = vmatmul.mubr.msk.bf16.gmra.mxu0 %vm7251_vm0, %v19787_v54  ;;  %v18822_v32 = vpop.f32.mrf.mxu1  ;;  %v18825_v24 = vadd.f32 %v18688_v31, %v8208_v55  ;;  %v12417_v61 = vrot.slane %v10933_v25, 9  ;;  %v19791_v17 = vld [vmem:[#allocation47_spill] sm:$0xff]  ;;  %v11075_v55 = vsel %vm14839_vm3, %v11073_v7, %v11074_v60  ;;  %v19794_v60 = vld [vmem:[#allocation22_spill] sm:$0xff] }
 0x49a   : > { %13602 = vmatprep.mubr.msk.bf16.mxu0 %vm7251_vm0, %v19788_v49  ;;  %v8132_v14 = vpop.f32.mrf.mxu0  ;;  %v11085_v54 = vrot.slane %v19792_v38, 5 }
 0x49b   : > { %v8211_v30 = vadd.f32 %v8132_v14, %v19789_v42  ;;  %v18833_v52 = vpop.f32.mrf.mxu1  ;;  %v18836_v11 = vadd.f32 %v18704_v8, %v8213_v2  ;;  %v19793_v42 = vld [vmem:[#allocation51_spill] sm:$0xff]  ;;  %v11072_v8 = vsel %vm14839_vm3, %v12417_v61, %v11071_v40  ;;  %v11092_v61 = vrot.slane %v18499_v50, 5 }
 0x49c   : > { %v13385_v16 = vpop.f32.mrf.mxu0  ;;  %v12433_v7 = vcombine.low %v11072_v8, %v11075_v55  ;;  %v11088_v55 = vrot.slane %v18468_v1, 5 }
 0x49d   : > { %v8214_v31 = vadd.f32 %v13385_v16, %v19791_v17  ;;  %v18841_v62 = vpop.f32.mrf.mxu1  ;;  %v18845_v49 = vadd.f32 %v18710_v44, %v8211_v30  ;;  %v11087_v44 = vrot.slane %v11085_v54, 4  ;;  %v11094_v1 = vrot.slane %v11092_v61, 4 }
 0x49e   : > { %v8135_v14 = vpop.f32.mrf.mxu0 }
 0x49f   : > { %v8212_v23 = vadd.f32 %v8135_v14, %v19793_v42  ;;  %v18850_v2 = vpop.f32.mrf.mxu1  ;;  %v18853_v25 = vadd.f32 %v18728_v6, %v8214_v31  ;;  %v10935_v6 = vld [vmem:[#allocation3 + $0xc0] sm:$0xe] }
 0x4a0   : > { %v13388_v16 = vpop.f32.mrf.mxu0  ;;  %v19795_v42 = vld [vmem:[#allocation28_spill] sm:$0xff] }
 0x4a1   : > { %v8217_v17 = vadd.f32 %v13388_v16, %v19794_v60  ;;  %13603 = vmatmul.mubr.msk.bf16.gmra.mxu0 %vm7251_vm0, %v12432_v56  ;;  %v18860_v30 = vpop.f32.mrf.mxu1  ;;  %v18863_v38 = vadd.f32 %v18740_v58, %v8212_v23  ;;  %v12419_v58 = vrot.slane %v10935_v6, 9  ;;  %v11089_v23 = vsel %vm14839_vm3, %v11087_v44, %v11088_v55 }
 0x4a2   : > { %13606 = vmatprep.mubr.msk.bf16.mxu0 %vm7251_vm0, %v12433_v7  ;;  %v8148_v40 = vpop.f32.mrf.mxu0  ;;  %v12420_v7 = vrot.slane %v10936_v53, 9  ;;  %v11095_v60 = vrot.slane %v18506_v47, 5 }
 0x4a3   : > { %v8215_v31 = vadd.f32 %v8148_v40, %v18482_v46  ;;  %v8552_v14 = vpop.f32.mrf.mxu1  ;;  %v18870_v21 = vadd.f32 %v18753_v27, %v8217_v17  ;;  %v11086_v17 = vsel %vm14839_vm3, %v12419_v58, %v11085_v54 }
 0x4a4   : > { %v13389_v56 = vpop.f32.mrf.mxu0  ;;  %v12435_v55 = vcombine.low %v11086_v17, %v11089_v23 }
 0x4a5   : > { %v8218_v8 = vadd.f32 %v13389_v56, %v19795_v42  ;;  %v18875_v16 = vpop.f32.mrf.mxu1  ;;  %v18878_v50 = vadd.f32 %v18770_v26, %v8215_v31  ;;  %v11096_v31 = vsel %vm14839_vm3, %v11094_v1, %v11095_v60 }
 0x4a6   : > { %v8151_v46 = vpop.f32.mrf.mxu0 }
 0x4a7   : > { %v8216_v27 = vadd.f32 %v8151_v46, %v18492_v20  ;;  %v18884_v40 = vpop.f32.mrf.mxu1  ;;  %v18887_v6 = vadd.f32 %v18792_v45, %v8218_v8  ;;  %v11093_v45 = vsel %vm14839_vm3, %v12420_v7, %v11092_v61 }
 0x4a8   : > { %v12436_v42 = vcombine.low %v11093_v45, %v11096_v31 }
 0x4a9   : > { %v13392_v44 = vpop.f32.mrf.mxu0  ;;  %13607 = vmatmul.mubr.msk.bf16.gmra.mxu0 %vm7251_vm0, %v12434_v34  ;;  %v18894_v47 = vpop.f32.mrf.mxu1  ;;  %v18897_v20 = vadd.f32 %v18799_v41, %v8216_v27  ;;  %v19797_v34 = vld [vmem:[#allocation27_spill] sm:$0xff] }
 0x4aa   : > { %v8221_v26 = vadd.f32 %v13392_v44, %v18502_v35  ;;  %13610 = vmatprep.mubr.msk.bf16.mxu0 %vm7251_vm0, %v12435_v55  ;;  %v19796_v35 = vld [vmem:[#allocation41_spill] sm:$0xff] }
 0x4ab   : > { %v8164_v54 = vpop.f32.mrf.mxu0  ;;  %v18905_v56 = vpop.f32.mrf.mxu1 }
 0x4ac   : > { %v8219_v53 = vadd.f32 %v8164_v54, %v19796_v35  ;;  %v18908_v15 = vadd.f32 %v18805_v3, %v8221_v26  ;;  %v19798_v54 = vld [vmem:[#allocation30_spill] sm:$0xff] }
 0x4ad   : > { %v13393_v4 = vpop.f32.mrf.mxu0  ;;  %v18911_v8 = vpop.f32.mrf.mxu1 }
 0x4ae   : > { %v8222_v41 = vadd.f32 %v13393_v4, %v19797_v34  ;;  %v18914_v58 = vadd.f32 %v18812_v12, %v8219_v53 }
 0x4af   : > { %v8167_v61 = vpop.f32.mrf.mxu0  ;;  %v18917_v23 = vpop.f32.mrf.mxu1 }
 0x4b0   : > { %v8220_v13 = vadd.f32 %v8167_v61, %v18540_v39  ;;  %v18920_v46 = vadd.f32 %v18822_v32, %v8222_v41 }
 0x4b1   : > { %v13396_v7 = vpop.f32.mrf.mxu0  ;;  %13611 = vmatmul.mubr.msk.bf16.gmra.mxu0 %vm7251_vm0, %v12436_v42  ;;  %v18924_v1 = vpop.f32.mrf.mxu1 }
 0x4b2   : > { %v8225_v3 = vadd.f32 %v13396_v7, %v18549_v0  ;;  %v18927_v60 = vadd.f32 %v18833_v52, %v8220_v13 }
 0x4b3   : > { %v8180_v12 = vpop.f32.mrf.mxu0  ;;  %v18930_v17 = vpop.f32.mrf.mxu1 }
 0x4b4   : > { %v8223_v27 = vadd.f32 %v8180_v12, %v18562_v22  ;;  %v18933_v39 = vadd.f32 %v18841_v62, %v8225_v3 }
 0x4b5   : > { %v13397_v32 = vpop.f32.mrf.mxu0  ;;  %v18936_v55 = vpop.f32.mrf.mxu1 }
 0x4b6   : > { %v8226_v44 = vadd.f32 %v13397_v32, %v18575_v59  ;;  %v18939_v0 = vadd.f32 %v18850_v2, %v8223_v27 }
 0x4b7   : > { %v8183_v26 = vpop.f32.mrf.mxu0  ;;  %v18942_v45 = vpop.f32.mrf.mxu1 }
 0x4b8   : > { %v8224_v52 = vadd.f32 %v8183_v26, %v19798_v54  ;;  %v18945_v22 = vadd.f32 %v18860_v30, %v8226_v44 }
 0x4b9   : > { %v13440_v31 = vpop.f32.mrf.mxu0  ;;  %v18950_v35 = vpop.f32.mrf.mxu1 }
 0x4ba   : > { %v18948_v62 = vadd.f32 %v13440_v31, %v18746_v18  ;;  %v18952_v59 = vadd.f32 %v8552_v14, %v8224_v52 }
 0x4bb   : > { %v9174_v53 = vpop.f32.mrf.mxu0  ;;  %v18957_v4 = vpop.f32.mrf.mxu1 }
 0x4bc   : > { %v18955_v2 = vadd.f32 %v9174_v53, %v18750_v36 }
 0x4bd   : > { %v13441_v34 = vpop.f32.mrf.mxu0  ;;  %v18962_v30 = vpop.f32.mrf.mxu1 }
 0x4be   : > { %v18960_v41 = vadd.f32 %v13441_v34, %v18757_v9 }
 0x4bf   : > { %v9177_v42 = vpop.f32.mrf.mxu0  ;;  %v18967_v61 = vpop.f32.mrf.mxu1 }
 0x4c0   : > { %v18965_v18 = vadd.f32 %v9177_v42, %v18761_v37 }
 0x4c1   : > { %v13444_v14 = vpop.f32.mrf.mxu0  ;;  %v18972_v36 = vpop.f32.mrf.mxu1 }
 0x4c2   : > { %v18970_v13 = vadd.f32 %v13444_v14, %v18764_v63  ;;  %19799 = vst [vmem:[#allocation32_spill] sm:$0xff] %v18972_v36 }
 0x4c3   : > { %v9190_v7 = vpop.f32.mrf.mxu0  ;;  %v18977_v9 = vpop.f32.mrf.mxu1 }
 0x4c4   : > { %v18975_v3 = vadd.f32 %v9190_v7, %v18767_v10  ;;  %19800 = vst [vmem:[#allocation35_spill] sm:$0xff] %v18977_v9 }
 0x4c5   : > { %v13445_v12 = vpop.f32.mrf.mxu0  ;;  %v18982_v37 = vpop.f32.mrf.mxu1 }
 0x4c6   : > { %v18980_v27 = vadd.f32 %v13445_v12, %v18773_v57  ;;  %19801 = vst [vmem:[#allocation38_spill] sm:$0xff] %v18982_v37 }
 0x4c7   : > { %v9193_v32 = vpop.f32.mrf.mxu0  ;;  %v18987_v63 = vpop.f32.mrf.mxu1 }
 0x4c8   : > { %v18985_v44 = vadd.f32 %v9193_v32, %v18776_v29  ;;  %19802 = vst [vmem:[#allocation42_spill] sm:$0xff] %v18987_v63 }
 0x4c9   : > { %v13448_v26 = vpop.f32.mrf.mxu0  ;;  %v18992_v10 = vpop.f32.mrf.mxu1 }
 0x4ca   : > { %v18990_v54 = vadd.f32 %v13448_v26, %v18779_v5  ;;  %19803 = vst [vmem:[#allocation43_spill] sm:$0xff] %v18992_v10 }
 0x4cb   : > { %v9206_v52 = vpop.f32.mrf.mxu0  ;;  %v18997_v57 = vpop.f32.mrf.mxu1 }
 0x4cc   : > { %v18995_v31 = vadd.f32 %v9206_v52, %v18782_v51  ;;  %19804 = vst [vmem:[#allocation50_spill] sm:$0xff] %v18997_v57 }
 0x4cd   : > { %v13449_v53 = vpop.f32.mrf.mxu0  ;;  %v19002_v29 = vpop.f32.mrf.mxu1 }
 0x4ce   : > { %v19000_v34 = vadd.f32 %v13449_v53, %v18785_v33  ;;  %19805 = vst [vmem:[#allocation44_spill] sm:$0xff] %v19002_v29 }
 0x4cf   : > { %v9209_v42 = vpop.f32.mrf.mxu0  ;;  %v19007_v5 = vpop.f32.mrf.mxu1 }
 0x4d0   : > { %v19005_v14 = vadd.f32 %v9209_v42, %v18795_v43  ;;  %19806 = vst [vmem:[#allocation45_spill] sm:$0xff] %v19007_v5 }
 0x4d1   : > { %v13452_v7 = vpop.f32.mrf.mxu0  ;;  %v19012_v51 = vpop.f32.mrf.mxu1 }
 0x4d2   : > { %v19010_v12 = vadd.f32 %v13452_v7, %v18802_v19  ;;  %19807 = vst [vmem:[#allocation48_spill] sm:$0xff] %v19012_v51 }
 0x4d3   : > { %v9222_v32 = vpop.f32.mrf.mxu0  ;;  %v19017_v52 = vpop.f32.mrf.mxu1 }
 0x4d4   : > { %v19015_v26 = vadd.f32 %v9222_v32, %v18809_v28  ;;  %19808 = vst [vmem:[#allocation49_spill] sm:$0xff] %v19017_v52 }
 0x4d5   : > { %v13453_v33 = vpop.f32.mrf.mxu0  ;;  %v19025_v29 = vpop.f32.mrf.mxu1 }
 0x4d6   : > { %v19020_v53 = vadd.f32 %v13453_v33, %v18815_v48  ;;  %19811 = vst [vmem:[#allocation56_spill] sm:$0xff] %v19025_v29 }
 0x4d7   : > { %v9225_v43 = vpop.f32.mrf.mxu0  ;;  %v19033_v51 = vpop.f32.mrf.mxu1 }
 0x4d8   : > { %19809 = vst [vmem:[#allocation52_spill] sm:$0xff] %v19020_v53  ;;  %v19023_v42 = vadd.f32 %v9225_v43, %v18825_v24  ;;  %19814 = vst [vmem:[#allocation55_spill] sm:$0xff] %v19033_v51 }
 0x4d9   : > { %v13456_v5 = vpop.f32.mrf.mxu0  ;;  %v19041_v52 = vpop.f32.mrf.mxu1 }
 0x4da   : > { %19810 = vst [vmem:[#allocation53_spill] sm:$0xff] %v19023_v42  ;;  %v19028_v19 = vadd.f32 %v13456_v5, %v18836_v11  ;;  %19817 = vst [vmem:[#allocation59_spill] sm:$0xff] %v19041_v52 }
 0x4db   : > { %v9238_v7 = vpop.f32.mrf.mxu0  ;;  %v19049_v29 = vpop.f32.mrf.mxu1 }
 0x4dc   : > { %19812 = vst [vmem:[#allocation54_spill] sm:$0xff] %v19028_v19  ;;  %v19031_v28 = vadd.f32 %v9238_v7, %v18845_v49  ;;  %19820 = vst [vmem:[#allocation64_spill] sm:$0xff] %v19049_v29 }
 0x4dd   : > { %v13457_v32 = vpop.f32.mrf.mxu0 }
 0x4de   : > { %19813 = vst [vmem:[#allocation58_spill] sm:$0xff] %v19031_v28  ;;  %v19036_v48 = vadd.f32 %v13457_v32, %v18853_v25 }
 0x4df   : > { %v9241_v33 = vpop.f32.mrf.mxu0 }
 0x4e0   : > { %19815 = vst [vmem:[#allocation57_spill] sm:$0xff] %v19036_v48  ;;  %v19039_v24 = vadd.f32 %v9241_v33, %v18863_v38  ;;  %v19057_v33 = vpop.f32.mrf.mxu1 }
 0x4e1   : > { %v13460_v43 = vpop.f32.mrf.mxu0  ;;  %19823 = vst [vmem:[#allocation9_spill] sm:$0xff] %v19057_v33 }
 0x4e2   : > { %19816 = vst [vmem:[#allocation60_spill] sm:$0xff] %v19039_v24  ;;  %v19044_v11 = vadd.f32 %v13460_v43, %v18870_v21 }
 0x4e3   : > { %v9254_v5 = vpop.f32.mrf.mxu0 }
 0x4e4   : > { %19818 = vst [vmem:[#allocation62_spill] sm:$0xff] %v19044_v11  ;;  %v19047_v49 = vadd.f32 %v9254_v5, %v18878_v50  ;;  %v19065_v5 = vpop.f32.mrf.mxu1 }
 0x4e5   : > { %v13461_v7 = vpop.f32.mrf.mxu0  ;;  %19826 = vst [vmem:[#allocation10_spill] sm:$0xff] %v19065_v5 }
 0x4e6   : > { %19819 = vst [vmem:[#allocation61_spill] sm:$0xff] %v19047_v49  ;;  %v19052_v25 = vadd.f32 %v13461_v7, %v18887_v6 }
 0x4e7   : > { %v9257_v32 = vpop.f32.mrf.mxu0 }
 0x4e8   : > { %19821 = vst [vmem:[#allocation63_spill] sm:$0xff] %v19052_v25  ;;  %v19055_v38 = vadd.f32 %v9257_v32, %v18897_v20  ;;  %v19073_v32 = vpop.f32.mrf.mxu1 }
 0x4e9   : > { %v13464_v52 = vpop.f32.mrf.mxu0  ;;  %19829 = vst [vmem:[#allocation31_spill] sm:$0xff] %v19073_v32 }
 0x4ea   : > { %19822 = vst [vmem:[#allocation65_spill] sm:$0xff] %v19055_v38  ;;  %v19060_v21 = vadd.f32 %v13464_v52, %v18908_v15  ;;  %v19078_v51 = vpop.f32.mrf.mxu1 }
 0x4eb   : > { %v9270_v43 = vpop.f32.mrf.mxu0  ;;  %19831 = vst [vmem:[#allocation34_spill] sm:$0xff] %v19078_v51 }
 0x4ec   : > { %19824 = vst [vmem:[#allocation7_spill] sm:$0xff] %v19060_v21  ;;  %v19063_v50 = vadd.f32 %v9270_v43, %v18914_v58 }
 0x4ed   : > { %v13465_v29 = vpop.f32.mrf.mxu0 }
 0x4ee   : > { %19825 = vst [vmem:[#allocation8_spill] sm:$0xff] %v19063_v50  ;;  %v19068_v6 = vadd.f32 %v13465_v29, %v18920_v46  ;;  %v13548_v5 = vpop.f32.mrf.mxu1 }
 0x4ef   : > { %v9273_v7 = vpop.f32.mrf.mxu0 }
 0x4f0   : > { %19827 = vst [vmem:[#allocation23_spill] sm:$0xff] %v19068_v6  ;;  %v19071_v20 = vadd.f32 %v9273_v7, %v18927_v60 }
 0x4f1   : > { %v13468_v33 = vpop.f32.mrf.mxu0 }
 0x4f2   : > { %19828 = vst [vmem:[#allocation39_spill] sm:$0xff] %v19071_v20  ;;  %v19076_v15 = vadd.f32 %v13468_v33, %v18933_v39  ;;  %v10762_v20 = vpop.f32.mrf.mxu1 }
 0x4f3   : > { %v9286_v52 = vpop.f32.mrf.mxu0 }
 0x4f4   : > { %19830 = vst [vmem:[#allocation20_spill] sm:$0xff] %v19076_v15  ;;  %v19081_v58 = vadd.f32 %v9286_v52, %v18939_v0  ;;  %v19089_v15 = vpop.f32.mrf.mxu1 }
 0x4f5   : > { %v13469_v43 = vpop.f32.mrf.mxu0 }
 0x4f6   : > { %19832 = vst [vmem:[#allocation16_spill] sm:$0xff] %v19081_v58  ;;  %v19084_v46 = vadd.f32 %v13469_v43, %v18945_v22  ;;  %v19093_v0 = vpop.f32.mrf.mxu1 }
 0x4f7   : > { %v9289_v29 = vpop.f32.mrf.mxu0 }
 0x4f8   : > { %19833 = vst [vmem:[#allocation33_spill] sm:$0xff] %v19084_v46  ;;  %v19087_v60 = vadd.f32 %v9289_v29, %v18952_v59 }
 0x4f9   : > { %v13512_v7 = vpop.f32.mrf.mxu0 }
 0x4fa   : > { %19834 = vst [vmem:[#allocation29_spill] sm:$0xff] %v19087_v60 }
 0x4fb   : > { %v10025_v32 = vpop.f32.mrf.mxu0  ;;  %v19099_v43 = vpop.f32.mrf.mxu1 }
 0x4fd   : > { %v13513_v39 = vpop.f32.mrf.mxu0  ;;  %v19105_v60 = vpop.f32.mrf.mxu1 }
 0x4ff   : > { %v10028_v33 = vpop.f32.mrf.mxu0  ;;  %v19111_v50 = vpop.f32.mrf.mxu1 }
 0x501   : > { %v13516_v51 = vpop.f32.mrf.mxu0  ;;  %v19117_v25 = vpop.f32.mrf.mxu1 }
 0x503   : > { %v19091_v6 = vpop.f32.mrf.mxu0  ;;  %v19123_v57 = vpop.f32.mrf.mxu1 }
 0x505   : > { %v19095_v52 = vpop.f32.mrf.mxu0  ;;  %v19129_v48 = vpop.f32.mrf.mxu1 }
 0x507   : > { %v19097_v22 = vpop.f32.mrf.mxu0  ;;  %v19135_v37 = vpop.f32.mrf.mxu1 }
 0x509   : > { %v19101_v59 = vpop.f32.mrf.mxu0  ;;  %v19141_v42 = vpop.f32.mrf.mxu1 }
 0x50b   : > { %v19103_v29 = vpop.f32.mrf.mxu0 }
 0x50d   : > { %v19107_v46 = vpop.f32.mrf.mxu0 }
 0x50f   : > { %v19109_v58 = vpop.f32.mrf.mxu0 }
 0x511   : > { %v19113_v21 = vpop.f32.mrf.mxu0 }
 0x513   : > { %v19115_v38 = vpop.f32.mrf.mxu0 }
 0x515   : > { %v19119_v49 = vpop.f32.mrf.mxu0 }
 0x516   : > { %19835 = vst [vmem:[#allocation21_spill] sm:$0xff] %v19119_v49 }
 0x517   : > { %v19121_v11 = vpop.f32.mrf.mxu0 }
 0x518   : > { %19836 = vst [vmem:[#allocation37_spill] sm:$0xff] %v19121_v11 }
 0x519   : > { %v19125_v24 = vpop.f32.mrf.mxu0 }
 0x51a   : > { %19837 = vst [vmem:[#allocation19_spill] sm:$0xff] %v19125_v24  ;;  %v19147_v24 = vpop.f32.mrf.mxu1 }
 0x51b   : > { %v19127_v10 = vpop.f32.mrf.mxu0  ;;  %19845 = vst [vmem:[#allocation14_spill] sm:$0xff] %v19147_v24 }
 0x51c   : > { %19838 = vst [vmem:[#allocation36_spill] sm:$0xff] %v19127_v10 }
 0x51d   : > { %v19131_v63 = vpop.f32.mrf.mxu0 }
 0x51e   : > { %19839 = vst [vmem:[#allocation40_spill] sm:$0xff] %v19131_v63  ;;  %v19153_v63 = vpop.f32.mrf.mxu1 }
 0x51f   : > { %v19133_v28 = vpop.f32.mrf.mxu0  ;;  %19848 = vst [vmem:[#allocation46_spill] sm:$0xff] %v19153_v63 }
 0x520   : > { %19840 = vst [vmem:[#allocation24_spill] sm:$0xff] %v19133_v28 }
 0x521   : > { %v19137_v19 = vpop.f32.mrf.mxu0 }
 0x522   : > { %19841 = vst [vmem:[#allocation11_spill] sm:$0xff] %v19137_v19  ;;  %v19159_v19 = vpop.f32.mrf.mxu1 }
 0x523   : > { %v19139_v9 = vpop.f32.mrf.mxu0  ;;  %19851 = vst [vmem:[#allocation26_spill] sm:$0xff] %v19159_v19 }
 0x524   : > { %19842 = vst [vmem:[#allocation12_spill] sm:$0xff] %v19139_v9 }
 0x525   : > { %v19143_v11 = vpop.f32.mrf.mxu0 }
 0x526   : > { %19843 = vst [vmem:[#allocation13_spill] sm:$0xff] %v19143_v11 }
 0x527   : > { %v19145_v49 = vpop.f32.mrf.mxu0 }
 0x528   : > { %19844 = vst [vmem:[#allocation18_spill] sm:$0xff] %v19145_v49  ;;  %v9784_v49 = vadd.f32 %v18875_v16, %v18948_v62  ;;  %v9783_v16 = vadd.f32 %v18905_v56, %v18965_v18  ;;  %v9786_v56 = vadd.f32 %v18917_v23, %v18975_v3  ;;  %v19194_v18 = vld [vmem:[%s19507_s7] ss:$0 sm:$0xff]  ;;  %v9789_v23 = vadd.f32 %v18924_v1, %v18980_v27 }
 0x529   : > { %v19149_v10 = vpop.f32.mrf.mxu0 }
 0x52a   : > { %19846 = vst [vmem:[#allocation25_spill] sm:$0xff] %v19149_v10  ;;  %v10154_v24 = vadd.f32 %v13512_v7, %v9784_v49  ;;  %v19169_v10 = vpop.f32.mrf.mxu1 }
 0x52b   : > { %v19151_v36 = vpop.f32.mrf.mxu0 }
 0x52c   : > { %19847 = vst [vmem:[#allocation15_spill] sm:$0xff] %v19151_v36  ;;  %v9782_v36 = vadd.f32 %v18884_v40, %v18955_v2  ;;  %v19179_v62 = vpop.f32.mrf.mxu1  ;;  %v10891_v49 = vadd.f32 %v13548_v5, %v10154_v24  ;;  %v9788_v40 = vadd.f32 %v18911_v8, %v18970_v13 }
 0x52d   : > { %v19155_v28 = vpop.f32.mrf.mxu0 }
 0x52e   : > { %19849 = vst [vmem:[#allocation17_spill] sm:$0xff] %v19155_v28  ;;  %v10152_v28 = vadd.f32 %v10025_v32, %v9782_v36  ;;  %v19187_v36 = vld [vmem:[%s19506_s6] ss:$0 sm:$0xff]  ;;  %v10158_v32 = vadd.f32 %v13516_v51, %v9788_v40  ;;  %v19196_v13 = vpop.f32.mrf.mxu1  ;;  %v10156_v51 = vadd.f32 %v19091_v6, %v9786_v56 }
 0x52f   : > { %v19157_v53 = vpop.f32.mrf.mxu0 }
 0x530   : > { %19850 = vst [vmem:[#allocation47_spill] sm:$0xff] %v19157_v53  ;;  %v9785_v53 = vadd.f32 %v18894_v47, %v18960_v41  ;;  %v10153_v47 = vadd.f32 %v10028_v33, %v9783_v16  ;;  %v10159_v16 = vadd.f32 %v19095_v52, %v9789_v23  ;;  %v19212_v6 = vpop.f32.mrf.mxu1 }
 0x531   : > { %v19161_v9 = vpop.f32.mrf.mxu0 }
 0x532   : > { %19852 = vst [vmem:[#allocation51_spill] sm:$0xff] %v19161_v9  ;;  %v10155_v9 = vadd.f32 %v13513_v39, %v9785_v53  ;;  %v10889_v53 = vadd.f32 %v10762_v20, %v10152_v28  ;;  %v10890_v33 = vadd.f32 %v19093_v0, %v10153_v47  ;;  %v9792_v0 = vadd.f32 %v18936_v55, %v18990_v54 }
 0x533   : > { %v19165_v11 = vpop.f32.mrf.mxu0  ;;  %v10893_v47 = vadd.f32 %v19105_v60, %v10156_v51  ;;  %v9790_v55 = vadd.f32 %v18942_v45, %v18995_v31  ;;  %v10896_v60 = vadd.f32 %v19111_v50, %v10159_v16 }
 0x534   : > { %v10892_v7 = vadd.f32 %v19089_v15, %v10155_v9  ;;  %v10895_v9 = vadd.f32 %v19099_v43, %v10158_v32  ;;  %v19230_v32 = vpop.f32.mrf.mxu1 }
 0x535   : > { %v19171_v63 = vpop.f32.mrf.mxu0 }
 0x537   : > { %v19175_v19 = vpop.f32.mrf.mxu0 }
 0x539   : > { %v13584_v2 = vpop.f32.mrf.mxu0 }
 0x53a   : > { %v11372_v41 = vadd.f32 %v13584_v2, %v10891_v49  ;;  %v9787_v49 = vadd.f32 %v18930_v17, %v18985_v44 }
 0x53b   : > { %v11243_v8 = vpop.f32.mrf.mxu0 }
 0x53c   : > { %v11411_v24 = vmul.f32 %v19187_v36, %v11372_v41  ;;  %v11370_v5 = vadd.f32 %v11243_v8, %v10889_v53  ;;  %v10157_v41 = vadd.f32 %v19097_v22, %v9787_v49  ;;  %v10162_v22 = vadd.f32 %v19101_v59, %v9792_v0 }
 0x53d   : > { %v13585_v3 = vpop.f32.mrf.mxu0  ;;  %v9793_v59 = vadd.f32 %v18950_v35, %v19000_v34  ;;  %v19248_v34 = vpop.f32.mrf.mxu1 }
 0x53e   : > { %v11450_v28 = vadd.f32 %v19194_v18, %v11411_v24  ;;  %v11409_v20 = vmul.f32 %v19187_v36, %v11370_v5  ;;  %v11373_v39 = vadd.f32 %v13585_v3, %v10892_v7  ;;  %v10160_v7 = vadd.f32 %v19103_v29, %v9790_v55 }
 0x53f   : > { %v11246_v40 = vpop.f32.mrf.mxu0  ;;  %v10894_v31 = vadd.f32 %v19117_v25, %v10157_v41  ;;  %v9791_v29 = vadd.f32 %v18957_v4, %v19005_v14  ;;  %v10899_v35 = vadd.f32 %v19123_v57, %v10162_v22  ;;  %v19855_v22 = vld [vmem:[#allocation21_spill] sm:$0xff] }
 0x540   : > { %v11482_v15 = vmax.f32 %v11450_v28, 0.0  ;;  %v11448_v1 = vadd.f32 %v19194_v18, %v11409_v20  ;;  %v11412_v27 = vmul.f32 %v19187_v36, %v11373_v39  ;;  %v11371_v2 = vadd.f32 %v11246_v40, %v10890_v33 }
 0x541   : > { %v13588_v52 = vpop.f32.mrf.mxu0  ;;  %v10163_v28 = vadd.f32 %v19107_v46, %v9793_v59  ;;  %v10161_v49 = vadd.f32 %v19109_v58, %v9791_v29  ;;  %v9796_v46 = vadd.f32 %v18962_v30, %v19010_v12  ;;  %v10897_v14 = vadd.f32 %v19129_v48, %v10160_v7  ;;  %v19266_v12 = vpop.f32.mrf.mxu1  ;;  %v19862_v29 = vld [vmem:[#allocation46_spill] sm:$0xff] }
 0x542   : > { %11514 = vst.msk [vmem:[%s19220_s24 + $0x10] sm:$0xff] %vm7251_vm0, %v11482_v15  ;;  %v11480_v17 = vmax.f32 %v11448_v1, 0.0  ;;  %v11451_v44 = vadd.f32 %v19194_v18, %v11412_v27  ;;  %v11410_v43 = vmul.f32 %v19187_v36, %v11371_v2  ;;  %v11376_v53 = vadd.f32 %v13588_v52, %v10895_v9 }
 0x543   : > { %v11259_v54 = vpop.f32.mrf.mxu0  ;;  %v10166_v1 = vadd.f32 %v19113_v21, %v9796_v46  ;;  %v9794_v58 = vadd.f32 %v18967_v61, %v19015_v26  ;;  %v10900_v30 = vadd.f32 %v19135_v37, %v10163_v28  ;;  %v19853_v21 = vld [vmem:[#allocation52_spill] sm:$0xff]  ;;  %v10898_v26 = vadd.f32 %v19141_v42, %v10161_v49  ;;  %v19864_v46 = vld [vmem:[#allocation58_spill] sm:$0xff] }
 0x544   : > { %11512 = vst.msk [vmem:[%s19220_s24] sm:$0xff] %vm7251_vm0, %v11480_v17  ;;  %v11483_v56 = vmax.f32 %v11451_v44, 0.0  ;;  %v11449_v8 = vadd.f32 %v19194_v18, %v11410_v43  ;;  %v11415_v24 = vmul.f32 %v19187_v36, %v11376_v53  ;;  %v11374_v5 = vadd.f32 %v11259_v54, %v10893_v47  ;;  %v19854_v47 = vld [vmem:[#allocation32_spill] sm:$0xff]  ;;  %v19856_v54 = vld [vmem:[#allocation53_spill] sm:$0xff] }
 0x545   : > { %v13589_v45 = vpop.f32.mrf.mxu0  ;;  %v10164_v52 = vadd.f32 %v19115_v38, %v9794_v58  ;;  %v9797_v17 = vadd.f32 %v19854_v47, %v19853_v21 }
 0x546   : > { %11515 = vst.msk [vmem:[%s19220_s24 + $0x18] sm:$0xff] %vm7251_vm0, %v11483_v56  ;;  %v11481_v50 = vmax.f32 %v11449_v8, 0.0  ;;  %v11454_v51 = vadd.f32 %v19194_v18, %v11415_v24  ;;  %v11413_v23 = vmul.f32 %v19187_v36, %v11374_v5  ;;  %v11377_v3 = vadd.f32 %v13589_v45, %v10896_v60  ;;  %v19857_v60 = vld [vmem:[#allocation35_spill] sm:$0xff]  ;;  %v19858_v8 = vld [vmem:[#allocation14_spill] sm:$0xff]  ;;  %v19284_v5 = vpop.f32.mrf.mxu1 }
 0x547   : > { %v11262_v20 = vpop.f32.mrf.mxu0  ;;  %v10167_v55 = vadd.f32 %v19855_v22, %v9797_v17  ;;  %v9795_v38 = vadd.f32 %v19857_v60, %v19856_v54  ;;  %v10903_v24 = vadd.f32 %v19858_v8, %v10166_v1  ;;  %v19872_v22 = vld [vmem:[#allocation50_spill] sm:$0xff] }
 0x548   : > { %11513 = vst.msk [vmem:[%s19220_s24 + $0x8] sm:$0xff] %vm7251_vm0, %v11481_v50  ;;  %v11486_v25 = vmax.f32 %v11454_v51, 0.0  ;;  %v11452_v39 = vadd.f32 %v19194_v18, %v11413_v23  ;;  %v11416_v33 = vmul.f32 %v19187_v36, %v11377_v3  ;;  %v11375_v16 = vadd.f32 %v11262_v20, %v10894_v31  ;;  %v19859_v31 = vld [vmem:[#allocation37_spill] sm:$0xff]  ;;  %v19860_v51 = vld [vmem:[#allocation54_spill] sm:$0xff] }
 0x549   : > { %v13592_v4 = vpop.f32.mrf.mxu0  ;;  %v10165_v50 = vadd.f32 %v19859_v31, %v9795_v38  ;;  %v19861_v23 = vld [vmem:[#allocation38_spill] sm:$0xff]  ;;  %v10901_v20 = vadd.f32 %v19862_v29, %v10164_v52  ;;  %v19876_v29 = vld [vmem:[#allocation11_spill] sm:$0xff] }
 0x54a   : > { %11518 = vst.msk [vmem:[%s19220_s24 + $0x30] sm:$0xff] %vm7251_vm0, %v11486_v25  ;;  %v11484_v57 = vmax.f32 %v11452_v39, 0.0  ;;  %v11455_v40 = vadd.f32 %v19194_v18, %v11416_v33  ;;  %v11414_v9 = vmul.f32 %v19187_v36, %v11375_v16  ;;  %v11380_v15 = vadd.f32 %v13592_v4, %v10899_v35  ;;  %v19863_v16 = vld [vmem:[#allocation19_spill] sm:$0xff]  ;;  %v19865_v4 = vld [vmem:[#allocation42_spill] sm:$0xff] }
 0x54b   : > { %v11275_v27 = vpop.f32.mrf.mxu0  ;;  %v9800_v3 = vadd.f32 %v19861_v23, %v19860_v51  ;;  %v10902_v47 = vadd.f32 %v19169_v10, %v10165_v50 }
 0x54c   : > { %11516 = vst.msk [vmem:[%s19220_s24 + $0x20] sm:$0xff] %vm7251_vm0, %v11484_v57  ;;  %v11487_v48 = vmax.f32 %v11455_v40, 0.0  ;;  %v11453_v2 = vadd.f32 %v19194_v18, %v11414_v9  ;;  %v11419_v41 = vmul.f32 %v19187_v36, %v11380_v15  ;;  %v11378_v0 = vadd.f32 %v11275_v27, %v10897_v14  ;;  %v19866_v40 = vld [vmem:[#allocation26_spill] sm:$0xff]  ;;  %v19302_v15 = vpop.f32.mrf.mxu1 }
 0x54d   : > { %v13593_v61 = vpop.f32.mrf.mxu0  ;;  %v10170_v49 = vadd.f32 %v19863_v16, %v9800_v3  ;;  %v9798_v14 = vadd.f32 %v19865_v4, %v19864_v46  ;;  %v10904_v9 = vadd.f32 %v19866_v40, %v10167_v55 }
 0x54e   : > { %11519 = vst.msk [vmem:[%s19220_s24 + $0x38] sm:$0xff] %vm7251_vm0, %v11487_v48  ;;  %v11485_v37 = vmax.f32 %v11453_v2, 0.0  ;;  %v11458_v44 = vadd.f32 %v19194_v18, %v11419_v41  ;;  %v11417_v43 = vmul.f32 %v19187_v36, %v11378_v0  ;;  %v11381_v53 = vadd.f32 %v13593_v61, %v10900_v30  ;;  %v19867_v48 = vld [vmem:[#allocation36_spill] sm:$0xff]  ;;  %v19868_v41 = vld [vmem:[#allocation57_spill] sm:$0xff]  ;;  %v19869_v0 = vld [vmem:[#allocation43_spill] sm:$0xff]  ;;  %v19320_v38 = vpop.f32.mrf.mxu1 }
 0x54f   : > { %v11278_v56 = vpop.f32.mrf.mxu0  ;;  %v10168_v2 = vadd.f32 %v19867_v48, %v9798_v14  ;;  %v9801_v52 = vadd.f32 %v19869_v0, %v19868_v41  ;;  %v10907_v60 = vadd.f32 %v19179_v62, %v10170_v49  ;;  %v19882_v0 = vld [vmem:[#allocation13_spill] sm:$0xff] }
 0x550   : > { %11517 = vst.msk [vmem:[%s19220_s24 + $0x28] sm:$0xff] %vm7251_vm0, %v11485_v37  ;;  %v11490_v42 = vmax.f32 %v11458_v44, 0.0  ;;  %v11456_v7 = vadd.f32 %v19194_v18, %v11417_v43  ;;  %v11420_v59 = vmul.f32 %v19187_v36, %v11381_v53  ;;  %v11379_v45 = vadd.f32 %v11278_v56, %v10898_v26  ;;  %v19870_v44 = vld [vmem:[#allocation40_spill] sm:$0xff]  ;;  %v19338_v49 = vpop.f32.mrf.mxu1 }
 0x551   : > { %v13596_v28 = vpop.f32.mrf.mxu0  ;;  %v10171_v43 = vadd.f32 %v19870_v44, %v9801_v52  ;;  %v19871_v53 = vld [vmem:[#allocation60_spill] sm:$0xff]  ;;  %v10905_v51 = vadd.f32 %v19196_v13, %v10168_v2 }
 0x552   : > { %11522 = vst.msk [vmem:[%s19220_s24 + $0x50] sm:$0xff] %vm7251_vm0, %v11490_v42  ;;  %v11488_v35 = vmax.f32 %v11456_v7, 0.0  ;;  %v11459_v25 = vadd.f32 %v19194_v18, %v11420_v59  ;;  %v11418_v39 = vmul.f32 %v19187_v36, %v11379_v45  ;;  %v11384_v33 = vadd.f32 %v13596_v28, %v10903_v24  ;;  %v19873_v42 = vld [vmem:[#allocation24_spill] sm:$0xff]  ;;  %v19874_v59 = vld [vmem:[#allocation62_spill] sm:$0xff] }
 0x553   : > { %v11291_v57 = vpop.f32.mrf.mxu0  ;;  %v9799_v55 = vadd.f32 %v19872_v22, %v19871_v53  ;;  %v19875_v45 = vld [vmem:[#allocation44_spill] sm:$0xff]  ;;  %v10908_v16 = vadd.f32 %v19212_v6, %v10171_v43  ;;  %v19885_v22 = vld [vmem:[#allocation18_spill] sm:$0xff] }
 0x554   : > { %11520 = vst.msk [vmem:[%s19220_s24 + $0x40] sm:$0xff] %vm7251_vm0, %v11488_v35  ;;  %v11491_v1 = vmax.f32 %v11459_v25, 0.0  ;;  %v11457_v58 = vadd.f32 %v19194_v18, %v11418_v39  ;;  %v11423_v27 = vmul.f32 %v19187_v36, %v11384_v33  ;;  %v11382_v30 = vadd.f32 %v11291_v57, %v10901_v20  ;;  %v19877_v35 = vld [vmem:[#allocation61_spill] sm:$0xff]  ;;  %v19879_v57 = vld [vmem:[#allocation12_spill] sm:$0xff] }
 0x555   : > { %v13597_v21 = vpop.f32.mrf.mxu0  ;;  %v10169_v7 = vadd.f32 %v19873_v42, %v9799_v55  ;;  %v9804_v31 = vadd.f32 %v19875_v45, %v19874_v59  ;;  %v19878_v25 = vld [vmem:[#allocation45_spill] sm:$0xff] }
 0x556   : > { %11523 = vst.msk [vmem:[%s19220_s24 + $0x58] sm:$0xff] %vm7251_vm0, %v11491_v1  ;;  %v11489_v17 = vmax.f32 %v11457_v58, 0.0  ;;  %v11462_v61 = vadd.f32 %v19194_v18, %v11423_v27  ;;  %v11421_v26 = vmul.f32 %v19187_v36, %v11382_v30  ;;  %v11385_v37 = vadd.f32 %v13597_v21, %v10904_v9  ;;  %v19880_v9 = vld [vmem:[#allocation63_spill] sm:$0xff]  ;;  %v19881_v1 = vld [vmem:[#allocation48_spill] sm:$0xff]  ;;  %v19883_v21 = vld [vmem:[#allocation65_spill] sm:$0xff] }
 0x557   : > { %v11294_v54 = vpop.f32.mrf.mxu0  ;;  %v10174_v20 = vadd.f32 %v19876_v29, %v9804_v31  ;;  %v9802_v39 = vadd.f32 %v19878_v25, %v19877_v35  ;;  %v9805_v58 = vadd.f32 %v19881_v1, %v19880_v9  ;;  %v10906_v30 = vadd.f32 %v19230_v32, %v10169_v7  ;;  %v19888_v59 = vld [vmem:[#allocation25_spill] sm:$0xff]  ;;  %v19889_v31 = vld [vmem:[#allocation8_spill] sm:$0xff]  ;;  %v19891_v35 = vld [vmem:[#allocation15_spill] sm:$0xff] }
 0x558   : > { %11521 = vst.msk [vmem:[%s19220_s24 + $0x48] sm:$0xff] %vm7251_vm0, %v11489_v17  ;;  %v11494_v10 = vmax.f32 %v11462_v61, 0.0  ;;  %v11460_v56 = vadd.f32 %v19194_v18, %v11421_v26  ;;  %v11424_v8 = vmul.f32 %v19187_v36, %v11385_v37  ;;  %v11383_v24 = vadd.f32 %v11294_v54, %v10902_v47  ;;  %v19884_v47 = vld [vmem:[#allocation49_spill] sm:$0xff]  ;;  %v13573_v37 = vpop.f32.mrf.mxu1  ;;  %v19886_v54 = vld [vmem:[#allocation7_spill] sm:$0xff] }
 0x559   : > { %v13600_v50 = vpop.f32.mrf.mxu0  ;;  %v10172_v40 = vadd.f32 %v19879_v57, %v9802_v39  ;;  %v10175_v52 = vadd.f32 %v19882_v0, %v9805_v58  ;;  %v9803_v17 = vadd.f32 %v19884_v47, %v19883_v21  ;;  %v10911_v26 = vadd.f32 %v19248_v34, %v10174_v20  ;;  %v19892_v39 = vld [vmem:[#allocation23_spill] sm:$0xff]  ;;  %v19894_v9 = vld [vmem:[#allocation17_spill] sm:$0xff]  ;;  %v19898_v47 = vld [vmem:[#allocation20_spill] sm:$0xff] }
 0x55a   : > { %11526 = vst.msk [vmem:[%s19220_s24 + $0x70] sm:$0xff] %vm7251_vm0, %v11494_v10  ;;  %v11492_v62 = vmax.f32 %v11460_v56, 0.0  ;;  %v11463_v23 = vadd.f32 %v19194_v18, %v11424_v8  ;;  %v11422_v3 = vmul.f32 %v19187_v36, %v11383_v24  ;;  %v11388_v28 = vadd.f32 %v13600_v50, %v10907_v60  ;;  %v19887_v60 = vld [vmem:[#allocation56_spill] sm:$0xff]  ;;  %v19890_v50 = vld [vmem:[#allocation55_spill] sm:$0xff] }
 0x55b   : > { %v11307_v33 = vpop.f32.mrf.mxu0  ;;  %v10173_v55 = vadd.f32 %v19885_v22, %v9803_v17  ;;  %v9808_v10 = vadd.f32 %v19887_v60, %v19886_v54  ;;  %v10909_v8 = vadd.f32 %v19266_v12, %v10172_v40  ;;  %v19895_v58 = vld [vmem:[#allocation39_spill] sm:$0xff]  ;;  %v19899_v17 = vld [vmem:[#allocation9_spill] sm:$0xff]  ;;  %v19901_v60 = vld [vmem:[#allocation16_spill] sm:$0xff] }
 0x55c   : > { %11524 = vst.msk [vmem:[%s19220_s24 + $0x60] sm:$0xff] %vm7251_vm0, %v11492_v62  ;;  %v11495_v13 = vmax.f32 %v11463_v23, 0.0  ;;  %v11461_v46 = vadd.f32 %v19194_v18, %v11422_v3  ;;  %v11427_v4 = vmul.f32 %v19187_v36, %v11388_v28  ;;  %v11386_v14 = vadd.f32 %v11307_v33, %v10905_v51  ;;  %v10861_v3 = vpop.f32.mrf.mxu1  ;;  %v19893_v33 = vld [vmem:[#allocation59_spill] sm:$0xff] }
 0x55d   : > { %v13601_v27 = vpop.f32.mrf.mxu0  ;;  %v10178_v45 = vadd.f32 %v19888_v59, %v9808_v10  ;;  %v9806_v51 = vadd.f32 %v19890_v50, %v19889_v31  ;;  %v10912_v23 = vadd.f32 %v19284_v5, %v10175_v52  ;;  %v19897_v52 = vld [vmem:[#allocation47_spill] sm:$0xff]  ;;  %v19902_v10 = vld [vmem:[#allocation10_spill] sm:$0xff] }
 0x55e   : > { %11527 = vst.msk [vmem:[%s19220_s24 + $0x78] sm:$0xff] %vm7251_vm0, %v11495_v13  ;;  %v11493_v6 = vmax.f32 %v11461_v46, 0.0  ;;  %v11466_v48 = vadd.f32 %v19194_v18, %v11427_v4  ;;  %v11425_v2 = vmul.f32 %v19187_v36, %v11386_v14  ;;  %v11389_v41 = vadd.f32 %v13601_v27, %v10908_v16  ;;  %v13576_v4 = vpop.f32.mrf.mxu1  ;;  %v19896_v27 = vld [vmem:[#allocation64_spill] sm:$0xff]  ;;  %v19904_v31 = vld [vmem:[#allocation31_spill] sm:$0xff] }
 0x55f   : > { %v11310_v61 = vpop.f32.mrf.mxu0  ;;  %v10176_v25 = vadd.f32 %v19891_v35, %v9806_v51  ;;  %v9809_v16 = vadd.f32 %v19893_v33, %v19892_v39  ;;  %v10910_v46 = vadd.f32 %v19302_v15, %v10173_v55  ;;  %v19900_v55 = vld [vmem:[#allocation51_spill] sm:$0xff] }
 0x560   : > { %11525 = vst.msk [vmem:[%s19220_s24 + $0x68] sm:$0xff] %vm7251_vm0, %v11493_v6  ;;  %v11498_v32 = vmax.f32 %v11466_v48, 0.0  ;;  %v11464_v44 = vadd.f32 %v19194_v18, %v11425_v2  ;;  %v11428_v43 = vmul.f32 %v19187_v36, %v11389_v41  ;;  %v11387_v53 = vadd.f32 %v11310_v61, %v10906_v30 }
 0x561   : > { %v13604_v56 = vpop.f32.mrf.mxu0  ;;  %v10179_v1 = vadd.f32 %v19894_v9, %v9809_v16  ;;  %v9807_v30 = vadd.f32 %v19896_v27, %v19895_v58  ;;  %v10915_v48 = vadd.f32 %v19320_v38, %v10178_v45  ;;  %v9812_v61 = vadd.f32 %v19899_v17, %v19898_v47  ;;  %v19903_v45 = vld [vmem:[#allocation33_spill] sm:$0xff] }
 0x562   : > { %11530 = vst.msk [vmem:[%s19220_s24 + $0x90] sm:$0xff] %vm7251_vm0, %v11498_v32  ;;  %v11496_v34 = vmax.f32 %v11464_v44, 0.0  ;;  %v11467_v24 = vadd.f32 %v19194_v18, %v11428_v43  ;;  %v11426_v42 = vmul.f32 %v19187_v36, %v11387_v53  ;;  %v11392_v7 = vadd.f32 %v13604_v56, %v10911_v26  ;;  %v10874_v44 = vpop.f32.mrf.mxu1 }
 0x563   : > { %v11323_v62 = vpop.f32.mrf.mxu0  ;;  %v10177_v21 = vadd.f32 %v19897_v52, %v9807_v30  ;;  %v10913_v32 = vadd.f32 %v19338_v49, %v10176_v25  ;;  %v10182_v54 = vadd.f32 %v19900_v55, %v9812_v61  ;;  %v9810_v56 = vadd.f32 %v19902_v10, %v19901_v60  ;;  %v19905_v25 = vld [vmem:[#allocation29_spill] sm:$0xff] }
 0x564   : > { %11528 = vst.msk [vmem:[%s19220_s24 + $0x80] sm:$0xff] %vm7251_vm0, %v11496_v34  ;;  %v11499_v12 = vmax.f32 %v11467_v24, 0.0  ;;  %v11465_v28 = vadd.f32 %v19194_v18, %v11426_v42  ;;  %v11431_v29 = vmul.f32 %v19187_v36, %v11392_v7  ;;  %v11390_v20 = vadd.f32 %v11323_v62, %v10909_v8 }
 0x565   : > { %v13605_v13 = vpop.f32.mrf.mxu0  ;;  %v10916_v34 = vadd.f32 %v13573_v37, %v10179_v1  ;;  %v10180_v59 = vadd.f32 %v19165_v11, %v9810_v56  ;;  %v9813_v50 = vadd.f32 %v19904_v31, %v19903_v45  ;;  %v10914_v62 = vadd.f32 %v10861_v3, %v10177_v21  ;;  %v19906_v11 = vld [vmem:[#allocation34_spill] sm:$0xff] }
 0x566   : > { %11531 = vst.msk [vmem:[%s19220_s24 + $0x98] sm:$0xff] %vm7251_vm0, %v11499_v12  ;;  %v11497_v5 = vmax.f32 %v11465_v28, 0.0  ;;  %v11470_v14 = vadd.f32 %v19194_v18, %v11431_v29  ;;  %v11429_v57 = vmul.f32 %v19187_v36, %v11390_v20  ;;  %v11393_v40 = vadd.f32 %v13605_v13, %v10912_v23  ;;  %v13577_v23 = vpop.f32.mrf.mxu1 }
 0x567   : > { %v11326_v6 = vpop.f32.mrf.mxu0  ;;  %v10919_v20 = vadd.f32 %v13576_v4, %v10182_v54  ;;  %v10183_v35 = vadd.f32 %v19171_v63, %v9813_v50  ;;  %v9811_v39 = vadd.f32 %v19906_v11, %v19905_v25 }
 0x568   : > { %11529 = vst.msk [vmem:[%s19220_s24 + $0x88] sm:$0xff] %vm7251_vm0, %v11497_v5  ;;  %v11502_v15 = vmax.f32 %v11470_v14, 0.0  ;;  %v11468_v2 = vadd.f32 %v19194_v18, %v11429_v57  ;;  %v11432_v41 = vmul.f32 %v19187_v36, %v11393_v40  ;;  %v11391_v0 = vadd.f32 %v11326_v6, %v10910_v46  ;;  %v10877_v4 = vpop.f32.mrf.mxu1 }
 0x569   : > { %v13608_v26 = vpop.f32.mrf.mxu0  ;;  %v10917_v5 = vadd.f32 %v10874_v44, %v10180_v59  ;;  %v10181_v14 = vadd.f32 %v19175_v19, %v9811_v39  ;;  %v10920_v58 = vadd.f32 %v13577_v23, %v10183_v35 }
 0x56a   : > { %11534 = vst.msk [vmem:[%s19220_s24 + $0xb0] sm:$0xff] %vm7251_vm0, %v11502_v15  ;;  %v11500_v38 = vmax.f32 %v11468_v2, 0.0  ;;  %v11471_v43 = vadd.f32 %v19194_v18, %v11432_v41  ;;  %v11430_v53 = vmul.f32 %v19187_v36, %v11391_v0  ;;  %v11396_v22 = vadd.f32 %v13608_v26, %v10915_v48 }
 0x56b   : > { %v11339_v8 = vpop.f32.mrf.mxu0  ;;  %v10918_v15 = vadd.f32 %v10877_v4, %v10181_v14 }
 0x56c   : > { %11532 = vst.msk [vmem:[%s19220_s24 + $0xa0] sm:$0xff] %vm7251_vm0, %v11500_v38  ;;  %v11503_v49 = vmax.f32 %v11471_v43, 0.0  ;;  %v11469_v24 = vadd.f32 %v19194_v18, %v11430_v53  ;;  %v11435_v42 = vmul.f32 %v19187_v36, %v11396_v22  ;;  %v11394_v7 = vadd.f32 %v11339_v8, %v10913_v32 }
 0x56d   : > { %v13609_v51 = vpop.f32.mrf.mxu0 }
 0x56e   : > { %11535 = vst.msk [vmem:[%s19220_s24 + $0xb8] sm:$0xff] %vm7251_vm0, %v11503_v49  ;;  %v11501_v37 = vmax.f32 %v11469_v24, 0.0  ;;  %v11474_v12 = vadd.f32 %v19194_v18, %v11435_v42  ;;  %v11433_v28 = vmul.f32 %v19187_v36, %v11394_v7  ;;  %v11397_v29 = vadd.f32 %v13609_v51, %v10916_v34 }
 0x56f   : > { %v11342_v33 = vpop.f32.mrf.mxu0 }
 0x570   : > { %11533 = vst.msk [vmem:[%s19220_s24 + $0xa8] sm:$0xff] %vm7251_vm0, %v11501_v37  ;;  %v11506_v3 = vmax.f32 %v11474_v12, 0.0  ;;  %v11472_v16 = vadd.f32 %v19194_v18, %v11433_v28  ;;  %v11436_v13 = vmul.f32 %v19187_v36, %v11397_v29  ;;  %v11395_v46 = vadd.f32 %v11342_v33, %v10914_v62 }
 0x571   : > { %v13612_v57 = vpop.f32.mrf.mxu0 }
 0x572   : > { %11538 = vst.msk [vmem:[%s19220_s24 + $0xd0] sm:$0xff] %vm7251_vm0, %v11506_v3  ;;  %v11504_v63 = vmax.f32 %v11472_v16, 0.0  ;;  %v11475_v40 = vadd.f32 %v19194_v18, %v11436_v13  ;;  %v11434_v9 = vmul.f32 %v19187_v36, %v11395_v46  ;;  %v11400_v1 = vadd.f32 %v13612_v57, %v10919_v20 }
 0x573   : > { %v11355_v27 = vpop.f32.mrf.mxu0 }
 0x574   : > { %11536 = vst.msk [vmem:[%s19220_s24 + $0xc0] sm:$0xff] %vm7251_vm0, %v11504_v63  ;;  %v11507_v30 = vmax.f32 %v11475_v40, 0.0  ;;  %v11473_v6 = vadd.f32 %v19194_v18, %v11434_v9  ;;  %v11439_v19 = vmul.f32 %v19187_v36, %v11400_v1  ;;  %v11398_v48 = vadd.f32 %v11355_v27, %v10917_v5 }
 0x575   : > { %v13613_v2 = vpop.f32.mrf.mxu0 }
 0x576   : > { %11539 = vst.msk [vmem:[%s19220_s24 + $0xd8] sm:$0xff] %vm7251_vm0, %v11507_v30  ;;  %v11505_v41 = vmax.f32 %v11473_v6, 0.0  ;;  %v11478_v0 = vadd.f32 %v19194_v18, %v11439_v19  ;;  %v11437_v52 = vmul.f32 %v19187_v36, %v11398_v48  ;;  %v11401_v21 = vadd.f32 %v13613_v2, %v10920_v58 }
 0x577   : > { %v11358_v47 = vpop.f32.mrf.mxu0 }
 0x578   : > { %11537 = vst.msk [vmem:[%s19220_s24 + $0xc8] sm:$0xff] %vm7251_vm0, %v11505_v41  ;;  %v11510_v17 = vmax.f32 %v11478_v0, 0.0  ;;  %v11476_v61 = vadd.f32 %v19194_v18, %v11437_v52  ;;  %v11440_v26 = vmul.f32 %v19187_v36, %v11401_v21  ;;  %v11399_v32 = vadd.f32 %v11358_v47, %v10918_v15 }
 0x57a   : > { %11542 = vst.msk [vmem:[%s19220_s24 + $0xf0] sm:$0xff] %vm7251_vm0, %v11510_v17  ;;  %v11508_v44 = vmax.f32 %v11476_v61, 0.0  ;;  %v11479_v38 = vadd.f32 %v19194_v18, %v11440_v26  ;;  %v11438_v43 = vmul.f32 %v19187_v36, %v11399_v32 }
 0x57c   : > { %11540 = vst.msk [vmem:[%s19220_s24 + $0xe0] sm:$0xff] %vm7251_vm0, %v11508_v44  ;;  %v11511_v53 = vmax.f32 %v11479_v38, 0.0  ;;  %v11477_v22 = vadd.f32 %v19194_v18, %v11438_v43 }
 0x57e   : > { %11543 = vst.msk [vmem:[%s19220_s24 + $0xf8] sm:$0xff] %vm7251_vm0, %v11511_v53  ;;  %v11509_v36 = vmax.f32 %v11477_v22, 0.0 }
 0x580   : > { %11541 = vst.msk [vmem:[%s19220_s24 + $0xe8] sm:$0xff] %vm7251_vm0, %v11509_v36 }
 0x581   : > { %13864 = shalt.err (!%p13861_p3)
}
 0x582   : > { %s13865_s18 = scalar_lea.hbm %s19450_s13, 4096  ;;  %s13869_s24 = scalar_lea.hbm %s19508_s8, 8192 }
 0x583   : > { %p13866_p4 = scmp.ne.s32.totalorder %s19450_s13, %s13865_s18  ;;  %p13870_p9 = scmp.lt.s32.totalorder %s19450_s13, %s19508_s8 }
 0x584   : > { %p13871_p10 = scmp.lt.s32.totalorder %s13869_s24, %s13865_s18 }
 0x585   : > { %p13867_p7 = pnand %p13866_p4, %p14000_p5 }
 0x586   : > { %p13872_p11 = por %p13871_p10, %p13870_p9 }
 0x587   : > { %p13868_p8 = pneg %p13867_p7 }
 0x589   : > { %p13873_p12 = pnand %p13872_p11, %p13868_p8 }
 0x58b   : > { %13876 = shalt.err (!%p13873_p12)
}
 0x58c   : > { %s13915_s12 = smov 128   ;;  %s13916_s17 = smov 8  }
 0x58d   : > { %13622 = dma.vmem_to_hbm [thread:$0]  (%p14000_p5), %s19452_s26, 4096, %s19450_s13, %s19460_s9, %s13915_s12, %s13915_s12, %s13916_s17  }
 0x58e PF: > { %p13628_p13 = scmp.ge.s32.totalorder %s13911_s30, 2  ;;  %s11573_s19 = sand.u32 1, %s13899_s27  }
 0x58f   : > { %s11574_s20 = scalar_lea.sflag [#allocation5], %s11573_s19 }
 0x590   : > { %p13625_p0 = pnand %p13628_p13, %p14004_p6 }
 0x592   : > { %p13626_p1 = pneg %p13625_p0 }
 0x594   : > { %13894 = dma.done.wait (%p13626_p1), %s11574_s20, 4096  }
 0x595   : > { %13896 = vsyncadd (%p13626_p1), %s11574_s20, 4294963200  ;;  %p18_p2 = scmp.ge.s32.totalorder %s13987_s11, 4   ;;  %s19907_s27 = smov %s13903_s28 }
 0x596   : > { %s19908_s28 = smov %s13907_s29  ;;  %s19909_s29 = smov %s13998_s14 }
 0x597   : > { %s19910_s30 = smov %s13987_s11  ;;  %20 = sbr.rel (!%p18_p2) target bundleno = 3 (0x3), region = 91 }
 0x59c   :  { %11579 = vsyncpa [#allocation5], 1 }
 0x59d   :  { %11581 = vsyncpa [#allocation5 + $0x1], 1 }

</bundles_post_ra>
